<compile_context>
chip_gen: v7x
topology: tpu7x:2x2x1
jax: 0.10.0
libtpu: 0.0.40
codegen_flags: <defaults>
</compile_context>

<pallas_src>
import jax
import jax.numpy as jnp
import numpy as np
from jax import lax
from jax.experimental import pallas as pl
from jax.experimental.pallas import tpu as pltpu

NUM_FEATURES = 310
NUM_CLASSES = 6
H1, H2, H3 = 400, 1000, 2000
LEAKY_SLOPE = 0.2

# padded (lane-aligned) sizes
F_PAD = 384      # 310 -> 384
H1_PAD = 512     # 400 -> 512
H2_PAD = 1024    # 1000 -> 1024
H3_PAD = 2048    # 2000 -> 2048
OUT_W = 8        # trimmed fused head: lane 0 = source, lanes 1..6 = classes, lane 7 = pad
OUT_PAD = 128    # lane-dense output tile written to HBM

# v5e is weight-DMA-bound at any batch tile (keep 256); v6e/v7x: 512 rows/step
# amortizes the ~0.35 us per-grid-step overhead to ~10% of per-step MXU time.
_DEVICE_KIND = jax.devices()[0].device_kind.lower()
MAX_BATCH_TILE = 256 if ("v5 lite" in _DEVICE_KIND or "v5e" in _DEVICE_KIND) else 512


def _round_up(x, m):
    return ((x + m - 1) // m) * m


def _pad2d(a, shape):
    return jnp.pad(a, [(0, s - d) for d, s in zip(a.shape, shape)])


def disc_kernel(x_ref, w1_ref, b1_ref, w2_ref, b2_ref, w3_ref, b3_ref,
                wh_ref, bh_ref, out_ref):
    """Fused 3-layer MLP + fused (sigmoid | masked-softmax) heads, one batch tile."""
    # Linear(310,400) + LeakyReLU(0.2)   [Dropout(0.5) = identity, eval mode]
    h = jnp.dot(x_ref[...], w1_ref[...],
                preferred_element_type=jnp.float32) + b1_ref[...]
    h = jnp.maximum(h, LEAKY_SLOPE * h).astype(jnp.bfloat16)

    # Linear(400,1000) + LeakyReLU(0.2)
    h = jnp.dot(h, w2_ref[...], preferred_element_type=jnp.float32) + b2_ref[...]
    h = jnp.maximum(h, LEAKY_SLOPE * h).astype(jnp.bfloat16)

    # Linear(1000,2000) + LeakyReLU(0.2)
    h = jnp.dot(h, w3_ref[...], preferred_element_type=jnp.float32) + b3_ref[...]
    h = jnp.maximum(h, LEAKY_SLOPE * h).astype(jnp.bfloat16)

    # Fused heads on the trimmed (2048, 8) weight.
    z = jnp.dot(h, wh_ref[...], preferred_element_type=jnp.float32) + bh_ref[...]

    col = lax.broadcasted_iota(jnp.int32, z.shape, 1)
    is_src = col == 0
    is_cls = jnp.logical_and(col >= 1, col <= NUM_CLASSES)

    # Single EUP exp serves both heads:
    #   sigmoid lane : exp(-|z|)            (numerically stable form)
    #   class lanes  : exp(z - max_class z) (masked softmax numerator)
    a = jnp.where(is_cls, z, -1e30)
    a_max = jnp.max(a, axis=-1, keepdims=True)
    e = jnp.exp(jnp.where(is_src, -jnp.abs(z), a - a_max))

    inv1pe = pl.reciprocal(1.0 + e, approx=True)
    sig = jnp.where(z >= 0.0, inv1pe, e * inv1pe)          # stable sigmoid(z)

    num = jnp.where(is_cls, e, 0.0)
    sm = num * pl.reciprocal(jnp.sum(num, axis=-1, keepdims=True), approx=True)

    # Zero-init the 128-lane tile (lane-dense HBM store), then write the 8 real lanes.
    out_ref[...] = jnp.zeros_like(out_ref)
    out_ref[:, pl.ds(0, OUT_W)] = jnp.where(is_src, sig, sm)


def init_params(key):
    """nn.Linear default init: U(-1/sqrt(fan_in), 1/sqrt(fan_in)).
    Weights stored as (in, out) so the kernel computes x @ W + b."""
    dims = [(NUM_FEATURES, H1), (H1, H2), (H2, H3), (H3, 1), (H3, NUM_CLASSES)]
    params = []
    for fan_in, fan_out in dims:
        key, kw, kb = jax.random.split(key, 3)
        bound = 1.0 / np.sqrt(fan_in)
        w = jax.random.uniform(kw, (fan_in, fan_out), jnp.float32, -bound, bound)
        b = jax.random.uniform(kb, (1, fan_out), jnp.float32, -bound, bound)
        params.append((w, b))
    return params


def pad_params(params):
    """Pad + cast for the kernel: bf16 weights, f32 biases, trimmed fused head."""
    (w1, b1), (w2, b2), (w3, b3), (wd, bd), (wa, ba) = params
    wh = jnp.concatenate([wd, wa], axis=1)   # (2000, 7): col 0 = disc, 1..6 = aux
    bh = jnp.concatenate([bd, ba], axis=1)   # (1, 7)
    return [
        _pad2d(w1, (F_PAD, H1_PAD)).astype(jnp.bfloat16),
        _pad2d(b1, (1, H1_PAD)).astype(jnp.float32),
        _pad2d(w2, (H1_PAD, H2_PAD)).astype(jnp.bfloat16),
        _pad2d(b2, (1, H2_PAD)).astype(jnp.float32),
        _pad2d(w3, (H2_PAD, H3_PAD)).astype(jnp.bfloat16),
        _pad2d(b3, (1, H3_PAD)).astype(jnp.float32),
        _pad2d(wh, (H3_PAD, OUT_W)).astype(jnp.bfloat16),
        _pad2d(bh, (1, OUT_W)).astype(jnp.float32),
    ]


@jax.jit
def discriminator_forward(x, w1, b1, w2, b2, w3, b3, wh, bh):
    # matches x.view(-1, num_features)
    x = x.reshape(-1, NUM_FEATURES).astype(jnp.float32)
    b = x.shape[0]

    if b <= MAX_BATCH_TILE:
        bt = max(16, _round_up(b, 16))      # bf16 sublane tile = 16
        b_pad = bt
    else:
        bt = MAX_BATCH_TILE
        b_pad = _round_up(b, bt)
    grid = (b_pad // bt,)

    # bf16 cast first, then pad -> one fused XLA pass (see TODO at top of file
    # about skipping this round trip entirely for very large batches).
    x_p = _pad2d(x.astype(jnp.bfloat16), (b_pad, F_PAD))

    const = lambda i: (0, 0)   # weights/biases resident across the batch grid
    row = lambda i: (i, 0)     # activation/output tiles stream over batch

    # Grid-invariant operands: single-buffer them (no re-fetch across the grid,
    # so double-buffering only wastes VMEM — halves weight VMEM to ~5.4 MiB).
    def const_spec(shape):
        return pl.BlockSpec(shape, const, pipeline_mode=pl.Buffered(1))

    in_specs = [
        pl.BlockSpec((bt, F_PAD), row),
        const_spec((F_PAD, H1_PAD)),
        const_spec((1, H1_PAD)),
        const_spec((H1_PAD, H2_PAD)),
        const_spec((1, H2_PAD)),
        const_spec((H2_PAD, H3_PAD)),
        const_spec((1, H3_PAD)),
        const_spec((H3_PAD, OUT_W)),
        const_spec((1, OUT_W)),
    ]

    flops = 2 * b_pad * (F_PAD * H1_PAD + H1_PAD * H2_PAD
                         + H2_PAD * H3_PAD + H3_PAD * OUT_W)
    weight_bytes = 2 * (F_PAD * H1_PAD + H1_PAD * H2_PAD
                        + H2_PAD * H3_PAD + H3_PAD * OUT_W)
    bias_bytes = 4 * (H1_PAD + H2_PAD + H3_PAD + OUT_W)
    bytes_accessed = (weight_bytes + bias_bytes
                      + b_pad * F_PAD * 2          # bf16 input
                      + b_pad * OUT_PAD * 4)       # f32 output

    out = pl.pallas_call(
        disc_kernel,
        out_shape=jax.ShapeDtypeStruct((b_pad, OUT_PAD), jnp.float32),
        grid=grid,
        in_specs=in_specs,
        out_specs=pl.BlockSpec((bt, OUT_PAD), row),
        compiler_params=pltpu.CompilerParams(
            dimension_semantics=("parallel",),
            vmem_limit_bytes=32 * 1024 * 1024),   # ~14-17 MiB real footprint; v7x-safe
        cost_estimate=pl.CostEstimate(
            flops=int(flops),
            transcendentals=int(b_pad * OUT_W),   # one fused exp per output lane
            bytes_accessed=int(bytes_accessed)),
    )(x_p, w1, b1, w2, b2, w3, b3, wh, bh)

    source_out = jnp.squeeze(out[:b, 0:1])                 # (B,1) -> (B,)  (scalar if B==1)
    class_out = jnp.squeeze(out[:b, 1:1 + NUM_CLASSES])    # (B,6)          ((6,) if B==1)
    return source_out, class_out


def reference_forward(x, params):
    """Pure-JAX f32 reference (eval-mode dropout) for a correctness check."""
    x = x.reshape(-1, NUM_FEATURES).astype(jnp.float32)
    (w1, b1), (w2, b2), (w3, b3), (wd, bd), (wa, ba) = params
    h = x @ w1 + b1
    h = jnp.where(h > 0, h, LEAKY_SLOPE * h)
    h = h @ w2 + b2
    h = jnp.where(h > 0, h, LEAKY_SLOPE * h)
    h = h @ w3 + b3
    h = jnp.where(h > 0, h, LEAKY_SLOPE * h)
    src = jax.nn.sigmoid(h @ wd + bd)
    cls = jax.nn.softmax(h @ wa + ba, axis=-1)
    return jnp.squeeze(src), jnp.squeeze(cls)


if __name__ == "__main__":
    key = jax.random.PRNGKey(0)
    k_param, k_x = jax.random.split(key)

    params = init_params(k_param)
    flat_padded = pad_params(params)

    batch = 4
    x = jax.random.normal(k_x, (batch, NUM_FEATURES), jnp.float32)

    source_out, class_out = discriminator_forward(x, *flat_padded)
    source_out = jax.block_until_ready(source_out)
    class_out = jax.block_until_ready(class_out)

    # sanity check vs f32 reference (bf16 weights/activations -> looser tolerance)
    ref_src, ref_cls = reference_forward(x, params)
    np.testing.assert_allclose(np.asarray(source_out), np.asarray(ref_src),
                               rtol=2e-2, atol=2e-2)
    np.testing.assert_allclose(np.asarray(class_out), np.asarray(ref_cls),
                               rtol=2e-2, atol=2e-2)
    assert source_out.shape == (batch,)
    assert class_out.shape == (batch, NUM_CLASSES)

    print("KERNEL_OK")
</pallas_src>

<mosaic_0001>
module attributes {stable_mosaic.version = 11 : i64} {
  func.func @disc_kernel(%arg0: i32, %arg1: memref<16x384xbf16, #tpu.memory_space<vmem>>, %arg2: memref<384x512xbf16, #tpu.memory_space<vmem>>, %arg3: memref<1x512xf32, #tpu.memory_space<vmem>>, %arg4: memref<512x1024xbf16, #tpu.memory_space<vmem>>, %arg5: memref<1x1024xf32, #tpu.memory_space<vmem>>, %arg6: memref<1024x2048xbf16, #tpu.memory_space<vmem>>, %arg7: memref<1x2048xf32, #tpu.memory_space<vmem>>, %arg8: memref<2048x8xbf16, #tpu.memory_space<vmem>>, %arg9: memref<1x8xf32, #tpu.memory_space<vmem>>, %arg10: memref<16x128xf32, #tpu.memory_space<vmem>>) attributes {dimension_semantics = [#tpu.dimension_semantics<parallel>], iteration_bounds = array<i64: 1>, scalar_prefetch = 0 : i64, scratch_operands = 0 : i64, tpu.core_type = #tpu.core_type<tc>, window_params = [{transform_indices = @transform_0, window_bounds = array<i64: 16, 384>}, {pipeline_mode = #tpu.pipeline_mode<synchronous>, transform_indices = @transform_1, window_bounds = array<i64: 384, 512>}, {pipeline_mode = #tpu.pipeline_mode<synchronous>, transform_indices = @transform_2, window_bounds = array<i64: 1, 512>}, {pipeline_mode = #tpu.pipeline_mode<synchronous>, transform_indices = @transform_3, window_bounds = array<i64: 512, 1024>}, {pipeline_mode = #tpu.pipeline_mode<synchronous>, transform_indices = @transform_4, window_bounds = array<i64: 1, 1024>}, {pipeline_mode = #tpu.pipeline_mode<synchronous>, transform_indices = @transform_5, window_bounds = array<i64: 1024, 2048>}, {pipeline_mode = #tpu.pipeline_mode<synchronous>, transform_indices = @transform_6, window_bounds = array<i64: 1, 2048>}, {pipeline_mode = #tpu.pipeline_mode<synchronous>, transform_indices = @transform_7, window_bounds = array<i64: 2048, 8>}, {pipeline_mode = #tpu.pipeline_mode<synchronous>, transform_indices = @transform_8, window_bounds = array<i64: 1, 8>}, {transform_indices = @transform_9, window_bounds = array<i64: 16, 128>}]} {
    %c0 = arith.constant 0 : index
    %c0_0 = arith.constant 0 : index
    %0 = vector.load %arg1[%c0, %c0_0] : memref<16x384xbf16, #tpu.memory_space<vmem>>, vector<16x384xbf16>
    %c0_1 = arith.constant 0 : index
    %c0_2 = arith.constant 0 : index
    %1 = vector.load %arg2[%c0_1, %c0_2] : memref<384x512xbf16, #tpu.memory_space<vmem>>, vector<384x512xbf16>
    %cst = arith.constant dense<0.000000e+00> : vector<16x512xf32>
    %2 = tpu.matmul %0, %1, %cst {dimension_numbers = #tpu.dot_dimension_numbers<[1], [0], [0], [1], [0, 0, 1, 1], [], []>} : vector<16x384xbf16>, vector<384x512xbf16>, vector<16x512xf32> -> vector<16x512xf32>
    %c0_3 = arith.constant 0 : index
    %c0_4 = arith.constant 0 : index
    %3 = vector.load %arg3[%c0_3, %c0_4] : memref<1x512xf32, #tpu.memory_space<vmem>>, vector<1x512xf32>
    %4 = vector.broadcast %3 : vector<1x512xf32> to vector<16x512xf32>
    %5 = arith.addf %2, %4 : vector<16x512xf32>
    %cst_5 = arith.constant 2.000000e-01 : f32
    %6 = vector.broadcast %cst_5 : f32 to vector<16x512xf32>
    %7 = arith.mulf %6, %5 : vector<16x512xf32>
    %8 = arith.maximumf %5, %7 : vector<16x512xf32>
    %9 = arith.truncf %8 : vector<16x512xf32> to vector<16x512xbf16>
    %c0_6 = arith.constant 0 : index
    %c0_7 = arith.constant 0 : index
    %10 = vector.load %arg4[%c0_6, %c0_7] : memref<512x1024xbf16, #tpu.memory_space<vmem>>, vector<512x1024xbf16>
    %cst_8 = arith.constant dense<0.000000e+00> : vector<16x1024xf32>
    %11 = tpu.matmul %9, %10, %cst_8 {dimension_numbers = #tpu.dot_dimension_numbers<[1], [0], [0], [1], [0, 0, 1, 1], [], []>} : vector<16x512xbf16>, vector<512x1024xbf16>, vector<16x1024xf32> -> vector<16x1024xf32>
    %c0_9 = arith.constant 0 : index
    %c0_10 = arith.constant 0 : index
    %12 = vector.load %arg5[%c0_9, %c0_10] : memref<1x1024xf32, #tpu.memory_space<vmem>>, vector<1x1024xf32>
    %13 = vector.broadcast %12 : vector<1x1024xf32> to vector<16x1024xf32>
    %14 = arith.addf %11, %13 : vector<16x1024xf32>
    %cst_11 = arith.constant 2.000000e-01 : f32
    %15 = vector.broadcast %cst_11 : f32 to vector<16x1024xf32>
    %16 = arith.mulf %15, %14 : vector<16x1024xf32>
    %17 = arith.maximumf %14, %16 : vector<16x1024xf32>
    %18 = arith.truncf %17 : vector<16x1024xf32> to vector<16x1024xbf16>
    %c0_12 = arith.constant 0 : index
    %c0_13 = arith.constant 0 : index
    %19 = vector.load %arg6[%c0_12, %c0_13] : memref<1024x2048xbf16, #tpu.memory_space<vmem>>, vector<1024x2048xbf16>
    %cst_14 = arith.constant dense<0.000000e+00> : vector<16x2048xf32>
    %20 = tpu.matmul %18, %19, %cst_14 {dimension_numbers = #tpu.dot_dimension_numbers<[1], [0], [0], [1], [0, 0, 1, 1], [], []>} : vector<16x1024xbf16>, vector<1024x2048xbf16>, vector<16x2048xf32> -> vector<16x2048xf32>
    %c0_15 = arith.constant 0 : index
    %c0_16 = arith.constant 0 : index
    %21 = vector.load %arg7[%c0_15, %c0_16] : memref<1x2048xf32, #tpu.memory_space<vmem>>, vector<1x2048xf32>
    %22 = vector.broadcast %21 : vector<1x2048xf32> to vector<16x2048xf32>
    %23 = arith.addf %20, %22 : vector<16x2048xf32>
    %cst_17 = arith.constant 2.000000e-01 : f32
    %24 = vector.broadcast %cst_17 : f32 to vector<16x2048xf32>
    %25 = arith.mulf %24, %23 : vector<16x2048xf32>
    %26 = arith.maximumf %23, %25 : vector<16x2048xf32>
    %27 = arith.truncf %26 : vector<16x2048xf32> to vector<16x2048xbf16>
    %c0_18 = arith.constant 0 : index
    %c0_19 = arith.constant 0 : index
    %28 = vector.load %arg8[%c0_18, %c0_19] : memref<2048x8xbf16, #tpu.memory_space<vmem>>, vector<2048x8xbf16>
    %cst_20 = arith.constant dense<0.000000e+00> : vector<16x8xf32>
    %29 = tpu.matmul %27, %28, %cst_20 {dimension_numbers = #tpu.dot_dimension_numbers<[1], [0], [0], [1], [0, 0, 1, 1], [], []>} : vector<16x2048xbf16>, vector<2048x8xbf16>, vector<16x8xf32> -> vector<16x8xf32>
    %c0_21 = arith.constant 0 : index
    %c0_22 = arith.constant 0 : index
    %30 = vector.load %arg9[%c0_21, %c0_22] : memref<1x8xf32, #tpu.memory_space<vmem>>, vector<1x8xf32>
    %31 = vector.broadcast %30 : vector<1x8xf32> to vector<16x8xf32>
    %32 = arith.addf %29, %31 : vector<16x8xf32>
    %33 = tpu.iota {dimensions = array<i32: 1>} : vector<16x8xi32>
    %c0_i32 = arith.constant 0 : i32
    %34 = vector.broadcast %c0_i32 : i32 to vector<16x8xi32>
    %35 = arith.cmpi eq, %33, %34 : vector<16x8xi32>
    %c1_i32 = arith.constant 1 : i32
    %36 = vector.broadcast %c1_i32 : i32 to vector<16x8xi32>
    %37 = arith.cmpi sge, %33, %36 : vector<16x8xi32>
    %c6_i32 = arith.constant 6 : i32
    %38 = vector.broadcast %c6_i32 : i32 to vector<16x8xi32>
    %39 = arith.cmpi sle, %33, %38 : vector<16x8xi32>
    %40 = arith.andi %37, %39 : vector<16x8xi1>
    %cst_23 = arith.constant -1.000000e+30 : f32
    %41 = vector.broadcast %cst_23 : f32 to vector<16x8xf32>
    %42 = arith.select %40, %32, %41 : vector<16x8xi1>, vector<16x8xf32>
    %cst_24 = arith.constant dense<0xFF800000> : vector<16xf32>
    %43 = vector.multi_reduction <maximumf>, %42, %cst_24 [1] : vector<16x8xf32> to vector<16xf32>
    %44 = vector.shape_cast %43 : vector<16xf32> to vector<16x1xf32>
    %45 = math.absf %32 : vector<16x8xf32>
    %cst_25 = arith.constant 0.000000e+00 : f32
    %46 = vector.broadcast %cst_25 : f32 to vector<16x8xf32>
    %47 = arith.subf %46, %45 : vector<16x8xf32>
    %48 = vector.broadcast %44 : vector<16x1xf32> to vector<16x8xf32>
    %49 = arith.subf %42, %48 : vector<16x8xf32>
    %50 = arith.select %35, %47, %49 : vector<16x8xi1>, vector<16x8xf32>
    %51 = math.exp %50 : vector<16x8xf32>
    %cst_26 = arith.constant 1.000000e+00 : f32
    %52 = vector.broadcast %cst_26 : f32 to vector<16x8xf32>
    %53 = arith.addf %52, %51 : vector<16x8xf32>
    %54 = tpu.reciprocal %53 {approx = true} : vector<16x8xf32> -> vector<16x8xf32>
    %cst_27 = arith.constant 0.000000e+00 : f32
    %55 = vector.broadcast %cst_27 : f32 to vector<16x8xf32>
    %56 = arith.cmpf oge, %32, %55 : vector<16x8xf32>
    %57 = arith.mulf %51, %54 : vector<16x8xf32>
    %58 = arith.select %56, %54, %57 : vector<16x8xi1>, vector<16x8xf32>
    %cst_28 = arith.constant 0.000000e+00 : f32
    %59 = vector.broadcast %cst_28 : f32 to vector<16x8xf32>
    %60 = arith.select %40, %51, %59 : vector<16x8xi1>, vector<16x8xf32>
    %cst_29 = arith.constant dense<0.000000e+00> : vector<16xf32>
    %61 = vector.multi_reduction <add>, %60, %cst_29 [1] : vector<16x8xf32> to vector<16xf32>
    %62 = vector.shape_cast %61 : vector<16xf32> to vector<16x1xf32>
    %63 = tpu.reciprocal %62 {approx = true} : vector<16x1xf32> -> vector<16x1xf32>
    %64 = vector.broadcast %63 : vector<16x1xf32> to vector<16x8xf32>
    %65 = arith.mulf %60, %64 : vector<16x8xf32>
    %cst_30 = arith.constant 0.000000e+00 : f32
    %66 = vector.broadcast %cst_30 : f32 to vector<16x128xf32>
    %c0_31 = arith.constant 0 : index
    %c0_32 = arith.constant 0 : index
    %67 = vector.load %arg10[%c0_31, %c0_32] : memref<16x128xf32, #tpu.memory_space<vmem>>, vector<16x128xf32>
    tpu.vector_store %arg10[%c0_31, %c0_32], %66 {strides = array<i32>} : memref<16x128xf32, #tpu.memory_space<vmem>>, vector<16x128xf32>,
    %68 = arith.select %35, %58, %65 : vector<16x8xi1>, vector<16x8xf32>
    %c0_33 = arith.constant 0 : index
    %c0_34 = arith.constant 0 : index
    %69 = vector.load %arg10[%c0_33, %c0_34] : memref<16x128xf32, #tpu.memory_space<vmem>>, vector<16x8xf32>
    tpu.vector_store %arg10[%c0_33, %c0_34], %68 {strides = array<i32>} : memref<16x128xf32, #tpu.memory_space<vmem>>, vector<16x8xf32>,
    return
  }
  func.func @transform_0(%arg0: i32) -> (i32, i32) {
    %c0_i32 = arith.constant 0 : i32
    %c0_i32_0 = arith.constant 0 : i32
    return %arg0, %c0_i32 : i32, i32
  }
  func.func @transform_1(%arg0: i32) -> (i32, i32) {
    %c0_i32 = arith.constant 0 : i32
    %c0_i32_0 = arith.constant 0 : i32
    %c0_i32_1 = arith.constant 0 : i32
    return %c0_i32, %c0_i32_0 : i32, i32
  }
  func.func @transform_2(%arg0: i32) -> (i32, i32) {
    %c0_i32 = arith.constant 0 : i32
    %c0_i32_0 = arith.constant 0 : i32
    %c0_i32_1 = arith.constant 0 : i32
    return %c0_i32, %c0_i32_0 : i32, i32
  }
  func.func @transform_3(%arg0: i32) -> (i32, i32) {
    %c0_i32 = arith.constant 0 : i32
    %c0_i32_0 = arith.constant 0 : i32
    %c0_i32_1 = arith.constant 0 : i32
    return %c0_i32, %c0_i32_0 : i32, i32
  }
  func.func @transform_4(%arg0: i32) -> (i32, i32) {
    %c0_i32 = arith.constant 0 : i32
    %c0_i32_0 = arith.constant 0 : i32
    %c0_i32_1 = arith.constant 0 : i32
    return %c0_i32, %c0_i32_0 : i32, i32
  }
  func.func @transform_5(%arg0: i32) -> (i32, i32) {
    %c0_i32 = arith.constant 0 : i32
    %c0_i32_0 = arith.constant 0 : i32
    %c0_i32_1 = arith.constant 0 : i32
    return %c0_i32, %c0_i32_0 : i32, i32
  }
  func.func @transform_6(%arg0: i32) -> (i32, i32) {
    %c0_i32 = arith.constant 0 : i32
    %c0_i32_0 = arith.constant 0 : i32
    %c0_i32_1 = arith.constant 0 : i32
    return %c0_i32, %c0_i32_0 : i32, i32
  }
  func.func @transform_7(%arg0: i32) -> (i32, i32) {
    %c0_i32 = arith.constant 0 : i32
    %c0_i32_0 = arith.constant 0 : i32
    %c0_i32_1 = arith.constant 0 : i32
    return %c0_i32, %c0_i32_0 : i32, i32
  }
  func.func @transform_8(%arg0: i32) -> (i32, i32) {
    %c0_i32 = arith.constant 0 : i32
    %c0_i32_0 = arith.constant 0 : i32
    %c0_i32_1 = arith.constant 0 : i32
    return %c0_i32, %c0_i32_0 : i32, i32
  }
  func.func @transform_9(%arg0: i32) -> (i32, i32) {
    %c0_i32 = arith.constant 0 : i32
    %c0_i32_0 = arith.constant 0 : i32
    return %arg0, %c0_i32 : i32, i32
  }
}

</mosaic_0001>

<bundles_post_ra>
// kernel: discriminator_forward.1
= control target key start
LH: loop header
LB: loop body
LE: loop exit
PB: predicated region body
PF: predicated region fallthrough
CT: control target
= control target key end

     0   :  { %14 = vsyncpa [#allocation3], 0  ;;  %s15176_s0 = inlined_call_operand.vmem [shape: bf16[16,384], index: 0, kind: input, shape index: {}]   ;;  %s15177_s1 = inlined_call_operand.hbm [shape: bf16[384,512], index: 1, kind: input, shape index: {}]   ;;  %s15178_s2 = inlined_call_operand.hbm [shape: f32[1,512], index: 2, kind: input, shape index: {}]   ;;  %s15179_s3 = inlined_call_operand.hbm [shape: bf16[512,1024], index: 3, kind: input, shape index: {}]   ;;  %s15180_s4 = inlined_call_operand.hbm [shape: f32[1,1024], index: 4, kind: input, shape index: {}]   ;;  %s15181_s5 = inlined_call_operand.hbm [shape: bf16[1024,2048], index: 5, kind: input, shape index: {}]   ;;  %s15182_s6 = inlined_call_operand.hbm [shape: f32[1,2048], index: 6, kind: input, shape index: {}]   ;;  %s15183_s7 = inlined_call_operand.vmem [shape: bf16[2048,8], index: 7, kind: input, shape index: {}]   ;;  %s15184_s8 = inlined_call_operand.hbm [shape: f32[1,8], index: 8, kind: input, shape index: {}]   ;;  %s15185_s9 = inlined_call_operand.vmem [shape: f32[16,128], index: 9, kind: output, shape index: {}]  }
   0x1   :  { %15 = vsyncpa [#allocation5], 0 }
   0x2   :  { %16 = vsyncpa [#allocation8], 0 }
   0x3   :  { %17 = vsyncpa [#allocation11], 0  ;;  %s14324_s30 = smov [#allocation4]   ;;  %s14325_s11 = smov [#allocation7]  }
   0x4   :  { %s38_s10 = sshll.u32 %s14324_s30, 4  ;;  %s60_s12 = sshll.u32 %s14325_s11, 4  ;;  %s39_s10 = int_to_ptr.vmem [resolvable:$true] %s38_s10  ;;  %s61_s12 = int_to_ptr.vmem [resolvable:$true] %s60_s12 }
   0x5   :  { %s14162_s15 = scalar_lea.hbm %s15178_s2, 64 }
   0x6   :  { %p14163_p0 = scmp.ne.s32.totalorder %s15178_s2, %s14162_s15  ;;  %p14166_p1 = scmp.lt.u32.totalorder %s14162_s15, %s15178_s2 }
   0x8   :  { %p14168_p2 = pnand %p14166_p1, %p14163_p0 }
   0xa   :  { %14171 = shalt.err (!%p14168_p2)
}
   0xb   :  { %s14172_s20 = scalar_lea.vmem %s39_s10, 64  ;;  %p14177_p4 = scmp.lt.s32.totalorder %s39_s10, %s39_s10 }
   0xc   :  { %p14173_p3 = scmp.ne.s32.totalorder %s39_s10, %s14172_s20  ;;  %p14178_p5 = scmp.lt.s32.totalorder %s14172_s20, %s14172_s20 }
   0xe   :  { %p14179_p6 = por %p14178_p5, %p14177_p4 }
  0x10   :  { %p14180_p7 = pnand %p14179_p6, %p14173_p3 }
  0x12   :  { %14183 = shalt.err (!%p14180_p7)
}
  0x13   :  { %41 = dma.hbm_to_vmem [thread:$0]  %s15178_s2, 64, %s39_s10, [#allocation5]  }
  0x14   :  { %s14184_s25 = scalar_lea.hbm %s15180_s4, 128 }
  0x15   :  { %p14185_p8 = scmp.ne.s32.totalorder %s15180_s4, %s14184_s25  ;;  %p14188_p9 = scmp.lt.u32.totalorder %s14184_s25, %s15180_s4 }
  0x17   :  { %p14190_p10 = pnand %p14188_p9, %p14185_p8 }
  0x19   :  { %14193 = shalt.err (!%p14190_p10)
}
  0x1a   :  { %s14194_s30 = scalar_lea.vmem %s61_s12, 128  ;;  %p14199_p12 = scmp.lt.s32.totalorder %s61_s12, %s61_s12 }
  0x1b   :  { %p14195_p11 = scmp.ne.s32.totalorder %s61_s12, %s14194_s30  ;;  %p14200_p13 = scmp.lt.s32.totalorder %s14194_s30, %s14194_s30 }
  0x1d   :  { %p14201_p0 = por %p14200_p13, %p14199_p12 }
  0x1f   :  { %p14202_p1 = pnand %p14201_p0, %p14195_p11 }
  0x21   :  { %14205 = shalt.err (!%p14202_p1)
}
  0x22   :  { %63 = dma.hbm_to_vmem [thread:$0]  %s15180_s4, 128, %s61_s12, [#allocation8]  }
  0x23   :  { %s14326_s11 = smov [#allocation10]   ;;  %s14327_s14 = smov [#allocation2]  }
  0x24   :  { %s82_s13 = sshll.u32 %s14326_s11, 4  ;;  %s25_s15 = sshll.u32 %s14327_s14, 4  ;;  %s83_s13 = int_to_ptr.vmem [resolvable:$true] %s82_s13  ;;  %s14413_s15 = int_to_ptr.vmem [resolvable:$true] %s25_s15 }
  0x25   :  { %s14206_s18 = scalar_lea.hbm %s15182_s6, 256 }
  0x26   :  { %p14207_p2 = scmp.ne.s32.totalorder %s15182_s6, %s14206_s18  ;;  %p14210_p3 = scmp.lt.u32.totalorder %s14206_s18, %s15182_s6 }
  0x28   :  { %p14212_p4 = pnand %p14210_p3, %p14207_p2 }
  0x2a   :  { %14215 = shalt.err (!%p14212_p4)
}
  0x2b   :  { %s14216_s4 = scalar_lea.vmem %s83_s13, 256  ;;  %p14221_p6 = scmp.lt.s32.totalorder %s83_s13, %s83_s13 }
  0x2c   :  { %p14217_p5 = scmp.ne.s32.totalorder %s83_s13, %s14216_s4  ;;  %p14222_p7 = scmp.lt.s32.totalorder %s14216_s4, %s14216_s4 }
  0x2e   :  { %p14223_p8 = por %p14222_p7, %p14221_p6 }
  0x30   :  { %p14224_p9 = pnand %p14223_p8, %p14217_p5 }
  0x32   :  { %14227 = shalt.err (!%p14224_p9)
}
  0x33   :  { %85 = dma.hbm_to_vmem [thread:$0]  %s15182_s6, 256, %s83_s13, [#allocation11]  }
  0x34   :  { %s14228_s26 = scalar_lea.hbm %s15177_s1, 12288 }
  0x35   :  { %p14229_p10 = scmp.ne.s32.totalorder %s15177_s1, %s14228_s26  ;;  %p14232_p11 = scmp.lt.u32.totalorder %s14228_s26, %s15177_s1 }
  0x37   :  { %p14234_p12 = pnand %p14232_p11, %p14229_p10 }
  0x39   :  { %14237 = shalt.err (!%p14234_p12)
}
  0x3a   :  { %s14238_s2 = scalar_lea.vmem %s14413_s15, 12288  ;;  %p14243_p0 = scmp.lt.s32.totalorder %s14413_s15, %s14413_s15 }
  0x3b   :  { %p14239_p13 = scmp.ne.s32.totalorder %s14413_s15, %s14238_s2  ;;  %p14244_p1 = scmp.lt.s32.totalorder %s14238_s2, %s14238_s2 }
  0x3d   :  { %p14245_p2 = por %p14244_p1, %p14243_p0 }
  0x3f   :  { %p14246_p3 = pnand %p14245_p2, %p14239_p13 }
  0x41   :  { %14249 = shalt.err (!%p14246_p3)
}
  0x42   :  { %s14328_s6 = smov 256   ;;  %s14329_s10 = smov 16  }
  0x43   :  { %31 = dma.hbm_to_vmem [thread:$0]  %s15177_s1, 12288, %s14413_s15, [#allocation3], %s14328_s6, %s14328_s6, %s14329_s10  }
  0x44   :  { %s14330_s14 = smov [#allocation6]   ;;  %s14250_s19 = scalar_lea.hbm %s15179_s3, 32768 }
  0x45   :  { %s47_s16 = sshll.u32 %s14330_s14, 4  ;;  %p14251_p4 = scmp.ne.s32.totalorder %s15179_s3, %s14250_s19  ;;  %s48_s16 = int_to_ptr.vmem [resolvable:$true] %s47_s16 }
  0x46   :  { %p14254_p5 = scmp.lt.u32.totalorder %s14250_s19, %s15179_s3 }
  0x48   :  { %p14256_p6 = pnand %p14254_p5, %p14251_p4 }
  0x4a   :  { %14259 = shalt.err (!%p14256_p6)
}
  0x4b   :  { %s14260_s12 = scalar_lea.vmem %s48_s16, 32768  ;;  %p14265_p8 = scmp.lt.s32.totalorder %s48_s16, %s48_s16 }
  0x4c   :  { %p14261_p7 = scmp.ne.s32.totalorder %s48_s16, %s14260_s12  ;;  %p14266_p9 = scmp.lt.s32.totalorder %s14260_s12, %s14260_s12 }
  0x4e   :  { %p14267_p10 = por %p14266_p9, %p14265_p8 }
  0x50   :  { %p14268_p11 = pnand %p14267_p10, %p14261_p7 }
  0x52   :  { %14271 = shalt.err (!%p14268_p11)
}
  0x53   :  { %s14331_s1 = smov 512   ;;  %s14332_s15 = smov 32  }
  0x54   :  { %53 = dma.hbm_to_vmem [thread:$0]  %s15179_s3, 32768, %s48_s16, [#allocation5], %s14331_s1, %s14331_s1, %s14332_s15  }
  0x55   :  { %s14333_s25 = smov [#allocation9]   ;;  %s14272_s29 = scalar_lea.hbm %s15181_s5, 131072 }
  0x56   :  { %s69_s26 = sshll.u32 %s14333_s25, 4  ;;  %p14273_p12 = scmp.ne.s32.totalorder %s15181_s5, %s14272_s29  ;;  %s70_s26 = int_to_ptr.vmem [resolvable:$true] %s69_s26 }
  0x57   :  { %p14276_p13 = scmp.lt.u32.totalorder %s14272_s29, %s15181_s5 }
  0x59   :  { %p14278_p0 = pnand %p14276_p13, %p14273_p12 }
  0x5b   :  { %14281 = shalt.err (!%p14278_p0)
}
  0x5c   :  { %s14282_s11 = scalar_lea.vmem %s70_s26, 131072  ;;  %p14287_p2 = scmp.lt.s32.totalorder %s70_s26, %s70_s26 }
  0x5d   :  { %p14283_p1 = scmp.ne.s32.totalorder %s70_s26, %s14282_s11  ;;  %p14288_p3 = scmp.lt.s32.totalorder %s14282_s11, %s14282_s11 }
  0x5f   :  { %p14289_p4 = por %p14288_p3, %p14287_p2 }
  0x61   :  { %p14290_p5 = pnand %p14289_p4, %p14283_p1 }
  0x63   :  { %14293 = shalt.err (!%p14290_p5)
}
  0x64   :  { %s14334_s3 = smov 1024   ;;  %s14335_s13 = smov 64  }
  0x65   :  { %75 = dma.hbm_to_vmem [thread:$0]  %s15181_s5, 131072, %s70_s26, [#allocation8], %s14334_s3, %s14334_s3, %s14335_s13  }
  0x66   :  { %s14336_s17 = smov [#allocation12]   ;;  %s14294_s21 = scalar_lea.hbm %s15184_s8, 16 }
  0x67   :  { %s94_s18 = sshll.u32 %s14336_s17, 4  ;;  %p14295_p6 = scmp.ne.s32.totalorder %s15184_s8, %s14294_s21  ;;  %s95_s18 = int_to_ptr.vmem [resolvable:$true] %s94_s18 }
  0x68   :  { %p14298_p7 = scmp.lt.u32.totalorder %s14294_s21, %s15184_s8 }
  0x6a   :  { %p14300_p8 = pnand %p14298_p7, %p14295_p6 }
  0x6c   :  { %14303 = shalt.err (!%p14300_p8)
}
  0x6d   :  { %s14304_s15 = scalar_lea.vmem %s95_s18, 16  ;;  %s14308_s5 = scalar_lea.vmem %s95_s18, 32 }
  0x6e   :  { %p14305_p9 = scmp.ne.s32.totalorder %s95_s18, %s14304_s15  ;;  %p14309_p10 = scmp.lt.s32.totalorder %s95_s18, %s95_s18 }
  0x6f   :  { %p14310_p11 = scmp.lt.s32.totalorder %s14308_s5, %s14304_s15 }
  0x71   :  { %p14311_p12 = por %p14310_p11, %p14309_p10 }
  0x73   :  { %p14312_p13 = pnand %p14311_p12, %p14305_p9 }
  0x75   :  { %14315 = shalt.err (!%p14312_p13)
}
  0x76   :  { %97 = dma.hbm_to_vmem [thread:$0]  %s15184_s8, 16, %s95_s18, [#allocation11]  }
  0x77   :  { %14316 = dma.done.wait [#allocation3], 12288  }
  0x78   :  { %14317 = vsyncadd [#allocation3], 4294955008 }
  0x79   :  { %14318 = dma.done.wait [#allocation5], 32832  }
  0x7a   :  { %14319 = vsyncadd [#allocation5], 4294934464 }
  0x7b   :  { %14320 = dma.done.wait [#allocation8], 131200  }
  0x7c   :  { %14321 = vsyncadd [#allocation8], 4294836096 }
  0x7d   :  { %14322 = dma.done.wait [#allocation11], 272  }
  0x7e   :  { %14323 = vsyncadd [#allocation11], 4294967024  ;;  %v13873_v0 = vld [vmem:[#allocation2 + $0x4] ss:$16 sps:$4 sm:$0xff]   ;;  %v13875_v1 = vld [vmem:[#allocation2] ss:$16 sps:$4 sm:$0xff]  }
  0x7f   :  { %738 = vmatprep.subr.bf16.mxu0 %v13873_v0  ;;  %v13876_v2 = vld [vmem:[#allocation2 + $0x24] ss:$16 sps:$4 sm:$0xff]   ;;  %v13878_v3 = vld [vmem:[#allocation2 + $0x20] ss:$16 sps:$4 sm:$0xff]   ;;  %v13894_v7 = vld [vmem:[#allocation2 + $0xc] ss:$16 sps:$4 sm:$0xff]  }
  0x80   :  { %739 = vmatpush1.bf16.msra.mxu0 %v13875_v1  ;;  %v13879_v4 = vld [vmem:[#allocation2 + $0x44] ss:$16 sps:$4 sm:$0xff]   ;;  %v13881_v5 = vld [vmem:[#allocation2 + $0x40] ss:$16 sps:$4 sm:$0xff]   ;;  %v13898_v10 = vld [vmem:[#allocation2 + $0x8] ss:$16 sps:$4 sm:$0xff]   ;;  %824 = vmatprep.subr.bf16.mxu1 %v13894_v7 }
  0x81   :  { %740 = vmatprep.subr.bf16.mxu0 %v13876_v2  ;;  %v13882_v6 = vld [vmem:[#allocation2 + $0x64] ss:$16 sps:$4 sm:$0xff]   ;;  %v13884_v8 = vld [vmem:[#allocation2 + $0x60] ss:$16 sps:$4 sm:$0xff]   ;;  %v13900_v11 = vld [vmem:[#allocation2 + $0x2c] ss:$16 sps:$4 sm:$0xff]   ;;  %825 = vmatpush1.bf16.msra.mxu1 %v13898_v10 }
  0x82   :  { %v13885_v9 = vld [vmem:[#allocation2 + $0x84] ss:$16 sps:$4 sm:$0xff]   ;;  %v13887_v12 = vld [vmem:[#allocation2 + $0x80] ss:$16 sps:$4 sm:$0xff]   ;;  %826 = vmatprep.subr.bf16.mxu1 %v13900_v11  ;;  %v13904_v13 = vld [vmem:[#allocation2 + $0x28] ss:$16 sps:$4 sm:$0xff]  }
  0x83   :  { %v13906_v14 = vld [vmem:[#allocation2 + $0x4c] ss:$16 sps:$4 sm:$0xff]   ;;  %v13888_v15 = vld [vmem:[#allocation2 + $0xa4] ss:$16 sps:$4 sm:$0xff]   ;;  %v13910_v16 = vld [vmem:[#allocation2 + $0x48] ss:$16 sps:$4 sm:$0xff]  }
  0x84   :  { %741 = vmatpush1.bf16.msra.mxu0 %v13878_v3  ;;  %v13912_v17 = vld [vmem:[#allocation2 + $0x6c] ss:$16 sps:$4 sm:$0xff]   ;;  %v13890_v18 = vld [vmem:[#allocation2 + $0xa0] ss:$16 sps:$4 sm:$0xff]   ;;  %v13891_v19 = vld [vmem:[#allocation2 + $0xc4] ss:$16 sps:$4 sm:$0xff]  }
  0x85   :  { %742 = vmatprep.subr.bf16.mxu0 %v13879_v4  ;;  %827 = vmatpush1.bf16.msra.mxu1 %v13904_v13  ;;  %v13916_v20 = vld [vmem:[#allocation2 + $0x68] ss:$16 sps:$4 sm:$0xff]   ;;  %v13918_v21 = vld [vmem:[#allocation2 + $0x8c] ss:$16 sps:$4 sm:$0xff]   ;;  %v13893_v22 = vld [vmem:[#allocation2 + $0xc0] ss:$16 sps:$4 sm:$0xff]  }
  0x86   :  { %828 = vmatprep.subr.bf16.mxu1 %v13906_v14  ;;  %v13896_v23 = vld [vmem:[#allocation2 + $0xe4] ss:$16 sps:$4 sm:$0xff]   ;;  %v13922_v24 = vld [vmem:[#allocation2 + $0x88] ss:$16 sps:$4 sm:$0xff]   ;;  %v13924_v25 = vld [vmem:[#allocation2 + $0xac] ss:$16 sps:$4 sm:$0xff]  }
  0x87   :  { %v13899_v26 = vld [vmem:[#allocation2 + $0xe0] ss:$16 sps:$4 sm:$0xff]   ;;  %v13902_v27 = vld [vmem:[#allocation2 + $0x104] ss:$16 sps:$4 sm:$0xff]   ;;  %v13928_v28 = vld [vmem:[#allocation2 + $0xa8] ss:$16 sps:$4 sm:$0xff]  }
  0x88   :  { %743 = vmatpush1.bf16.msra.mxu0 %v13881_v5  ;;  %v13930_v29 = vld [vmem:[#allocation2 + $0xcc] ss:$16 sps:$4 sm:$0xff]   ;;  %v13905_v30 = vld [vmem:[#allocation2 + $0x100] ss:$16 sps:$4 sm:$0xff]   ;;  %v13908_v31 = vld [vmem:[#allocation2 + $0x124] ss:$16 sps:$4 sm:$0xff]  }
  0x89   :  { %744 = vmatprep.subr.bf16.mxu0 %v13882_v6  ;;  %829 = vmatpush1.bf16.msra.mxu1 %v13910_v16  ;;  %v13934_v32 = vld [vmem:[#allocation2 + $0xc8] ss:$16 sps:$4 sm:$0xff]   ;;  %v13936_v33 = vld [vmem:[#allocation2 + $0xec] ss:$16 sps:$4 sm:$0xff]   ;;  %v13911_v34 = vld [vmem:[#allocation2 + $0x120] ss:$16 sps:$4 sm:$0xff]  }
  0x8a   :  { %830 = vmatprep.subr.bf16.mxu1 %v13912_v17  ;;  %v13952_v35 = vld [vmem:[%s15176_s0 + $0x4] ss:$12 sps:$4 sm:$0xff]   ;;  %v13940_v37 = vld [vmem:[#allocation2 + $0xe8] ss:$16 sps:$4 sm:$0xff]   ;;  %v13942_v38 = vld [vmem:[#allocation2 + $0x10c] ss:$16 sps:$4 sm:$0xff]  }
  0x8b   :  { %v13914_v36 = vld [vmem:[#allocation2 + $0x144] ss:$16 sps:$4 sm:$0xff]   ;;  %770 = vmatprep.mubr.bf16.mxu0 %v13952_v35  ;;  %856 = vmatprep.mubr.bf16.mxu1 %v13952_v35  ;;  %v13917_v39 = vld [vmem:[#allocation2 + $0x140] ss:$16 sps:$4 sm:$0xff]   ;;  %v13946_v41 = vld [vmem:[#allocation2 + $0x108] ss:$16 sps:$4 sm:$0xff]  }
  0x8c   :  { %745 = vmatpush1.bf16.msra.mxu0 %v13884_v8  ;;  %v13920_v40 = vld [vmem:[#allocation2 + $0x164] ss:$16 sps:$4 sm:$0xff]   ;;  %v13948_v42 = vld [vmem:[#allocation2 + $0x12c] ss:$16 sps:$4 sm:$0xff]   ;;  %v13923_v43 = vld [vmem:[#allocation2 + $0x160] ss:$16 sps:$4 sm:$0xff]  }
  0x8d   :  { %746 = vmatprep.subr.bf16.mxu0 %v13885_v9  ;;  %831 = vmatpush1.bf16.msra.mxu1 %v13916_v20  ;;  %v13926_v44 = vld [vmem:[#allocation2 + $0x184] ss:$16 sps:$4 sm:$0xff]   ;;  %v13956_v45 = vld [vmem:[#allocation2 + $0x128] ss:$16 sps:$4 sm:$0xff]   ;;  %v13957_v46 = vld [vmem:[#allocation2 + $0x14c] ss:$16 sps:$4 sm:$0xff]  }
  0x8e   :  { %832 = vmatprep.subr.bf16.mxu1 %v13918_v21  ;;  %v13929_v47 = vld [vmem:[#allocation2 + $0x180] ss:$16 sps:$4 sm:$0xff]   ;;  %v13932_v48 = vld [vmem:[#allocation2 + $0x1a4] ss:$16 sps:$4 sm:$0xff]   ;;  %v13962_v49 = vld [vmem:[#allocation2 + $0x148] ss:$16 sps:$4 sm:$0xff]  }
  0x8f   :  { %v13963_v50 = vld [vmem:[#allocation2 + $0x16c] ss:$16 sps:$4 sm:$0xff]   ;;  %v13935_v51 = vld [vmem:[#allocation2 + $0x1a0] ss:$16 sps:$4 sm:$0xff]   ;;  %v13938_v52 = vld [vmem:[#allocation2 + $0x1c4] ss:$16 sps:$4 sm:$0xff]  }
  0x90   :  { %747 = vmatpush1.bf16.msra.mxu0 %v13887_v12  ;;  %v13968_v53 = vld [vmem:[#allocation2 + $0x168] ss:$16 sps:$4 sm:$0xff]   ;;  %v13969_v54 = vld [vmem:[#allocation2 + $0x18c] ss:$16 sps:$4 sm:$0xff]   ;;  %v13941_v55 = vld [vmem:[#allocation2 + $0x1c0] ss:$16 sps:$4 sm:$0xff]  }
  0x91   :  { %748 = vmatprep.subr.bf16.mxu0 %v13888_v15  ;;  %833 = vmatpush1.bf16.msra.mxu1 %v13922_v24  ;;  %v13944_v56 = vld [vmem:[#allocation2 + $0x1e4] ss:$16 sps:$4 sm:$0xff]   ;;  %v13974_v57 = vld [vmem:[#allocation2 + $0x188] ss:$16 sps:$4 sm:$0xff]   ;;  %v13975_v58 = vld [vmem:[#allocation2 + $0x1ac] ss:$16 sps:$4 sm:$0xff]  }
  0x92   :  { %834 = vmatprep.subr.bf16.mxu1 %v13924_v25  ;;  %v13947_v59 = vld [vmem:[#allocation2 + $0x1e0] ss:$16 sps:$4 sm:$0xff]   ;;  %v13955_v61 = vld [vmem:[#allocation2 + $0x204] ss:$16 sps:$4 sm:$0xff]   ;;  %v13980_v62 = vld [vmem:[#allocation2 + $0x1a8] ss:$16 sps:$4 sm:$0xff]  }
  0x93   :  { %v13950_v60 = vld [vmem:[%s15176_s0] ss:$12 sps:$4 sm:$0xff]   ;;  %v13961_v1 = vld [vmem:[#allocation2 + $0x224] ss:$16 sps:$4 sm:$0xff]   ;;  %v13986_v2 = vld [vmem:[#allocation2 + $0x1c8] ss:$16 sps:$4 sm:$0xff]  }
  0x94   :  { %749 = vmatpush1.bf16.msra.mxu0 %v13890_v18  ;;  %v13981_v63 = vld [vmem:[#allocation2 + $0x1cc] ss:$16 sps:$4 sm:$0xff]   ;;  %v13953_v0 = vld [vmem:[#allocation2 + $0x200] ss:$16 sps:$4 sm:$0xff]   ;;  %v14337_v5 = vmov 0   ;;  %vm11943_vm3 = vcmask 64512  }
  0x95   :  { %750 = vmatprep.subr.bf16.mxu0 %v13891_v19  ;;  %835 = vmatpush1.bf16.msra.mxu1 %v13928_v28  ;;  %v13987_v3 = vld [vmem:[#allocation2 + $0x1ec] ss:$16 sps:$4 sm:$0xff]   ;;  %v13959_v4 = vld [vmem:[#allocation2 + $0x220] ss:$16 sps:$4 sm:$0xff]   ;;  %v13967_v6 = vld [vmem:[#allocation2 + $0x244] ss:$16 sps:$4 sm:$0xff]  }
  0x96   :  { %836 = vmatprep.subr.bf16.mxu1 %v13930_v29  ;;  %v13992_v7 = vld [vmem:[#allocation2 + $0x1e8] ss:$16 sps:$4 sm:$0xff]   ;;  %v13995_v8 = vld [vmem:[#allocation2 + $0x20c] ss:$16 sps:$4 sm:$0xff]   ;;  %v13965_v9 = vld [vmem:[#allocation2 + $0x240] ss:$16 sps:$4 sm:$0xff]  }
  0x97   :  { %v13973_v10 = vld [vmem:[#allocation2 + $0x264] ss:$16 sps:$4 sm:$0xff]   ;;  %v13993_v11 = vld [vmem:[#allocation2 + $0x208] ss:$16 sps:$4 sm:$0xff]   ;;  %v14001_v12 = vld [vmem:[#allocation2 + $0x22c] ss:$16 sps:$4 sm:$0xff]  }
  0x98   :  { %751 = vmatpush1.bf16.msra.mxu0 %v13893_v22  ;;  %v13971_v13 = vld [vmem:[#allocation2 + $0x260] ss:$16 sps:$4 sm:$0xff]   ;;  %v13979_v14 = vld [vmem:[#allocation2 + $0x284] ss:$16 sps:$4 sm:$0xff]   ;;  %v13999_v15 = vld [vmem:[#allocation2 + $0x228] ss:$16 sps:$4 sm:$0xff]  }
  0x99   :  { %752 = vmatprep.subr.bf16.mxu0 %v13896_v23  ;;  %837 = vmatpush1.bf16.msra.mxu1 %v13934_v32  ;;  %v14005_v16 = vld [vmem:[#allocation2 + $0x24c] ss:$16 sps:$4 sm:$0xff]   ;;  %v13977_v17 = vld [vmem:[#allocation2 + $0x280] ss:$16 sps:$4 sm:$0xff]   ;;  %v13985_v18 = vld [vmem:[#allocation2 + $0x2a4] ss:$16 sps:$4 sm:$0xff]  }
  0x9a   :  { %838 = vmatprep.subr.bf16.mxu1 %v13936_v33  ;;  %v14003_v19 = vld [vmem:[#allocation2 + $0x248] ss:$16 sps:$4 sm:$0xff]   ;;  %v14008_v20 = vld [vmem:[#allocation2 + $0x26c] ss:$16 sps:$4 sm:$0xff]   ;;  %v13983_v21 = vld [vmem:[#allocation2 + $0x2a0] ss:$16 sps:$4 sm:$0xff]  }
  0x9b   :  { %v13991_v22 = vld [vmem:[#allocation2 + $0x2c4] ss:$16 sps:$4 sm:$0xff]   ;;  %v14006_v23 = vld [vmem:[#allocation2 + $0x268] ss:$16 sps:$4 sm:$0xff]   ;;  %v14011_v24 = vld [vmem:[#allocation2 + $0x28c] ss:$16 sps:$4 sm:$0xff]  }
  0x9c   :  { %753 = vmatpush1.bf16.msra.mxu0 %v13899_v26  ;;  %v13989_v25 = vld [vmem:[#allocation2 + $0x2c0] ss:$16 sps:$4 sm:$0xff]   ;;  %v13998_v26 = vld [vmem:[#allocation2 + $0x2e4] ss:$16 sps:$4 sm:$0xff]   ;;  %v14012_v32 = vld [vmem:[#allocation2 + $0x2a8] ss:$16 sps:$4 sm:$0xff]  }
  0x9d   :  { %754 = vmatprep.subr.bf16.mxu0 %v13902_v27  ;;  %839 = vmatpush1.bf16.msra.mxu1 %v13940_v37  ;;  %v14009_v27 = vld [vmem:[#allocation2 + $0x288] ss:$16 sps:$4 sm:$0xff]  }
  0x9e   :  { %840 = vmatprep.subr.bf16.mxu1 %v13942_v38  ;;  %v930_v28 = vld [vmem:[#allocation6] sm:$0xff] }
  0x9f   :  { %v934_v29 = vld [vmem:[#allocation6 + $0x20] sm:$0xff] }
  0xa0   :  { %755 = vmatpush1.bf16.msra.mxu0 %v13905_v30  ;;  %v14014_v30 = vld [vmem:[#allocation2 + $0x2ac] ss:$16 sps:$4 sm:$0xff]   ;;  %v938_v33 = vld [vmem:[#allocation6 + $0x40] sm:$0xff]  ;;  %v12098_v37 = vcombine.high %v930_v28, %v934_v29 }
  0xa1   :  { %756 = vmatprep.subr.bf16.mxu0 %v13908_v31  ;;  %841 = vmatpush1.bf16.msra.mxu1 %v13946_v41  ;;  %v13996_v31 = vld [vmem:[#allocation2 + $0x2e0] ss:$16 sps:$4 sm:$0xff]   ;;  %v14002_v35 = vld [vmem:[%s15176_s0 + $0x8] ss:$12 sps:$4 sm:$0xff]  }
  0xa2   :  { %842 = vmatprep.subr.bf16.mxu1 %v13948_v42  ;;  %v14015_v38 = vld [vmem:[#allocation2 + $0x2c8] ss:$16 sps:$4 sm:$0xff]   ;;  %v14020_v42 = vld [vmem:[#allocation2 + $0x2ec] ss:$16 sps:$4 sm:$0xff]  }
  0xa3   :  { %v950_v41 = vld [vmem:[#allocation6 + $0xa0] sm:$0xff] }
  0xa4   :  { %757 = vmatpush1.bf16.msra.mxu0 %v13911_v34  ;;  %v942_v34 = vld [vmem:[#allocation6 + $0x60] sm:$0xff] }
  0xa5   :  { %758 = vmatprep.subr.bf16.mxu0 %v13914_v36  ;;  %843 = vmatpush1.bf16.msra.mxu1 %v13956_v45  ;;  %v14017_v36 = vld [vmem:[#allocation2 + $0x2cc] ss:$16 sps:$4 sm:$0xff]  }
  0xa6   :  { %844 = vmatprep.subr.bf16.mxu1 %v13957_v46  ;;  %v935_v45 = vld [vmem:[#allocation6 + $0x28] sm:$0xff]  ;;  %v14018_v46 = vld [vmem:[#allocation2 + $0x2e8] ss:$16 sps:$4 sm:$0xff]  }
  0xa8   :  { %759 = vmatpush1.bf16.msra.mxu0 %v13917_v39  ;;  %v12097_v39 = vcombine.low %v930_v28, %v934_v29  ;;  %v983_v28 = vld [vmem:[#allocation6 + $0x1a8] sm:$0xff] }
  0xa9   :  { %760 = vmatprep.subr.bf16.mxu0 %v13920_v40  ;;  %845 = vmatpush1.bf16.msra.mxu1 %v13962_v49  ;;  %v946_v40 = vld [vmem:[#allocation6 + $0x80] sm:$0xff] }
  0xaa   :  { %846 = vmatprep.subr.bf16.mxu1 %v13963_v50  ;;  %v958_v49 = vld [vmem:[#allocation6 + $0xe0] sm:$0xff]  ;;  %v12114_v50 = vcombine.high %v946_v40, %v950_v41 }
  0xac   :  { %761 = vmatpush1.bf16.msra.mxu0 %v13923_v43  ;;  %v12106_v43 = vcombine.high %v938_v33, %v942_v34 }
  0xad   :  { %762 = vmatprep.subr.bf16.mxu0 %v13926_v44  ;;  %847 = vmatpush1.bf16.msra.mxu1 %v13968_v53  ;;  %v931_v44 = vld [vmem:[#allocation6 + $0x8] sm:$0xff] }
  0xae   :  { %848 = vmatprep.subr.bf16.mxu1 %v13969_v54  ;;  %v12100_v53 = vcombine.high %v931_v44, %v935_v45  ;;  %v12113_v54 = vcombine.low %v946_v40, %v950_v41  ;;  %v1014_v40 = vld [vmem:[#allocation6 + $0x2a0] sm:$0xff] }
  0xb0   :  { %763 = vmatpush1.bf16.msra.mxu0 %v13929_v47  ;;  %v12105_v47 = vcombine.low %v938_v33, %v942_v34 }
  0xb1   :  { %764 = vmatprep.subr.bf16.mxu0 %v13932_v48  ;;  %849 = vmatpush1.bf16.msra.mxu1 %v13974_v57  ;;  %v954_v48 = vld [vmem:[#allocation6 + $0xc0] sm:$0xff] }
  0xb2   :  { %850 = vmatprep.subr.bf16.mxu1 %v13975_v58  ;;  %v12122_v57 = vcombine.high %v954_v48, %v958_v49  ;;  %v12099_v58 = vcombine.low %v931_v44, %v935_v45  ;;  %v999_v44 = vld [vmem:[#allocation6 + $0x228] sm:$0xff] }
  0xb4   :  { %765 = vmatpush1.bf16.msra.mxu0 %v13935_v51  ;;  %v939_v51 = vld [vmem:[#allocation6 + $0x48] sm:$0xff] }
  0xb5   :  { %766 = vmatprep.subr.bf16.mxu0 %v13938_v52  ;;  %851 = vmatpush1.bf16.msra.mxu1 %v13980_v62  ;;  %v943_v52 = vld [vmem:[#allocation6 + $0x68] sm:$0xff]  ;;  %v12121_v62 = vcombine.low %v954_v48, %v958_v49  ;;  %v1022_v48 = vld [vmem:[#allocation6 + $0x2e0] sm:$0xff] }
  0xb6   :  { %852 = vmatprep.subr.bf16.mxu1 %v13981_v63  ;;  %v970_v63 = vld [vmem:[#allocation6 + $0x140] sm:$0xff] }
  0xb8   :  { %767 = vmatpush1.bf16.msra.mxu0 %v13941_v55  ;;  %v962_v55 = vld [vmem:[#allocation6 + $0x100] sm:$0xff] }
  0xb9   :  { %768 = vmatprep.subr.bf16.mxu0 %v13944_v56  ;;  %853 = vmatpush1.bf16.msra.mxu1 %v13986_v2  ;;  %v966_v56 = vld [vmem:[#allocation6 + $0x120] sm:$0xff]  ;;  %v12107_v2 = vcombine.low %v939_v51, %v943_v52 }
  0xba   :  { %854 = vmatprep.subr.bf16.mxu1 %v13987_v3  ;;  %v955_v3 = vld [vmem:[#allocation6 + $0xc8] sm:$0xff] }
  0xbc   :  { %769 = vmatpush1.bf16.msra.mxu0 %v13947_v59  ;;  %v947_v59 = vld [vmem:[#allocation6 + $0x88] sm:$0xff] }
  0xbd   :  { %781 = vmatprep.subr.bf16.mxu0 %v13955_v61  ;;  %855 = vmatpush1.bf16.msra.mxu1 %v13992_v7  ;;  %v12108_v61 = vcombine.high %v939_v51, %v943_v52  ;;  %v978_v7 = vld [vmem:[#allocation6 + $0x180] sm:$0xff]  ;;  %v1003_v51 = vld [vmem:[#allocation6 + $0x248] sm:$0xff] }
  0xbe   :  { %867 = vmatprep.subr.bf16.mxu1 %v13995_v8  ;;  %v982_v8 = vld [vmem:[#allocation6 + $0x1a0] sm:$0xff]  ;;  %v1007_v52 = vld [vmem:[#allocation6 + $0x268] sm:$0xff] }
  0xbf   :  { %771 = vmatmul.mubr.bf16.vlgmr.msra.gmra.mrb[0].mxu0 %v13950_v60 }
  0xc0   :  { %782 = vmatpush1.bf16.msra.mxu0 %v13953_v0  ;;  %813 = vmatprep.mubr.bf16.mxu0 %v14337_v5  ;;  %v974_v0 = vld [vmem:[#allocation6 + $0x160] sm:$0xff] }
  0xc1   :  { %783 = vmatprep.subr.bf16.mxu0 %v13961_v1  ;;  %857 = vmatmul.mubr.bf16.vlgmr.msra.gmra.mrb[0].mxu1 %v13950_v60  ;;  %v951_v60 = vld [vmem:[#allocation6 + $0xa8] sm:$0xff]  ;;  %v12130_v1 = vcombine.high %v962_v55, %v966_v56 }
  0xc2   :  { %868 = vmatpush1.bf16.msra.mxu1 %v13993_v11  ;;  %899 = vmatprep.mubr.bf16.mxu1 %v14337_v5  ;;  %v12116_v5 = vcombine.high %v947_v59, %v951_v60  ;;  %v963_v11 = vld [vmem:[#allocation6 + $0x108] sm:$0xff] }
  0xc3   :  { %869 = vmatprep.subr.bf16.mxu1 %v14001_v12  ;;  %v967_v12 = vld [vmem:[#allocation6 + $0x128] sm:$0xff] }
  0xc4   :  { %784 = vmatpush1.bf16.msra.mxu0 %v13959_v4  ;;  %v959_v4 = vld [vmem:[#allocation6 + $0xe8] sm:$0xff] }
  0xc5   :  { %785 = vmatprep.subr.bf16.mxu0 %v13967_v6  ;;  %v12129_v6 = vcombine.low %v962_v55, %v966_v56  ;;  %v1026_v55 = vld [vmem:[#allocation6 + $0x300] sm:$0xff] }
  0xc6   :  { %870 = vmatpush1.bf16.msra.mxu1 %v13999_v15  ;;  %v986_v15 = vld [vmem:[#allocation6 + $0x1c0] sm:$0xff] }
  0xc7   :  { %871 = vmatprep.subr.bf16.mxu1 %v14005_v16  ;;  %v990_v16 = vld [vmem:[#allocation6 + $0x1e0] sm:$0xff] }
  0xc8   :  { %786 = vmatpush1.bf16.msra.mxu0 %v13965_v9  ;;  %v12138_v9 = vcombine.high %v970_v63, %v974_v0  ;;  %v1030_v56 = vld [vmem:[#allocation6 + $0x320] sm:$0xff] }
  0xc9   :  { %787 = vmatprep.subr.bf16.mxu0 %v13973_v10  ;;  %v12115_v10 = vcombine.low %v947_v59, %v951_v60  ;;  %v1011_v59 = vld [vmem:[#allocation6 + $0x288] sm:$0xff] }
  0xca   :  { %872 = vmatpush1.bf16.msra.mxu1 %v14003_v19  ;;  %v971_v19 = vld [vmem:[#allocation6 + $0x148] sm:$0xff] }
  0xcb   :  { %873 = vmatprep.subr.bf16.mxu1 %v14008_v20  ;;  %v975_v20 = vld [vmem:[#allocation6 + $0x168] sm:$0xff] }
  0xcc   :  { %788 = vmatpush1.bf16.msra.mxu0 %v13971_v13  ;;  %v12124_v13 = vcombine.high %v955_v3, %v959_v4  ;;  %v12140_v29 = vcombine.high %v971_v19, %v975_v20  ;;  %v12139_v34 = vcombine.low %v971_v19, %v975_v20  ;;  %v1015_v60 = vld [vmem:[#allocation6 + $0x2a8] sm:$0xff]  ;;  %v1042_v20 = vld [vmem:[#allocation6 + $0x380] sm:$0xff] }
  0xcd   :  { %789 = vmatprep.subr.bf16.mxu0 %v13979_v14  ;;  %v12137_v14 = vcombine.low %v970_v63, %v974_v0  ;;  %v12194_v63 = vcombine.high %v1026_v55, %v1030_v56  ;;  %v12171_v0 = vcombine.low %v1003_v51, %v1007_v52 }
  0xce   :  { %874 = vmatpush1.bf16.msra.mxu1 %v14006_v23  ;;  %v994_v23 = vld [vmem:[#allocation6 + $0x200] sm:$0xff] }
  0xcf   :  { %875 = vmatprep.subr.bf16.mxu1 %v14011_v24  ;;  %v998_v24 = vld [vmem:[#allocation6 + $0x220] sm:$0xff] }
  0xd0   :  { %790 = vmatpush1.bf16.msra.mxu0 %v13977_v17  ;;  %v12146_v17 = vcombine.high %v978_v7, %v982_v8  ;;  %v12162_v33 = vcombine.high %v994_v23, %v998_v24 }
  0xd1   :  { %791 = vmatprep.subr.bf16.mxu0 %v13985_v18  ;;  %v12123_v18 = vcombine.low %v955_v3, %v959_v4  ;;  %v12180_v3 = vcombine.high %v1011_v59, %v1015_v60  ;;  %v12193_v4 = vcombine.low %v1026_v55, %v1030_v56 }
  0xd2   :  { %876 = vmatpush1.bf16.msra.mxu1 %v14009_v27  ;;  %v979_v27 = vld [vmem:[#allocation6 + $0x188] sm:$0xff] }
  0xd3   :  { %877 = vmatprep.subr.bf16.mxu1 %v14014_v30  ;;  %v12153_v30 = vcombine.low %v986_v15, %v990_v16 }
  0xd4   :  { %792 = vmatpush1.bf16.msra.mxu0 %v13983_v21  ;;  %v12132_v21 = vcombine.high %v963_v11, %v967_v12 }
  0xd5   :  { %793 = vmatprep.subr.bf16.mxu0 %v13991_v22  ;;  %v12145_v22 = vcombine.low %v978_v7, %v982_v8  ;;  %v1031_v7 = vld [vmem:[#allocation6 + $0x328] sm:$0xff] }
  0xd6   :  { %878 = vmatpush1.bf16.msra.mxu1 %v14012_v32  ;;  %v1006_v32 = vld [vmem:[#allocation6 + $0x260] sm:$0xff] }
  0xd7   :  { %879 = vmatprep.subr.bf16.mxu1 %v14017_v36  ;;  %v991_v36 = vld [vmem:[#allocation6 + $0x1e8] sm:$0xff] }
  0xd8   :  { %794 = vmatpush1.bf16.msra.mxu0 %v13989_v25  ;;  %v12154_v25 = vcombine.high %v986_v15, %v990_v16  ;;  %v1039_v16 = vld [vmem:[#allocation6 + $0x368] sm:$0xff] }
  0xd9   :  { %795 = vmatprep.subr.bf16.mxu0 %v13998_v26  ;;  %v12131_v26 = vcombine.low %v963_v11, %v967_v12  ;;  %v1034_v12 = vld [vmem:[#allocation6 + $0x340] sm:$0xff] }
  0xda   :  { %880 = vmatpush1.bf16.msra.mxu1 %v14015_v38  ;;  %v12161_v38 = vcombine.low %v994_v23, %v998_v24  ;;  %v1047_v24 = vld [vmem:[#allocation6 + $0x3a8] sm:$0xff] }
  0xdb   :  { %881 = vmatprep.subr.bf16.mxu1 %v14020_v42  ;;  %v12147_v42 = vcombine.low %v979_v27, %v983_v28 }
  0xdc   :  { %796 = vmatpush1.bf16.msra.mxu0 %v13996_v31  ;;  %v1002_v31 = vld [vmem:[#allocation6 + $0x240] sm:$0xff] }
  0xdd   :  { %2508 = vmatprep.subr.bf16.mxu0 %v12098_v37  ;;  %v12148_v37 = vcombine.high %v979_v27, %v983_v28  ;;  %v12170_v41 = vcombine.high %v1002_v31, %v1006_v32  ;;  %v1050_v28 = vld [vmem:[#allocation6 + $0x3c0] sm:$0xff] }
  0xde   :  { %882 = vmatpush1.bf16.msra.mxu1 %v14018_v46  ;;  %v12169_v46 = vcombine.low %v1002_v31, %v1006_v32  ;;  %v1055_v32 = vld [vmem:[#allocation6 + $0x3e8] sm:$0xff] }
  0xdf   :  { %814 = vmatmul.mubr.bf16.vlgmr.msra.gmra.mrb[0].mxu0 %v14002_v35  ;;  %2594 = vmatprep.subr.bf16.mxu1 %v12100_v53 }
  0xe0   :  { %2509 = vmatpush1.bf16.msra.mxu0 %v12097_v39  ;;  %v1010_v39 = vld [vmem:[#allocation6 + $0x280] sm:$0xff] }
  0xe1   :  { %2510 = vmatprep.subr.bf16.mxu0 %v12106_v43  ;;  %900 = vmatmul.mubr.bf16.vlgmr.msra.gmra.mrb[0].mxu1 %v14002_v35  ;;  %v987_v35 = vld [vmem:[#allocation6 + $0x1c8] sm:$0xff]  ;;  %v12178_v49 = vcombine.high %v1010_v39, %v1014_v40 }
  0xe2   :  { %2595 = vmatpush1.bf16.msra.mxu1 %v12099_v58  ;;  %v995_v43 = vld [vmem:[#allocation6 + $0x208] sm:$0xff]  ;;  %v12156_v45 = vcombine.high %v987_v35, %v991_v36 }
  0xe3   :  { %2596 = vmatprep.subr.bf16.mxu1 %v12108_v61  ;;  %v12164_v53 = vcombine.high %v995_v43, %v999_v44  ;;  %v12163_v58 = vcombine.low %v995_v43, %v999_v44  ;;  %v12172_v61 = vcombine.high %v1003_v51, %v1007_v52  ;;  %v222_v44 = vlaneseq }
  0xe4   :  { %2511 = vmatpush1.bf16.msra.mxu0 %v12105_v47  ;;  %v1018_v47 = vld [vmem:[#allocation6 + $0x2c0] sm:$0xff] }
  0xe5   :  { %2512 = vmatprep.subr.bf16.mxu0 %v12114_v50  ;;  %v12155_v50 = vcombine.low %v987_v35, %v991_v36  ;;  %v1058_v36 = vld [vmem:[#allocation6 + $0x400] sm:$0xff] }
  0xe6   :  { %2597 = vmatpush1.bf16.msra.mxu1 %v12107_v2  ;;  %v1023_v2 = vld [vmem:[#allocation6 + $0x2e8] sm:$0xff] }
  0xe7   :  { %2598 = vmatprep.subr.bf16.mxu1 %v12116_v5  ;;  %v12179_v5 = vcombine.low %v1011_v59, %v1015_v60 }
  0xe8   :  { %2513 = vmatpush1.bf16.msra.mxu0 %v12113_v54  ;;  %v12177_v54 = vcombine.low %v1010_v39, %v1014_v40  ;;  %v1063_v40 = vld [vmem:[#allocation6 + $0x428] sm:$0xff] }
  0xe9   :  { %2514 = vmatprep.subr.bf16.mxu0 %v12122_v57  ;;  %v12186_v57 = vcombine.high %v1018_v47, %v1022_v48 }
  0xea   :  { %2599 = vmatpush1.bf16.msra.mxu1 %v12115_v10 }
  0xeb   :  { %2600 = vmatprep.subr.bf16.mxu1 %v12124_v13  ;;  %v1038_v13 = vld [vmem:[#allocation6 + $0x360] sm:$0xff] }
  0xec   :  { %2515 = vmatpush1.bf16.msra.mxu0 %v12121_v62  ;;  %v12185_v62 = vcombine.low %v1018_v47, %v1022_v48  ;;  %v12202_v15 = vcombine.high %v1034_v12, %v1038_v13  ;;  %v220_v47 = vld [vmem:[#allocation4] sm:$0xf] }
  0xed   :  { %2516 = vmatprep.subr.bf16.mxu0 %v12130_v1  ;;  %v1019_v1 = vld [vmem:[#allocation6 + $0x2c8] sm:$0xff] }
  0xee   :  { %2601 = vmatpush1.bf16.msra.mxu1 %v12123_v18  ;;  %v12188_v8 = vcombine.high %v1019_v1, %v1023_v2 }
  0xef   :  { %2602 = vmatprep.subr.bf16.mxu1 %v12132_v21  ;;  %v1046_v21 = vld [vmem:[#allocation6 + $0x3a0] sm:$0xff] }
  0xf0   :  { %2517 = vmatpush1.bf16.msra.mxu0 %v12129_v6  ;;  %v1027_v6 = vld [vmem:[#allocation6 + $0x308] sm:$0xff]  ;;  %v12210_v23 = vcombine.high %v1042_v20, %v1046_v21 }
  0xf1   :  { %2518 = vmatprep.subr.bf16.mxu0 %v12138_v9  ;;  %v12187_v9 = vcombine.low %v1019_v1, %v1023_v2  ;;  %v12196_v10 = vcombine.high %v1027_v6, %v1031_v7  ;;  %v12195_v11 = vcombine.low %v1027_v6, %v1031_v7  ;;  %v1070_v7 = vld [vmem:[#allocation6 + $0x460] sm:$0xff] }
  0xf2   :  { %2603 = vmatpush1.bf16.msra.mxu1 %v12131_v26 }
  0xf3   :  { %2604 = vmatprep.subr.bf16.mxu1 %v12140_v29  ;;  %v1054_v29 = vld [vmem:[#allocation6 + $0x3e0] sm:$0xff] }
  0xf4   :  { %2519 = vmatpush1.bf16.msra.mxu0 %v12137_v14  ;;  %v1035_v14 = vld [vmem:[#allocation6 + $0x348] sm:$0xff]  ;;  %v12218_v31 = vcombine.high %v1050_v28, %v1054_v29 }
  0xf5   :  { %2520 = vmatprep.subr.bf16.mxu0 %v12146_v17  ;;  %v12201_v17 = vcombine.low %v1034_v12, %v1038_v13  ;;  %v12203_v18 = vcombine.low %v1035_v14, %v1039_v16  ;;  %v12204_v19 = vcombine.high %v1035_v14, %v1039_v16  ;;  %v1074_v16 = vld [vmem:[#allocation6 + $0x480] sm:$0xff] }
  0xf6   :  { %2605 = vmatpush1.bf16.msra.mxu1 %v12139_v34 }
  0xf7   :  { %2606 = vmatprep.subr.bf16.mxu1 %v12148_v37  ;;  %v1062_v37 = vld [vmem:[#allocation6 + $0x420] sm:$0xff] }
  0xf8   :  { %2521 = vmatpush1.bf16.msra.mxu0 %v12145_v22  ;;  %v1043_v22 = vld [vmem:[#allocation6 + $0x388] sm:$0xff]  ;;  %v12226_v39 = vcombine.high %v1058_v36, %v1062_v37 }
  0xf9   :  { %2522 = vmatprep.subr.bf16.mxu0 %v12154_v25  ;;  %v12209_v25 = vcombine.low %v1042_v20, %v1046_v21  ;;  %v12211_v26 = vcombine.low %v1043_v22, %v1047_v24  ;;  %v12212_v27 = vcombine.high %v1043_v22, %v1047_v24  ;;  %v1075_v20 = vld [vmem:[#allocation6 + $0x488] sm:$0xff] }
  0xfa   :  { %2607 = vmatpush1.bf16.msra.mxu1 %v12147_v42  ;;  %v1079_v21 = vld [vmem:[#allocation6 + $0x4a8] sm:$0xff] }
  0xfb   :  { %2608 = vmatprep.subr.bf16.mxu1 %v12156_v45  ;;  %v14490_v45 = vshrl.u32 %v222_v44, 7 }
  0xfc   :  { %2523 = vmatpush1.bf16.msra.mxu0 %v12153_v30  ;;  %v1051_v30 = vld [vmem:[#allocation6 + $0x3c8] sm:$0xff] }
  0xfd   :  { %2524 = vmatprep.subr.bf16.mxu0 %v12162_v33  ;;  %v12217_v33 = vcombine.low %v1050_v28, %v1054_v29  ;;  %v12219_v34 = vcombine.low %v1051_v30, %v1055_v32  ;;  %v12220_v35 = vcombine.high %v1051_v30, %v1055_v32  ;;  %v14496_v48 = vsub.s32 1, %v14490_v45 }
  0xfe   :  { %2609 = vmatpush1.bf16.msra.mxu1 %v12155_v50  ;;  %v14501_v59 = vsub.s32 2, %v14490_v45  ;;  %v12244_v32 = vcombine.high %v1075_v20, %v1079_v21 }
  0xff   :  { %2610 = vmatprep.subr.bf16.mxu1 %v12164_v53  ;;  %v229_v50 = vrot.slane %v220_v47, %v14496_v48 }
 0x100   :  { %2525 = vmatpush1.bf16.msra.mxu0 %v12161_v38  ;;  %v1059_v38 = vld [vmem:[#allocation6 + $0x408] sm:$0xff] }
 0x101   :  { %2526 = vmatprep.subr.bf16.mxu0 %v12170_v41  ;;  %v12225_v41 = vcombine.low %v1058_v36, %v1062_v37  ;;  %v12227_v42 = vcombine.low %v1059_v38, %v1063_v40  ;;  %v12228_v43 = vcombine.high %v1059_v38, %v1063_v40  ;;  %v1086_v36 = vld [vmem:[#allocation6 + $0x4e0] sm:$0xff]  ;;  %v1083_v37 = vld [vmem:[#allocation6 + $0x4c8] sm:$0xff] }
 0x102   :  { %2611 = vmatpush1.bf16.msra.mxu1 %v12163_v58  ;;  %v1087_v38 = vld [vmem:[#allocation6 + $0x4e8] sm:$0xff] }
 0x103   :  { %2612 = vmatprep.subr.bf16.mxu1 %v12172_v61 }
 0x104   :  { %2527 = vmatpush1.bf16.msra.mxu0 %v12169_v46  ;;  %v14493_v46 = vsub.s32 0, %v14490_v45 }
 0x105   :  { %2528 = vmatprep.subr.bf16.mxu0 %v12178_v49 }
 0x106   :  { %2613 = vmatpush1.bf16.msra.mxu1 %v12171_v0  ;;  %v225_v49 = vrot.slane %v220_v47, %v14493_v46 }
 0x107   :  { %2614 = vmatprep.subr.bf16.mxu1 %v12180_v3  ;;  %v1066_v3 = vld [vmem:[#allocation6 + $0x440] sm:$0xff] }
 0x108   :  { %2529 = vmatpush1.bf16.msra.mxu0 %v12177_v54  ;;  %v12234_v14 = vcombine.high %v1066_v3, %v1070_v7 }
 0x109   :  { %2530 = vmatprep.subr.bf16.mxu0 %v12186_v57 }
 0x10a   :  { %2615 = vmatpush1.bf16.msra.mxu1 %v12179_v5 }
 0x10b   :  { %2616 = vmatprep.subr.bf16.mxu1 %v12188_v8  ;;  %v1067_v8 = vld [vmem:[#allocation6 + $0x448] sm:$0xff] }
 0x10c   :  { %2531 = vmatpush1.bf16.msra.mxu0 %v12185_v62  ;;  %v14504_v62 = vsub.s32 3, %v14490_v45 }
 0x10d   :  { %2532 = vmatprep.subr.bf16.mxu0 %v12194_v63 }
 0x10e   :  { %2617 = vmatpush1.bf16.msra.mxu1 %v12187_v9  ;;  %v1071_v9 = vld [vmem:[#allocation6 + $0x468] sm:$0xff] }
 0x10f   :  { %2618 = vmatprep.subr.bf16.mxu1 %v12196_v10  ;;  %v237_v10 = vrot.slane %v220_v47, %v14504_v62  ;;  %v12235_v28 = vcombine.low %v1067_v8, %v1071_v9 }
 0x110   :  { %2533 = vmatpush1.bf16.msra.mxu0 %v12193_v4  ;;  %v233_v4 = vrot.slane %v220_v47, %v14501_v59 }
 0x111   :  { %2534 = vmatprep.subr.bf16.mxu0 %v12202_v15  ;;  %v12236_v15 = vcombine.high %v1067_v8, %v1071_v9  ;;  %v1110_v8 = vld [vmem:[#allocation6 + $0x5a0] sm:$0xff]  ;;  %v1107_v9 = vld [vmem:[#allocation6 + $0x588] sm:$0xff] }
 0x112   :  { %2619 = vmatpush1.bf16.msra.mxu1 %v12195_v11 }
 0x113   :  { %2620 = vmatprep.subr.bf16.mxu1 %v12204_v19  ;;  %v1078_v19 = vld [vmem:[#allocation6 + $0x4a0] sm:$0xff] }
 0x114   :  { %2535 = vmatpush1.bf16.msra.mxu0 %v12201_v17 }
 0x115   :  { %2536 = vmatprep.subr.bf16.mxu0 %v12210_v23 }
 0x116   :  { %2621 = vmatpush1.bf16.msra.mxu1 %v12203_v18 }
 0x117   :  { %2622 = vmatprep.subr.bf16.mxu1 %v12212_v27  ;;  %v12233_v27 = vcombine.low %v1066_v3, %v1070_v7  ;;  %v1106_v7 = vld [vmem:[#allocation6 + $0x580] sm:$0xff] }
 0x118   :  { %2537 = vmatpush1.bf16.msra.mxu0 %v12209_v25 }
 0x119   :  { %2538 = vmatprep.subr.bf16.mxu0 %v12218_v31  ;;  %v12242_v31 = vcombine.high %v1074_v16, %v1078_v19 }
 0x11a   :  { %2623 = vmatpush1.bf16.msra.mxu1 %v12211_v26 }
 0x11b   :  { %2624 = vmatprep.subr.bf16.mxu1 %v12220_v35 }
 0x11c   :  { %2539 = vmatpush1.bf16.msra.mxu0 %v12217_v33  ;;  %v1082_v33 = vld [vmem:[#allocation6 + $0x4c0] sm:$0xff] }
 0x11d   :  { %2551 = vmatprep.subr.bf16.mxu0 %v12226_v39 }
 0x11e   :  { %2625 = vmatpush1.bf16.msra.mxu1 %v12219_v34 }
 0x11f   :  { %2637 = vmatprep.subr.bf16.mxu1 %v12228_v43 }
 0x1b2   :  { %v815_v51 = vpop.f32.mrb[0].mxu0 }
 0x1b3   :  { %v13682_v52 = vadd.f32 %v815_v51, %v225_v49  ;;  %v817_v53 = vpop.f32.mrb[1].mxu0  ;;  %v1090_v51 = vld [vmem:[#allocation6 + $0x500] sm:$0xff] }
 0x1b4   :  { %v13683_v54 = vadd.f32 %v817_v53, %v229_v50  ;;  %v819_v55 = vpop.f32.mrb[2].mxu0  ;;  %v901_v13 = vpop.f32.mrb[0].mxu1  ;;  %v1094_v53 = vld [vmem:[#allocation6 + $0x520] sm:$0xff] }
 0x1b5   :  { %v910_v56 = vmul.f32 0.2, %v13682_v52  ;;  %v13684_v57 = vadd.f32 %v819_v55, %v225_v49  ;;  %v821_v58 = vpop.f32.mrb[3].mxu0  ;;  %v13686_v17 = vadd.f32 %v901_v13, %v233_v4  ;;  %v903_v18 = vpop.f32.mrb[1].mxu1  ;;  %v12250_v49 = vcombine.high %v1082_v33, %v1086_v36  ;;  %v1095_v55 = vld [vmem:[#allocation6 + $0x528] sm:$0xff] }
 0x1b6   :  { %v911_v60 = vmul.f32 0.2, %v13683_v54  ;;  %v13685_v61 = vadd.f32 %v821_v58, %v229_v50  ;;  %v13687_v22 = vadd.f32 %v903_v18, %v237_v10  ;;  %v905_v23 = vpop.f32.mrb[2].mxu1  ;;  %v12252_v50 = vcombine.high %v1083_v37, %v1087_v38  ;;  %v1118_v18 = vld [vmem:[#allocation6 + $0x5e0] sm:$0xff] }
 0x1b7   :  { %v914_v63 = vmul.f32 0.2, %v13684_v57  ;;  %v918_v1 = vmax.f32 %v13682_v52, %v910_v56  ;;  %v912_v24 = vmul.f32 0.2, %v13686_v17  ;;  %v13688_v25 = vadd.f32 %v905_v23, %v233_v4  ;;  %v907_v26 = vpop.f32.mrb[3].mxu1 }
 0x1b8   :  { %v915_v0 = vmul.f32 0.2, %v13685_v61  ;;  %v919_v5 = vmax.f32 %v13683_v54, %v911_v60  ;;  %v913_v29 = vmul.f32 0.2, %v13687_v22  ;;  %v13689_v30 = vadd.f32 %v907_v26, %v237_v10  ;;  %v1091_v54 = vld [vmem:[#allocation6 + $0x508] sm:$0xff]  ;;  %v1126_v26 = vld [vmem:[#allocation6 + $0x620] sm:$0xff] }
 0x1b9   :  { %v922_v2 = vmax.f32 %v13684_v57, %v914_v63  ;;  %v920_v34 = vmax.f32 %v13686_v17, %v912_v24  ;;  %v916_v35 = vmul.f32 0.2, %v13688_v25  ;;  %v12249_v57 = vcombine.low %v1082_v33, %v1086_v36  ;;  %v1098_v63 = vld [vmem:[#allocation6 + $0x540] sm:$0xff]  ;;  %v1111_v10 = vld [vmem:[#allocation6 + $0x5a8] sm:$0xff] }
 0x1ba   :  { %v923_v6 = vmax.f32 %v13685_v61, %v915_v0  ;;  %v921_v39 = vmax.f32 %v13687_v22, %v913_v29  ;;  %v917_v40 = vmul.f32 0.2, %v13689_v30  ;;  %v12251_v58 = vcombine.low %v1083_v37, %v1087_v38  ;;  %v1102_v0 = vld [vmem:[#allocation6 + $0x560] sm:$0xff]  ;;  %v1135_v36 = vld [vmem:[#allocation6 + $0x668] sm:$0xff] }
 0x1bb   :  { %v14508_v11 = vpack.c.bf16 %v922_v2, %v918_v1  ;;  %v924_v43 = vmax.f32 %v13688_v25, %v916_v35  ;;  %v12258_v60 = vcombine.high %v1090_v51, %v1094_v53  ;;  %v12260_v61 = vcombine.high %v1091_v54, %v1095_v55  ;;  %v1099_v1 = vld [vmem:[#allocation6 + $0x548] sm:$0xff]  ;;  %v1114_v17 = vld [vmem:[#allocation6 + $0x5c0] sm:$0xff] }
 0x1bc   :  { %v14510_v12 = vpack.c.bf16 %v923_v6, %v919_v5  ;;  %v925_v47 = vmax.f32 %v13689_v30, %v917_v40  ;;  %v1103_v2 = vld [vmem:[#allocation6 + $0x568] sm:$0xff]  ;;  %v12257_v3 = vcombine.low %v1090_v51, %v1094_v53  ;;  %v12259_v4 = vcombine.low %v1091_v54, %v1095_v55  ;;  %v1122_v25 = vld [vmem:[#allocation6 + $0x600] sm:$0xff] }
 0x1bd   :  { %v14516_v52 = vpack.c.bf16 %v924_v43, %v920_v34  ;;  %v12266_v5 = vcombine.high %v1098_v63, %v1102_v0  ;;  %v12268_v6 = vcombine.high %v1099_v1, %v1103_v2  ;;  %v12265_v13 = vcombine.low %v1098_v63, %v1102_v0  ;;  %v1130_v33 = vld [vmem:[#allocation6 + $0x640] sm:$0xff]  ;;  %v1131_v35 = vld [vmem:[#allocation6 + $0x648] sm:$0xff] }
 0x1be   :  { %2540 = vmatprep.mubr.bf16.mxu0 %v14510_v12  ;;  %2626 = vmatprep.mubr.bf16.mxu1 %v14510_v12  ;;  %v14518_v56 = vpack.c.bf16 %v925_v47, %v921_v39  ;;  %v12275_v22 = vcombine.low %v1107_v9, %v1111_v10  ;;  %v12282_v23 = vcombine.high %v1114_v17, %v1118_v18  ;;  %v1134_v34 = vld [vmem:[#allocation6 + $0x660] sm:$0xff]  ;;  %v1143_v47 = vld [vmem:[#allocation6 + $0x6a8] sm:$0xff] }
 0x1bf   :  { %2541 = vmatmul.mubr.bf16.vlgmr.msra.gmra.mrb[4].mxu0 %v14508_v11  ;;  %2627 = vmatmul.mubr.bf16.vlgmr.msra.gmra.mrb[4].mxu1 %v14508_v11  ;;  %v12281_v29 = vcombine.low %v1114_v17, %v1118_v18  ;;  %v12289_v37 = vcombine.low %v1122_v25, %v1126_v26  ;;  %v12298_v39 = vcombine.high %v1130_v33, %v1134_v34  ;;  %v1138_v43 = vld [vmem:[#allocation6 + $0x680] sm:$0xff] }
 0x1c0   :  { %2552 = vmatpush1.bf16.msra.mxu0 %v12225_v41  ;;  %2638 = vmatpush1.bf16.msra.mxu1 %v12227_v42  ;;  %v12241_v41 = vcombine.low %v1074_v16, %v1078_v19  ;;  %v12243_v42 = vcombine.low %v1075_v20, %v1079_v21  ;;  %v12276_v16 = vcombine.high %v1107_v9, %v1111_v10  ;;  %v1115_v19 = vld [vmem:[#allocation6 + $0x5c8] sm:$0xff]  ;;  %v1146_v54 = vld [vmem:[#allocation6 + $0x6c0] sm:$0xff] }
 0x1c1   :  { %2553 = vmatprep.subr.bf16.mxu0 %v12234_v14  ;;  %2639 = vmatprep.subr.bf16.mxu1 %v12236_v15  ;;  %v12267_v14 = vcombine.low %v1099_v1, %v1103_v2  ;;  %v12274_v15 = vcombine.high %v1106_v7, %v1110_v8  ;;  %v1119_v20 = vld [vmem:[#allocation6 + $0x5e8] sm:$0xff]  ;;  %v12273_v21 = vcombine.low %v1106_v7, %v1110_v8  ;;  %v1150_v55 = vld [vmem:[#allocation6 + $0x6e0] sm:$0xff] }
 0x1c2   :  { %2583 = vmatprep.mubr.bf16.mxu0 %v14518_v56  ;;  %2669 = vmatprep.mubr.bf16.mxu1 %v14518_v56  ;;  %v12284_v24 = vcombine.high %v1115_v19, %v1119_v20  ;;  %v12283_v30 = vcombine.low %v1115_v19, %v1119_v20  ;;  %v12300_v40 = vcombine.high %v1131_v35, %v1135_v36  ;;  %v1154_v1 = vld [vmem:[#allocation6 + $0x700] sm:$0xff] }
 0x1c3   :  { %v12314_v63 = vcombine.high %v1146_v54, %v1150_v55  ;;  %v1158_v2 = vld [vmem:[#allocation6 + $0x720] sm:$0xff] }
 0x1c4   :  { %2554 = vmatpush1.bf16.msra.mxu0 %v12233_v27  ;;  %2640 = vmatpush1.bf16.msra.mxu1 %v12235_v28  ;;  %v1123_v27 = vld [vmem:[#allocation6 + $0x608] sm:$0xff]  ;;  %v12322_v7 = vcombine.high %v1154_v1, %v1158_v2  ;;  %v1162_v9 = vld [vmem:[#allocation6 + $0x740] sm:$0xff] }
 0x1c5   :  { %2555 = vmatprep.subr.bf16.mxu0 %v12242_v31  ;;  %2641 = vmatprep.subr.bf16.mxu1 %v12244_v32  ;;  %v1127_v28 = vld [vmem:[#allocation6 + $0x628] sm:$0xff]  ;;  %v12290_v31 = vcombine.high %v1122_v25, %v1126_v26  ;;  %v1166_v10 = vld [vmem:[#allocation6 + $0x760] sm:$0xff] }
 0x1c6   :  { %v12292_v32 = vcombine.high %v1123_v27, %v1127_v28  ;;  %v12291_v38 = vcombine.low %v1123_v27, %v1127_v28  ;;  %v12330_v17 = vcombine.high %v1162_v9, %v1166_v10  ;;  %v1170_v19 = vld [vmem:[#allocation6 + $0x780] sm:$0xff] }
 0x1c7   :  { %v1174_v20 = vld [vmem:[#allocation6 + $0x7a0] sm:$0xff] }
 0x1c8   :  { %2556 = vmatpush1.bf16.msra.mxu0 %v12241_v41  ;;  %2642 = vmatpush1.bf16.msra.mxu1 %v12243_v42  ;;  %v1142_v41 = vld [vmem:[#allocation6 + $0x6a0] sm:$0xff]  ;;  %v1139_v42 = vld [vmem:[#allocation6 + $0x688] sm:$0xff]  ;;  %v12338_v25 = vcombine.high %v1170_v19, %v1174_v20 }
 0x1c9   :  { %2557 = vmatprep.subr.bf16.mxu0 %v12250_v49  ;;  %2643 = vmatprep.subr.bf16.mxu1 %v12252_v50  ;;  %v12297_v49 = vcombine.low %v1130_v33, %v1134_v34  ;;  %v12299_v50 = vcombine.low %v1131_v35, %v1135_v36  ;;  %v12306_v51 = vcombine.high %v1138_v43, %v1142_v41  ;;  %v1178_v27 = vld [vmem:[#allocation6 + $0x7c0] sm:$0xff]  ;;  %v932_v35 = vld [vmem:[#allocation6 + $0x10] sm:$0xff] }
 0x1ca   :  { %v12308_v53 = vcombine.high %v1139_v42, %v1143_v47  ;;  %v1182_v28 = vld [vmem:[#allocation6 + $0x7e0] sm:$0xff]  ;;  %v936_v36 = vld [vmem:[#allocation6 + $0x30] sm:$0xff] }
 0x1cb   :  { %v12346_v33 = vcombine.high %v1178_v27, %v1182_v28 }
 0x1cc   :  { %2558 = vmatpush1.bf16.msra.mxu0 %v12249_v57  ;;  %2644 = vmatpush1.bf16.msra.mxu1 %v12251_v58  ;;  %v1147_v57 = vld [vmem:[#allocation6 + $0x6c8] sm:$0xff] }
 0x1cd   :  { %2559 = vmatprep.subr.bf16.mxu0 %v12258_v60  ;;  %2645 = vmatprep.subr.bf16.mxu1 %v12260_v61  ;;  %v1151_v58 = vld [vmem:[#allocation6 + $0x6e8] sm:$0xff]  ;;  %v12305_v60 = vcombine.low %v1138_v43, %v1142_v41  ;;  %v12307_v61 = vcombine.low %v1139_v42, %v1143_v47  ;;  %v12102_v43 = vcombine.high %v932_v35, %v936_v36  ;;  %v940_v42 = vld [vmem:[#allocation6 + $0x50] sm:$0xff] }
 0x1ce   :  { %v12316_v0 = vcombine.high %v1147_v57, %v1151_v58  ;;  %v944_v47 = vld [vmem:[#allocation6 + $0x70] sm:$0xff] }
 0x1d0   :  { %2560 = vmatpush1.bf16.msra.mxu0 %v12257_v3  ;;  %2646 = vmatpush1.bf16.msra.mxu1 %v12259_v4  ;;  %v1155_v3 = vld [vmem:[#allocation6 + $0x708] sm:$0xff] }
 0x1d1   :  { %2561 = vmatprep.subr.bf16.mxu0 %v12266_v5  ;;  %2647 = vmatprep.subr.bf16.mxu1 %v12268_v6  ;;  %v1159_v4 = vld [vmem:[#allocation6 + $0x728] sm:$0xff]  ;;  %v12313_v5 = vcombine.low %v1146_v54, %v1150_v55  ;;  %v12315_v6 = vcombine.low %v1147_v57, %v1151_v58  ;;  %v12110_v54 = vcombine.high %v940_v42, %v944_v47  ;;  %v948_v57 = vld [vmem:[#allocation6 + $0x90] sm:$0xff] }
 0x1d2   :  { %v12324_v8 = vcombine.high %v1155_v3, %v1159_v4  ;;  %v952_v58 = vld [vmem:[#allocation6 + $0xb0] sm:$0xff] }
 0x1d4   :  { %2562 = vmatpush1.bf16.msra.mxu0 %v12265_v13  ;;  %2648 = vmatpush1.bf16.msra.mxu1 %v12267_v14  ;;  %v1163_v13 = vld [vmem:[#allocation6 + $0x748] sm:$0xff] }
 0x1d5   :  { %2563 = vmatprep.subr.bf16.mxu0 %v12274_v15  ;;  %2649 = vmatprep.subr.bf16.mxu1 %v12276_v16  ;;  %v1167_v14 = vld [vmem:[#allocation6 + $0x768] sm:$0xff]  ;;  %v12321_v15 = vcombine.low %v1154_v1, %v1158_v2  ;;  %v12323_v16 = vcombine.low %v1155_v3, %v1159_v4  ;;  %v12118_v1 = vcombine.high %v948_v57, %v952_v58  ;;  %v956_v3 = vld [vmem:[#allocation6 + $0xd0] sm:$0xff] }
 0x1d6   :  { %v12332_v18 = vcombine.high %v1163_v13, %v1167_v14  ;;  %v960_v4 = vld [vmem:[#allocation6 + $0xf0] sm:$0xff] }
 0x1d8   :  { %2564 = vmatpush1.bf16.msra.mxu0 %v12273_v21  ;;  %2650 = vmatpush1.bf16.msra.mxu1 %v12275_v22  ;;  %v1171_v21 = vld [vmem:[#allocation6 + $0x788] sm:$0xff] }
 0x1d9   :  { %2565 = vmatprep.subr.bf16.mxu0 %v12282_v23  ;;  %2651 = vmatprep.subr.bf16.mxu1 %v12284_v24  ;;  %v1175_v22 = vld [vmem:[#allocation6 + $0x7a8] sm:$0xff]  ;;  %v12329_v23 = vcombine.low %v1162_v9, %v1166_v10  ;;  %v12331_v24 = vcombine.low %v1163_v13, %v1167_v14  ;;  %v12126_v9 = vcombine.high %v956_v3, %v960_v4  ;;  %v964_v13 = vld [vmem:[#allocation6 + $0x110] sm:$0xff] }
 0x1da   :  { %v12340_v26 = vcombine.high %v1171_v21, %v1175_v22  ;;  %v968_v14 = vld [vmem:[#allocation6 + $0x130] sm:$0xff] }
 0x1dc   :  { %2566 = vmatpush1.bf16.msra.mxu0 %v12281_v29  ;;  %2652 = vmatpush1.bf16.msra.mxu1 %v12283_v30  ;;  %v1179_v29 = vld [vmem:[#allocation6 + $0x7c8] sm:$0xff] }
 0x1dd   :  { %2567 = vmatprep.subr.bf16.mxu0 %v12290_v31  ;;  %2653 = vmatprep.subr.bf16.mxu1 %v12292_v32  ;;  %v1183_v30 = vld [vmem:[#allocation6 + $0x7e8] sm:$0xff]  ;;  %v12337_v31 = vcombine.low %v1170_v19, %v1174_v20  ;;  %v12339_v32 = vcombine.low %v1171_v21, %v1175_v22  ;;  %v972_v20 = vld [vmem:[#allocation6 + $0x150] sm:$0xff]  ;;  %v973_v22 = vld [vmem:[#allocation6 + $0x158] sm:$0xff] }
 0x1de   :  { %v12348_v34 = vcombine.high %v1179_v29, %v1183_v30  ;;  %v976_v21 = vld [vmem:[#allocation6 + $0x170] sm:$0xff] }
 0x1e0   :  { %2568 = vmatpush1.bf16.msra.mxu0 %v12289_v37  ;;  %2654 = vmatpush1.bf16.msra.mxu1 %v12291_v38  ;;  %v933_v37 = vld [vmem:[#allocation6 + $0x18] sm:$0xff] }
 0x1e1   :  { %2569 = vmatprep.subr.bf16.mxu0 %v12298_v39  ;;  %2655 = vmatprep.subr.bf16.mxu1 %v12300_v40  ;;  %v937_v38 = vld [vmem:[#allocation6 + $0x38] sm:$0xff]  ;;  %v12345_v39 = vcombine.low %v1178_v27, %v1182_v28  ;;  %v12347_v40 = vcombine.low %v1179_v29, %v1183_v30  ;;  %v980_v28 = vld [vmem:[#allocation6 + $0x190] sm:$0xff] }
 0x1e2   :  { %v12104_v41 = vcombine.high %v933_v37, %v937_v38  ;;  %v984_v29 = vld [vmem:[#allocation6 + $0x1b0] sm:$0xff]  ;;  %v981_v30 = vld [vmem:[#allocation6 + $0x198] sm:$0xff] }
 0x1e4   :  { %2570 = vmatpush1.bf16.msra.mxu0 %v12297_v49  ;;  %2656 = vmatpush1.bf16.msra.mxu1 %v12299_v50  ;;  %v941_v49 = vld [vmem:[#allocation6 + $0x58] sm:$0xff] }
 0x1e5   :  { %2571 = vmatprep.subr.bf16.mxu0 %v12306_v51  ;;  %2657 = vmatprep.subr.bf16.mxu1 %v12308_v53  ;;  %v945_v50 = vld [vmem:[#allocation6 + $0x78] sm:$0xff]  ;;  %v12101_v51 = vcombine.low %v932_v35, %v936_v36  ;;  %v12103_v53 = vcombine.low %v933_v37, %v937_v38  ;;  %v988_v36 = vld [vmem:[#allocation6 + $0x1d0] sm:$0xff] }
 0x1e6   :  { %v12112_v55 = vcombine.high %v941_v49, %v945_v50  ;;  %v992_v37 = vld [vmem:[#allocation6 + $0x1f0] sm:$0xff]  ;;  %v989_v38 = vld [vmem:[#allocation6 + $0x1d8] sm:$0xff] }
 0x1e8   :  { %2572 = vmatpush1.bf16.msra.mxu0 %v12305_v60  ;;  %2658 = vmatpush1.bf16.msra.mxu1 %v12307_v61  ;;  %v949_v60 = vld [vmem:[#allocation6 + $0x98] sm:$0xff] }
 0x1e9   :  { %2573 = vmatprep.subr.bf16.mxu0 %v12314_v63  ;;  %2659 = vmatprep.subr.bf16.mxu1 %v12316_v0  ;;  %v953_v61 = vld [vmem:[#allocation6 + $0xb8] sm:$0xff]  ;;  %v12109_v63 = vcombine.low %v940_v42, %v944_v47  ;;  %v12111_v0 = vcombine.low %v941_v49, %v945_v50  ;;  %v996_v47 = vld [vmem:[#allocation6 + $0x210] sm:$0xff] }
 0x1ea   :  { %v12120_v2 = vcombine.high %v949_v60, %v953_v61  ;;  %v1000_v49 = vld [vmem:[#allocation6 + $0x230] sm:$0xff]  ;;  %v997_v50 = vld [vmem:[#allocation6 + $0x218] sm:$0xff] }
 0x1ec   :  { %2574 = vmatpush1.bf16.msra.mxu0 %v12313_v5  ;;  %2660 = vmatpush1.bf16.msra.mxu1 %v12315_v6  ;;  %v957_v5 = vld [vmem:[#allocation6 + $0xd8] sm:$0xff] }
 0x1ed   :  { %2575 = vmatprep.subr.bf16.mxu0 %v12322_v7  ;;  %2661 = vmatprep.subr.bf16.mxu1 %v12324_v8  ;;  %v961_v6 = vld [vmem:[#allocation6 + $0xf8] sm:$0xff]  ;;  %v12117_v7 = vcombine.low %v948_v57, %v952_v58  ;;  %v12119_v8 = vcombine.low %v949_v60, %v953_v61  ;;  %v1004_v58 = vld [vmem:[#allocation6 + $0x250] sm:$0xff] }
 0x1ee   :  { %v12128_v10 = vcombine.high %v957_v5, %v961_v6  ;;  %v1008_v60 = vld [vmem:[#allocation6 + $0x270] sm:$0xff]  ;;  %v1005_v61 = vld [vmem:[#allocation6 + $0x258] sm:$0xff] }
 0x1f0   :  { %2576 = vmatpush1.bf16.msra.mxu0 %v12321_v15  ;;  %2662 = vmatpush1.bf16.msra.mxu1 %v12323_v16  ;;  %v969_v15 = vld [vmem:[#allocation6 + $0x138] sm:$0xff]  ;;  %v12125_v16 = vcombine.low %v956_v3, %v960_v4  ;;  %v1012_v4 = vld [vmem:[#allocation6 + $0x290] sm:$0xff] }
 0x1f1   :  { %2577 = vmatprep.subr.bf16.mxu0 %v12330_v17  ;;  %2663 = vmatprep.subr.bf16.mxu1 %v12332_v18  ;;  %v12127_v17 = vcombine.low %v957_v5, %v961_v6  ;;  %v12134_v18 = vcombine.high %v964_v13, %v968_v14  ;;  %v1016_v5 = vld [vmem:[#allocation6 + $0x2b0] sm:$0xff]  ;;  %v1013_v6 = vld [vmem:[#allocation6 + $0x298] sm:$0xff] }
 0x1f4   :  { %2578 = vmatpush1.bf16.msra.mxu0 %v12329_v23  ;;  %2664 = vmatpush1.bf16.msra.mxu1 %v12331_v24  ;;  %v977_v23 = vld [vmem:[#allocation6 + $0x178] sm:$0xff]  ;;  %v12133_v24 = vcombine.low %v964_v13, %v968_v14  ;;  %v1020_v14 = vld [vmem:[#allocation6 + $0x2d0] sm:$0xff] }
 0x1f5   :  { %2579 = vmatprep.subr.bf16.mxu0 %v12338_v25  ;;  %2665 = vmatprep.subr.bf16.mxu1 %v12340_v26  ;;  %v12142_v26 = vcombine.high %v972_v20, %v976_v21  ;;  %v12144_v27 = vcombine.high %v973_v22, %v977_v23 }
 0x1f8   :  { %2580 = vmatpush1.bf16.msra.mxu0 %v12337_v31  ;;  %2666 = vmatpush1.bf16.msra.mxu1 %v12339_v32  ;;  %v985_v31 = vld [vmem:[#allocation6 + $0x1b8] sm:$0xff]  ;;  %v12141_v32 = vcombine.low %v972_v20, %v976_v21  ;;  %v1028_v21 = vld [vmem:[#allocation6 + $0x310] sm:$0xff] }
 0x1f9   :  { %2581 = vmatprep.subr.bf16.mxu0 %v12346_v33  ;;  %2667 = vmatprep.subr.bf16.mxu1 %v12348_v34  ;;  %v12143_v33 = vcombine.low %v973_v22, %v977_v23  ;;  %v12150_v34 = vcombine.high %v980_v28, %v984_v29  ;;  %v12152_v35 = vcombine.high %v981_v30, %v985_v31  ;;  %v1032_v22 = vld [vmem:[#allocation6 + $0x330] sm:$0xff]  ;;  %v1029_v23 = vld [vmem:[#allocation6 + $0x318] sm:$0xff] }
 0x1fc   :  { %2582 = vmatpush1.bf16.msra.mxu0 %v12345_v39  ;;  %2668 = vmatpush1.bf16.msra.mxu1 %v12347_v40  ;;  %v993_v39 = vld [vmem:[#allocation6 + $0x1f8] sm:$0xff]  ;;  %v12149_v40 = vcombine.low %v980_v28, %v984_v29  ;;  %v1036_v29 = vld [vmem:[#allocation6 + $0x350] sm:$0xff] }
 0x1fd   :  { %2680 = vmatprep.subr.bf16.mxu0 %v12102_v43  ;;  %2766 = vmatprep.subr.bf16.mxu1 %v12104_v41  ;;  %v12151_v43 = vcombine.low %v981_v30, %v985_v31  ;;  %v12158_v41 = vcombine.high %v988_v36, %v992_v37  ;;  %v12160_v42 = vcombine.high %v989_v38, %v993_v39  ;;  %v1040_v30 = vld [vmem:[#allocation6 + $0x370] sm:$0xff]  ;;  %v1037_v31 = vld [vmem:[#allocation6 + $0x358] sm:$0xff] }
 0x1ff   :  { %2584 = vmatmul.mubr.bf16.vlgmr.msra.gmra.mrb[4].mxu0 %v14516_v52  ;;  %2670 = vmatmul.mubr.bf16.vlgmr.msra.gmra.mrb[4].mxu1 %v14516_v52 }
 0x200   :  { %2681 = vmatpush1.bf16.msra.mxu0 %v12101_v51  ;;  %2712 = vmatprep.mubr.bf16.mxu0 %v14510_v12  ;;  %v1001_v51 = vld [vmem:[#allocation6 + $0x238] sm:$0xff] }
 0x201   :  { %2767 = vmatpush1.bf16.msra.mxu1 %v12103_v53  ;;  %2798 = vmatprep.mubr.bf16.mxu1 %v14510_v12  ;;  %v965_v12 = vld [vmem:[#allocation6 + $0x118] sm:$0xff]  ;;  %v12157_v53 = vcombine.low %v988_v36, %v992_v37  ;;  %v12168_v57 = vcombine.high %v997_v50, %v1001_v51  ;;  %v1044_v37 = vld [vmem:[#allocation6 + $0x390] sm:$0xff] }
 0x202   :  { %2682 = vmatprep.subr.bf16.mxu0 %v12110_v54  ;;  %2768 = vmatprep.subr.bf16.mxu1 %v12112_v55  ;;  %v12136_v19 = vcombine.high %v965_v12, %v969_v15  ;;  %v12135_v25 = vcombine.low %v965_v12, %v969_v15  ;;  %v12159_v54 = vcombine.low %v989_v38, %v993_v39  ;;  %v1024_v12 = vld [vmem:[#allocation6 + $0x2f0] sm:$0xff]  ;;  %v1021_v15 = vld [vmem:[#allocation6 + $0x2d8] sm:$0xff] }
 0x203   :  { %v12166_v55 = vcombine.high %v996_v47, %v1000_v49  ;;  %v1048_v38 = vld [vmem:[#allocation6 + $0x3b0] sm:$0xff]  ;;  %v1045_v39 = vld [vmem:[#allocation6 + $0x398] sm:$0xff] }
 0x204   :  { %2683 = vmatpush1.bf16.msra.mxu0 %v12109_v63  ;;  %v1009_v63 = vld [vmem:[#allocation6 + $0x278] sm:$0xff] }
 0x205   :  { %2769 = vmatpush1.bf16.msra.mxu1 %v12111_v0  ;;  %2684 = vmatprep.subr.bf16.mxu0 %v12118_v1  ;;  %v12165_v0 = vcombine.low %v996_v47, %v1000_v49  ;;  %v12167_v1 = vcombine.low %v997_v50, %v1001_v51  ;;  %v12176_v3 = vcombine.high %v1005_v61, %v1009_v63  ;;  %v1052_v49 = vld [vmem:[#allocation6 + $0x3d0] sm:$0xff]  ;;  %v1053_v51 = vld [vmem:[#allocation6 + $0x3d8] sm:$0xff] }
 0x206   :  { %2770 = vmatprep.subr.bf16.mxu1 %v12120_v2  ;;  %v12174_v2 = vcombine.high %v1004_v58, %v1008_v60  ;;  %v1056_v50 = vld [vmem:[#allocation6 + $0x3f0] sm:$0xff] }
 0x208   :  { %2685 = vmatpush1.bf16.msra.mxu0 %v12117_v7  ;;  %v1017_v7 = vld [vmem:[#allocation6 + $0x2b8] sm:$0xff] }
 0x209   :  { %2771 = vmatpush1.bf16.msra.mxu1 %v12119_v8  ;;  %2686 = vmatprep.subr.bf16.mxu0 %v12126_v9  ;;  %v12173_v8 = vcombine.low %v1004_v58, %v1008_v60  ;;  %v12175_v9 = vcombine.low %v1005_v61, %v1009_v63  ;;  %v12184_v13 = vcombine.high %v1013_v6, %v1017_v7  ;;  %v1060_v60 = vld [vmem:[#allocation6 + $0x410] sm:$0xff]  ;;  %v1061_v63 = vld [vmem:[#allocation6 + $0x418] sm:$0xff] }
 0x20a   :  { %2772 = vmatprep.subr.bf16.mxu1 %v12128_v10  ;;  %v12182_v10 = vcombine.high %v1012_v4, %v1016_v5  ;;  %v1064_v61 = vld [vmem:[#allocation6 + $0x430] sm:$0xff] }
 0x20c   :  { %2687 = vmatpush1.bf16.msra.mxu0 %v12125_v16  ;;  %v1025_v16 = vld [vmem:[#allocation6 + $0x2f8] sm:$0xff] }
 0x20d   :  { %2773 = vmatpush1.bf16.msra.mxu1 %v12127_v17  ;;  %2688 = vmatprep.subr.bf16.mxu0 %v12134_v18  ;;  %v12181_v17 = vcombine.low %v1012_v4, %v1016_v5  ;;  %v12183_v18 = vcombine.low %v1013_v6, %v1017_v7  ;;  %v12192_v20 = vcombine.high %v1021_v15, %v1025_v16  ;;  %v1068_v5 = vld [vmem:[#allocation6 + $0x450] sm:$0xff] }
 0x20e   :  { %2774 = vmatprep.subr.bf16.mxu1 %v12136_v19  ;;  %v12190_v19 = vcombine.high %v1020_v14, %v1024_v12  ;;  %v1072_v6 = vld [vmem:[#allocation6 + $0x470] sm:$0xff]  ;;  %v12229_v7 = vcombine.low %v1060_v60, %v1064_v61 }
 0x210   :  { %2689 = vmatpush1.bf16.msra.mxu0 %v12133_v24  ;;  %v1033_v24 = vld [vmem:[#allocation6 + $0x338] sm:$0xff] }
 0x211   :  { %2775 = vmatpush1.bf16.msra.mxu1 %v12135_v25  ;;  %2690 = vmatprep.subr.bf16.mxu0 %v12142_v26  ;;  %v12189_v25 = vcombine.low %v1020_v14, %v1024_v12  ;;  %v12191_v26 = vcombine.low %v1021_v15, %v1025_v16  ;;  %v12200_v28 = vcombine.high %v1029_v23, %v1033_v24  ;;  %v1076_v14 = vld [vmem:[#allocation6 + $0x490] sm:$0xff]  ;;  %v1077_v16 = vld [vmem:[#allocation6 + $0x498] sm:$0xff] }
 0x212   :  { %2776 = vmatprep.subr.bf16.mxu1 %v12144_v27  ;;  %v12198_v27 = vcombine.high %v1028_v21, %v1032_v22  ;;  %v1080_v12 = vld [vmem:[#allocation6 + $0x4b0] sm:$0xff] }
 0x214   :  { %2691 = vmatpush1.bf16.msra.mxu0 %v12141_v32  ;;  %v1041_v32 = vld [vmem:[#allocation6 + $0x378] sm:$0xff] }
 0x215   :  { %2777 = vmatpush1.bf16.msra.mxu1 %v12143_v33  ;;  %2692 = vmatprep.subr.bf16.mxu0 %v12150_v34  ;;  %v12197_v33 = vcombine.low %v1028_v21, %v1032_v22  ;;  %v12199_v34 = vcombine.low %v1029_v23, %v1033_v24  ;;  %v12208_v36 = vcombine.high %v1037_v31, %v1041_v32  ;;  %v1084_v22 = vld [vmem:[#allocation6 + $0x4d0] sm:$0xff]  ;;  %v1085_v24 = vld [vmem:[#allocation6 + $0x4d8] sm:$0xff] }
 0x216   :  { %2778 = vmatprep.subr.bf16.mxu1 %v12152_v35  ;;  %v12206_v35 = vcombine.high %v1036_v29, %v1040_v30  ;;  %v1088_v23 = vld [vmem:[#allocation6 + $0x4f0] sm:$0xff] }
 0x218   :  { %2693 = vmatpush1.bf16.msra.mxu0 %v12149_v40  ;;  %v1049_v40 = vld [vmem:[#allocation6 + $0x3b8] sm:$0xff] }
 0x219   :  { %2779 = vmatpush1.bf16.msra.mxu1 %v12151_v43  ;;  %2694 = vmatprep.subr.bf16.mxu0 %v12158_v41  ;;  %v12205_v43 = vcombine.low %v1036_v29, %v1040_v30  ;;  %v12207_v41 = vcombine.low %v1037_v31, %v1041_v32  ;;  %v12216_v47 = vcombine.high %v1045_v39, %v1049_v40  ;;  %v1092_v29 = vld [vmem:[#allocation6 + $0x510] sm:$0xff]  ;;  %v1093_v31 = vld [vmem:[#allocation6 + $0x518] sm:$0xff] }
 0x21a   :  { %2780 = vmatprep.subr.bf16.mxu1 %v12160_v42  ;;  %v12214_v42 = vcombine.high %v1044_v37, %v1048_v38  ;;  %v1096_v30 = vld [vmem:[#allocation6 + $0x530] sm:$0xff]  ;;  %v1097_v32 = vld [vmem:[#allocation6 + $0x538] sm:$0xff] }
 0x21c   :  { %2695 = vmatpush1.bf16.msra.mxu0 %v12157_v53  ;;  %v1057_v53 = vld [vmem:[#allocation6 + $0x3f8] sm:$0xff] }
 0x21d   :  { %2781 = vmatpush1.bf16.msra.mxu1 %v12159_v54  ;;  %2696 = vmatprep.subr.bf16.mxu0 %v12166_v55  ;;  %v12213_v54 = vcombine.low %v1044_v37, %v1048_v38  ;;  %v12215_v55 = vcombine.low %v1045_v39, %v1049_v40  ;;  %v12224_v58 = vcombine.high %v1053_v51, %v1057_v53  ;;  %v1104_v37 = vld [vmem:[#allocation6 + $0x570] sm:$0xff]  ;;  %v1101_v38 = vld [vmem:[#allocation6 + $0x558] sm:$0xff] }
 0x21e   :  { %2782 = vmatprep.subr.bf16.mxu1 %v12168_v57  ;;  %v12222_v57 = vcombine.high %v1052_v49, %v1056_v50  ;;  %v1105_v39 = vld [vmem:[#allocation6 + $0x578] sm:$0xff]  ;;  %v12261_v40 = vcombine.low %v1092_v29, %v1096_v30 }
 0x220   :  { %2697 = vmatpush1.bf16.msra.mxu0 %v12165_v0  ;;  %v1065_v0 = vld [vmem:[#allocation6 + $0x438] sm:$0xff] }
 0x221   :  { %2783 = vmatpush1.bf16.msra.mxu1 %v12167_v1  ;;  %2698 = vmatprep.subr.bf16.mxu0 %v12174_v2  ;;  %v12221_v1 = vcombine.low %v1052_v49, %v1056_v50  ;;  %v12223_v2 = vcombine.low %v1053_v51, %v1057_v53  ;;  %v12232_v4 = vcombine.high %v1061_v63, %v1065_v0  ;;  %v1112_v49 = vld [vmem:[#allocation6 + $0x5b0] sm:$0xff]  ;;  %v1109_v50 = vld [vmem:[#allocation6 + $0x598] sm:$0xff] }
 0x222   :  { %2784 = vmatprep.subr.bf16.mxu1 %v12176_v3  ;;  %v12230_v3 = vcombine.high %v1060_v60, %v1064_v61  ;;  %v1113_v51 = vld [vmem:[#allocation6 + $0x5b8] sm:$0xff]  ;;  %v1120_v60 = vld [vmem:[#allocation6 + $0x5f0] sm:$0xff] }
 0x223   :  { %v1117_v61 = vld [vmem:[#allocation6 + $0x5d8] sm:$0xff] }
 0x224   :  { %2699 = vmatpush1.bf16.msra.mxu0 %v12173_v8  ;;  %v1069_v8 = vld [vmem:[#allocation6 + $0x458] sm:$0xff] }
 0x225   :  { %2785 = vmatpush1.bf16.msra.mxu1 %v12175_v9  ;;  %2700 = vmatprep.subr.bf16.mxu0 %v12182_v10  ;;  %v1073_v9 = vld [vmem:[#allocation6 + $0x478] sm:$0xff]  ;;  %v12231_v10 = vcombine.low %v1061_v63, %v1065_v0 }
 0x226   :  { %2786 = vmatprep.subr.bf16.mxu1 %v12184_v13  ;;  %v12238_v13 = vcombine.high %v1068_v5, %v1072_v6  ;;  %v12240_v15 = vcombine.high %v1069_v8, %v1073_v9  ;;  %v1121_v63 = vld [vmem:[#allocation6 + $0x5f8] sm:$0xff] }
 0x228   :  { %2701 = vmatpush1.bf16.msra.mxu0 %v12181_v17  ;;  %v1081_v17 = vld [vmem:[#allocation6 + $0x4b8] sm:$0xff] }
 0x229   :  { %2787 = vmatpush1.bf16.msra.mxu1 %v12183_v18  ;;  %2702 = vmatprep.subr.bf16.mxu0 %v12190_v19  ;;  %v12237_v18 = vcombine.low %v1068_v5, %v1072_v6  ;;  %v12239_v19 = vcombine.low %v1069_v8, %v1073_v9  ;;  %v12248_v21 = vcombine.high %v1077_v16, %v1081_v17  ;;  %v1128_v5 = vld [vmem:[#allocation6 + $0x630] sm:$0xff]  ;;  %v1125_v6 = vld [vmem:[#allocation6 + $0x618] sm:$0xff] }
 0x22a   :  { %2788 = vmatprep.subr.bf16.mxu1 %v12192_v20  ;;  %v12246_v20 = vcombine.high %v1076_v14, %v1080_v12  ;;  %v12287_v9 = vcombine.low %v1117_v61, %v1121_v63 }
 0x22c   :  { %2703 = vmatpush1.bf16.msra.mxu0 %v12189_v25  ;;  %v1089_v25 = vld [vmem:[#allocation6 + $0x4f8] sm:$0xff] }
 0x22d   :  { %2789 = vmatpush1.bf16.msra.mxu1 %v12191_v26  ;;  %2704 = vmatprep.subr.bf16.mxu0 %v12198_v27  ;;  %v12245_v26 = vcombine.low %v1076_v14, %v1080_v12  ;;  %v12254_v27 = vcombine.high %v1084_v22, %v1088_v23  ;;  %v1132_v14 = vld [vmem:[#allocation6 + $0x650] sm:$0xff] }
 0x22e   :  { %2790 = vmatprep.subr.bf16.mxu1 %v12200_v28  ;;  %v12256_v28 = vcombine.high %v1085_v24, %v1089_v25  ;;  %v1136_v12 = vld [vmem:[#allocation6 + $0x670] sm:$0xff] }
 0x230   :  { %2705 = vmatpush1.bf16.msra.mxu0 %v12197_v33  ;;  %v12255_v33 = vcombine.low %v1085_v24, %v1089_v25  ;;  %v1145_v24 = vld [vmem:[#allocation6 + $0x6b8] sm:$0xff]  ;;  %v12301_v25 = vcombine.low %v1132_v14, %v1136_v12 }
 0x231   :  { %2791 = vmatpush1.bf16.msra.mxu1 %v12199_v34  ;;  %2706 = vmatprep.subr.bf16.mxu0 %v12206_v35  ;;  %v12262_v34 = vcombine.high %v1092_v29, %v1096_v30  ;;  %v12264_v35 = vcombine.high %v1093_v31, %v1097_v32  ;;  %v1152_v29 = vld [vmem:[#allocation6 + $0x6f0] sm:$0xff]  ;;  %v1149_v30 = vld [vmem:[#allocation6 + $0x6d8] sm:$0xff] }
 0x232   :  { %2792 = vmatprep.subr.bf16.mxu1 %v12208_v36  ;;  %v1100_v36 = vld [vmem:[#allocation6 + $0x550] sm:$0xff] }
 0x233   :  { %v12269_v53 = vcombine.low %v1100_v36, %v1104_v37 }
 0x234   :  { %2707 = vmatpush1.bf16.msra.mxu0 %v12205_v43  ;;  %v12263_v43 = vcombine.low %v1093_v31, %v1097_v32  ;;  %v1153_v31 = vld [vmem:[#allocation6 + $0x6f8] sm:$0xff] }
 0x235   :  { %2793 = vmatpush1.bf16.msra.mxu1 %v12207_v41  ;;  %2708 = vmatprep.subr.bf16.mxu0 %v12214_v42  ;;  %v12270_v41 = vcombine.high %v1100_v36, %v1104_v37  ;;  %v12272_v42 = vcombine.high %v1101_v38, %v1105_v39  ;;  %v1160_v36 = vld [vmem:[#allocation6 + $0x730] sm:$0xff]  ;;  %v1157_v37 = vld [vmem:[#allocation6 + $0x718] sm:$0xff] }
 0x236   :  { %2794 = vmatprep.subr.bf16.mxu1 %v12216_v47  ;;  %v1108_v47 = vld [vmem:[#allocation6 + $0x590] sm:$0xff] }
 0x237   :  { %v12277_v0 = vcombine.low %v1108_v47, %v1112_v49 }
 0x238   :  { %2709 = vmatpush1.bf16.msra.mxu0 %v12213_v54  ;;  %v12271_v54 = vcombine.low %v1101_v38, %v1105_v39  ;;  %v1161_v38 = vld [vmem:[#allocation6 + $0x738] sm:$0xff] }
 0x239   :  { %2795 = vmatpush1.bf16.msra.mxu1 %v12215_v55  ;;  %2710 = vmatprep.subr.bf16.mxu0 %v12222_v57  ;;  %v12278_v55 = vcombine.high %v1108_v47, %v1112_v49  ;;  %v12280_v57 = vcombine.high %v1109_v50, %v1113_v51  ;;  %v1168_v47 = vld [vmem:[#allocation6 + $0x770] sm:$0xff]  ;;  %v1165_v49 = vld [vmem:[#allocation6 + $0x758] sm:$0xff] }
 0x23a   :  { %2796 = vmatprep.subr.bf16.mxu1 %v12224_v58  ;;  %v1116_v58 = vld [vmem:[#allocation6 + $0x5d0] sm:$0xff] }
 0x23b   :  { %v12285_v8 = vcombine.low %v1116_v58, %v1120_v60 }
 0x23c   :  { %2711 = vmatpush1.bf16.msra.mxu0 %v12221_v1  ;;  %v12279_v1 = vcombine.low %v1109_v50, %v1113_v51  ;;  %v1169_v50 = vld [vmem:[#allocation6 + $0x778] sm:$0xff] }
 0x23d   :  { %2797 = vmatpush1.bf16.msra.mxu1 %v12223_v2  ;;  %2723 = vmatprep.subr.bf16.mxu0 %v12230_v3  ;;  %v12286_v2 = vcombine.high %v1116_v58, %v1120_v60  ;;  %v12288_v3 = vcombine.high %v1117_v61, %v1121_v63  ;;  %v1176_v58 = vld [vmem:[#allocation6 + $0x7b0] sm:$0xff]  ;;  %v1173_v60 = vld [vmem:[#allocation6 + $0x798] sm:$0xff] }
 0x23e   :  { %2809 = vmatprep.subr.bf16.mxu1 %v12232_v4  ;;  %v1124_v4 = vld [vmem:[#allocation6 + $0x610] sm:$0xff]  ;;  %v1177_v61 = vld [vmem:[#allocation6 + $0x7b8] sm:$0xff] }
 0x23f   :  { %2713 = vmatmul.mubr.bf16.vlgmr.msra.gmra.mrb[8].mxu0 %v14508_v11 }
 0x240   :  { %2799 = vmatmul.mubr.bf16.vlgmr.msra.gmra.mrb[8].mxu1 %v14508_v11  ;;  %2724 = vmatpush1.bf16.msra.mxu0 %v12229_v7  ;;  %v12247_v11 = vcombine.low %v1077_v16, %v1081_v17  ;;  %v1129_v7 = vld [vmem:[#allocation6 + $0x638] sm:$0xff]  ;;  %v12293_v17 = vcombine.low %v1124_v4, %v1128_v5 }
 0x241   :  { %2755 = vmatprep.mubr.bf16.mxu0 %v14518_v56  ;;  %2810 = vmatpush1.bf16.msra.mxu1 %v12231_v10  ;;  %v12294_v10 = vcombine.high %v1124_v4, %v1128_v5  ;;  %v1137_v16 = vld [vmem:[#allocation6 + $0x678] sm:$0xff]  ;;  %v1184_v4 = vld [vmem:[#allocation6 + $0x7f0] sm:$0xff] }
 0x242   :  { %2841 = vmatprep.mubr.bf16.mxu1 %v14518_v56  ;;  %2725 = vmatprep.subr.bf16.mxu0 %v12238_v13  ;;  %v12253_v56 = vcombine.low %v1084_v22, %v1088_v23  ;;  %v12296_v13 = vcombine.high %v1125_v6, %v1129_v7  ;;  %v1144_v22 = vld [vmem:[#allocation6 + $0x6b0] sm:$0xff]  ;;  %v1141_v23 = vld [vmem:[#allocation6 + $0x698] sm:$0xff] }
 0x243   :  { %2811 = vmatprep.subr.bf16.mxu1 %v12240_v15  ;;  %v1133_v15 = vld [vmem:[#allocation6 + $0x658] sm:$0xff] }
 0x244   :  { %2726 = vmatpush1.bf16.msra.mxu0 %v12237_v18  ;;  %v12295_v18 = vcombine.low %v1125_v6, %v1129_v7  ;;  %v1181_v5 = vld [vmem:[#allocation6 + $0x7d8] sm:$0xff] }
 0x245   :  { %2812 = vmatpush1.bf16.msra.mxu1 %v12239_v19  ;;  %2727 = vmatprep.subr.bf16.mxu0 %v12246_v20  ;;  %v12302_v19 = vcombine.high %v1132_v14, %v1136_v12  ;;  %v12304_v20 = vcombine.high %v1133_v15, %v1137_v16  ;;  %v1185_v6 = vld [vmem:[#allocation6 + $0x7f8] sm:$0xff]  ;;  %v2900_v14 = vld [vmem:[#allocation9 + $0x40] sm:$0xff]  ;;  %v2893_v12 = vld [vmem:[#allocation9 + $0x8] sm:$0xff] }
 0x246   :  { %2813 = vmatprep.subr.bf16.mxu1 %v12248_v21  ;;  %v1140_v21 = vld [vmem:[#allocation6 + $0x690] sm:$0xff] }
 0x247   :  { %v12309_v32 = vcombine.low %v1140_v21, %v1144_v22 }
 0x248   :  { %2728 = vmatpush1.bf16.msra.mxu0 %v12245_v26  ;;  %v12303_v26 = vcombine.low %v1133_v15, %v1137_v16  ;;  %v2901_v15 = vld [vmem:[#allocation9 + $0x48] sm:$0xff] }
 0x249   :  { %2814 = vmatpush1.bf16.msra.mxu1 %v12247_v11  ;;  %2729 = vmatprep.subr.bf16.mxu0 %v12254_v27  ;;  %v12310_v11 = vcombine.high %v1140_v21, %v1144_v22  ;;  %v12312_v27 = vcombine.high %v1141_v23, %v1145_v24  ;;  %v2916_v21 = vld [vmem:[#allocation9 + $0xc0] sm:$0xff]  ;;  %v2909_v22 = vld [vmem:[#allocation9 + $0x88] sm:$0xff] }
 0x24a   :  { %2815 = vmatprep.subr.bf16.mxu1 %v12256_v28  ;;  %v1148_v28 = vld [vmem:[#allocation6 + $0x6d0] sm:$0xff] }
 0x24b   :  { %v12317_v39 = vcombine.low %v1148_v28, %v1152_v29 }
 0x24c   :  { %2730 = vmatpush1.bf16.msra.mxu0 %v12253_v56  ;;  %v12311_v56 = vcombine.low %v1141_v23, %v1145_v24  ;;  %v2917_v23 = vld [vmem:[#allocation9 + $0xc8] sm:$0xff] }
 0x24d   :  { %2816 = vmatpush1.bf16.msra.mxu1 %v12255_v33  ;;  %2731 = vmatprep.subr.bf16.mxu0 %v12262_v34  ;;  %v12318_v33 = vcombine.high %v1148_v28, %v1152_v29  ;;  %v12320_v34 = vcombine.high %v1149_v30, %v1153_v31  ;;  %v2932_v28 = vld [vmem:[#allocation9 + $0x140] sm:$0xff]  ;;  %v2925_v29 = vld [vmem:[#allocation9 + $0x108] sm:$0xff] }
 0x24e   :  { %2817 = vmatprep.subr.bf16.mxu1 %v12264_v35  ;;  %v1156_v35 = vld [vmem:[#allocation6 + $0x710] sm:$0xff] }
 0x24f   :  { %v12325_v51 = vcombine.low %v1156_v35, %v1160_v36 }
 0x250   :  { %2732 = vmatpush1.bf16.msra.mxu0 %v12261_v40  ;;  %v12319_v40 = vcombine.low %v1149_v30, %v1153_v31  ;;  %v2933_v30 = vld [vmem:[#allocation9 + $0x148] sm:$0xff] }
 0x251   :  { %2818 = vmatpush1.bf16.msra.mxu1 %v12263_v43  ;;  %2733 = vmatprep.subr.bf16.mxu0 %v12270_v41  ;;  %v12326_v43 = vcombine.high %v1156_v35, %v1160_v36  ;;  %v12328_v41 = vcombine.high %v1157_v37, %v1161_v38  ;;  %v2948_v35 = vld [vmem:[#allocation9 + $0x1c0] sm:$0xff]  ;;  %v2941_v36 = vld [vmem:[#allocation9 + $0x188] sm:$0xff] }
 0x252   :  { %2819 = vmatprep.subr.bf16.mxu1 %v12272_v42  ;;  %v1164_v42 = vld [vmem:[#allocation6 + $0x750] sm:$0xff] }
 0x253   :  { %v12333_v63 = vcombine.low %v1164_v42, %v1168_v47 }
 0x254   :  { %2734 = vmatpush1.bf16.msra.mxu0 %v12269_v53  ;;  %v12327_v53 = vcombine.low %v1157_v37, %v1161_v38  ;;  %v2949_v37 = vld [vmem:[#allocation9 + $0x1c8] sm:$0xff] }
 0x255   :  { %2820 = vmatpush1.bf16.msra.mxu1 %v12271_v54  ;;  %2735 = vmatprep.subr.bf16.mxu0 %v12278_v55  ;;  %v12334_v54 = vcombine.high %v1164_v42, %v1168_v47  ;;  %v12336_v55 = vcombine.high %v1165_v49, %v1169_v50  ;;  %v2957_v42 = vld [vmem:[#allocation9 + $0x208] sm:$0xff] }
 0x256   :  { %2821 = vmatprep.subr.bf16.mxu1 %v12280_v57  ;;  %v1172_v57 = vld [vmem:[#allocation6 + $0x790] sm:$0xff] }
 0x257   :  { %v12341_v7 = vcombine.low %v1172_v57, %v1176_v58  ;;  %v2965_v47 = vld [vmem:[#allocation9 + $0x248] sm:$0xff] }
 0x258   :  { %2736 = vmatpush1.bf16.msra.mxu0 %v12277_v0  ;;  %v12335_v0 = vcombine.low %v1165_v49, %v1169_v50  ;;  %v12403_v50 = vcombine.low %v2941_v36, %v2949_v37 }
 0x259   :  { %2822 = vmatpush1.bf16.msra.mxu1 %v12279_v1  ;;  %2737 = vmatprep.subr.bf16.mxu0 %v12286_v2  ;;  %v12342_v1 = vcombine.high %v1172_v57, %v1176_v58  ;;  %v12344_v2 = vcombine.high %v1173_v60, %v1177_v61  ;;  %v2973_v57 = vld [vmem:[#allocation9 + $0x288] sm:$0xff] }
 0x25a   :  { %2823 = vmatprep.subr.bf16.mxu1 %v12288_v3  ;;  %v1180_v3 = vld [vmem:[#allocation6 + $0x7d0] sm:$0xff] }
 0x25b   :  { %v12349_v16 = vcombine.low %v1180_v3, %v1184_v4  ;;  %v2981_v58 = vld [vmem:[#allocation9 + $0x2c8] sm:$0xff] }
 0x25c   :  { %2738 = vmatpush1.bf16.msra.mxu0 %v12285_v8  ;;  %v12343_v8 = vcombine.low %v1173_v60, %v1177_v61  ;;  %v12419_v61 = vcombine.low %v2957_v42, %v2965_v47 }
 0x25d   :  { %2824 = vmatpush1.bf16.msra.mxu1 %v12287_v9  ;;  %2739 = vmatprep.subr.bf16.mxu0 %v12294_v10  ;;  %v12350_v9 = vcombine.high %v1180_v3, %v1184_v4  ;;  %v12352_v10 = vcombine.high %v1181_v5, %v1185_v6  ;;  %v2989_v3 = vld [vmem:[#allocation9 + $0x308] sm:$0xff] }
 0x25e   :  { %2825 = vmatprep.subr.bf16.mxu1 %v12296_v13  ;;  %v2892_v13 = vld [vmem:[#allocation9] sm:$0xff]  ;;  %v2997_v4 = vld [vmem:[#allocation9 + $0x348] sm:$0xff] }
 0x25f   :  { %v12353_v24 = vcombine.low %v2892_v13, %v2900_v14 }
 0x260   :  { %2740 = vmatpush1.bf16.msra.mxu0 %v12293_v17  ;;  %v12351_v17 = vcombine.low %v1181_v5, %v1185_v6  ;;  %v12435_v6 = vcombine.low %v2973_v57, %v2981_v58 }
 0x261   :  { %2826 = vmatpush1.bf16.msra.mxu1 %v12295_v18  ;;  %2741 = vmatprep.subr.bf16.mxu0 %v12302_v19  ;;  %v12354_v18 = vcombine.high %v2892_v13, %v2900_v14  ;;  %v12356_v19 = vcombine.high %v2893_v12, %v2901_v15  ;;  %v3005_v13 = vld [vmem:[#allocation9 + $0x388] sm:$0xff] }
 0x262   :  { %2827 = vmatprep.subr.bf16.mxu1 %v12304_v20  ;;  %v2908_v20 = vld [vmem:[#allocation9 + $0x80] sm:$0xff]  ;;  %v3013_v14 = vld [vmem:[#allocation9 + $0x3c8] sm:$0xff] }
 0x263   :  { %v12369_v31 = vcombine.low %v2908_v20, %v2916_v21 }
 0x264   :  { %2742 = vmatpush1.bf16.msra.mxu0 %v12301_v25  ;;  %v12355_v25 = vcombine.low %v2893_v12, %v2901_v15  ;;  %v12451_v15 = vcombine.low %v2989_v3, %v2997_v4 }
 0x265   :  { %2828 = vmatpush1.bf16.msra.mxu1 %v12303_v26  ;;  %2743 = vmatprep.subr.bf16.mxu0 %v12310_v11  ;;  %v12370_v26 = vcombine.high %v2908_v20, %v2916_v21  ;;  %v12372_v11 = vcombine.high %v2909_v22, %v2917_v23  ;;  %v3021_v20 = vld [vmem:[#allocation9 + $0x408] sm:$0xff] }
 0x266   :  { %2829 = vmatprep.subr.bf16.mxu1 %v12312_v27  ;;  %v2924_v27 = vld [vmem:[#allocation9 + $0x100] sm:$0xff]  ;;  %v3029_v21 = vld [vmem:[#allocation9 + $0x448] sm:$0xff] }
 0x267   :  { %v12385_v38 = vcombine.low %v2924_v27, %v2932_v28 }
 0x268   :  { %2744 = vmatpush1.bf16.msra.mxu0 %v12309_v32  ;;  %v12371_v32 = vcombine.low %v2909_v22, %v2917_v23  ;;  %v12467_v23 = vcombine.low %v3005_v13, %v3013_v14 }
 0x269   :  { %2830 = vmatpush1.bf16.msra.mxu1 %v12311_v56  ;;  %2745 = vmatprep.subr.bf16.mxu0 %v12318_v33  ;;  %v12386_v56 = vcombine.high %v2924_v27, %v2932_v28  ;;  %v12388_v33 = vcombine.high %v2925_v29, %v2933_v30  ;;  %v3037_v27 = vld [vmem:[#allocation9 + $0x488] sm:$0xff] }
 0x26a   :  { %2831 = vmatprep.subr.bf16.mxu1 %v12320_v34  ;;  %v2940_v34 = vld [vmem:[#allocation9 + $0x180] sm:$0xff]  ;;  %v3045_v28 = vld [vmem:[#allocation9 + $0x4c8] sm:$0xff] }
 0x26b   :  { %v12401_v49 = vcombine.low %v2940_v34, %v2948_v35 }
 0x26c   :  { %2746 = vmatpush1.bf16.msra.mxu0 %v12317_v39  ;;  %v12387_v39 = vcombine.low %v2925_v29, %v2933_v30  ;;  %v12483_v30 = vcombine.low %v3021_v20, %v3029_v21 }
 0x26d   :  { %2832 = vmatpush1.bf16.msra.mxu1 %v12319_v40  ;;  %2747 = vmatprep.subr.bf16.mxu0 %v12326_v43  ;;  %v12402_v40 = vcombine.high %v2940_v34, %v2948_v35  ;;  %v2956_v43 = vld [vmem:[#allocation9 + $0x200] sm:$0xff]  ;;  %v3053_v34 = vld [vmem:[#allocation9 + $0x508] sm:$0xff] }
 0x26e   :  { %2833 = vmatprep.subr.bf16.mxu1 %v12328_v41  ;;  %v2964_v41 = vld [vmem:[#allocation9 + $0x240] sm:$0xff]  ;;  %v3061_v35 = vld [vmem:[#allocation9 + $0x548] sm:$0xff] }
 0x26f   :  { %v12417_v60 = vcombine.low %v2956_v43, %v2964_v41 }
 0x270   :  { %2748 = vmatpush1.bf16.msra.mxu0 %v12325_v51  ;;  %v12418_v51 = vcombine.high %v2956_v43, %v2964_v41  ;;  %v3069_v43 = vld [vmem:[#allocation9 + $0x588] sm:$0xff] }
 0x271   :  { %2834 = vmatpush1.bf16.msra.mxu1 %v12327_v53  ;;  %2749 = vmatprep.subr.bf16.mxu0 %v12334_v54  ;;  %v12420_v53 = vcombine.high %v2957_v42, %v2965_v47  ;;  %v2972_v54 = vld [vmem:[#allocation9 + $0x280] sm:$0xff]  ;;  %v3077_v41 = vld [vmem:[#allocation9 + $0x5c8] sm:$0xff]  ;;  %v12515_v47 = vcombine.low %v3053_v34, %v3061_v35 }
 0x272   :  { %2835 = vmatprep.subr.bf16.mxu1 %v12336_v55  ;;  %v2980_v55 = vld [vmem:[#allocation9 + $0x2c0] sm:$0xff] }
 0x273   :  { %v12433_v5 = vcombine.low %v2972_v54, %v2980_v55 }
 0x274   :  { %2750 = vmatpush1.bf16.msra.mxu0 %v12333_v63  ;;  %v12434_v63 = vcombine.high %v2972_v54, %v2980_v55  ;;  %v3085_v54 = vld [vmem:[#allocation9 + $0x608] sm:$0xff] }
 0x275   :  { %2836 = vmatpush1.bf16.msra.mxu1 %v12335_v0  ;;  %2751 = vmatprep.subr.bf16.mxu0 %v12342_v1  ;;  %v12436_v0 = vcombine.high %v2973_v57, %v2981_v58  ;;  %v2988_v1 = vld [vmem:[#allocation9 + $0x300] sm:$0xff]  ;;  %v3093_v55 = vld [vmem:[#allocation9 + $0x648] sm:$0xff]  ;;  %v12531_v58 = vcombine.low %v3069_v43, %v3077_v41 }
 0x276   :  { %2837 = vmatprep.subr.bf16.mxu1 %v12344_v2  ;;  %v2996_v2 = vld [vmem:[#allocation9 + $0x340] sm:$0xff] }
 0x277   :  { %v12449_v12 = vcombine.low %v2988_v1, %v2996_v2 }
 0x278   :  { %2752 = vmatpush1.bf16.msra.mxu0 %v12341_v7  ;;  %v12450_v7 = vcombine.high %v2988_v1, %v2996_v2  ;;  %v3101_v1 = vld [vmem:[#allocation9 + $0x688] sm:$0xff] }
 0x279   :  { %2838 = vmatpush1.bf16.msra.mxu1 %v12343_v8  ;;  %2753 = vmatprep.subr.bf16.mxu0 %v12350_v9  ;;  %v12452_v8 = vcombine.high %v2989_v3, %v2997_v4  ;;  %v3004_v9 = vld [vmem:[#allocation9 + $0x380] sm:$0xff]  ;;  %v3109_v2 = vld [vmem:[#allocation9 + $0x6c8] sm:$0xff]  ;;  %v12547_v4 = vcombine.low %v3085_v54, %v3093_v55 }
 0x27a   :  { %2839 = vmatprep.subr.bf16.mxu1 %v12352_v10  ;;  %v3012_v10 = vld [vmem:[#allocation9 + $0x3c0] sm:$0xff] }
 0x27b   :  { %v12465_v22 = vcombine.low %v3004_v9, %v3012_v10 }
 0x27c   :  { %2754 = vmatpush1.bf16.msra.mxu0 %v12349_v16  ;;  %v12466_v16 = vcombine.high %v3004_v9, %v3012_v10  ;;  %v3117_v9 = vld [vmem:[#allocation9 + $0x708] sm:$0xff] }
 0x27d   :  { %2840 = vmatpush1.bf16.msra.mxu1 %v12351_v17  ;;  %9120 = vmatprep.subr.bf16.mxu0 %v12354_v18  ;;  %v12468_v17 = vcombine.high %v3005_v13, %v3013_v14  ;;  %v3020_v18 = vld [vmem:[#allocation9 + $0x400] sm:$0xff]  ;;  %v3125_v10 = vld [vmem:[#allocation9 + $0x748] sm:$0xff]  ;;  %v12563_v14 = vcombine.low %v3101_v1, %v3109_v2 }
 0x27e   :  { %9292 = vmatprep.subr.bf16.mxu1 %v12356_v19  ;;  %v3028_v19 = vld [vmem:[#allocation9 + $0x440] sm:$0xff] }
 0x27f   :  { %2756 = vmatmul.mubr.bf16.vlgmr.msra.gmra.mrb[8].mxu0 %v14516_v52  ;;  %v12481_v29 = vcombine.low %v3020_v18, %v3028_v19 }
 0x280   :  { %2842 = vmatmul.mubr.bf16.vlgmr.msra.gmra.mrb[8].mxu1 %v14516_v52  ;;  %9121 = vmatpush1.bf16.msra.mxu0 %v12353_v24  ;;  %v12404_v52 = vcombine.high %v2941_v36, %v2949_v37  ;;  %v12482_v24 = vcombine.high %v3020_v18, %v3028_v19  ;;  %v12499_v37 = vcombine.low %v3037_v27, %v3045_v28  ;;  %v3133_v18 = vld [vmem:[#allocation9 + $0x788] sm:$0xff] }
 0x281   :  { %9293 = vmatpush1.bf16.msra.mxu1 %v12355_v25  ;;  %9122 = vmatprep.subr.bf16.mxu0 %v12370_v26  ;;  %v12484_v25 = vcombine.high %v3021_v20, %v3029_v21  ;;  %v3036_v26 = vld [vmem:[#allocation9 + $0x480] sm:$0xff]  ;;  %v3141_v19 = vld [vmem:[#allocation9 + $0x7c8] sm:$0xff]  ;;  %v12579_v21 = vcombine.low %v3117_v9, %v3125_v10 }
 0x282   :  { %9294 = vmatprep.subr.bf16.mxu1 %v12372_v11  ;;  %v3044_v11 = vld [vmem:[#allocation9 + $0x4c0] sm:$0xff] }
 0x283   :  { %v12497_v36 = vcombine.low %v3036_v26, %v3044_v11 }
 0x284   :  { %9123 = vmatpush1.bf16.msra.mxu0 %v12369_v31  ;;  %v12498_v31 = vcombine.high %v3036_v26, %v3044_v11  ;;  %v14536_v26 = vld [vmem:[#allocation9 + $0x808] sm:$0xff] }
 0x285   :  { %9295 = vmatpush1.bf16.msra.mxu1 %v12371_v32  ;;  %9124 = vmatprep.subr.bf16.mxu0 %v12386_v56  ;;  %v12500_v32 = vcombine.high %v3037_v27, %v3045_v28  ;;  %v3052_v56 = vld [vmem:[#allocation9 + $0x500] sm:$0xff]  ;;  %v14538_v11 = vld [vmem:[#allocation9 + $0x848] sm:$0xff]  ;;  %v12595_v28 = vcombine.low %v3133_v18, %v3141_v19 }
 0x286   :  { %9296 = vmatprep.subr.bf16.mxu1 %v12388_v33  ;;  %v3060_v33 = vld [vmem:[#allocation9 + $0x540] sm:$0xff] }
 0x287   :  { %v12513_v42 = vcombine.low %v3052_v56, %v3060_v33 }
 0x288   :  { %9125 = vmatpush1.bf16.msra.mxu0 %v12385_v38  ;;  %v12514_v38 = vcombine.high %v3052_v56, %v3060_v33 }
 0x289   :  { %9297 = vmatpush1.bf16.msra.mxu1 %v12387_v39  ;;  %9126 = vmatprep.subr.bf16.mxu0 %v12402_v40  ;;  %v12516_v39 = vcombine.high %v3053_v34, %v3061_v35  ;;  %v3068_v40 = vld [vmem:[#allocation9 + $0x580] sm:$0xff] }
 0x28a   :  { %9298 = vmatprep.subr.bf16.mxu1 %v12404_v52  ;;  %v3076_v52 = vld [vmem:[#allocation9 + $0x5c0] sm:$0xff] }
 0x28b   :  { %v12529_v57 = vcombine.low %v3068_v40, %v3076_v52 }
 0x28c   :  { %9127 = vmatpush1.bf16.msra.mxu0 %v12401_v49  ;;  %v12530_v49 = vcombine.high %v3068_v40, %v3076_v52 }
 0x28d   :  { %9299 = vmatpush1.bf16.msra.mxu1 %v12403_v50  ;;  %9128 = vmatprep.subr.bf16.mxu0 %v12418_v51  ;;  %v12532_v50 = vcombine.high %v3069_v43, %v3077_v41  ;;  %v3084_v51 = vld [vmem:[#allocation9 + $0x600] sm:$0xff] }
 0x28e   :  { %9300 = vmatprep.subr.bf16.mxu1 %v12420_v53  ;;  %v3092_v53 = vld [vmem:[#allocation9 + $0x640] sm:$0xff] }
 0x28f   :  { %v12545_v3 = vcombine.low %v3084_v51, %v3092_v53 }
 0x290   :  { %9129 = vmatpush1.bf16.msra.mxu0 %v12417_v60  ;;  %v12546_v60 = vcombine.high %v3084_v51, %v3092_v53 }
 0x291   :  { %9301 = vmatpush1.bf16.msra.mxu1 %v12419_v61  ;;  %9130 = vmatprep.subr.bf16.mxu0 %v12434_v63  ;;  %v12548_v61 = vcombine.high %v3085_v54, %v3093_v55  ;;  %v3100_v63 = vld [vmem:[#allocation9 + $0x680] sm:$0xff] }
 0x292   :  { %9302 = vmatprep.subr.bf16.mxu1 %v12436_v0  ;;  %v3108_v0 = vld [vmem:[#allocation9 + $0x6c0] sm:$0xff] }
 0x293   :  { %v12561_v13 = vcombine.low %v3100_v63, %v3108_v0 }
 0x294   :  { %9131 = vmatpush1.bf16.msra.mxu0 %v12433_v5  ;;  %v12562_v5 = vcombine.high %v3100_v63, %v3108_v0 }
 0x295   :  { %9303 = vmatpush1.bf16.msra.mxu1 %v12435_v6  ;;  %9132 = vmatprep.subr.bf16.mxu0 %v12450_v7  ;;  %v12564_v6 = vcombine.high %v3101_v1, %v3109_v2  ;;  %v3116_v7 = vld [vmem:[#allocation9 + $0x700] sm:$0xff] }
 0x296   :  { %9304 = vmatprep.subr.bf16.mxu1 %v12452_v8  ;;  %v3124_v8 = vld [vmem:[#allocation9 + $0x740] sm:$0xff] }
 0x297   :  { %v12577_v20 = vcombine.low %v3116_v7, %v3124_v8 }
 0x298   :  { %9133 = vmatpush1.bf16.msra.mxu0 %v12449_v12  ;;  %v12578_v12 = vcombine.high %v3116_v7, %v3124_v8 }
 0x299   :  { %9305 = vmatpush1.bf16.msra.mxu1 %v12451_v15  ;;  %9134 = vmatprep.subr.bf16.mxu0 %v12466_v16  ;;  %v12580_v15 = vcombine.high %v3117_v9, %v3125_v10  ;;  %v3132_v16 = vld [vmem:[#allocation9 + $0x780] sm:$0xff] }
 0x29a   :  { %9306 = vmatprep.subr.bf16.mxu1 %v12468_v17  ;;  %v3140_v17 = vld [vmem:[#allocation9 + $0x7c0] sm:$0xff] }
 0x29b   :  { %v12593_v27 = vcombine.low %v3132_v16, %v3140_v17  ;;  %v3164_v10 = vld [vmem:[#allocation9 + $0x880] sm:$0xff] }
 0x29c   :  { %9135 = vmatpush1.bf16.msra.mxu0 %v12465_v22  ;;  %v12594_v22 = vcombine.high %v3132_v16, %v3140_v17  ;;  %v3173_v16 = vld [vmem:[#allocation9 + $0x8c8] sm:$0xff] }
 0x29d   :  { %9307 = vmatpush1.bf16.msra.mxu1 %v12467_v23  ;;  %9136 = vmatprep.subr.bf16.mxu0 %v12482_v24  ;;  %v12596_v23 = vcombine.high %v3133_v18, %v3141_v19  ;;  %v14532_v24 = vld [vmem:[#allocation9 + $0x800] sm:$0xff] }
 0x29e   :  { %9308 = vmatprep.subr.bf16.mxu1 %v12484_v25  ;;  %v14534_v25 = vld [vmem:[#allocation9 + $0x840] sm:$0xff] }
 0x29f   :  { %v12609_v19 = vcombine.low %v14532_v24, %v14534_v25 }
 0x2a0   :  { %9137 = vmatpush1.bf16.msra.mxu0 %v12481_v29  ;;  %v12610_v29 = vcombine.high %v14532_v24, %v14534_v25 }
 0x2a1   :  { %9309 = vmatpush1.bf16.msra.mxu1 %v12483_v30  ;;  %9138 = vmatprep.subr.bf16.mxu0 %v12498_v31  ;;  %v12612_v30 = vcombine.high %v14536_v26, %v14538_v11  ;;  %v14544_v31 = vld [vmem:[#allocation7] sm:$0xff] }
 0x2a2   :  { %9310 = vmatprep.subr.bf16.mxu1 %v12500_v32  ;;  %v1191_v32 = vrot.slane %v14544_v31, %v14493_v46  ;;  %v1199_v56 = vrot.slane %v14544_v31, %v14501_v59  ;;  %v1195_v33 = vrot.slane %v14544_v31, %v14496_v48  ;;  %v1203_v34 = vrot.slane %v14544_v31, %v14504_v62 }
 0x2a4   :  { %9139 = vmatpush1.bf16.msra.mxu0 %v12497_v36 }
 0x2a5   :  { %9311 = vmatpush1.bf16.msra.mxu1 %v12499_v37  ;;  %9140 = vmatprep.subr.bf16.mxu0 %v12514_v38 }
 0x2a6   :  { %9312 = vmatprep.subr.bf16.mxu1 %v12516_v39 }
 0x2a8   :  { %9141 = vmatpush1.bf16.msra.mxu0 %v12513_v42 }
 0x2a9   :  { %9313 = vmatpush1.bf16.msra.mxu1 %v12515_v47  ;;  %9142 = vmatprep.subr.bf16.mxu0 %v12530_v49 }
 0x2aa   :  { %9314 = vmatprep.subr.bf16.mxu1 %v12532_v50 }
 0x2ac   :  { %9143 = vmatpush1.bf16.msra.mxu0 %v12529_v57 }
 0x2ad   :  { %9315 = vmatpush1.bf16.msra.mxu1 %v12531_v58  ;;  %9144 = vmatprep.subr.bf16.mxu0 %v12546_v60 }
 0x2ae   :  { %9316 = vmatprep.subr.bf16.mxu1 %v12548_v61 }
 0x2b0   :  { %9145 = vmatpush1.bf16.msra.mxu0 %v12545_v3 }
 0x2b1   :  { %9317 = vmatpush1.bf16.msra.mxu1 %v12547_v4  ;;  %9146 = vmatprep.subr.bf16.mxu0 %v12562_v5 }
 0x2b2   :  { %9318 = vmatprep.subr.bf16.mxu1 %v12564_v6 }
 0x2b4   :  { %9147 = vmatpush1.bf16.msra.mxu0 %v12561_v13 }
 0x2b5   :  { %9319 = vmatpush1.bf16.msra.mxu1 %v12563_v14  ;;  %9148 = vmatprep.subr.bf16.mxu0 %v12578_v12  ;;  %v3172_v12 = vld [vmem:[#allocation9 + $0x8c0] sm:$0xff] }
 0x2b6   :  { %9320 = vmatprep.subr.bf16.mxu1 %v12580_v15  ;;  %v3165_v15 = vld [vmem:[#allocation9 + $0x888] sm:$0xff]  ;;  %v12625_v24 = vcombine.low %v3164_v10, %v3172_v12 }
 0x2b7   :  { %v12627_v25 = vcombine.low %v3165_v15, %v3173_v16 }
 0x2b8   :  { %9149 = vmatpush1.bf16.msra.mxu0 %v12577_v20  ;;  %v12611_v20 = vcombine.low %v14536_v26, %v14538_v11 }
 0x2b9   :  { %9321 = vmatpush1.bf16.msra.mxu1 %v12579_v21  ;;  %9150 = vmatprep.subr.bf16.mxu0 %v12594_v22  ;;  %v3180_v21 = vld [vmem:[#allocation9 + $0x900] sm:$0xff]  ;;  %v12626_v22 = vcombine.high %v3164_v10, %v3172_v12 }
 0x2ba   :  { %9322 = vmatprep.subr.bf16.mxu1 %v12596_v23  ;;  %v12628_v23 = vcombine.high %v3165_v15, %v3173_v16  ;;  %v3276_v16 = vld [vmem:[#allocation9 + $0xc00] sm:$0xff] }
 0x2bc   :  { %9151 = vmatpush1.bf16.msra.mxu0 %v12593_v27  ;;  %v3188_v27 = vld [vmem:[#allocation9 + $0x940] sm:$0xff] }
 0x2bd   :  { %9323 = vmatpush1.bf16.msra.mxu1 %v12595_v28  ;;  %9163 = vmatprep.subr.bf16.mxu0 %v12610_v29  ;;  %v3181_v28 = vld [vmem:[#allocation9 + $0x908] sm:$0xff]  ;;  %v12642_v26 = vcombine.high %v3180_v21, %v3188_v27 }
 0x2be   :  { %9335 = vmatprep.subr.bf16.mxu1 %v12612_v30  ;;  %v3189_v29 = vld [vmem:[#allocation9 + $0x948] sm:$0xff]  ;;  %v3196_v30 = vld [vmem:[#allocation9 + $0x980] sm:$0xff] }
 0x2bf   :  { %v12644_v11 = vcombine.high %v3181_v28, %v3189_v29 }
 0x2d2   :  { %v2585_v35 = vpop.f32.mrb[4].mxu0  ;;  %v2671_v36 = vpop.f32.mrb[4].mxu1 }
 0x2d3   :  { %v13690_v37 = vadd.f32 %v2585_v35, %v1191_v32  ;;  %v13694_v38 = vadd.f32 %v2671_v36, %v1199_v56  ;;  %v2587_v39 = vpop.f32.mrb[5].mxu0  ;;  %v2673_v40 = vpop.f32.mrb[5].mxu1  ;;  %v12643_v35 = vcombine.low %v3181_v28, %v3189_v29  ;;  %v3292_v29 = vld [vmem:[#allocation9 + $0xc80] sm:$0xff] }
 0x2d4   :  { %v13691_v52 = vadd.f32 %v2587_v39, %v1195_v33  ;;  %v13695_v43 = vadd.f32 %v2673_v40, %v1203_v34  ;;  %v2589_v41 = vpop.f32.mrb[6].mxu0  ;;  %v2675_v42 = vpop.f32.mrb[6].mxu1  ;;  %v3220_v39 = vld [vmem:[#allocation9 + $0xa40] sm:$0xff]  ;;  %v3213_v40 = vld [vmem:[#allocation9 + $0xa08] sm:$0xff] }
 0x2d5   :  { %v2852_v47 = vmul.f32 0.2, %v13690_v37  ;;  %v2854_v49 = vmul.f32 0.2, %v13694_v38  ;;  %v13692_v50 = vadd.f32 %v2589_v41, %v1191_v32  ;;  %v13696_v51 = vadd.f32 %v2675_v42, %v1199_v56  ;;  %v2591_v53 = vpop.f32.mrb[7].mxu0  ;;  %v2677_v54 = vpop.f32.mrb[7].mxu1 }
 0x2d6   :  { %v2853_v55 = vmul.f32 0.2, %v13691_v52  ;;  %v2855_v57 = vmul.f32 0.2, %v13695_v43  ;;  %v13693_v58 = vadd.f32 %v2591_v53, %v1195_v33  ;;  %v13697_v60 = vadd.f32 %v2677_v54, %v1203_v34  ;;  %v3204_v32 = vld [vmem:[#allocation9 + $0x9c0] sm:$0xff]  ;;  %v3197_v56 = vld [vmem:[#allocation9 + $0x988] sm:$0xff] }
 0x2d7   :  { %v2860_v61 = vmul.f32 0.2, %v13692_v50  ;;  %v2862_v63 = vmul.f32 0.2, %v13696_v51  ;;  %v2868_v2 = vmax.f32 %v13690_v37, %v2852_v47  ;;  %v2870_v3 = vmax.f32 %v13694_v38, %v2854_v49  ;;  %v3205_v33 = vld [vmem:[#allocation9 + $0x9c8] sm:$0xff]  ;;  %v3212_v38 = vld [vmem:[#allocation9 + $0xa00] sm:$0xff] }
 0x2d8   :  { %v2861_v0 = vmul.f32 0.2, %v13693_v58  ;;  %v2863_v1 = vmul.f32 0.2, %v13697_v60  ;;  %v2869_v6 = vmax.f32 %v13691_v52, %v2853_v55  ;;  %v2871_v7 = vmax.f32 %v13695_v43, %v2855_v57  ;;  %v3221_v52 = vld [vmem:[#allocation9 + $0xa48] sm:$0xff]  ;;  %v3228_v49 = vld [vmem:[#allocation9 + $0xa80] sm:$0xff] }
 0x2d9   :  { %v2876_v4 = vmax.f32 %v13692_v50, %v2860_v61  ;;  %v2878_v5 = vmax.f32 %v13696_v51, %v2862_v63  ;;  %v12641_v34 = vcombine.low %v3180_v21, %v3188_v27  ;;  %v12658_v36 = vcombine.high %v3196_v30, %v3204_v32  ;;  %v3236_v50 = vld [vmem:[#allocation9 + $0xac0] sm:$0xff]  ;;  %v3229_v51 = vld [vmem:[#allocation9 + $0xa88] sm:$0xff] }
 0x2da   :  { %v2877_v8 = vmax.f32 %v13693_v58, %v2861_v0  ;;  %v2879_v9 = vmax.f32 %v13697_v60, %v2863_v1  ;;  %v12660_v37 = vcombine.high %v3197_v56, %v3205_v33  ;;  %v12657_v43 = vcombine.low %v3196_v30, %v3204_v32  ;;  %v3237_v53 = vld [vmem:[#allocation9 + $0xac8] sm:$0xff]  ;;  %v3244_v60 = vld [vmem:[#allocation9 + $0xb00] sm:$0xff] }
 0x2db   :  { %v14554_v13 = vpack.c.bf16 %v2876_v4, %v2868_v2  ;;  %v14556_v14 = vpack.c.bf16 %v2878_v5, %v2870_v3  ;;  %v12659_v41 = vcombine.low %v3197_v56, %v3205_v33  ;;  %v12674_v42 = vcombine.high %v3212_v38, %v3220_v39  ;;  %v3252_v61 = vld [vmem:[#allocation9 + $0xb40] sm:$0xff]  ;;  %v3245_v63 = vld [vmem:[#allocation9 + $0xb08] sm:$0xff] }
 0x2dc   :  { %v14558_v17 = vpack.c.bf16 %v2877_v8, %v2869_v6  ;;  %v14560_v18 = vpack.c.bf16 %v2879_v9, %v2871_v7  ;;  %v12676_v47 = vcombine.high %v3213_v40, %v3221_v52  ;;  %v12673_v54 = vcombine.low %v3212_v38, %v3220_v39  ;;  %v3253_v0 = vld [vmem:[#allocation9 + $0xb48] sm:$0xff]  ;;  %v3260_v5 = vld [vmem:[#allocation9 + $0xb80] sm:$0xff] }
 0x2dd   :  { %v12675_v55 = vcombine.low %v3213_v40, %v3221_v52  ;;  %v12690_v57 = vcombine.high %v3228_v49, %v3236_v50  ;;  %v12692_v58 = vcombine.high %v3229_v51, %v3237_v53  ;;  %v12689_v1 = vcombine.low %v3228_v49, %v3236_v50  ;;  %v3268_v6 = vld [vmem:[#allocation9 + $0xbc0] sm:$0xff]  ;;  %v3261_v7 = vld [vmem:[#allocation9 + $0xb88] sm:$0xff] }
 0x2de   :  { %9152 = vmatprep.mubr.bf16.mxu0 %v14558_v17  ;;  %9324 = vmatprep.mubr.bf16.mxu1 %v14558_v17  ;;  %v12691_v2 = vcombine.low %v3229_v51, %v3237_v53  ;;  %v12706_v3 = vcombine.high %v3244_v60, %v3252_v61  ;;  %v12708_v4 = vcombine.high %v3245_v63, %v3253_v0  ;;  %v3269_v8 = vld [vmem:[#allocation9 + $0xbc8] sm:$0xff]  ;;  %v3308_v33 = vld [vmem:[#allocation9 + $0xd00] sm:$0xff] }
 0x2df   :  { %9153 = vmatmul.mubr.bf16.vlgmr.msra.gmra.mrb[12].mxu0 %v14554_v13  ;;  %9325 = vmatmul.mubr.bf16.vlgmr.msra.gmra.mrb[12].mxu1 %v14554_v13  ;;  %v12705_v9 = vcombine.low %v3244_v60, %v3252_v61  ;;  %v12707_v10 = vcombine.low %v3245_v63, %v3253_v0  ;;  %v12722_v12 = vcombine.high %v3260_v5, %v3268_v6  ;;  %v3285_v21 = vld [vmem:[#allocation9 + $0xc48] sm:$0xff]  ;;  %v3324_v52 = vld [vmem:[#allocation9 + $0xd80] sm:$0xff] }
 0x2e0   :  { %9164 = vmatpush1.bf16.msra.mxu0 %v12609_v19  ;;  %9336 = vmatpush1.bf16.msra.mxu1 %v12611_v20  ;;  %v12724_v15 = vcombine.high %v3261_v7, %v3269_v8  ;;  %v3284_v19 = vld [vmem:[#allocation9 + $0xc40] sm:$0xff]  ;;  %v3277_v20 = vld [vmem:[#allocation9 + $0xc08] sm:$0xff] }
 0x2e1   :  { %9195 = vmatprep.mubr.bf16.mxu0 %v14560_v18  ;;  %9367 = vmatprep.mubr.bf16.mxu1 %v14560_v18  ;;  %v12738_v27 = vcombine.high %v3276_v16, %v3284_v19  ;;  %v12740_v28 = vcombine.high %v3277_v20, %v3285_v21  ;;  %v12739_v30 = vcombine.low %v3277_v20, %v3285_v21  ;;  %v3340_v53 = vld [vmem:[#allocation9 + $0xe00] sm:$0xff] }
 0x2e2   :  { %9165 = vmatprep.subr.bf16.mxu0 %v12626_v22  ;;  %9337 = vmatprep.subr.bf16.mxu1 %v12628_v23  ;;  %v12721_v22 = vcombine.low %v3260_v5, %v3268_v6  ;;  %v12723_v23 = vcombine.low %v3261_v7, %v3269_v8  ;;  %v3356_v0 = vld [vmem:[#allocation9 + $0xe80] sm:$0xff] }
 0x2e3   :  { %v3372_v8 = vld [vmem:[#allocation9 + $0xf00] sm:$0xff] }
 0x2e4   :  { %9166 = vmatpush1.bf16.msra.mxu0 %v12625_v24  ;;  %9338 = vmatpush1.bf16.msra.mxu1 %v12627_v25  ;;  %v3300_v24 = vld [vmem:[#allocation9 + $0xcc0] sm:$0xff]  ;;  %v3293_v25 = vld [vmem:[#allocation9 + $0xc88] sm:$0xff] }
 0x2e5   :  { %9167 = vmatprep.subr.bf16.mxu0 %v12642_v26  ;;  %9339 = vmatprep.subr.bf16.mxu1 %v12644_v11  ;;  %v3301_v26 = vld [vmem:[#allocation9 + $0xcc8] sm:$0xff]  ;;  %v12737_v11 = vcombine.low %v3276_v16, %v3284_v19  ;;  %v12754_v32 = vcombine.high %v3292_v29, %v3300_v24  ;;  %v3388_v21 = vld [vmem:[#allocation9 + $0xf80] sm:$0xff] }
 0x2e6   :  { %v12756_v56 = vcombine.high %v3293_v25, %v3301_v26  ;;  %v12755_v38 = vcombine.low %v3293_v25, %v3301_v26  ;;  %v3404_v26 = vld [vmem:[#allocation9 + $0x1000] sm:$0xff] }
 0x2e8   :  { %9168 = vmatpush1.bf16.msra.mxu0 %v12641_v34  ;;  %9340 = vmatpush1.bf16.msra.mxu1 %v12643_v35  ;;  %v3316_v34 = vld [vmem:[#allocation9 + $0xd40] sm:$0xff]  ;;  %v3309_v35 = vld [vmem:[#allocation9 + $0xd08] sm:$0xff] }
 0x2e9   :  { %9169 = vmatprep.subr.bf16.mxu0 %v12658_v36  ;;  %9341 = vmatprep.subr.bf16.mxu1 %v12660_v37  ;;  %v3317_v36 = vld [vmem:[#allocation9 + $0xd48] sm:$0xff]  ;;  %v12753_v37 = vcombine.low %v3292_v29, %v3300_v24  ;;  %v12770_v39 = vcombine.high %v3308_v33, %v3316_v34 }
 0x2ea   :  { %v12772_v40 = vcombine.high %v3309_v35, %v3317_v36  ;;  %v12771_v49 = vcombine.low %v3309_v35, %v3317_v36  ;;  %v3420_v36 = vld [vmem:[#allocation9 + $0x1080] sm:$0xff] }
 0x2ec   :  { %9170 = vmatpush1.bf16.msra.mxu0 %v12657_v43  ;;  %9342 = vmatpush1.bf16.msra.mxu1 %v12659_v41  ;;  %v3332_v43 = vld [vmem:[#allocation9 + $0xdc0] sm:$0xff]  ;;  %v3325_v41 = vld [vmem:[#allocation9 + $0xd88] sm:$0xff] }
 0x2ed   :  { %9171 = vmatprep.subr.bf16.mxu0 %v12674_v42  ;;  %9343 = vmatprep.subr.bf16.mxu1 %v12676_v47  ;;  %v3333_v42 = vld [vmem:[#allocation9 + $0xdc8] sm:$0xff]  ;;  %v12769_v47 = vcombine.low %v3308_v33, %v3316_v34  ;;  %v12786_v50 = vcombine.high %v3324_v52, %v3332_v43 }
 0x2ee   :  { %v12788_v51 = vcombine.high %v3325_v41, %v3333_v42  ;;  %v12787_v60 = vcombine.low %v3325_v41, %v3333_v42  ;;  %v3436_v42 = vld [vmem:[#allocation9 + $0x1100] sm:$0xff] }
 0x2f0   :  { %9172 = vmatpush1.bf16.msra.mxu0 %v12673_v54  ;;  %9344 = vmatpush1.bf16.msra.mxu1 %v12675_v55  ;;  %v3348_v54 = vld [vmem:[#allocation9 + $0xe40] sm:$0xff]  ;;  %v3341_v55 = vld [vmem:[#allocation9 + $0xe08] sm:$0xff] }
 0x2f1   :  { %9173 = vmatprep.subr.bf16.mxu0 %v12690_v57  ;;  %9345 = vmatprep.subr.bf16.mxu1 %v12692_v58  ;;  %v3349_v57 = vld [vmem:[#allocation9 + $0xe48] sm:$0xff]  ;;  %v12785_v58 = vcombine.low %v3324_v52, %v3332_v43  ;;  %v12802_v61 = vcombine.high %v3340_v53, %v3348_v54 }
 0x2f2   :  { %v12804_v63 = vcombine.high %v3341_v55, %v3349_v57  ;;  %v12803_v5 = vcombine.low %v3341_v55, %v3349_v57  ;;  %v3452_v57 = vld [vmem:[#allocation9 + $0x1180] sm:$0xff] }
 0x2f4   :  { %9174 = vmatpush1.bf16.msra.mxu0 %v12689_v1  ;;  %9346 = vmatpush1.bf16.msra.mxu1 %v12691_v2  ;;  %v3364_v1 = vld [vmem:[#allocation9 + $0xec0] sm:$0xff]  ;;  %v3357_v2 = vld [vmem:[#allocation9 + $0xe88] sm:$0xff] }
 0x2f5   :  { %9175 = vmatprep.subr.bf16.mxu0 %v12706_v3  ;;  %9347 = vmatprep.subr.bf16.mxu1 %v12708_v4  ;;  %v3365_v3 = vld [vmem:[#allocation9 + $0xec8] sm:$0xff]  ;;  %v12801_v4 = vcombine.low %v3340_v53, %v3348_v54  ;;  %v12818_v6 = vcombine.high %v3356_v0, %v3364_v1 }
 0x2f6   :  { %v12820_v7 = vcombine.high %v3357_v2, %v3365_v3  ;;  %v12819_v16 = vcombine.low %v3357_v2, %v3365_v3  ;;  %v3468_v3 = vld [vmem:[#allocation9 + $0x1200] sm:$0xff] }
 0x2f8   :  { %9176 = vmatpush1.bf16.msra.mxu0 %v12705_v9  ;;  %9348 = vmatpush1.bf16.msra.mxu1 %v12707_v10  ;;  %v3380_v9 = vld [vmem:[#allocation9 + $0xf40] sm:$0xff]  ;;  %v3373_v10 = vld [vmem:[#allocation9 + $0xf08] sm:$0xff] }
 0x2f9   :  { %9177 = vmatprep.subr.bf16.mxu0 %v12722_v12  ;;  %9349 = vmatprep.subr.bf16.mxu1 %v12724_v15  ;;  %v3381_v12 = vld [vmem:[#allocation9 + $0xf48] sm:$0xff]  ;;  %v12817_v15 = vcombine.low %v3356_v0, %v3364_v1  ;;  %v12834_v19 = vcombine.high %v3372_v8, %v3380_v9 }
 0x2fa   :  { %v12836_v20 = vcombine.high %v3373_v10, %v3381_v12  ;;  %v12835_v29 = vcombine.low %v3373_v10, %v3381_v12  ;;  %v3484_v12 = vld [vmem:[#allocation9 + $0x1280] sm:$0xff] }
 0x2fc   :  { %9178 = vmatpush1.bf16.msra.mxu0 %v12721_v22  ;;  %9350 = vmatpush1.bf16.msra.mxu1 %v12723_v23  ;;  %v3396_v22 = vld [vmem:[#allocation9 + $0xfc0] sm:$0xff]  ;;  %v3389_v23 = vld [vmem:[#allocation9 + $0xf88] sm:$0xff] }
 0x2fd   :  { %9179 = vmatprep.subr.bf16.mxu0 %v12738_v27  ;;  %9351 = vmatprep.subr.bf16.mxu1 %v12740_v28  ;;  %v3397_v27 = vld [vmem:[#allocation9 + $0xfc8] sm:$0xff]  ;;  %v12833_v28 = vcombine.low %v3372_v8, %v3380_v9  ;;  %v12850_v24 = vcombine.high %v3388_v21, %v3396_v22 }
 0x2fe   :  { %v12852_v25 = vcombine.high %v3389_v23, %v3397_v27  ;;  %v12851_v33 = vcombine.low %v3389_v23, %v3397_v27  ;;  %v3500_v27 = vld [vmem:[#allocation9 + $0x1300] sm:$0xff] }
 0x300   :  { %9180 = vmatpush1.bf16.msra.mxu0 %v12737_v11  ;;  %9352 = vmatpush1.bf16.msra.mxu1 %v12739_v30  ;;  %v3412_v11 = vld [vmem:[#allocation9 + $0x1040] sm:$0xff]  ;;  %v3405_v30 = vld [vmem:[#allocation9 + $0x1008] sm:$0xff] }
 0x301   :  { %9181 = vmatprep.subr.bf16.mxu0 %v12754_v32  ;;  %9353 = vmatprep.subr.bf16.mxu1 %v12756_v56  ;;  %v3413_v32 = vld [vmem:[#allocation9 + $0x1048] sm:$0xff]  ;;  %v12849_v56 = vcombine.low %v3388_v21, %v3396_v22  ;;  %v12866_v34 = vcombine.high %v3404_v26, %v3412_v11 }
 0x302   :  { %v12868_v35 = vcombine.high %v3405_v30, %v3413_v32  ;;  %v12867_v52 = vcombine.low %v3405_v30, %v3413_v32  ;;  %v3516_v32 = vld [vmem:[#allocation9 + $0x1380] sm:$0xff] }
 0x304   :  { %9182 = vmatpush1.bf16.msra.mxu0 %v12753_v37  ;;  %9354 = vmatpush1.bf16.msra.mxu1 %v12755_v38  ;;  %v3428_v37 = vld [vmem:[#allocation9 + $0x10c0] sm:$0xff]  ;;  %v3421_v38 = vld [vmem:[#allocation9 + $0x1088] sm:$0xff] }
 0x305   :  { %9183 = vmatprep.subr.bf16.mxu0 %v12770_v39  ;;  %9355 = vmatprep.subr.bf16.mxu1 %v12772_v40  ;;  %v3429_v39 = vld [vmem:[#allocation9 + $0x10c8] sm:$0xff]  ;;  %v12865_v40 = vcombine.low %v3404_v26, %v3412_v11  ;;  %v12882_v43 = vcombine.high %v3420_v36, %v3428_v37 }
 0x306   :  { %v12884_v41 = vcombine.high %v3421_v38, %v3429_v39  ;;  %v12883_v53 = vcombine.low %v3421_v38, %v3429_v39  ;;  %v3532_v39 = vld [vmem:[#allocation9 + $0x1400] sm:$0xff] }
 0x308   :  { %9184 = vmatpush1.bf16.msra.mxu0 %v12769_v47  ;;  %9356 = vmatpush1.bf16.msra.mxu1 %v12771_v49  ;;  %v3444_v47 = vld [vmem:[#allocation9 + $0x1140] sm:$0xff]  ;;  %v3437_v49 = vld [vmem:[#allocation9 + $0x1108] sm:$0xff] }
 0x309   :  { %9185 = vmatprep.subr.bf16.mxu0 %v12786_v50  ;;  %9357 = vmatprep.subr.bf16.mxu1 %v12788_v51  ;;  %v3445_v50 = vld [vmem:[#allocation9 + $0x1148] sm:$0xff]  ;;  %v12881_v51 = vcombine.low %v3420_v36, %v3428_v37  ;;  %v12898_v54 = vcombine.high %v3436_v42, %v3444_v47 }
 0x30a   :  { %v12900_v55 = vcombine.high %v3437_v49, %v3445_v50  ;;  %v12899_v0 = vcombine.low %v3437_v49, %v3445_v50  ;;  %v3548_v50 = vld [vmem:[#allocation9 + $0x1480] sm:$0xff] }
 0x30c   :  { %9186 = vmatpush1.bf16.msra.mxu0 %v12785_v58  ;;  %9358 = vmatpush1.bf16.msra.mxu1 %v12787_v60  ;;  %v3460_v58 = vld [vmem:[#allocation9 + $0x11c0] sm:$0xff]  ;;  %v3453_v60 = vld [vmem:[#allocation9 + $0x1188] sm:$0xff] }
 0x30d   :  { %9187 = vmatprep.subr.bf16.mxu0 %v12802_v61  ;;  %9359 = vmatprep.subr.bf16.mxu1 %v12804_v63  ;;  %v3461_v61 = vld [vmem:[#allocation9 + $0x11c8] sm:$0xff]  ;;  %v12897_v63 = vcombine.low %v3436_v42, %v3444_v47  ;;  %v12914_v1 = vcombine.high %v3452_v57, %v3460_v58 }
 0x30e   :  { %v12916_v2 = vcombine.high %v3453_v60, %v3461_v61  ;;  %v12915_v8 = vcombine.low %v3453_v60, %v3461_v61  ;;  %v3564_v61 = vld [vmem:[#allocation9 + $0x1500] sm:$0xff] }
 0x310   :  { %9188 = vmatpush1.bf16.msra.mxu0 %v12801_v4  ;;  %9360 = vmatpush1.bf16.msra.mxu1 %v12803_v5  ;;  %v3476_v4 = vld [vmem:[#allocation9 + $0x1240] sm:$0xff]  ;;  %v3469_v5 = vld [vmem:[#allocation9 + $0x1208] sm:$0xff] }
 0x311   :  { %9189 = vmatprep.subr.bf16.mxu0 %v12818_v6  ;;  %9361 = vmatprep.subr.bf16.mxu1 %v12820_v7  ;;  %v3477_v6 = vld [vmem:[#allocation9 + $0x1248] sm:$0xff]  ;;  %v12913_v7 = vcombine.low %v3452_v57, %v3460_v58  ;;  %v12930_v9 = vcombine.high %v3468_v3, %v3476_v4 }
 0x312   :  { %v12932_v10 = vcombine.high %v3469_v5, %v3477_v6  ;;  %v12931_v21 = vcombine.low %v3469_v5, %v3477_v6  ;;  %v3580_v6 = vld [vmem:[#allocation9 + $0x1580] sm:$0xff] }
 0x314   :  { %9190 = vmatpush1.bf16.msra.mxu0 %v12817_v15  ;;  %9362 = vmatpush1.bf16.msra.mxu1 %v12819_v16  ;;  %v3492_v15 = vld [vmem:[#allocation9 + $0x12c0] sm:$0xff]  ;;  %v3485_v16 = vld [vmem:[#allocation9 + $0x1288] sm:$0xff] }
 0x315   :  { %9191 = vmatprep.subr.bf16.mxu0 %v12834_v19  ;;  %9363 = vmatprep.subr.bf16.mxu1 %v12836_v20  ;;  %v3493_v19 = vld [vmem:[#allocation9 + $0x12c8] sm:$0xff]  ;;  %v12929_v20 = vcombine.low %v3468_v3, %v3476_v4  ;;  %v12946_v22 = vcombine.high %v3484_v12, %v3492_v15 }
 0x316   :  { %v12948_v23 = vcombine.high %v3485_v16, %v3493_v19  ;;  %v12947_v26 = vcombine.low %v3485_v16, %v3493_v19  ;;  %v3596_v19 = vld [vmem:[#allocation9 + $0x1600] sm:$0xff] }
 0x318   :  { %9192 = vmatpush1.bf16.msra.mxu0 %v12833_v28  ;;  %9364 = vmatpush1.bf16.msra.mxu1 %v12835_v29  ;;  %v3508_v28 = vld [vmem:[#allocation9 + $0x1340] sm:$0xff]  ;;  %v3501_v29 = vld [vmem:[#allocation9 + $0x1308] sm:$0xff] }
 0x319   :  { %9193 = vmatprep.subr.bf16.mxu0 %v12850_v24  ;;  %9365 = vmatprep.subr.bf16.mxu1 %v12852_v25  ;;  %v3509_v24 = vld [vmem:[#allocation9 + $0x1348] sm:$0xff]  ;;  %v12945_v25 = vcombine.low %v3484_v12, %v3492_v15  ;;  %v12962_v11 = vcombine.high %v3500_v27, %v3508_v28 }
 0x31a   :  { %v12964_v30 = vcombine.high %v3501_v29, %v3509_v24  ;;  %v12963_v36 = vcombine.low %v3501_v29, %v3509_v24  ;;  %v3612_v24 = vld [vmem:[#allocation9 + $0x1680] sm:$0xff] }
 0x31c   :  { %9194 = vmatpush1.bf16.msra.mxu0 %v12849_v56  ;;  %9366 = vmatpush1.bf16.msra.mxu1 %v12851_v33  ;;  %v3524_v56 = vld [vmem:[#allocation9 + $0x13c0] sm:$0xff]  ;;  %v3517_v33 = vld [vmem:[#allocation9 + $0x1388] sm:$0xff] }
 0x31d   :  { %9206 = vmatprep.subr.bf16.mxu0 %v12866_v34  ;;  %9378 = vmatprep.subr.bf16.mxu1 %v12868_v35  ;;  %v3525_v34 = vld [vmem:[#allocation9 + $0x13c8] sm:$0xff]  ;;  %v12961_v35 = vcombine.low %v3500_v27, %v3508_v28  ;;  %v12978_v37 = vcombine.high %v3516_v32, %v3524_v56 }
 0x31e   :  { %v12980_v38 = vcombine.high %v3517_v33, %v3525_v34  ;;  %v12979_v42 = vcombine.low %v3517_v33, %v3525_v34  ;;  %v14581_v34 = vsub.s32 5, %v14490_v45 }
 0x31f   :  { %9196 = vmatmul.mubr.bf16.vlgmr.msra.gmra.mrb[12].mxu0 %v14556_v14  ;;  %9368 = vmatmul.mubr.bf16.vlgmr.msra.gmra.mrb[12].mxu1 %v14556_v14 }
 0x320   :  { %9207 = vmatpush1.bf16.msra.mxu0 %v12865_v40  ;;  %9379 = vmatpush1.bf16.msra.mxu1 %v12867_v52  ;;  %v3540_v40 = vld [vmem:[#allocation9 + $0x1440] sm:$0xff]  ;;  %v3533_v52 = vld [vmem:[#allocation9 + $0x1408] sm:$0xff] }
 0x321   :  { %9208 = vmatprep.subr.bf16.mxu0 %v12882_v43  ;;  %9380 = vmatprep.subr.bf16.mxu1 %v12884_v41  ;;  %v3541_v43 = vld [vmem:[#allocation9 + $0x1448] sm:$0xff]  ;;  %v12977_v41 = vcombine.low %v3516_v32, %v3524_v56  ;;  %v12994_v47 = vcombine.high %v3532_v39, %v3540_v40  ;;  %v14578_v32 = vsub.s32 6, %v14490_v45 }
 0x322   :  { %v12996_v49 = vcombine.high %v3533_v52, %v3541_v43  ;;  %v12995_v57 = vcombine.low %v3533_v52, %v3541_v43  ;;  %v3637_v52 = vld [vmem:[#allocation9 + $0x1748] sm:$0xff] }
 0x324   :  { %9209 = vmatpush1.bf16.msra.mxu0 %v12881_v51  ;;  %9381 = vmatpush1.bf16.msra.mxu1 %v12883_v53  ;;  %v3556_v51 = vld [vmem:[#allocation9 + $0x14c0] sm:$0xff]  ;;  %v3549_v53 = vld [vmem:[#allocation9 + $0x1488] sm:$0xff] }
 0x325   :  { %9210 = vmatprep.subr.bf16.mxu0 %v12898_v54  ;;  %9382 = vmatprep.subr.bf16.mxu1 %v12900_v55  ;;  %v3557_v54 = vld [vmem:[#allocation9 + $0x14c8] sm:$0xff]  ;;  %v12993_v55 = vcombine.low %v3532_v39, %v3540_v40  ;;  %v13010_v58 = vcombine.high %v3548_v50, %v3556_v51  ;;  %v3636_v39 = vld [vmem:[#allocation9 + $0x1740] sm:$0xff] }
 0x326   :  { %v13012_v60 = vcombine.high %v3549_v53, %v3557_v54  ;;  %v13011_v3 = vcombine.low %v3549_v53, %v3557_v54  ;;  %v3629_v40 = vld [vmem:[#allocation9 + $0x1708] sm:$0xff]  ;;  %v14594_v53 = vld [vmem:[#allocation9 + $0x1780] sm:$0xff] }
 0x327   :  { %v14596_v54 = vld [vmem:[#allocation9 + $0x17c0] sm:$0xff] }
 0x328   :  { %9211 = vmatpush1.bf16.msra.mxu0 %v12897_v63  ;;  %9383 = vmatpush1.bf16.msra.mxu1 %v12899_v0  ;;  %v3572_v63 = vld [vmem:[#allocation9 + $0x1540] sm:$0xff]  ;;  %v3565_v0 = vld [vmem:[#allocation9 + $0x1508] sm:$0xff] }
 0x329   :  { %9212 = vmatprep.subr.bf16.mxu0 %v12914_v1  ;;  %9384 = vmatprep.subr.bf16.mxu1 %v12916_v2  ;;  %v3573_v1 = vld [vmem:[#allocation9 + $0x1548] sm:$0xff]  ;;  %v13009_v2 = vcombine.low %v3548_v50, %v3556_v51  ;;  %v13026_v4 = vcombine.high %v3564_v61, %v3572_v63  ;;  %v13092_v51 = vcombine.high %v3629_v40, %v3637_v52 }
 0x32a   :  { %v13028_v5 = vcombine.high %v3565_v0, %v3573_v1  ;;  %v13027_v12 = vcombine.low %v3565_v0, %v3573_v1  ;;  %v13091_v1 = vcombine.low %v3629_v40, %v3637_v52 }
 0x32c   :  { %9213 = vmatpush1.bf16.msra.mxu0 %v12913_v7  ;;  %9385 = vmatpush1.bf16.msra.mxu1 %v12915_v8  ;;  %v3588_v7 = vld [vmem:[#allocation9 + $0x15c0] sm:$0xff]  ;;  %v3581_v8 = vld [vmem:[#allocation9 + $0x1588] sm:$0xff] }
 0x32d   :  { %9214 = vmatprep.subr.bf16.mxu0 %v12930_v9  ;;  %9386 = vmatprep.subr.bf16.mxu1 %v12932_v10  ;;  %v3589_v9 = vld [vmem:[#allocation9 + $0x15c8] sm:$0xff]  ;;  %v13025_v10 = vcombine.low %v3564_v61, %v3572_v63  ;;  %v13042_v15 = vcombine.high %v3580_v6, %v3588_v7 }
 0x32e   :  { %v13044_v16 = vcombine.high %v3581_v8, %v3589_v9  ;;  %v13043_v27 = vcombine.low %v3581_v8, %v3589_v9 }
 0x330   :  { %9215 = vmatpush1.bf16.msra.mxu0 %v12929_v20  ;;  %9387 = vmatpush1.bf16.msra.mxu1 %v12931_v21  ;;  %v3604_v20 = vld [vmem:[#allocation9 + $0x1640] sm:$0xff]  ;;  %v3597_v21 = vld [vmem:[#allocation9 + $0x1608] sm:$0xff] }
 0x331   :  { %9216 = vmatprep.subr.bf16.mxu0 %v12946_v22  ;;  %9388 = vmatprep.subr.bf16.mxu1 %v12948_v23  ;;  %v3605_v22 = vld [vmem:[#allocation9 + $0x1648] sm:$0xff]  ;;  %v13041_v23 = vcombine.low %v3580_v6, %v3588_v7  ;;  %v13058_v28 = vcombine.high %v3596_v19, %v3604_v20  ;;  %v13057_v56 = vcombine.low %v3596_v19, %v3604_v20  ;;  %v14600_v6 = vld [vmem:[#allocation9 + $0x1800] sm:$0xff] }
 0x332   :  { %v13060_v29 = vcombine.high %v3597_v21, %v3605_v22  ;;  %v13059_v33 = vcombine.low %v3597_v21, %v3605_v22  ;;  %v3661_v19 = vld [vmem:[#allocation9 + $0x1808] sm:$0xff] }
 0x334   :  { %9217 = vmatpush1.bf16.msra.mxu0 %v12945_v25  ;;  %9389 = vmatpush1.bf16.msra.mxu1 %v12947_v26  ;;  %v3620_v25 = vld [vmem:[#allocation9 + $0x16c0] sm:$0xff]  ;;  %v3613_v26 = vld [vmem:[#allocation9 + $0x1688] sm:$0xff] }
 0x335   :  { %9218 = vmatprep.subr.bf16.mxu0 %v12962_v11  ;;  %9390 = vmatprep.subr.bf16.mxu1 %v12964_v30  ;;  %v3621_v11 = vld [vmem:[#allocation9 + $0x16c8] sm:$0xff]  ;;  %v14575_v30 = vsub.s32 4, %v14490_v45 }
 0x337   :  { %v1207_v43 = vrot.slane %v14544_v31, %v14575_v30 }
 0x338   :  { %9219 = vmatpush1.bf16.msra.mxu0 %v12961_v35  ;;  %9391 = vmatpush1.bf16.msra.mxu1 %v12963_v36  ;;  %v13074_v35 = vcombine.high %v3612_v24, %v3620_v25  ;;  %v13076_v36 = vcombine.high %v3613_v26, %v3621_v11 }
 0x339   :  { %9220 = vmatprep.subr.bf16.mxu0 %v12978_v37  ;;  %9392 = vmatprep.subr.bf16.mxu1 %v12980_v38  ;;  %v14584_v37 = vsub.s32 7, %v14490_v45  ;;  %v3628_v38 = vld [vmem:[#allocation9 + $0x1700] sm:$0xff] }
 0x33a   :  { %v13090_v50 = vcombine.high %v3628_v38, %v3636_v39  ;;  %v13089_v0 = vcombine.low %v3628_v38, %v3636_v39 }
 0x33b   :  { %v1219_v45 = vrot.slane %v14544_v31, %v14584_v37 }
 0x33c   :  { %9221 = vmatpush1.bf16.msra.mxu0 %v12977_v41  ;;  %9393 = vmatpush1.bf16.msra.mxu1 %v12979_v42  ;;  %v1215_v41 = vrot.slane %v14544_v31, %v14578_v32  ;;  %v13073_v42 = vcombine.low %v3612_v24, %v3620_v25 }
 0x33d   :  { %9222 = vmatprep.subr.bf16.mxu0 %v12994_v47  ;;  %9394 = vmatprep.subr.bf16.mxu1 %v12996_v49  ;;  %v13075_v47 = vcombine.low %v3613_v26, %v3621_v11  ;;  %v1211_v49 = vrot.slane %v14544_v31, %v14581_v34  ;;  %v13105_v26 = vcombine.low %v14594_v53, %v14596_v54 }
 0x340   :  { %9223 = vmatpush1.bf16.msra.mxu0 %v12993_v55  ;;  %9395 = vmatpush1.bf16.msra.mxu1 %v12995_v57  ;;  %v3645_v57 = vld [vmem:[#allocation9 + $0x1788] sm:$0xff] }
 0x341   :  { %9224 = vmatprep.subr.bf16.mxu0 %v13010_v58  ;;  %9396 = vmatprep.subr.bf16.mxu1 %v13012_v60  ;;  %v3653_v58 = vld [vmem:[#allocation9 + $0x17c8] sm:$0xff] }
 0x344   :  { %9225 = vmatpush1.bf16.msra.mxu0 %v13009_v2  ;;  %9397 = vmatpush1.bf16.msra.mxu1 %v13011_v3 }
 0x345   :  { %9226 = vmatprep.subr.bf16.mxu0 %v13026_v4  ;;  %9398 = vmatprep.subr.bf16.mxu1 %v13028_v5  ;;  %v13106_v5 = vcombine.high %v14594_v53, %v14596_v54  ;;  %v3684_v53 = vld [vmem:[#allocation9 + $0x18c0] sm:$0xff]  ;;  %v3677_v54 = vld [vmem:[#allocation9 + $0x1888] sm:$0xff] }
 0x348   :  { %9227 = vmatpush1.bf16.msra.mxu0 %v13025_v10  ;;  %9399 = vmatpush1.bf16.msra.mxu1 %v13027_v12 }
 0x349   :  { %9228 = vmatprep.subr.bf16.mxu0 %v13042_v15  ;;  %9400 = vmatprep.subr.bf16.mxu1 %v13044_v16  ;;  %v13108_v15 = vcombine.high %v3645_v57, %v3653_v58  ;;  %v3668_v16 = vld [vmem:[#allocation9 + $0x1840] sm:$0xff] }
 0x34c   :  { %9229 = vmatpush1.bf16.msra.mxu0 %v13041_v23  ;;  %9401 = vmatpush1.bf16.msra.mxu1 %v13043_v27 }
 0x34d   :  { %9230 = vmatprep.subr.bf16.mxu0 %v13058_v28  ;;  %9402 = vmatprep.subr.bf16.mxu1 %v13060_v29  ;;  %v3669_v28 = vld [vmem:[#allocation9 + $0x1848] sm:$0xff] }
 0x34e   :  { %v13124_v40 = vcombine.high %v3661_v19, %v3669_v28 }
 0x350   :  { %9231 = vmatpush1.bf16.msra.mxu0 %v13057_v56  ;;  %9403 = vmatpush1.bf16.msra.mxu1 %v13059_v33  ;;  %v13107_v33 = vcombine.low %v3645_v57, %v3653_v58 }
 0x351   :  { %9232 = vmatprep.subr.bf16.mxu0 %v13074_v35  ;;  %9404 = vmatprep.subr.bf16.mxu1 %v13076_v36  ;;  %v13122_v35 = vcombine.high %v14600_v6, %v3668_v16 }
 0x352   :  { %v2757_v55 = vpop.f32.mrb[8].mxu0 }
 0x353   :  { %v13698_v60 = vadd.f32 %v2757_v55, %v1207_v43  ;;  %v2843_v61 = vpop.f32.mrb[8].mxu1  ;;  %v2759_v63 = vpop.f32.mrb[9].mxu0  ;;  %v3685_v55 = vld [vmem:[#allocation9 + $0x18c8] sm:$0xff] }
 0x354   :  { %v13702_v2 = vadd.f32 %v2843_v61, %v1215_v41  ;;  %v13699_v3 = vadd.f32 %v2759_v63, %v1211_v49  ;;  %v2845_v4 = vpop.f32.mrb[9].mxu1  ;;  %9233 = vmatpush1.bf16.msra.mxu0 %v13073_v42  ;;  %9405 = vmatpush1.bf16.msra.mxu1 %v13075_v47  ;;  %v2761_v31 = vpop.f32.mrb[10].mxu0  ;;  %v3676_v47 = vld [vmem:[#allocation9 + $0x1880] sm:$0xff] }
 0x355   :  { %v2856_v7 = vmul.f32 0.2, %v13698_v60  ;;  %v13703_v8 = vadd.f32 %v2845_v4, %v1219_v45  ;;  %v13700_v9 = vadd.f32 %v2761_v31, %v1207_v43  ;;  %v2847_v10 = vpop.f32.mrb[10].mxu1  ;;  %v2763_v12 = vpop.f32.mrb[11].mxu0  ;;  %9234 = vmatprep.subr.bf16.mxu0 %v13090_v50  ;;  %9406 = vmatprep.subr.bf16.mxu1 %v13092_v51  ;;  %v13121_v51 = vcombine.low %v14600_v6, %v3668_v16  ;;  %v3692_v63 = vld [vmem:[#allocation9 + $0x1900] sm:$0xff]  ;;  %v3701_v4 = vld [vmem:[#allocation9 + $0x1948] sm:$0xff] }
 0x356   :  { %v2858_v20 = vmul.f32 0.2, %v13702_v2  ;;  %v2857_v21 = vmul.f32 0.2, %v13699_v3  ;;  %v13704_v22 = vadd.f32 %v2847_v10, %v1215_v41  ;;  %v13701_v23 = vadd.f32 %v2763_v12, %v1211_v49  ;;  %v2849_v27 = vpop.f32.mrb[11].mxu1  ;;  %v3709_v10 = vld [vmem:[#allocation9 + $0x1988] sm:$0xff] }
 0x357   :  { %v2859_v29 = vmul.f32 0.2, %v13703_v8  ;;  %v2864_v24 = vmul.f32 0.2, %v13700_v9  ;;  %v13705_v25 = vadd.f32 %v2849_v27, %v1219_v45  ;;  %v2872_v36 = vmax.f32 %v13698_v60, %v2856_v7  ;;  %v3717_v12 = vld [vmem:[#allocation9 + $0x19c8] sm:$0xff] }
 0x358   :  { %v2866_v11 = vmul.f32 0.2, %v13704_v22  ;;  %v2865_v56 = vmul.f32 0.2, %v13701_v23  ;;  %9235 = vmatpush1.bf16.msra.mxu0 %v13089_v0  ;;  %9407 = vmatpush1.bf16.msra.mxu1 %v13091_v1  ;;  %v2874_v52 = vmax.f32 %v13702_v2, %v2858_v20  ;;  %v2873_v43 = vmax.f32 %v13699_v3, %v2857_v21  ;;  %v3700_v2 = vld [vmem:[#allocation9 + $0x1940] sm:$0xff]  ;;  %v3693_v3 = vld [vmem:[#allocation9 + $0x1908] sm:$0xff] }
 0x359   :  { %v2880_v38 = vmax.f32 %v13700_v9, %v2864_v24  ;;  %v2867_v39 = vmul.f32 0.2, %v13705_v25  ;;  %9236 = vmatprep.subr.bf16.mxu0 %v13106_v5  ;;  %9408 = vmatprep.subr.bf16.mxu1 %v13108_v15  ;;  %v2875_v49 = vmax.f32 %v13703_v8, %v2859_v29  ;;  %v13123_v60 = vcombine.low %v3661_v19, %v3669_v28  ;;  %v3708_v8 = vld [vmem:[#allocation9 + $0x1980] sm:$0xff]  ;;  %v3733_v27 = vld [vmem:[#allocation9 + $0x1a48] sm:$0xff] }
 0x35a   :  { %v2882_v41 = vmax.f32 %v13704_v22, %v2866_v11  ;;  %v2881_v42 = vmax.f32 %v13701_v23, %v2865_v56  ;;  %v13138_v0 = vcombine.high %v3676_v47, %v3684_v53  ;;  %v13140_v1 = vcombine.high %v3677_v54, %v3685_v55  ;;  %v3716_v9 = vld [vmem:[#allocation9 + $0x19c0] sm:$0xff]  ;;  %v3725_v23 = vld [vmem:[#allocation9 + $0x1a08] sm:$0xff] }
 0x35b   :  { %v14605_v45 = vpack.c.bf16 %v2880_v38, %v2872_v36  ;;  %v2883_v50 = vmax.f32 %v13705_v25, %v2867_v39  ;;  %v13137_v31 = vcombine.low %v3676_v47, %v3684_v53  ;;  %v13139_v5 = vcombine.low %v3677_v54, %v3685_v55  ;;  %v3724_v21 = vld [vmem:[#allocation9 + $0x1a00] sm:$0xff]  ;;  %v3741_v56 = vld [vmem:[#allocation9 + $0x1a88] sm:$0xff] }
 0x35c   :  { %v14608_v57 = vpack.c.bf16 %v2882_v41, %v2874_v52  ;;  %v14610_v58 = vpack.c.bf16 %v2881_v42, %v2873_v43  ;;  %9237 = vmatpush1.bf16.msra.mxu0 %v13105_v26  ;;  %9409 = vmatpush1.bf16.msra.mxu1 %v13107_v33  ;;  %v13154_v6 = vcombine.high %v3692_v63, %v3700_v2  ;;  %v3732_v22 = vld [vmem:[#allocation9 + $0x1a40] sm:$0xff]  ;;  %v3749_v33 = vld [vmem:[#allocation9 + $0x1ac8] sm:$0xff] }
 0x35d   :  { %v14612_v61 = vpack.c.bf16 %v2883_v50, %v2875_v49  ;;  %9249 = vmatprep.subr.bf16.mxu0 %v13122_v35  ;;  %9421 = vmatprep.subr.bf16.mxu1 %v13124_v40  ;;  %v13156_v7 = vcombine.high %v3693_v3, %v3701_v4  ;;  %v13153_v15 = vcombine.low %v3692_v63, %v3700_v2  ;;  %v3740_v26 = vld [vmem:[#allocation9 + $0x1a80] sm:$0xff]  ;;  %v3757_v43 = vld [vmem:[#allocation9 + $0x1b08] sm:$0xff] }
 0x35e   :  { %9238 = vmatprep.mubr.bf16.mxu0 %v14610_v58  ;;  %9410 = vmatprep.mubr.bf16.mxu1 %v14610_v58  ;;  %v13155_v16 = vcombine.low %v3693_v3, %v3701_v4  ;;  %v13170_v19 = vcombine.high %v3708_v8, %v3716_v9  ;;  %v13172_v20 = vcombine.high %v3709_v10, %v3717_v12  ;;  %v3748_v11 = vld [vmem:[#allocation9 + $0x1ac0] sm:$0xff]  ;;  %v3765_v41 = vld [vmem:[#allocation9 + $0x1b48] sm:$0xff] }
 0x35f   :  { %9239 = vmatmul.mubr.bf16.vlgmr.msra.gmra.mrb[12].mxu0 %v14605_v45  ;;  %9411 = vmatmul.mubr.bf16.vlgmr.msra.gmra.mrb[12].mxu1 %v14605_v45  ;;  %v13169_v28 = vcombine.low %v3708_v8, %v3716_v9  ;;  %v13171_v29 = vcombine.low %v3709_v10, %v3717_v12  ;;  %v13186_v24 = vcombine.high %v3724_v21, %v3732_v22  ;;  %v3756_v40 = vld [vmem:[#allocation9 + $0x1b00] sm:$0xff]  ;;  %v3773_v54 = vld [vmem:[#allocation9 + $0x1b88] sm:$0xff] }
 0x360   :  { %9250 = vmatpush1.bf16.msra.mxu0 %v13121_v51  ;;  %9422 = vmatpush1.bf16.msra.mxu1 %v13123_v60  ;;  %v13188_v25 = vcombine.high %v3725_v23, %v3733_v27  ;;  %v13185_v35 = vcombine.low %v3724_v21, %v3732_v22  ;;  %v13187_v36 = vcombine.low %v3725_v23, %v3733_v27  ;;  %v3764_v52 = vld [vmem:[#allocation9 + $0x1b40] sm:$0xff]  ;;  %v3781_v55 = vld [vmem:[#allocation9 + $0x1bc8] sm:$0xff] }
 0x361   :  { %9281 = vmatprep.mubr.bf16.mxu0 %v14612_v61  ;;  %9453 = vmatprep.mubr.bf16.mxu1 %v14612_v61  ;;  %v13202_v38 = vcombine.high %v3740_v26, %v3748_v11  ;;  %v13204_v39 = vcombine.high %v3741_v56, %v3749_v33  ;;  %v13201_v42 = vcombine.low %v3740_v26, %v3748_v11  ;;  %v3772_v51 = vld [vmem:[#allocation9 + $0x1b80] sm:$0xff]  ;;  %v3789_v4 = vld [vmem:[#allocation9 + $0x1c08] sm:$0xff] }
 0x362   :  { %9251 = vmatprep.subr.bf16.mxu0 %v13138_v0  ;;  %9423 = vmatprep.subr.bf16.mxu1 %v13140_v1  ;;  %v13203_v47 = vcombine.low %v3741_v56, %v3749_v33  ;;  %v13218_v49 = vcombine.high %v3756_v40, %v3764_v52  ;;  %v13220_v50 = vcombine.high %v3757_v43, %v3765_v41  ;;  %v3780_v53 = vld [vmem:[#allocation9 + $0x1bc0] sm:$0xff]  ;;  %v3805_v12 = vld [vmem:[#allocation9 + $0x1c88] sm:$0xff] }
 0x363   :  { %v13217_v60 = vcombine.low %v3756_v40, %v3764_v52  ;;  %v13219_v63 = vcombine.low %v3757_v43, %v3765_v41  ;;  %v13234_v0 = vcombine.high %v3772_v51, %v3780_v53  ;;  %v13236_v1 = vcombine.high %v3773_v54, %v3781_v55  ;;  %v3788_v2 = vld [vmem:[#allocation9 + $0x1c00] sm:$0xff]  ;;  %v3821_v27 = vld [vmem:[#allocation9 + $0x1d08] sm:$0xff] }
 0x364   :  { %9252 = vmatpush1.bf16.msra.mxu0 %v13137_v31  ;;  %9424 = vmatpush1.bf16.msra.mxu1 %v13139_v5  ;;  %v3796_v3 = vld [vmem:[#allocation9 + $0x1c40] sm:$0xff]  ;;  %v3797_v31 = vld [vmem:[#allocation9 + $0x1c48] sm:$0xff]  ;;  %v13233_v5 = vcombine.low %v3772_v51, %v3780_v53 }
 0x365   :  { %9253 = vmatprep.subr.bf16.mxu0 %v13154_v6  ;;  %9425 = vmatprep.subr.bf16.mxu1 %v13156_v7  ;;  %v13235_v6 = vcombine.low %v3773_v54, %v3781_v55  ;;  %v13250_v7 = vcombine.high %v3788_v2, %v3796_v3  ;;  %v13252_v8 = vcombine.high %v3789_v4, %v3797_v31  ;;  %v3804_v9 = vld [vmem:[#allocation9 + $0x1c80] sm:$0xff]  ;;  %v3837_v33 = vld [vmem:[#allocation9 + $0x1d88] sm:$0xff] }
 0x366   :  { %v3812_v10 = vld [vmem:[#allocation9 + $0x1cc0] sm:$0xff]  ;;  %v3853_v41 = vld [vmem:[#allocation9 + $0x1e08] sm:$0xff] }
 0x367   :  { %v3820_v22 = vld [vmem:[#allocation9 + $0x1d00] sm:$0xff]  ;;  %v3869_v55 = vld [vmem:[#allocation9 + $0x1e88] sm:$0xff] }
 0x368   :  { %9254 = vmatpush1.bf16.msra.mxu0 %v13153_v15  ;;  %9426 = vmatpush1.bf16.msra.mxu1 %v13155_v16  ;;  %v3813_v15 = vld [vmem:[#allocation9 + $0x1cc8] sm:$0xff]  ;;  %v13249_v16 = vcombine.low %v3788_v2, %v3796_v3  ;;  %v3828_v23 = vld [vmem:[#allocation9 + $0x1d40] sm:$0xff] }
 0x369   :  { %9255 = vmatprep.subr.bf16.mxu0 %v13170_v19  ;;  %9427 = vmatprep.subr.bf16.mxu1 %v13172_v20  ;;  %v13251_v19 = vcombine.low %v3789_v4, %v3797_v31  ;;  %v13266_v20 = vcombine.high %v3804_v9, %v3812_v10  ;;  %v13268_v21 = vcombine.high %v3805_v12, %v3813_v15  ;;  %v3836_v11 = vld [vmem:[#allocation9 + $0x1d80] sm:$0xff]  ;;  %v3885_v31 = vld [vmem:[#allocation9 + $0x1f08] sm:$0xff] }
 0x36a   :  { %v3844_v56 = vld [vmem:[#allocation9 + $0x1dc0] sm:$0xff] }
 0x36b   :  { %v3852_v52 = vld [vmem:[#allocation9 + $0x1e00] sm:$0xff] }
 0x36c   :  { %9256 = vmatpush1.bf16.msra.mxu0 %v13169_v28  ;;  %9428 = vmatpush1.bf16.msra.mxu1 %v13171_v29  ;;  %v3829_v28 = vld [vmem:[#allocation9 + $0x1d48] sm:$0xff]  ;;  %v13265_v29 = vcombine.low %v3804_v9, %v3812_v10  ;;  %v3860_v43 = vld [vmem:[#allocation9 + $0x1e40] sm:$0xff] }
 0x36d   :  { %9257 = vmatprep.subr.bf16.mxu0 %v13186_v24  ;;  %9429 = vmatprep.subr.bf16.mxu1 %v13188_v25  ;;  %v13267_v24 = vcombine.low %v3805_v12, %v3813_v15  ;;  %v13282_v25 = vcombine.high %v3820_v22, %v3828_v23  ;;  %v13284_v26 = vcombine.high %v3821_v27, %v3829_v28  ;;  %v3868_v53 = vld [vmem:[#allocation9 + $0x1e80] sm:$0xff]  ;;  %v3901_v15 = vld [vmem:[#allocation9 + $0x1f88] sm:$0xff] }
 0x36e   :  { %v3876_v54 = vld [vmem:[#allocation9 + $0x1ec0] sm:$0xff] }
 0x36f   :  { %v3884_v3 = vld [vmem:[#allocation9 + $0x1f00] sm:$0xff] }
 0x370   :  { %9258 = vmatpush1.bf16.msra.mxu0 %v13185_v35  ;;  %9430 = vmatpush1.bf16.msra.mxu1 %v13187_v36  ;;  %v3845_v35 = vld [vmem:[#allocation9 + $0x1dc8] sm:$0xff]  ;;  %v13281_v36 = vcombine.low %v3820_v22, %v3828_v23  ;;  %v3892_v4 = vld [vmem:[#allocation9 + $0x1f40] sm:$0xff]  ;;  %v2894_v23 = vld [vmem:[#allocation9 + $0x10] sm:$0xff] }
 0x371   :  { %9259 = vmatprep.subr.bf16.mxu0 %v13202_v38  ;;  %9431 = vmatprep.subr.bf16.mxu1 %v13204_v39  ;;  %v13283_v38 = vcombine.low %v3821_v27, %v3829_v28  ;;  %v13298_v39 = vcombine.high %v3836_v11, %v3844_v56  ;;  %v13300_v40 = vcombine.high %v3837_v33, %v3845_v35  ;;  %v3900_v10 = vld [vmem:[#allocation9 + $0x1f80] sm:$0xff]  ;;  %v2902_v27 = vld [vmem:[#allocation9 + $0x50] sm:$0xff]  ;;  %v2895_v28 = vld [vmem:[#allocation9 + $0x18] sm:$0xff] }
 0x372   :  { %v3908_v12 = vld [vmem:[#allocation9 + $0x1fc0] sm:$0xff] }
 0x374   :  { %9260 = vmatpush1.bf16.msra.mxu0 %v13201_v42  ;;  %9432 = vmatpush1.bf16.msra.mxu1 %v13203_v47  ;;  %v3861_v42 = vld [vmem:[#allocation9 + $0x1e48] sm:$0xff]  ;;  %v13297_v47 = vcombine.low %v3836_v11, %v3844_v56  ;;  %v2910_v56 = vld [vmem:[#allocation9 + $0x90] sm:$0xff] }
 0x375   :  { %9261 = vmatprep.subr.bf16.mxu0 %v13218_v49  ;;  %9433 = vmatprep.subr.bf16.mxu1 %v13220_v50  ;;  %v13299_v49 = vcombine.low %v3837_v33, %v3845_v35  ;;  %v13314_v50 = vcombine.high %v3852_v52, %v3860_v43  ;;  %v13316_v51 = vcombine.high %v3853_v41, %v3861_v42  ;;  %v2918_v33 = vld [vmem:[#allocation9 + $0xd0] sm:$0xff]  ;;  %v2911_v35 = vld [vmem:[#allocation9 + $0x98] sm:$0xff] }
 0x378   :  { %9262 = vmatpush1.bf16.msra.mxu0 %v13217_v60  ;;  %9434 = vmatpush1.bf16.msra.mxu1 %v13219_v63  ;;  %v3877_v60 = vld [vmem:[#allocation9 + $0x1ec8] sm:$0xff]  ;;  %v13313_v63 = vcombine.low %v3852_v52, %v3860_v43  ;;  %v2926_v43 = vld [vmem:[#allocation9 + $0x110] sm:$0xff] }
 0x379   :  { %9263 = vmatprep.subr.bf16.mxu0 %v13234_v0  ;;  %9435 = vmatprep.subr.bf16.mxu1 %v13236_v1  ;;  %v13315_v0 = vcombine.low %v3853_v41, %v3861_v42  ;;  %v13330_v1 = vcombine.high %v3868_v53, %v3876_v54  ;;  %v13332_v2 = vcombine.high %v3869_v55, %v3877_v60  ;;  %v2934_v41 = vld [vmem:[#allocation9 + $0x150] sm:$0xff]  ;;  %v2927_v42 = vld [vmem:[#allocation9 + $0x118] sm:$0xff] }
 0x37c   :  { %9264 = vmatpush1.bf16.msra.mxu0 %v13233_v5  ;;  %9436 = vmatpush1.bf16.msra.mxu1 %v13235_v6  ;;  %v3893_v5 = vld [vmem:[#allocation9 + $0x1f48] sm:$0xff]  ;;  %v13329_v6 = vcombine.low %v3868_v53, %v3876_v54  ;;  %v2942_v54 = vld [vmem:[#allocation9 + $0x190] sm:$0xff] }
 0x37d   :  { %9265 = vmatprep.subr.bf16.mxu0 %v13250_v7  ;;  %9437 = vmatprep.subr.bf16.mxu1 %v13252_v8  ;;  %v13331_v7 = vcombine.low %v3869_v55, %v3877_v60  ;;  %v13346_v8 = vcombine.high %v3884_v3, %v3892_v4  ;;  %v13348_v9 = vcombine.high %v3885_v31, %v3893_v5  ;;  %v2950_v55 = vld [vmem:[#allocation9 + $0x1d0] sm:$0xff]  ;;  %v2943_v60 = vld [vmem:[#allocation9 + $0x198] sm:$0xff] }
 0x380   :  { %9266 = vmatpush1.bf16.msra.mxu0 %v13249_v16  ;;  %9438 = vmatpush1.bf16.msra.mxu1 %v13251_v19  ;;  %v3909_v16 = vld [vmem:[#allocation9 + $0x1fc8] sm:$0xff]  ;;  %v13345_v19 = vcombine.low %v3884_v3, %v3892_v4  ;;  %v2958_v4 = vld [vmem:[#allocation9 + $0x210] sm:$0xff] }
 0x381   :  { %9267 = vmatprep.subr.bf16.mxu0 %v13266_v20  ;;  %9439 = vmatprep.subr.bf16.mxu1 %v13268_v21  ;;  %v13347_v20 = vcombine.low %v3885_v31, %v3893_v5  ;;  %v13362_v21 = vcombine.high %v3900_v10, %v3908_v12  ;;  %v13364_v22 = vcombine.high %v3901_v15, %v3909_v16  ;;  %v2966_v31 = vld [vmem:[#allocation9 + $0x250] sm:$0xff]  ;;  %v2959_v5 = vld [vmem:[#allocation9 + $0x218] sm:$0xff] }
 0x384   :  { %9268 = vmatpush1.bf16.msra.mxu0 %v13265_v29  ;;  %9440 = vmatpush1.bf16.msra.mxu1 %v13267_v24  ;;  %v2903_v29 = vld [vmem:[#allocation9 + $0x58] sm:$0xff]  ;;  %v13361_v24 = vcombine.low %v3900_v10, %v3908_v12  ;;  %v2974_v12 = vld [vmem:[#allocation9 + $0x290] sm:$0xff] }
 0x385   :  { %9269 = vmatprep.subr.bf16.mxu0 %v13282_v25  ;;  %9441 = vmatprep.subr.bf16.mxu1 %v13284_v26  ;;  %v13363_v25 = vcombine.low %v3901_v15, %v3909_v16  ;;  %v12358_v26 = vcombine.high %v2894_v23, %v2902_v27  ;;  %v12360_v11 = vcombine.high %v2895_v28, %v2903_v29  ;;  %v2982_v15 = vld [vmem:[#allocation9 + $0x2d0] sm:$0xff]  ;;  %v2975_v16 = vld [vmem:[#allocation9 + $0x298] sm:$0xff] }
 0x388   :  { %9270 = vmatpush1.bf16.msra.mxu0 %v13281_v36  ;;  %9442 = vmatpush1.bf16.msra.mxu1 %v13283_v38  ;;  %v2919_v36 = vld [vmem:[#allocation9 + $0xd8] sm:$0xff]  ;;  %v12357_v38 = vcombine.low %v2894_v23, %v2902_v27  ;;  %v2990_v27 = vld [vmem:[#allocation9 + $0x310] sm:$0xff] }
 0x389   :  { %9271 = vmatprep.subr.bf16.mxu0 %v13298_v39  ;;  %9443 = vmatprep.subr.bf16.mxu1 %v13300_v40  ;;  %v12359_v39 = vcombine.low %v2895_v28, %v2903_v29  ;;  %v12374_v40 = vcombine.high %v2910_v56, %v2918_v33  ;;  %v12376_v52 = vcombine.high %v2911_v35, %v2919_v36  ;;  %v2998_v28 = vld [vmem:[#allocation9 + $0x350] sm:$0xff]  ;;  %v2991_v29 = vld [vmem:[#allocation9 + $0x318] sm:$0xff] }
 0x38c   :  { %9272 = vmatpush1.bf16.msra.mxu0 %v13297_v47  ;;  %9444 = vmatpush1.bf16.msra.mxu1 %v13299_v49  ;;  %v2935_v47 = vld [vmem:[#allocation9 + $0x158] sm:$0xff]  ;;  %v12373_v49 = vcombine.low %v2910_v56, %v2918_v33  ;;  %v3006_v33 = vld [vmem:[#allocation9 + $0x390] sm:$0xff] }
 0x38d   :  { %9273 = vmatprep.subr.bf16.mxu0 %v13314_v50  ;;  %9445 = vmatprep.subr.bf16.mxu1 %v13316_v51  ;;  %v12375_v50 = vcombine.low %v2911_v35, %v2919_v36  ;;  %v12390_v51 = vcombine.high %v2926_v43, %v2934_v41  ;;  %v12392_v53 = vcombine.high %v2927_v42, %v2935_v47  ;;  %v3014_v35 = vld [vmem:[#allocation9 + $0x3d0] sm:$0xff]  ;;  %v3007_v36 = vld [vmem:[#allocation9 + $0x398] sm:$0xff] }
 0x390   :  { %9274 = vmatpush1.bf16.msra.mxu0 %v13313_v63  ;;  %9446 = vmatpush1.bf16.msra.mxu1 %v13315_v0  ;;  %v2951_v63 = vld [vmem:[#allocation9 + $0x1d8] sm:$0xff]  ;;  %v12389_v0 = vcombine.low %v2926_v43, %v2934_v41  ;;  %v3022_v41 = vld [vmem:[#allocation9 + $0x410] sm:$0xff] }
 0x391   :  { %9275 = vmatprep.subr.bf16.mxu0 %v13330_v1  ;;  %9447 = vmatprep.subr.bf16.mxu1 %v13332_v2  ;;  %v12391_v1 = vcombine.low %v2927_v42, %v2935_v47  ;;  %v12406_v2 = vcombine.high %v2942_v54, %v2950_v55  ;;  %v12408_v3 = vcombine.high %v2943_v60, %v2951_v63  ;;  %v3030_v42 = vld [vmem:[#allocation9 + $0x450] sm:$0xff]  ;;  %v3023_v47 = vld [vmem:[#allocation9 + $0x418] sm:$0xff] }
 0x394   :  { %9276 = vmatpush1.bf16.msra.mxu0 %v13329_v6  ;;  %9448 = vmatpush1.bf16.msra.mxu1 %v13331_v7  ;;  %v2967_v6 = vld [vmem:[#allocation9 + $0x258] sm:$0xff]  ;;  %v12405_v7 = vcombine.low %v2942_v54, %v2950_v55  ;;  %v3038_v55 = vld [vmem:[#allocation9 + $0x490] sm:$0xff] }
 0x395   :  { %9277 = vmatprep.subr.bf16.mxu0 %v13346_v8  ;;  %9449 = vmatprep.subr.bf16.mxu1 %v13348_v9  ;;  %v12407_v8 = vcombine.low %v2943_v60, %v2951_v63  ;;  %v12422_v9 = vcombine.high %v2958_v4, %v2966_v31  ;;  %v12424_v10 = vcombine.high %v2959_v5, %v2967_v6  ;;  %v3046_v60 = vld [vmem:[#allocation9 + $0x4d0] sm:$0xff]  ;;  %v3039_v63 = vld [vmem:[#allocation9 + $0x498] sm:$0xff] }
 0x398   :  { %9278 = vmatpush1.bf16.msra.mxu0 %v13345_v19  ;;  %9450 = vmatpush1.bf16.msra.mxu1 %v13347_v20  ;;  %v2983_v19 = vld [vmem:[#allocation9 + $0x2d8] sm:$0xff]  ;;  %v12421_v20 = vcombine.low %v2958_v4, %v2966_v31  ;;  %v3054_v31 = vld [vmem:[#allocation9 + $0x510] sm:$0xff] }
 0x399   :  { %9279 = vmatprep.subr.bf16.mxu0 %v13362_v21  ;;  %9451 = vmatprep.subr.bf16.mxu1 %v13364_v22  ;;  %v12423_v21 = vcombine.low %v2959_v5, %v2967_v6  ;;  %v12438_v22 = vcombine.high %v2974_v12, %v2982_v15  ;;  %v12440_v23 = vcombine.high %v2975_v16, %v2983_v19  ;;  %v3062_v5 = vld [vmem:[#allocation9 + $0x550] sm:$0xff]  ;;  %v3055_v6 = vld [vmem:[#allocation9 + $0x518] sm:$0xff] }
 0x39c   :  { %9280 = vmatpush1.bf16.msra.mxu0 %v13361_v24  ;;  %9452 = vmatpush1.bf16.msra.mxu1 %v13363_v25  ;;  %v2999_v24 = vld [vmem:[#allocation9 + $0x358] sm:$0xff]  ;;  %v12437_v25 = vcombine.low %v2974_v12, %v2982_v15  ;;  %v3070_v15 = vld [vmem:[#allocation9 + $0x590] sm:$0xff] }
 0x39d   :  { %9464 = vmatprep.subr.bf16.mxu0 %v12358_v26  ;;  %9636 = vmatprep.subr.bf16.mxu1 %v12360_v11  ;;  %v12439_v26 = vcombine.low %v2975_v16, %v2983_v19  ;;  %v12454_v11 = vcombine.high %v2990_v27, %v2998_v28  ;;  %v12456_v56 = vcombine.high %v2991_v29, %v2999_v24  ;;  %v3078_v16 = vld [vmem:[#allocation9 + $0x5d0] sm:$0xff]  ;;  %v3071_v19 = vld [vmem:[#allocation9 + $0x598] sm:$0xff] }
 0x39f   :  { %9282 = vmatmul.mubr.bf16.vlgmr.msra.gmra.mrb[12].mxu0 %v14608_v57  ;;  %9454 = vmatmul.mubr.bf16.vlgmr.msra.gmra.mrb[12].mxu1 %v14608_v57 }
 0x3a0   :  { %9465 = vmatpush1.bf16.msra.mxu0 %v12357_v38  ;;  %9496 = vmatprep.mubr.bf16.mxu0 %v14558_v17  ;;  %v3015_v38 = vld [vmem:[#allocation9 + $0x3d8] sm:$0xff] }
 0x3a1   :  { %9637 = vmatpush1.bf16.msra.mxu1 %v12359_v39  ;;  %9668 = vmatprep.mubr.bf16.mxu1 %v14558_v17  ;;  %v12453_v39 = vcombine.low %v2990_v27, %v2998_v28  ;;  %v12472_v43 = vcombine.high %v3007_v36, %v3015_v38  ;;  %v3086_v28 = vld [vmem:[#allocation9 + $0x610] sm:$0xff] }
 0x3a2   :  { %9466 = vmatprep.subr.bf16.mxu0 %v12374_v40  ;;  %9638 = vmatprep.subr.bf16.mxu1 %v12376_v52  ;;  %v12455_v40 = vcombine.low %v2991_v29, %v2999_v24  ;;  %v12470_v52 = vcombine.high %v3006_v33, %v3014_v35  ;;  %v3094_v29 = vld [vmem:[#allocation9 + $0x650] sm:$0xff]  ;;  %v3087_v24 = vld [vmem:[#allocation9 + $0x618] sm:$0xff] }
 0x3a4   :  { %9467 = vmatpush1.bf16.msra.mxu0 %v12373_v49  ;;  %v3031_v49 = vld [vmem:[#allocation9 + $0x458] sm:$0xff] }
 0x3a5   :  { %9639 = vmatpush1.bf16.msra.mxu1 %v12375_v50  ;;  %9468 = vmatprep.subr.bf16.mxu0 %v12390_v51  ;;  %v12469_v50 = vcombine.low %v3006_v33, %v3014_v35  ;;  %v12471_v51 = vcombine.low %v3007_v36, %v3015_v38  ;;  %v12488_v54 = vcombine.high %v3023_v47, %v3031_v49  ;;  %v3102_v35 = vld [vmem:[#allocation9 + $0x690] sm:$0xff]  ;;  %v3103_v38 = vld [vmem:[#allocation9 + $0x698] sm:$0xff] }
 0x3a6   :  { %9640 = vmatprep.subr.bf16.mxu1 %v12392_v53  ;;  %v12486_v53 = vcombine.high %v3022_v41, %v3030_v42  ;;  %v3110_v36 = vld [vmem:[#allocation9 + $0x6d0] sm:$0xff] }
 0x3a8   :  { %9469 = vmatpush1.bf16.msra.mxu0 %v12389_v0  ;;  %v3047_v0 = vld [vmem:[#allocation9 + $0x4d8] sm:$0xff] }
 0x3a9   :  { %9641 = vmatpush1.bf16.msra.mxu1 %v12391_v1  ;;  %9470 = vmatprep.subr.bf16.mxu0 %v12406_v2  ;;  %v12485_v1 = vcombine.low %v3022_v41, %v3030_v42  ;;  %v12487_v2 = vcombine.low %v3023_v47, %v3031_v49  ;;  %v12504_v4 = vcombine.high %v3039_v63, %v3047_v0  ;;  %v3118_v42 = vld [vmem:[#allocation9 + $0x710] sm:$0xff]  ;;  %v3119_v49 = vld [vmem:[#allocation9 + $0x718] sm:$0xff] }
 0x3aa   :  { %9642 = vmatprep.subr.bf16.mxu1 %v12408_v3  ;;  %v12502_v3 = vcombine.high %v3038_v55, %v3046_v60  ;;  %v3126_v47 = vld [vmem:[#allocation9 + $0x750] sm:$0xff] }
 0x3ac   :  { %9471 = vmatpush1.bf16.msra.mxu0 %v12405_v7  ;;  %v3063_v7 = vld [vmem:[#allocation9 + $0x558] sm:$0xff] }
 0x3ad   :  { %9643 = vmatpush1.bf16.msra.mxu1 %v12407_v8  ;;  %9472 = vmatprep.subr.bf16.mxu0 %v12422_v9  ;;  %v12501_v8 = vcombine.low %v3038_v55, %v3046_v60  ;;  %v12503_v9 = vcombine.low %v3039_v63, %v3047_v0  ;;  %v12520_v12 = vcombine.high %v3055_v6, %v3063_v7  ;;  %v3134_v60 = vld [vmem:[#allocation9 + $0x790] sm:$0xff]  ;;  %v3135_v0 = vld [vmem:[#allocation9 + $0x798] sm:$0xff] }
 0x3ae   :  { %9644 = vmatprep.subr.bf16.mxu1 %v12424_v10  ;;  %v12518_v10 = vcombine.high %v3054_v31, %v3062_v5  ;;  %v3142_v63 = vld [vmem:[#allocation9 + $0x7d0] sm:$0xff] }
 0x3b0   :  { %9473 = vmatpush1.bf16.msra.mxu0 %v12421_v20  ;;  %v3079_v20 = vld [vmem:[#allocation9 + $0x5d8] sm:$0xff] }
 0x3b1   :  { %9645 = vmatpush1.bf16.msra.mxu1 %v12423_v21  ;;  %9474 = vmatprep.subr.bf16.mxu0 %v12438_v22  ;;  %v12517_v21 = vcombine.low %v3054_v31, %v3062_v5  ;;  %v12519_v22 = vcombine.low %v3055_v6, %v3063_v7  ;;  %v12536_v27 = vcombine.high %v3071_v19, %v3079_v20  ;;  %v3150_v5 = vld [vmem:[#allocation9 + $0x810] sm:$0xff]  ;;  %v3151_v7 = vld [vmem:[#allocation9 + $0x818] sm:$0xff] }
 0x3b2   :  { %9646 = vmatprep.subr.bf16.mxu1 %v12440_v23  ;;  %v12534_v23 = vcombine.high %v3070_v15, %v3078_v16  ;;  %v3158_v6 = vld [vmem:[#allocation9 + $0x850] sm:$0xff] }
 0x3b4   :  { %9475 = vmatpush1.bf16.msra.mxu0 %v12437_v25  ;;  %v3095_v25 = vld [vmem:[#allocation9 + $0x658] sm:$0xff] }
 0x3b5   :  { %9647 = vmatpush1.bf16.msra.mxu1 %v12439_v26  ;;  %9476 = vmatprep.subr.bf16.mxu0 %v12454_v11  ;;  %v12533_v26 = vcombine.low %v3070_v15, %v3078_v16  ;;  %v12535_v11 = vcombine.low %v3071_v19, %v3079_v20  ;;  %v12552_v33 = vcombine.high %v3087_v24, %v3095_v25  ;;  %v3166_v16 = vld [vmem:[#allocation9 + $0x890] sm:$0xff] }
 0x3b6   :  { %9648 = vmatprep.subr.bf16.mxu1 %v12456_v56  ;;  %v12550_v56 = vcombine.high %v3086_v28, %v3094_v29  ;;  %v3174_v19 = vld [vmem:[#allocation9 + $0x8d0] sm:$0xff]  ;;  %v12613_v20 = vcombine.low %v3150_v5, %v3158_v6 }
 0x3b8   :  { %9477 = vmatpush1.bf16.msra.mxu0 %v12453_v39  ;;  %v3111_v39 = vld [vmem:[#allocation9 + $0x6d8] sm:$0xff] }
 0x3b9   :  { %9649 = vmatpush1.bf16.msra.mxu1 %v12455_v40  ;;  %9478 = vmatprep.subr.bf16.mxu0 %v12470_v52  ;;  %v12549_v40 = vcombine.low %v3086_v28, %v3094_v29  ;;  %v12551_v52 = vcombine.low %v3087_v24, %v3095_v25  ;;  %v12568_v41 = vcombine.high %v3103_v38, %v3111_v39  ;;  %v3182_v28 = vld [vmem:[#allocation9 + $0x910] sm:$0xff]  ;;  %v3183_v25 = vld [vmem:[#allocation9 + $0x918] sm:$0xff] }
 0x3ba   :  { %9650 = vmatprep.subr.bf16.mxu1 %v12472_v43  ;;  %v12566_v43 = vcombine.high %v3102_v35, %v3110_v36  ;;  %v3190_v29 = vld [vmem:[#allocation9 + $0x950] sm:$0xff] }
 0x3bc   :  { %9479 = vmatpush1.bf16.msra.mxu0 %v12469_v50  ;;  %v3127_v50 = vld [vmem:[#allocation9 + $0x758] sm:$0xff] }
 0x3bd   :  { %9651 = vmatpush1.bf16.msra.mxu1 %v12471_v51  ;;  %9480 = vmatprep.subr.bf16.mxu0 %v12486_v53  ;;  %v12565_v51 = vcombine.low %v3102_v35, %v3110_v36  ;;  %v12567_v53 = vcombine.low %v3103_v38, %v3111_v39  ;;  %v12584_v55 = vcombine.high %v3119_v49, %v3127_v50  ;;  %v3198_v36 = vld [vmem:[#allocation9 + $0x990] sm:$0xff]  ;;  %v3199_v39 = vld [vmem:[#allocation9 + $0x998] sm:$0xff] }
 0x3be   :  { %9652 = vmatprep.subr.bf16.mxu1 %v12488_v54  ;;  %v12582_v54 = vcombine.high %v3118_v42, %v3126_v47  ;;  %v3206_v38 = vld [vmem:[#allocation9 + $0x9d0] sm:$0xff] }
 0x3c0   :  { %9481 = vmatpush1.bf16.msra.mxu0 %v12485_v1  ;;  %v3143_v1 = vld [vmem:[#allocation9 + $0x7d8] sm:$0xff] }
 0x3c1   :  { %9653 = vmatpush1.bf16.msra.mxu1 %v12487_v2  ;;  %9482 = vmatprep.subr.bf16.mxu0 %v12502_v3  ;;  %v12581_v2 = vcombine.low %v3118_v42, %v3126_v47  ;;  %v12583_v3 = vcombine.low %v3119_v49, %v3127_v50  ;;  %v12600_v31 = vcombine.high %v3135_v0, %v3143_v1  ;;  %v3214_v47 = vld [vmem:[#allocation9 + $0xa10] sm:$0xff]  ;;  %v3215_v50 = vld [vmem:[#allocation9 + $0xa18] sm:$0xff] }
 0x3c2   :  { %9654 = vmatprep.subr.bf16.mxu1 %v12504_v4  ;;  %v12598_v4 = vcombine.high %v3134_v60, %v3142_v63  ;;  %v3222_v49 = vld [vmem:[#allocation9 + $0xa50] sm:$0xff] }
 0x3c4   :  { %9483 = vmatpush1.bf16.msra.mxu0 %v12501_v8  ;;  %v3159_v8 = vld [vmem:[#allocation9 + $0x858] sm:$0xff] }
 0x3c5   :  { %9655 = vmatpush1.bf16.msra.mxu1 %v12503_v9  ;;  %9484 = vmatprep.subr.bf16.mxu0 %v12518_v10  ;;  %v12597_v9 = vcombine.low %v3134_v60, %v3142_v63  ;;  %v12599_v10 = vcombine.low %v3135_v0, %v3143_v1  ;;  %v12616_v15 = vcombine.high %v3151_v7, %v3159_v8  ;;  %v3230_v63 = vld [vmem:[#allocation9 + $0xa90] sm:$0xff]  ;;  %v3231_v1 = vld [vmem:[#allocation9 + $0xa98] sm:$0xff] }
 0x3c6   :  { %9656 = vmatprep.subr.bf16.mxu1 %v12520_v12  ;;  %v12614_v12 = vcombine.high %v3150_v5, %v3158_v6  ;;  %v3238_v0 = vld [vmem:[#allocation9 + $0xad0] sm:$0xff] }
 0x3c7   :  { %v3246_v6 = vld [vmem:[#allocation9 + $0xb10] sm:$0xff] }
 0x3c8   :  { %9485 = vmatpush1.bf16.msra.mxu0 %v12517_v21  ;;  %v3167_v21 = vld [vmem:[#allocation9 + $0x898] sm:$0xff] }
 0x3c9   :  { %9657 = vmatpush1.bf16.msra.mxu1 %v12519_v22  ;;  %9486 = vmatprep.subr.bf16.mxu0 %v12534_v23  ;;  %v3175_v22 = vld [vmem:[#allocation9 + $0x8d8] sm:$0xff]  ;;  %v12615_v23 = vcombine.low %v3151_v7, %v3159_v8  ;;  %v3254_v7 = vld [vmem:[#allocation9 + $0xb50] sm:$0xff] }
 0x3ca   :  { %9658 = vmatprep.subr.bf16.mxu1 %v12536_v27  ;;  %v12630_v27 = vcombine.high %v3166_v16, %v3174_v19  ;;  %v12632_v24 = vcombine.high %v3167_v21, %v3175_v22  ;;  %v3247_v8 = vld [vmem:[#allocation9 + $0xb18] sm:$0xff] }
 0x3cc   :  { %9487 = vmatpush1.bf16.msra.mxu0 %v12533_v26  ;;  %v3191_v26 = vld [vmem:[#allocation9 + $0x958] sm:$0xff] }
 0x3cd   :  { %9659 = vmatpush1.bf16.msra.mxu1 %v12535_v11  ;;  %9488 = vmatprep.subr.bf16.mxu0 %v12550_v56  ;;  %v12629_v11 = vcombine.low %v3166_v16, %v3174_v19  ;;  %v12631_v56 = vcombine.low %v3167_v21, %v3175_v22  ;;  %v12648_v35 = vcombine.high %v3183_v25, %v3191_v26  ;;  %v3262_v19 = vld [vmem:[#allocation9 + $0xb90] sm:$0xff]  ;;  %v3263_v21 = vld [vmem:[#allocation9 + $0xb98] sm:$0xff] }
 0x3ce   :  { %9660 = vmatprep.subr.bf16.mxu1 %v12552_v33  ;;  %v12646_v33 = vcombine.high %v3182_v28, %v3190_v29  ;;  %v3271_v22 = vld [vmem:[#allocation9 + $0xbd8] sm:$0xff] }
 0x3d0   :  { %9489 = vmatpush1.bf16.msra.mxu0 %v12549_v40  ;;  %v3207_v40 = vld [vmem:[#allocation9 + $0x9d8] sm:$0xff] }
 0x3d1   :  { %9661 = vmatpush1.bf16.msra.mxu1 %v12551_v52  ;;  %9490 = vmatprep.subr.bf16.mxu0 %v12566_v43  ;;  %v12645_v52 = vcombine.low %v3182_v28, %v3190_v29  ;;  %v12647_v43 = vcombine.low %v3183_v25, %v3191_v26  ;;  %v12664_v42 = vcombine.high %v3199_v39, %v3207_v40  ;;  %v3286_v25 = vld [vmem:[#allocation9 + $0xc50] sm:$0xff]  ;;  %v3279_v26 = vld [vmem:[#allocation9 + $0xc18] sm:$0xff] }
 0x3d2   :  { %9662 = vmatprep.subr.bf16.mxu1 %v12568_v41  ;;  %v12662_v41 = vcombine.high %v3198_v36, %v3206_v38  ;;  %v12728_v29 = vcombine.high %v3263_v21, %v3271_v22 }
 0x3d4   :  { %9491 = vmatpush1.bf16.msra.mxu0 %v12565_v51  ;;  %v3223_v51 = vld [vmem:[#allocation9 + $0xa58] sm:$0xff] }
 0x3d5   :  { %9663 = vmatpush1.bf16.msra.mxu1 %v12567_v53  ;;  %9492 = vmatprep.subr.bf16.mxu0 %v12582_v54  ;;  %v12661_v53 = vcombine.low %v3198_v36, %v3206_v38  ;;  %v12663_v54 = vcombine.low %v3199_v39, %v3207_v40  ;;  %v12680_v60 = vcombine.high %v3215_v50, %v3223_v51  ;;  %v3294_v38 = vld [vmem:[#allocation9 + $0xc90] sm:$0xff]  ;;  %v3295_v40 = vld [vmem:[#allocation9 + $0xc98] sm:$0xff] }
 0x3d6   :  { %9664 = vmatprep.subr.bf16.mxu1 %v12584_v55  ;;  %v12678_v55 = vcombine.high %v3214_v47, %v3222_v49  ;;  %v3302_v39 = vld [vmem:[#allocation9 + $0xcd0] sm:$0xff] }
 0x3d8   :  { %9493 = vmatpush1.bf16.msra.mxu0 %v12581_v2  ;;  %v3239_v2 = vld [vmem:[#allocation9 + $0xad8] sm:$0xff] }
 0x3d9   :  { %9665 = vmatpush1.bf16.msra.mxu1 %v12583_v3  ;;  %9494 = vmatprep.subr.bf16.mxu0 %v12598_v4  ;;  %v12677_v3 = vcombine.low %v3214_v47, %v3222_v49  ;;  %v12679_v4 = vcombine.low %v3215_v50, %v3223_v51  ;;  %v12696_v5 = vcombine.high %v3231_v1, %v3239_v2  ;;  %v3310_v49 = vld [vmem:[#allocation9 + $0xd10] sm:$0xff]  ;;  %v3311_v51 = vld [vmem:[#allocation9 + $0xd18] sm:$0xff] }
 0x3da   :  { %9666 = vmatprep.subr.bf16.mxu1 %v12600_v31  ;;  %v12694_v31 = vcombine.high %v3230_v63, %v3238_v0  ;;  %v3318_v50 = vld [vmem:[#allocation9 + $0xd50] sm:$0xff] }
 0x3dc   :  { %9495 = vmatpush1.bf16.msra.mxu0 %v12597_v9  ;;  %v3255_v9 = vld [vmem:[#allocation9 + $0xb58] sm:$0xff] }
 0x3dd   :  { %9667 = vmatpush1.bf16.msra.mxu1 %v12599_v10  ;;  %9507 = vmatprep.subr.bf16.mxu0 %v12614_v12  ;;  %v12693_v10 = vcombine.low %v3230_v63, %v3238_v0  ;;  %v12695_v12 = vcombine.low %v3231_v1, %v3239_v2  ;;  %v12712_v16 = vcombine.high %v3247_v8, %v3255_v9  ;;  %v3326_v0 = vld [vmem:[#allocation9 + $0xd90] sm:$0xff]  ;;  %v3327_v2 = vld [vmem:[#allocation9 + $0xd98] sm:$0xff] }
 0x3de   :  { %9679 = vmatprep.subr.bf16.mxu1 %v12616_v15  ;;  %v12710_v15 = vcombine.high %v3246_v6, %v3254_v7  ;;  %v3334_v1 = vld [vmem:[#allocation9 + $0xdd0] sm:$0xff] }
 0x3df   :  { %9497 = vmatmul.mubr.bf16.vlgmr.msra.gmra.mrb[16].mxu0 %v14554_v13 }
 0x3e0   :  { %9669 = vmatmul.mubr.bf16.vlgmr.msra.gmra.mrb[16].mxu1 %v14554_v13  ;;  %9508 = vmatpush1.bf16.msra.mxu0 %v12613_v20  ;;  %v3270_v20 = vld [vmem:[#allocation9 + $0xbd0] sm:$0xff] }
 0x3e1   :  { %9539 = vmatprep.mubr.bf16.mxu0 %v14560_v18  ;;  %9680 = vmatpush1.bf16.msra.mxu1 %v12615_v23  ;;  %v12709_v23 = vcombine.low %v3246_v6, %v3254_v7  ;;  %v12726_v28 = vcombine.high %v3262_v19, %v3270_v20  ;;  %v3342_v7 = vld [vmem:[#allocation9 + $0xe10] sm:$0xff] }
 0x3e2   :  { %9711 = vmatprep.mubr.bf16.mxu1 %v14560_v18  ;;  %9509 = vmatprep.subr.bf16.mxu0 %v12630_v27  ;;  %v12711_v27 = vcombine.low %v3247_v8, %v3255_v9  ;;  %v3350_v8 = vld [vmem:[#allocation9 + $0xe50] sm:$0xff]  ;;  %v3343_v9 = vld [vmem:[#allocation9 + $0xe18] sm:$0xff] }
 0x3e3   :  { %9681 = vmatprep.subr.bf16.mxu1 %v12632_v24  ;;  %v3278_v24 = vld [vmem:[#allocation9 + $0xc10] sm:$0xff] }
 0x3e4   :  { %9510 = vmatpush1.bf16.msra.mxu0 %v12629_v11  ;;  %v3287_v11 = vld [vmem:[#allocation9 + $0xc58] sm:$0xff] }
 0x3e5   :  { %9682 = vmatpush1.bf16.msra.mxu1 %v12631_v56  ;;  %9511 = vmatprep.subr.bf16.mxu0 %v12646_v33  ;;  %v12725_v56 = vcombine.low %v3262_v19, %v3270_v20  ;;  %v12727_v33 = vcombine.low %v3263_v21, %v3271_v22  ;;  %v12744_v36 = vcombine.high %v3279_v26, %v3287_v11  ;;  %v3358_v20 = vld [vmem:[#allocation9 + $0xe90] sm:$0xff]  ;;  %v3359_v22 = vld [vmem:[#allocation9 + $0xe98] sm:$0xff] }
 0x3e6   :  { %9683 = vmatprep.subr.bf16.mxu1 %v12648_v35  ;;  %v12742_v35 = vcombine.high %v3278_v24, %v3286_v25  ;;  %v3366_v21 = vld [vmem:[#allocation9 + $0xed0] sm:$0xff] }
 0x3e8   :  { %9512 = vmatpush1.bf16.msra.mxu0 %v12645_v52  ;;  %v3303_v52 = vld [vmem:[#allocation9 + $0xcd8] sm:$0xff] }
 0x3e9   :  { %9684 = vmatpush1.bf16.msra.mxu1 %v12647_v43  ;;  %9513 = vmatprep.subr.bf16.mxu0 %v12662_v41  ;;  %v12741_v43 = vcombine.low %v3278_v24, %v3286_v25  ;;  %v12743_v41 = vcombine.low %v3279_v26, %v3287_v11  ;;  %v12760_v47 = vcombine.high %v3295_v40, %v3303_v52  ;;  %v3374_v25 = vld [vmem:[#allocation9 + $0xf10] sm:$0xff]  ;;  %v3375_v11 = vld [vmem:[#allocation9 + $0xf18] sm:$0xff] }
 0x3ea   :  { %9685 = vmatprep.subr.bf16.mxu1 %v12664_v42  ;;  %v12758_v42 = vcombine.high %v3294_v38, %v3302_v39  ;;  %v3382_v26 = vld [vmem:[#allocation9 + $0xf50] sm:$0xff] }
 0x3ec   :  { %9514 = vmatpush1.bf16.msra.mxu0 %v12661_v53  ;;  %v3319_v53 = vld [vmem:[#allocation9 + $0xd58] sm:$0xff] }
 0x3ed   :  { %9686 = vmatpush1.bf16.msra.mxu1 %v12663_v54  ;;  %9515 = vmatprep.subr.bf16.mxu0 %v12678_v55  ;;  %v12757_v54 = vcombine.low %v3294_v38, %v3302_v39  ;;  %v12759_v55 = vcombine.low %v3295_v40, %v3303_v52  ;;  %v12776_v63 = vcombine.high %v3311_v51, %v3319_v53  ;;  %v3390_v39 = vld [vmem:[#allocation9 + $0xf90] sm:$0xff]  ;;  %v3391_v52 = vld [vmem:[#allocation9 + $0xf98] sm:$0xff] }
 0x3ee   :  { %9687 = vmatprep.subr.bf16.mxu1 %v12680_v60  ;;  %v12774_v60 = vcombine.high %v3310_v49, %v3318_v50  ;;  %v3398_v40 = vld [vmem:[#allocation9 + $0xfd0] sm:$0xff] }
 0x3f0   :  { %9516 = vmatpush1.bf16.msra.mxu0 %v12677_v3  ;;  %v3335_v3 = vld [vmem:[#allocation9 + $0xdd8] sm:$0xff] }
 0x3f1   :  { %9688 = vmatpush1.bf16.msra.mxu1 %v12679_v4  ;;  %9517 = vmatprep.subr.bf16.mxu0 %v12694_v31  ;;  %v12773_v4 = vcombine.low %v3310_v49, %v3318_v50  ;;  %v12775_v31 = vcombine.low %v3311_v51, %v3319_v53  ;;  %v12792_v6 = vcombine.high %v3327_v2, %v3335_v3  ;;  %v3406_v50 = vld [vmem:[#allocation9 + $0x1010] sm:$0xff]  ;;  %v3407_v53 = vld [vmem:[#allocation9 + $0x1018] sm:$0xff] }
 0x3f2   :  { %9689 = vmatprep.subr.bf16.mxu1 %v12696_v5  ;;  %v12790_v5 = vcombine.high %v3326_v0, %v3334_v1  ;;  %v3414_v51 = vld [vmem:[#allocation9 + $0x1050] sm:$0xff] }
 0x3f4   :  { %9518 = vmatpush1.bf16.msra.mxu0 %v12693_v10  ;;  %v3351_v10 = vld [vmem:[#allocation9 + $0xe58] sm:$0xff] }
 0x3f5   :  { %9690 = vmatpush1.bf16.msra.mxu1 %v12695_v12  ;;  %9519 = vmatprep.subr.bf16.mxu0 %v12710_v15  ;;  %v12789_v12 = vcombine.low %v3326_v0, %v3334_v1  ;;  %v12791_v15 = vcombine.low %v3327_v2, %v3335_v3  ;;  %v12808_v19 = vcombine.high %v3343_v9, %v3351_v10  ;;  %v3422_v1 = vld [vmem:[#allocation9 + $0x1090] sm:$0xff] }
 0x3f6   :  { %9691 = vmatprep.subr.bf16.mxu1 %v12712_v16  ;;  %v12806_v16 = vcombine.high %v3342_v7, %v3350_v8  ;;  %v3430_v2 = vld [vmem:[#allocation9 + $0x10d0] sm:$0xff]  ;;  %v12869_v3 = vcombine.low %v3406_v50, %v3414_v51 }
 0x3f8   :  { %9520 = vmatpush1.bf16.msra.mxu0 %v12709_v23  ;;  %v3367_v23 = vld [vmem:[#allocation9 + $0xed8] sm:$0xff] }
 0x3f9   :  { %9692 = vmatpush1.bf16.msra.mxu1 %v12711_v27  ;;  %9521 = vmatprep.subr.bf16.mxu0 %v12726_v28  ;;  %v12805_v27 = vcombine.low %v3342_v7, %v3350_v8  ;;  %v12807_v28 = vcombine.low %v3343_v9, %v3351_v10  ;;  %v12824_v24 = vcombine.high %v3359_v22, %v3367_v23  ;;  %v3438_v7 = vld [vmem:[#allocation9 + $0x1110] sm:$0xff]  ;;  %v3439_v10 = vld [vmem:[#allocation9 + $0x1118] sm:$0xff] }
 0x3fa   :  { %9693 = vmatprep.subr.bf16.mxu1 %v12728_v29  ;;  %v12822_v29 = vcombine.high %v3358_v20, %v3366_v21  ;;  %v3446_v8 = vld [vmem:[#allocation9 + $0x1150] sm:$0xff] }
 0x3fc   :  { %9522 = vmatpush1.bf16.msra.mxu0 %v12725_v56  ;;  %v3383_v56 = vld [vmem:[#allocation9 + $0xf58] sm:$0xff] }
 0x3fd   :  { %9694 = vmatpush1.bf16.msra.mxu1 %v12727_v33  ;;  %9523 = vmatprep.subr.bf16.mxu0 %v12742_v35  ;;  %v12821_v33 = vcombine.low %v3358_v20, %v3366_v21  ;;  %v12823_v35 = vcombine.low %v3359_v22, %v3367_v23  ;;  %v12840_v38 = vcombine.high %v3375_v11, %v3383_v56  ;;  %v3454_v21 = vld [vmem:[#allocation9 + $0x1190] sm:$0xff]  ;;  %v3455_v23 = vld [vmem:[#allocation9 + $0x1198] sm:$0xff] }
 0x3fe   :  { %9695 = vmatprep.subr.bf16.mxu1 %v12744_v36  ;;  %v12838_v36 = vcombine.high %v3374_v25, %v3382_v26  ;;  %v3462_v22 = vld [vmem:[#allocation9 + $0x11d0] sm:$0xff] }
 0x400   :  { %9524 = vmatpush1.bf16.msra.mxu0 %v12741_v43  ;;  %v3399_v43 = vld [vmem:[#allocation9 + $0xfd8] sm:$0xff] }
 0x401   :  { %9696 = vmatpush1.bf16.msra.mxu1 %v12743_v41  ;;  %9525 = vmatprep.subr.bf16.mxu0 %v12758_v42  ;;  %v12837_v41 = vcombine.low %v3374_v25, %v3382_v26  ;;  %v12839_v42 = vcombine.low %v3375_v11, %v3383_v56  ;;  %v12856_v49 = vcombine.high %v3391_v52, %v3399_v43  ;;  %v3470_v26 = vld [vmem:[#allocation9 + $0x1210] sm:$0xff]  ;;  %v3471_v56 = vld [vmem:[#allocation9 + $0x1218] sm:$0xff] }
 0x402   :  { %9697 = vmatprep.subr.bf16.mxu1 %v12760_v47  ;;  %v12854_v47 = vcombine.high %v3390_v39, %v3398_v40  ;;  %v3478_v11 = vld [vmem:[#allocation9 + $0x1250] sm:$0xff] }
 0x404   :  { %9526 = vmatpush1.bf16.msra.mxu0 %v12757_v54  ;;  %v3415_v54 = vld [vmem:[#allocation9 + $0x1058] sm:$0xff] }
 0x405   :  { %9698 = vmatpush1.bf16.msra.mxu1 %v12759_v55  ;;  %9527 = vmatprep.subr.bf16.mxu0 %v12774_v60  ;;  %v12853_v55 = vcombine.low %v3390_v39, %v3398_v40  ;;  %v12855_v60 = vcombine.low %v3391_v52, %v3399_v43  ;;  %v12872_v0 = vcombine.high %v3407_v53, %v3415_v54  ;;  %v3486_v40 = vld [vmem:[#allocation9 + $0x1290] sm:$0xff]  ;;  %v3487_v43 = vld [vmem:[#allocation9 + $0x1298] sm:$0xff] }
 0x406   :  { %9699 = vmatprep.subr.bf16.mxu1 %v12776_v63  ;;  %v12870_v63 = vcombine.high %v3406_v50, %v3414_v51  ;;  %v3494_v52 = vld [vmem:[#allocation9 + $0x12d0] sm:$0xff] }
 0x407   :  { %v3502_v51 = vld [vmem:[#allocation9 + $0x1310] sm:$0xff] }
 0x408   :  { %9528 = vmatpush1.bf16.msra.mxu0 %v12773_v4  ;;  %v3423_v4 = vld [vmem:[#allocation9 + $0x1098] sm:$0xff] }
 0x409   :  { %9700 = vmatpush1.bf16.msra.mxu1 %v12775_v31  ;;  %9529 = vmatprep.subr.bf16.mxu0 %v12790_v5  ;;  %v3431_v31 = vld [vmem:[#allocation9 + $0x10d8] sm:$0xff]  ;;  %v12871_v5 = vcombine.low %v3407_v53, %v3415_v54  ;;  %v3510_v53 = vld [vmem:[#allocation9 + $0x1350] sm:$0xff] }
 0x40a   :  { %9701 = vmatprep.subr.bf16.mxu1 %v12792_v6  ;;  %v12886_v6 = vcombine.high %v3422_v1, %v3430_v2  ;;  %v12888_v9 = vcombine.high %v3423_v4, %v3431_v31  ;;  %v3503_v54 = vld [vmem:[#allocation9 + $0x1318] sm:$0xff] }
 0x40c   :  { %9530 = vmatpush1.bf16.msra.mxu0 %v12789_v12  ;;  %v3447_v12 = vld [vmem:[#allocation9 + $0x1158] sm:$0xff] }
 0x40d   :  { %9702 = vmatpush1.bf16.msra.mxu1 %v12791_v15  ;;  %9531 = vmatprep.subr.bf16.mxu0 %v12806_v16  ;;  %v12885_v15 = vcombine.low %v3422_v1, %v3430_v2  ;;  %v12887_v16 = vcombine.low %v3423_v4, %v3431_v31  ;;  %v12904_v20 = vcombine.high %v3439_v10, %v3447_v12  ;;  %v3518_v2 = vld [vmem:[#allocation9 + $0x1390] sm:$0xff]  ;;  %v3519_v4 = vld [vmem:[#allocation9 + $0x1398] sm:$0xff] }
 0x40e   :  { %9703 = vmatprep.subr.bf16.mxu1 %v12808_v19  ;;  %v12902_v19 = vcombine.high %v3438_v7, %v3446_v8  ;;  %v3527_v31 = vld [vmem:[#allocation9 + $0x13d8] sm:$0xff] }
 0x410   :  { %9532 = vmatpush1.bf16.msra.mxu0 %v12805_v27  ;;  %v3463_v27 = vld [vmem:[#allocation9 + $0x11d8] sm:$0xff] }
 0x411   :  { %9704 = vmatpush1.bf16.msra.mxu1 %v12807_v28  ;;  %9533 = vmatprep.subr.bf16.mxu0 %v12822_v29  ;;  %v12901_v28 = vcombine.low %v3438_v7, %v3446_v8  ;;  %v12903_v29 = vcombine.low %v3439_v10, %v3447_v12  ;;  %v12920_v25 = vcombine.high %v3455_v23, %v3463_v27  ;;  %v3542_v10 = vld [vmem:[#allocation9 + $0x1450] sm:$0xff]  ;;  %v3535_v12 = vld [vmem:[#allocation9 + $0x1418] sm:$0xff] }
 0x412   :  { %9705 = vmatprep.subr.bf16.mxu1 %v12824_v24  ;;  %v12918_v24 = vcombine.high %v3454_v21, %v3462_v22  ;;  %v12984_v8 = vcombine.high %v3519_v4, %v3527_v31 }
 0x414   :  { %9534 = vmatpush1.bf16.msra.mxu0 %v12821_v33  ;;  %v3479_v33 = vld [vmem:[#allocation9 + $0x1258] sm:$0xff] }
 0x415   :  { %9706 = vmatpush1.bf16.msra.mxu1 %v12823_v35  ;;  %9535 = vmatprep.subr.bf16.mxu0 %v12838_v36  ;;  %v12917_v35 = vcombine.low %v3454_v21, %v3462_v22  ;;  %v12919_v36 = vcombine.low %v3455_v23, %v3463_v27  ;;  %v12936_v39 = vcombine.high %v3471_v56, %v3479_v33  ;;  %v3550_v22 = vld [vmem:[#allocation9 + $0x1490] sm:$0xff]  ;;  %v3551_v27 = vld [vmem:[#allocation9 + $0x1498] sm:$0xff] }
 0x416   :  { %9707 = vmatprep.subr.bf16.mxu1 %v12840_v38  ;;  %v12934_v38 = vcombine.high %v3470_v26, %v3478_v11  ;;  %v3558_v23 = vld [vmem:[#allocation9 + $0x14d0] sm:$0xff] }
 0x418   :  { %9536 = vmatpush1.bf16.msra.mxu0 %v12837_v41  ;;  %v3495_v41 = vld [vmem:[#allocation9 + $0x12d8] sm:$0xff] }
 0x419   :  { %9708 = vmatpush1.bf16.msra.mxu1 %v12839_v42  ;;  %9537 = vmatprep.subr.bf16.mxu0 %v12854_v47  ;;  %v12933_v42 = vcombine.low %v3470_v26, %v3478_v11  ;;  %v12935_v47 = vcombine.low %v3471_v56, %v3479_v33  ;;  %v12952_v50 = vcombine.high %v3487_v43, %v3495_v41  ;;  %v3566_v11 = vld [vmem:[#allocation9 + $0x1510] sm:$0xff]  ;;  %v3567_v33 = vld [vmem:[#allocation9 + $0x1518] sm:$0xff] }
 0x41a   :  { %9709 = vmatprep.subr.bf16.mxu1 %v12856_v49  ;;  %v12950_v49 = vcombine.high %v3486_v40, %v3494_v52  ;;  %v3574_v56 = vld [vmem:[#allocation9 + $0x1550] sm:$0xff] }
 0x41c   :  { %9538 = vmatpush1.bf16.msra.mxu0 %v12853_v55  ;;  %v3511_v55 = vld [vmem:[#allocation9 + $0x1358] sm:$0xff] }
 0x41d   :  { %9710 = vmatpush1.bf16.msra.mxu1 %v12855_v60  ;;  %9550 = vmatprep.subr.bf16.mxu0 %v12870_v63  ;;  %v12949_v60 = vcombine.low %v3486_v40, %v3494_v52  ;;  %v12951_v63 = vcombine.low %v3487_v43, %v3495_v41  ;;  %v12968_v1 = vcombine.high %v3503_v54, %v3511_v55  ;;  %v3582_v52 = vld [vmem:[#allocation9 + $0x1590] sm:$0xff]  ;;  %v3583_v41 = vld [vmem:[#allocation9 + $0x1598] sm:$0xff] }
 0x41e   :  { %9722 = vmatprep.subr.bf16.mxu1 %v12872_v0  ;;  %v12966_v0 = vcombine.high %v3502_v51, %v3510_v53  ;;  %v3590_v43 = vld [vmem:[#allocation9 + $0x15d0] sm:$0xff] }
 0x41f   :  { %9540 = vmatmul.mubr.bf16.vlgmr.msra.gmra.mrb[16].mxu0 %v14556_v14 }
 0x420   :  { %9712 = vmatmul.mubr.bf16.vlgmr.msra.gmra.mrb[16].mxu1 %v14556_v14  ;;  %9551 = vmatpush1.bf16.msra.mxu0 %v12869_v3  ;;  %v3526_v3 = vld [vmem:[#allocation9 + $0x13d0] sm:$0xff] }
 0x421   :  { %9582 = vmatprep.mubr.bf16.mxu0 %v14610_v58  ;;  %9723 = vmatpush1.bf16.msra.mxu1 %v12871_v5  ;;  %v12965_v5 = vcombine.low %v3502_v51, %v3510_v53  ;;  %v12982_v7 = vcombine.high %v3518_v2, %v3526_v3  ;;  %v3598_v53 = vld [vmem:[#allocation9 + $0x1610] sm:$0xff] }
 0x422   :  { %9754 = vmatprep.mubr.bf16.mxu1 %v14610_v58  ;;  %9552 = vmatprep.subr.bf16.mxu0 %v12886_v6  ;;  %v12967_v6 = vcombine.low %v3503_v54, %v3511_v55  ;;  %v3606_v54 = vld [vmem:[#allocation9 + $0x1650] sm:$0xff]  ;;  %v3599_v55 = vld [vmem:[#allocation9 + $0x1618] sm:$0xff] }
 0x423   :  { %9724 = vmatprep.subr.bf16.mxu1 %v12888_v9  ;;  %v3534_v9 = vld [vmem:[#allocation9 + $0x1410] sm:$0xff] }
 0x424   :  { %9553 = vmatpush1.bf16.msra.mxu0 %v12885_v15  ;;  %v3543_v15 = vld [vmem:[#allocation9 + $0x1458] sm:$0xff] }
 0x425   :  { %9725 = vmatpush1.bf16.msra.mxu1 %v12887_v16  ;;  %9554 = vmatprep.subr.bf16.mxu0 %v12902_v19  ;;  %v12981_v16 = vcombine.low %v3518_v2, %v3526_v3  ;;  %v12983_v19 = vcombine.low %v3519_v4, %v3527_v31  ;;  %v13000_v21 = vcombine.high %v3535_v12, %v3543_v15  ;;  %v3614_v3 = vld [vmem:[#allocation9 + $0x1690] sm:$0xff]  ;;  %v3615_v31 = vld [vmem:[#allocation9 + $0x1698] sm:$0xff] }
 0x426   :  { %9726 = vmatprep.subr.bf16.mxu1 %v12904_v20  ;;  %v12998_v20 = vcombine.high %v3534_v9, %v3542_v10  ;;  %v3622_v4 = vld [vmem:[#allocation9 + $0x16d0] sm:$0xff] }
 0x428   :  { %9555 = vmatpush1.bf16.msra.mxu0 %v12901_v28  ;;  %v3559_v28 = vld [vmem:[#allocation9 + $0x14d8] sm:$0xff] }
 0x429   :  { %9727 = vmatpush1.bf16.msra.mxu1 %v12903_v29  ;;  %9556 = vmatprep.subr.bf16.mxu0 %v12918_v24  ;;  %v12997_v29 = vcombine.low %v3534_v9, %v3542_v10  ;;  %v12999_v24 = vcombine.low %v3535_v12, %v3543_v15  ;;  %v13016_v26 = vcombine.high %v3551_v27, %v3559_v28  ;;  %v3630_v10 = vld [vmem:[#allocation9 + $0x1710] sm:$0xff]  ;;  %v3631_v15 = vld [vmem:[#allocation9 + $0x1718] sm:$0xff] }
 0x42a   :  { %9728 = vmatprep.subr.bf16.mxu1 %v12920_v25  ;;  %v13014_v25 = vcombine.high %v3550_v22, %v3558_v23  ;;  %v3638_v12 = vld [vmem:[#allocation9 + $0x1750] sm:$0xff] }
 0x42c   :  { %9557 = vmatpush1.bf16.msra.mxu0 %v12917_v35  ;;  %v3575_v35 = vld [vmem:[#allocation9 + $0x1558] sm:$0xff] }
 0x42d   :  { %9729 = vmatpush1.bf16.msra.mxu1 %v12919_v36  ;;  %9558 = vmatprep.subr.bf16.mxu0 %v12934_v38  ;;  %v13013_v36 = vcombine.low %v3550_v22, %v3558_v23  ;;  %v13015_v38 = vcombine.low %v3551_v27, %v3559_v28  ;;  %v13032_v40 = vcombine.high %v3567_v33, %v3575_v35  ;;  %v3646_v23 = vld [vmem:[#allocation9 + $0x1790] sm:$0xff]  ;;  %v3647_v28 = vld [vmem:[#allocation9 + $0x1798] sm:$0xff] }
 0x42e   :  { %9730 = vmatprep.subr.bf16.mxu1 %v12936_v39  ;;  %v13030_v39 = vcombine.high %v3566_v11, %v3574_v56  ;;  %v3654_v27 = vld [vmem:[#allocation9 + $0x17d0] sm:$0xff] }
 0x430   :  { %9559 = vmatpush1.bf16.msra.mxu0 %v12933_v42  ;;  %v3591_v42 = vld [vmem:[#allocation9 + $0x15d8] sm:$0xff] }
 0x431   :  { %9731 = vmatpush1.bf16.msra.mxu1 %v12935_v47  ;;  %9560 = vmatprep.subr.bf16.mxu0 %v12950_v49  ;;  %v13029_v47 = vcombine.low %v3566_v11, %v3574_v56  ;;  %v13031_v49 = vcombine.low %v3567_v33, %v3575_v35  ;;  %v13048_v51 = vcombine.high %v3583_v41, %v3591_v42  ;;  %v3662_v56 = vld [vmem:[#allocation9 + $0x1810] sm:$0xff]  ;;  %v3663_v35 = vld [vmem:[#allocation9 + $0x1818] sm:$0xff] }
 0x432   :  { %9732 = vmatprep.subr.bf16.mxu1 %v12952_v50  ;;  %v13046_v50 = vcombine.high %v3582_v52, %v3590_v43  ;;  %v3670_v33 = vld [vmem:[#allocation9 + $0x1850] sm:$0xff] }
 0x434   :  { %9561 = vmatpush1.bf16.msra.mxu0 %v12949_v60  ;;  %v3607_v60 = vld [vmem:[#allocation9 + $0x1658] sm:$0xff] }
 0x435   :  { %9733 = vmatpush1.bf16.msra.mxu1 %v12951_v63  ;;  %9562 = vmatprep.subr.bf16.mxu0 %v12966_v0  ;;  %v13045_v63 = vcombine.low %v3582_v52, %v3590_v43  ;;  %v13047_v0 = vcombine.low %v3583_v41, %v3591_v42  ;;  %v13064_v2 = vcombine.high %v3599_v55, %v3607_v60  ;;  %v3678_v43 = vld [vmem:[#allocation9 + $0x1890] sm:$0xff] }
 0x436   :  { %9734 = vmatprep.subr.bf16.mxu1 %v12968_v1  ;;  %v13062_v1 = vcombine.high %v3598_v53, %v3606_v54  ;;  %v3686_v41 = vld [vmem:[#allocation9 + $0x18d0] sm:$0xff]  ;;  %v13125_v42 = vcombine.low %v3662_v56, %v3670_v33 }
 0x438   :  { %9563 = vmatpush1.bf16.msra.mxu0 %v12965_v5  ;;  %v3623_v5 = vld [vmem:[#allocation9 + $0x16d8] sm:$0xff] }
 0x439   :  { %9735 = vmatpush1.bf16.msra.mxu1 %v12967_v6  ;;  %9564 = vmatprep.subr.bf16.mxu0 %v12982_v7  ;;  %v13061_v6 = vcombine.low %v3598_v53, %v3606_v54  ;;  %v13063_v7 = vcombine.low %v3599_v55, %v3607_v60  ;;  %v13080_v9 = vcombine.high %v3615_v31, %v3623_v5  ;;  %v3694_v53 = vld [vmem:[#allocation9 + $0x1910] sm:$0xff]  ;;  %v3695_v60 = vld [vmem:[#allocation9 + $0x1918] sm:$0xff] }
 0x43a   :  { %9736 = vmatprep.subr.bf16.mxu1 %v12984_v8  ;;  %v13078_v8 = vcombine.high %v3614_v3, %v3622_v4  ;;  %v3702_v54 = vld [vmem:[#allocation9 + $0x1950] sm:$0xff] }
 0x43c   :  { %9565 = vmatpush1.bf16.msra.mxu0 %v12981_v16  ;;  %v3639_v16 = vld [vmem:[#allocation9 + $0x1758] sm:$0xff] }
 0x43d   :  { %9737 = vmatpush1.bf16.msra.mxu1 %v12983_v19  ;;  %9566 = vmatprep.subr.bf16.mxu0 %v12998_v20  ;;  %v13077_v19 = vcombine.low %v3614_v3, %v3622_v4  ;;  %v13079_v20 = vcombine.low %v3615_v31, %v3623_v5  ;;  %v13096_v22 = vcombine.high %v3631_v15, %v3639_v16  ;;  %v3710_v4 = vld [vmem:[#allocation9 + $0x1990] sm:$0xff]  ;;  %v3711_v5 = vld [vmem:[#allocation9 + $0x1998] sm:$0xff] }
 0x43e   :  { %9738 = vmatprep.subr.bf16.mxu1 %v13000_v21  ;;  %v13094_v21 = vcombine.high %v3630_v10, %v3638_v12  ;;  %v3718_v31 = vld [vmem:[#allocation9 + $0x19d0] sm:$0xff] }
 0x440   :  { %9567 = vmatpush1.bf16.msra.mxu0 %v12997_v29  ;;  %v3655_v29 = vld [vmem:[#allocation9 + $0x17d8] sm:$0xff] }
 0x441   :  { %9739 = vmatpush1.bf16.msra.mxu1 %v12999_v24  ;;  %9568 = vmatprep.subr.bf16.mxu0 %v13014_v25  ;;  %v13093_v24 = vcombine.low %v3630_v10, %v3638_v12  ;;  %v13095_v25 = vcombine.low %v3631_v15, %v3639_v16  ;;  %v13112_v11 = vcombine.high %v3647_v28, %v3655_v29  ;;  %v3726_v12 = vld [vmem:[#allocation9 + $0x1a10] sm:$0xff]  ;;  %v3727_v16 = vld [vmem:[#allocation9 + $0x1a18] sm:$0xff] }
 0x442   :  { %9740 = vmatprep.subr.bf16.mxu1 %v13016_v26  ;;  %v13110_v26 = vcombine.high %v3646_v23, %v3654_v27  ;;  %v3734_v15 = vld [vmem:[#allocation9 + $0x1a50] sm:$0xff] }
 0x444   :  { %9569 = vmatpush1.bf16.msra.mxu0 %v13013_v36  ;;  %v3671_v36 = vld [vmem:[#allocation9 + $0x1858] sm:$0xff] }
 0x445   :  { %9741 = vmatpush1.bf16.msra.mxu1 %v13015_v38  ;;  %9570 = vmatprep.subr.bf16.mxu0 %v13030_v39  ;;  %v13109_v38 = vcombine.low %v3646_v23, %v3654_v27  ;;  %v13111_v39 = vcombine.low %v3647_v28, %v3655_v29  ;;  %v13128_v52 = vcombine.high %v3663_v35, %v3671_v36  ;;  %v3742_v27 = vld [vmem:[#allocation9 + $0x1a90] sm:$0xff]  ;;  %v3743_v29 = vld [vmem:[#allocation9 + $0x1a98] sm:$0xff] }
 0x446   :  { %9742 = vmatprep.subr.bf16.mxu1 %v13032_v40  ;;  %v13126_v40 = vcombine.high %v3662_v56, %v3670_v33  ;;  %v3750_v28 = vld [vmem:[#allocation9 + $0x1ad0] sm:$0xff] }
 0x447   :  { %v13206_v56 = vcombine.high %v3742_v27, %v3750_v28 }
 0x448   :  { %9571 = vmatpush1.bf16.msra.mxu0 %v13029_v47  ;;  %v3679_v47 = vld [vmem:[#allocation9 + $0x1898] sm:$0xff] }
 0x449   :  { %9743 = vmatpush1.bf16.msra.mxu1 %v13031_v49  ;;  %9572 = vmatprep.subr.bf16.mxu0 %v13046_v50  ;;  %v3687_v49 = vld [vmem:[#allocation9 + $0x18d8] sm:$0xff]  ;;  %v13127_v50 = vcombine.low %v3663_v35, %v3671_v36  ;;  %v3758_v35 = vld [vmem:[#allocation9 + $0x1b10] sm:$0xff] }
 0x44a   :  { %9744 = vmatprep.subr.bf16.mxu1 %v13048_v51  ;;  %v13142_v51 = vcombine.high %v3678_v43, %v3686_v41  ;;  %v13144_v55 = vcombine.high %v3679_v47, %v3687_v49  ;;  %v3766_v36 = vld [vmem:[#allocation9 + $0x1b50] sm:$0xff] }
 0x44c   :  { %9573 = vmatpush1.bf16.msra.mxu0 %v13045_v63  ;;  %v3703_v63 = vld [vmem:[#allocation9 + $0x1958] sm:$0xff] }
 0x44d   :  { %9745 = vmatpush1.bf16.msra.mxu1 %v13047_v0  ;;  %9574 = vmatprep.subr.bf16.mxu0 %v13062_v1  ;;  %v13141_v0 = vcombine.low %v3678_v43, %v3686_v41  ;;  %v13143_v1 = vcombine.low %v3679_v47, %v3687_v49  ;;  %v13160_v3 = vcombine.high %v3695_v60, %v3703_v63 }
 0x44e   :  { %9746 = vmatprep.subr.bf16.mxu1 %v13064_v2  ;;  %v13158_v2 = vcombine.high %v3694_v53, %v3702_v54  ;;  %v13222_v49 = vcombine.high %v3758_v35, %v3766_v36 }
 0x450   :  { %9575 = vmatpush1.bf16.msra.mxu0 %v13061_v6  ;;  %v3719_v6 = vld [vmem:[#allocation9 + $0x19d8] sm:$0xff] }
 0x451   :  { %9747 = vmatpush1.bf16.msra.mxu1 %v13063_v7  ;;  %9576 = vmatprep.subr.bf16.mxu0 %v13078_v8  ;;  %v13157_v7 = vcombine.low %v3694_v53, %v3702_v54  ;;  %v13159_v8 = vcombine.low %v3695_v60, %v3703_v63  ;;  %v13176_v10 = vcombine.high %v3711_v5, %v3719_v6 }
 0x452   :  { %9748 = vmatprep.subr.bf16.mxu1 %v13080_v9  ;;  %v13174_v9 = vcombine.high %v3710_v4, %v3718_v31 }
 0x454   :  { %9577 = vmatpush1.bf16.msra.mxu0 %v13077_v19  ;;  %v3735_v19 = vld [vmem:[#allocation9 + $0x1a58] sm:$0xff] }
 0x455   :  { %9749 = vmatpush1.bf16.msra.mxu1 %v13079_v20  ;;  %9578 = vmatprep.subr.bf16.mxu0 %v13094_v21  ;;  %v13173_v20 = vcombine.low %v3710_v4, %v3718_v31  ;;  %v13175_v21 = vcombine.low %v3711_v5, %v3719_v6  ;;  %v13192_v23 = vcombine.high %v3727_v16, %v3735_v19  ;;  %v3775_v4 = vld [vmem:[#allocation9 + $0x1b98] sm:$0xff] }
 0x456   :  { %9750 = vmatprep.subr.bf16.mxu1 %v13096_v22  ;;  %v13190_v22 = vcombine.high %v3726_v12, %v3734_v15  ;;  %v3783_v31 = vld [vmem:[#allocation9 + $0x1bd8] sm:$0xff] }
 0x458   :  { %9579 = vmatpush1.bf16.msra.mxu0 %v13093_v24  ;;  %v3751_v24 = vld [vmem:[#allocation9 + $0x1ad8] sm:$0xff] }
 0x459   :  { %9751 = vmatpush1.bf16.msra.mxu1 %v13095_v25  ;;  %9580 = vmatprep.subr.bf16.mxu0 %v13110_v26  ;;  %v13189_v25 = vcombine.low %v3726_v12, %v3734_v15  ;;  %v3916_v26 = vld [vmem:[#allocation10] sm:$0xff]  ;;  %v13208_v33 = vcombine.high %v3743_v29, %v3751_v24  ;;  %v13207_v47 = vcombine.low %v3743_v29, %v3751_v24  ;;  %v3790_v12 = vld [vmem:[#allocation9 + $0x1c10] sm:$0xff] }
 0x45a   :  { %9752 = vmatprep.subr.bf16.mxu1 %v13112_v11  ;;  %v13191_v11 = vcombine.low %v3727_v16, %v3735_v19  ;;  %v3927_v43 = vrot.slane %v3916_v26, %v14496_v48  ;;  %v3935_v41 = vrot.slane %v3916_v26, %v14504_v62  ;;  %v3798_v15 = vld [vmem:[#allocation9 + $0x1c50] sm:$0xff]  ;;  %v13240_v24 = vcombine.high %v3775_v4, %v3783_v31 }
 0x45c   :  { %9581 = vmatpush1.bf16.msra.mxu0 %v13109_v38  ;;  %v3923_v38 = vrot.slane %v3916_v26, %v14493_v46 }
 0x45d   :  { %9753 = vmatpush1.bf16.msra.mxu1 %v13111_v39  ;;  %9593 = vmatprep.subr.bf16.mxu0 %v13126_v40  ;;  %v3931_v39 = vrot.slane %v3916_v26, %v14501_v59  ;;  %v3759_v40 = vld [vmem:[#allocation9 + $0x1b18] sm:$0xff] }
 0x45e   :  { %9765 = vmatprep.subr.bf16.mxu1 %v13128_v52  ;;  %v3767_v52 = vld [vmem:[#allocation9 + $0x1b58] sm:$0xff] }
 0x45f   :  { %9583 = vmatmul.mubr.bf16.vlgmr.msra.gmra.mrb[16].mxu0 %v14605_v45  ;;  %v3799_v26 = vld [vmem:[#allocation9 + $0x1c58] sm:$0xff] }
 0x460   :  { %9755 = vmatmul.mubr.bf16.vlgmr.msra.gmra.mrb[16].mxu1 %v14605_v45  ;;  %9594 = vmatpush1.bf16.msra.mxu0 %v13125_v42  ;;  %v13205_v42 = vcombine.low %v3742_v27, %v3750_v28 }
 0x461   :  { %9625 = vmatprep.mubr.bf16.mxu0 %v14612_v61  ;;  %9766 = vmatpush1.bf16.msra.mxu1 %v13127_v50  ;;  %v14640_v50 = vld [vmem:[#allocation9 + $0x1b90] sm:$0xff] }
 0x462   :  { %9797 = vmatprep.mubr.bf16.mxu1 %v14612_v61  ;;  %9595 = vmatprep.subr.bf16.mxu0 %v13142_v51  ;;  %v14642_v51 = vld [vmem:[#allocation9 + $0x1bd0] sm:$0xff] }
 0x463   :  { %9767 = vmatprep.subr.bf16.mxu1 %v13144_v55  ;;  %v13224_v55 = vcombine.high %v3759_v40, %v3767_v52 }
 0x464   :  { %9596 = vmatpush1.bf16.msra.mxu0 %v13141_v0 }
 0x465   :  { %9768 = vmatpush1.bf16.msra.mxu1 %v13143_v1  ;;  %9597 = vmatprep.subr.bf16.mxu0 %v13158_v2  ;;  %v13221_v2 = vcombine.low %v3758_v35, %v3766_v36  ;;  %v13239_v35 = vcombine.low %v3775_v4, %v3783_v31 }
 0x466   :  { %9769 = vmatprep.subr.bf16.mxu1 %v13160_v3  ;;  %v13223_v3 = vcombine.low %v3759_v40, %v3767_v52 }
 0x468   :  { %9598 = vmatpush1.bf16.msra.mxu0 %v13157_v7 }
 0x469   :  { %9770 = vmatpush1.bf16.msra.mxu1 %v13159_v8  ;;  %9599 = vmatprep.subr.bf16.mxu0 %v13174_v9  ;;  %v13237_v9 = vcombine.low %v14640_v50, %v14642_v51 }
 0x46a   :  { %9771 = vmatprep.subr.bf16.mxu1 %v13176_v10  ;;  %v13238_v10 = vcombine.high %v14640_v50, %v14642_v51  ;;  %v3806_v51 = vld [vmem:[#allocation9 + $0x1c90] sm:$0xff] }
 0x46c   :  { %9600 = vmatpush1.bf16.msra.mxu0 %v13173_v20 }
 0x46d   :  { %9772 = vmatpush1.bf16.msra.mxu1 %v13175_v21  ;;  %9601 = vmatprep.subr.bf16.mxu0 %v13190_v22 }
 0x46e   :  { %9773 = vmatprep.subr.bf16.mxu1 %v13192_v23 }
 0x470   :  { %9602 = vmatpush1.bf16.msra.mxu0 %v13189_v25  ;;  %v3791_v25 = vld [vmem:[#allocation9 + $0x1c18] sm:$0xff] }
 0x471   :  { %9774 = vmatpush1.bf16.msra.mxu1 %v13191_v11  ;;  %9603 = vmatprep.subr.bf16.mxu0 %v13206_v56  ;;  %v13256_v50 = vcombine.high %v3791_v25, %v3799_v26 }
 0x472   :  { %v9283_v53 = vpop.f32.mrb[12].mxu0  ;;  %v9455_v54 = vpop.f32.mrb[12].mxu1  ;;  %9775 = vmatprep.subr.bf16.mxu1 %v13208_v33 }
 0x473   :  { %v13706_v60 = vadd.f32 %v9283_v53, %v3923_v38  ;;  %v13710_v63 = vadd.f32 %v9455_v54, %v3931_v39  ;;  %v9285_v0 = vpop.f32.mrb[13].mxu0  ;;  %v9457_v1 = vpop.f32.mrb[13].mxu1  ;;  %v3814_v53 = vld [vmem:[#allocation9 + $0x1cd0] sm:$0xff] }
 0x474   :  { %v13707_v5 = vadd.f32 %v9285_v0, %v3927_v43  ;;  %v13711_v6 = vadd.f32 %v9457_v1, %v3935_v41  ;;  %v9287_v7 = vpop.f32.mrb[14].mxu0  ;;  %v9459_v8 = vpop.f32.mrb[14].mxu1  ;;  %9604 = vmatpush1.bf16.msra.mxu0 %v13205_v42  ;;  %v3807_v0 = vld [vmem:[#allocation9 + $0x1c98] sm:$0xff]  ;;  %v13270_v4 = vcombine.high %v3806_v51, %v3814_v53 }
 0x475   :  { %v10496_v16 = vmul.f32 0.2, %v13706_v60  ;;  %v10498_v19 = vmul.f32 0.2, %v13710_v63  ;;  %v13708_v20 = vadd.f32 %v9287_v7, %v3923_v38  ;;  %v13712_v21 = vadd.f32 %v9459_v8, %v3931_v39  ;;  %9776 = vmatpush1.bf16.msra.mxu1 %v13207_v47  ;;  %v9289_v22 = vpop.f32.mrb[15].mxu0  ;;  %v9461_v23 = vpop.f32.mrb[15].mxu1  ;;  %9605 = vmatprep.subr.bf16.mxu0 %v13222_v49 }
 0x476   :  { %v10497_v27 = vmul.f32 0.2, %v13707_v5  ;;  %v13709_v28 = vadd.f32 %v9289_v22, %v3927_v43  ;;  %v13713_v29 = vadd.f32 %v9461_v23, %v3935_v41  ;;  %9777 = vmatprep.subr.bf16.mxu1 %v13224_v55  ;;  %v10499_v11 = vmul.f32 0.2, %v13711_v6  ;;  %v3815_v1 = vld [vmem:[#allocation9 + $0x1cd8] sm:$0xff]  ;;  %v3822_v7 = vld [vmem:[#allocation9 + $0x1d10] sm:$0xff] }
 0x477   :  { %v10512_v56 = vmul.f32 0.2, %v13708_v20  ;;  %v10514_v33 = vmul.f32 0.2, %v13712_v21  ;;  %v10528_v36 = vmax.f32 %v13706_v60, %v10496_v16  ;;  %v13254_v38 = vcombine.high %v3790_v12, %v3798_v15  ;;  %v3823_v8 = vld [vmem:[#allocation9 + $0x1d18] sm:$0xff] }
 0x478   :  { %v10513_v40 = vmul.f32 0.2, %v13709_v28  ;;  %v10515_v52 = vmul.f32 0.2, %v13713_v29  ;;  %9606 = vmatpush1.bf16.msra.mxu0 %v13221_v2  ;;  %v10530_v39 = vmax.f32 %v13710_v63, %v10498_v19  ;;  %v10529_v43 = vmax.f32 %v13707_v5, %v10497_v27  ;;  %v3838_v19 = vld [vmem:[#allocation9 + $0x1d90] sm:$0xff]  ;;  %v3847_v22 = vld [vmem:[#allocation9 + $0x1dd8] sm:$0xff] }
 0x479   :  { %v10544_v42 = vmax.f32 %v13708_v20, %v10512_v56  ;;  %v10546_v47 = vmax.f32 %v13712_v21, %v10514_v33  ;;  %9778 = vmatpush1.bf16.msra.mxu1 %v13223_v3  ;;  %9607 = vmatprep.subr.bf16.mxu0 %v13238_v10  ;;  %v10531_v54 = vmax.f32 %v13711_v6, %v10499_v11  ;;  %v3830_v6 = vld [vmem:[#allocation9 + $0x1d50] sm:$0xff]  ;;  %v3831_v10 = vld [vmem:[#allocation9 + $0x1d58] sm:$0xff] }
 0x47a   :  { %v10545_v41 = vmax.f32 %v13709_v28, %v10513_v40  ;;  %v10547_v49 = vmax.f32 %v13713_v29, %v10515_v52  ;;  %9779 = vmatprep.subr.bf16.mxu1 %v13240_v24  ;;  %v13253_v63 = vcombine.low %v3790_v12, %v3798_v15  ;;  %v13255_v3 = vcombine.low %v3791_v25, %v3799_v26  ;;  %v3846_v20 = vld [vmem:[#allocation9 + $0x1dd0] sm:$0xff]  ;;  %v3839_v21 = vld [vmem:[#allocation9 + $0x1d98] sm:$0xff] }
 0x47b   :  { %v14648_v55 = vpack.c.bf16 %v10544_v42, %v10528_v36  ;;  %v14650_v60 = vpack.c.bf16 %v10546_v47, %v10530_v39  ;;  %v13272_v5 = vcombine.high %v3807_v0, %v3815_v1  ;;  %v13269_v16 = vcombine.low %v3806_v51, %v3814_v53  ;;  %v3854_v24 = vld [vmem:[#allocation9 + $0x1e10] sm:$0xff]  ;;  %v3855_v26 = vld [vmem:[#allocation9 + $0x1e18] sm:$0xff] }
 0x47c   :  { %9608 = vmatpush1.bf16.msra.mxu0 %v13237_v9  ;;  %v14652_v2 = vpack.c.bf16 %v10545_v41, %v10529_v43  ;;  %v14654_v31 = vpack.c.bf16 %v10547_v49, %v10531_v54  ;;  %v13271_v9 = vcombine.low %v3807_v0, %v3815_v1  ;;  %v13286_v12 = vcombine.high %v3822_v7, %v3830_v6  ;;  %v3862_v25 = vld [vmem:[#allocation9 + $0x1e50] sm:$0xff]  ;;  %v3863_v11 = vld [vmem:[#allocation9 + $0x1e58] sm:$0xff] }
 0x47d   :  { %9780 = vmatpush1.bf16.msra.mxu1 %v13239_v35  ;;  %9609 = vmatprep.subr.bf16.mxu0 %v13254_v38  ;;  %v13288_v15 = vcombine.high %v3823_v8, %v3831_v10  ;;  %v13285_v23 = vcombine.low %v3822_v7, %v3830_v6  ;;  %v13287_v27 = vcombine.low %v3823_v8, %v3831_v10  ;;  %v3870_v40 = vld [vmem:[#allocation9 + $0x1e90] sm:$0xff]  ;;  %v3871_v38 = vld [vmem:[#allocation9 + $0x1e98] sm:$0xff] }
 0x47e   :  { %9781 = vmatprep.subr.bf16.mxu1 %v13256_v50  ;;  %v13302_v28 = vcombine.high %v3838_v19, %v3846_v20  ;;  %v13304_v29 = vcombine.high %v3839_v21, %v3847_v22  ;;  %v13301_v56 = vcombine.low %v3838_v19, %v3846_v20  ;;  %v13303_v33 = vcombine.low %v3839_v21, %v3847_v22  ;;  %v3878_v52 = vld [vmem:[#allocation9 + $0x1ed0] sm:$0xff]  ;;  %v3879_v39 = vld [vmem:[#allocation9 + $0x1ed8] sm:$0xff]  ;;  %v2905_v19 = vld [vmem:[#allocation9 + $0x68] sm:$0xff] }
 0x47f   :  { %v13318_v35 = vcombine.high %v3854_v24, %v3862_v25  ;;  %v13320_v36 = vcombine.high %v3855_v26, %v3863_v11  ;;  %v13317_v42 = vcombine.low %v3854_v24, %v3862_v25  ;;  %v13319_v47 = vcombine.low %v3855_v26, %v3863_v11  ;;  %v3886_v49 = vld [vmem:[#allocation9 + $0x1f10] sm:$0xff]  ;;  %v3887_v51 = vld [vmem:[#allocation9 + $0x1f18] sm:$0xff]  ;;  %v2913_v24 = vld [vmem:[#allocation9 + $0xa8] sm:$0xff] }
 0x480   :  { %9610 = vmatpush1.bf16.msra.mxu0 %v13253_v63  ;;  %v13334_v43 = vcombine.high %v3870_v40, %v3878_v52  ;;  %v13336_v41 = vcombine.high %v3871_v38, %v3879_v39  ;;  %v3894_v50 = vld [vmem:[#allocation9 + $0x1f50] sm:$0xff]  ;;  %v3895_v53 = vld [vmem:[#allocation9 + $0x1f58] sm:$0xff]  ;;  %v13333_v54 = vcombine.low %v3870_v40, %v3878_v52  ;;  %v13335_v0 = vcombine.low %v3871_v38, %v3879_v39  ;;  %v2921_v25 = vld [vmem:[#allocation9 + $0xe8] sm:$0xff] }
 0x481   :  { %9782 = vmatpush1.bf16.msra.mxu1 %v13255_v3  ;;  %9611 = vmatprep.subr.bf16.mxu0 %v13270_v4  ;;  %v13350_v1 = vcombine.high %v3886_v49, %v3894_v50  ;;  %v13352_v63 = vcombine.high %v3887_v51, %v3895_v53  ;;  %v3902_v3 = vld [vmem:[#allocation9 + $0x1f90] sm:$0xff]  ;;  %v3911_v7 = vld [vmem:[#allocation9 + $0x1fd8] sm:$0xff]  ;;  %v13349_v6 = vcombine.low %v3886_v49, %v3894_v50  ;;  %v2937_v40 = vld [vmem:[#allocation9 + $0x168] sm:$0xff] }
 0x482   :  { %9783 = vmatprep.subr.bf16.mxu1 %v13272_v5  ;;  %v3910_v4 = vld [vmem:[#allocation9 + $0x1fd0] sm:$0xff]  ;;  %v3903_v5 = vld [vmem:[#allocation9 + $0x1f98] sm:$0xff]  ;;  %v13351_v8 = vcombine.low %v3887_v51, %v3895_v53  ;;  %v12379_v38 = vcombine.low %v2913_v24, %v2921_v25  ;;  %v2953_v49 = vld [vmem:[#allocation9 + $0x1e8] sm:$0xff] }
 0x483   :  { %v13366_v10 = vcombine.high %v3902_v3, %v3910_v4  ;;  %v13365_v20 = vcombine.low %v3902_v3, %v3910_v4  ;;  %v13367_v21 = vcombine.low %v3903_v5, %v3911_v7  ;;  %v2969_v3 = vld [vmem:[#allocation9 + $0x268] sm:$0xff] }
 0x484   :  { %9612 = vmatpush1.bf16.msra.mxu0 %v13269_v16  ;;  %v13368_v16 = vcombine.high %v3903_v5, %v3911_v7 }
 0x485   :  { %9784 = vmatpush1.bf16.msra.mxu1 %v13271_v9  ;;  %9613 = vmatprep.subr.bf16.mxu0 %v13286_v12  ;;  %v2896_v9 = vld [vmem:[#allocation9 + $0x20] sm:$0xff] }
 0x486   :  { %9785 = vmatprep.subr.bf16.mxu1 %v13288_v15  ;;  %v2904_v12 = vld [vmem:[#allocation9 + $0x60] sm:$0xff]  ;;  %v2897_v15 = vld [vmem:[#allocation9 + $0x28] sm:$0xff] }
 0x487   :  { %v12362_v22 = vcombine.high %v2896_v9, %v2904_v12  ;;  %v12363_v26 = vcombine.low %v2897_v15, %v2905_v19 }
 0x488   :  { %9614 = vmatpush1.bf16.msra.mxu0 %v13285_v23  ;;  %v12364_v23 = vcombine.high %v2897_v15, %v2905_v19 }
 0x489   :  { %9786 = vmatpush1.bf16.msra.mxu1 %v13287_v27  ;;  %9615 = vmatprep.subr.bf16.mxu0 %v13302_v28  ;;  %v2912_v27 = vld [vmem:[#allocation9 + $0xa0] sm:$0xff] }
 0x48a   :  { %9787 = vmatprep.subr.bf16.mxu1 %v13304_v29  ;;  %v2920_v28 = vld [vmem:[#allocation9 + $0xe0] sm:$0xff]  ;;  %v12361_v29 = vcombine.low %v2896_v9, %v2904_v12  ;;  %v2985_v9 = vld [vmem:[#allocation9 + $0x2e8] sm:$0xff] }
 0x48b   :  { %v12378_v11 = vcombine.high %v2912_v27, %v2920_v28  ;;  %v12377_v52 = vcombine.low %v2912_v27, %v2920_v28  ;;  %v3001_v27 = vld [vmem:[#allocation9 + $0x368] sm:$0xff] }
 0x48c   :  { %9616 = vmatpush1.bf16.msra.mxu0 %v13301_v56  ;;  %v2928_v56 = vld [vmem:[#allocation9 + $0x120] sm:$0xff] }
 0x48d   :  { %9788 = vmatpush1.bf16.msra.mxu1 %v13303_v33  ;;  %9617 = vmatprep.subr.bf16.mxu0 %v13318_v35  ;;  %v2936_v33 = vld [vmem:[#allocation9 + $0x160] sm:$0xff]  ;;  %v12380_v35 = vcombine.high %v2913_v24, %v2921_v25 }
 0x48e   :  { %9789 = vmatprep.subr.bf16.mxu1 %v13320_v36  ;;  %v2929_v36 = vld [vmem:[#allocation9 + $0x128] sm:$0xff]  ;;  %v12394_v39 = vcombine.high %v2928_v56, %v2936_v33  ;;  %v12393_v50 = vcombine.low %v2928_v56, %v2936_v33 }
 0x48f   :  { %v12395_v51 = vcombine.low %v2929_v36, %v2937_v40  ;;  %v3009_v56 = vld [vmem:[#allocation9 + $0x3a8] sm:$0xff] }
 0x490   :  { %9618 = vmatpush1.bf16.msra.mxu0 %v13317_v42  ;;  %v12396_v42 = vcombine.high %v2929_v36, %v2937_v40  ;;  %v3017_v33 = vld [vmem:[#allocation9 + $0x3e8] sm:$0xff] }
 0x491   :  { %9790 = vmatpush1.bf16.msra.mxu1 %v13319_v47  ;;  %9619 = vmatprep.subr.bf16.mxu0 %v13334_v43  ;;  %v2944_v47 = vld [vmem:[#allocation9 + $0x1a0] sm:$0xff] }
 0x492   :  { %9791 = vmatprep.subr.bf16.mxu1 %v13336_v41  ;;  %v2952_v43 = vld [vmem:[#allocation9 + $0x1e0] sm:$0xff]  ;;  %v2945_v41 = vld [vmem:[#allocation9 + $0x1a8] sm:$0xff] }
 0x493   :  { %v12410_v53 = vcombine.high %v2944_v47, %v2952_v43  ;;  %v12409_v4 = vcombine.low %v2944_v47, %v2952_v43  ;;  %v12411_v5 = vcombine.low %v2945_v41, %v2953_v49  ;;  %v3033_v47 = vld [vmem:[#allocation9 + $0x468] sm:$0xff] }
 0x494   :  { %9620 = vmatpush1.bf16.msra.mxu0 %v13333_v54  ;;  %v12412_v54 = vcombine.high %v2945_v41, %v2953_v49  ;;  %v12475_v41 = vcombine.low %v3009_v56, %v3017_v33 }
 0x495   :  { %9792 = vmatpush1.bf16.msra.mxu1 %v13335_v0  ;;  %9621 = vmatprep.subr.bf16.mxu0 %v13350_v1  ;;  %v2960_v0 = vld [vmem:[#allocation9 + $0x220] sm:$0xff] }
 0x496   :  { %9793 = vmatprep.subr.bf16.mxu1 %v13352_v63  ;;  %v2968_v1 = vld [vmem:[#allocation9 + $0x260] sm:$0xff]  ;;  %v2961_v63 = vld [vmem:[#allocation9 + $0x228] sm:$0xff] }
 0x497   :  { %v12426_v7 = vcombine.high %v2960_v0, %v2968_v1  ;;  %v12425_v12 = vcombine.low %v2960_v0, %v2968_v1  ;;  %v12427_v15 = vcombine.low %v2961_v63, %v2969_v3  ;;  %v3049_v0 = vld [vmem:[#allocation9 + $0x4e8] sm:$0xff] }
 0x498   :  { %9622 = vmatpush1.bf16.msra.mxu0 %v13349_v6  ;;  %v12428_v6 = vcombine.high %v2961_v63, %v2969_v3 }
 0x499   :  { %9794 = vmatpush1.bf16.msra.mxu1 %v13351_v8  ;;  %9623 = vmatprep.subr.bf16.mxu0 %v13366_v10  ;;  %v2976_v8 = vld [vmem:[#allocation9 + $0x2a0] sm:$0xff] }
 0x49a   :  { %9795 = vmatprep.subr.bf16.mxu1 %v13368_v16  ;;  %v2984_v10 = vld [vmem:[#allocation9 + $0x2e0] sm:$0xff]  ;;  %v2977_v16 = vld [vmem:[#allocation9 + $0x2a8] sm:$0xff] }
 0x49b   :  { %v12442_v19 = vcombine.high %v2976_v8, %v2984_v10  ;;  %v12441_v28 = vcombine.low %v2976_v8, %v2984_v10  ;;  %v3065_v8 = vld [vmem:[#allocation9 + $0x568] sm:$0xff] }
 0x49c   :  { %9624 = vmatpush1.bf16.msra.mxu0 %v13365_v20  ;;  %v12444_v20 = vcombine.high %v2977_v16, %v2985_v9 }
 0x49d   :  { %9796 = vmatpush1.bf16.msra.mxu1 %v13367_v21  ;;  %9808 = vmatprep.subr.bf16.mxu0 %v12362_v22  ;;  %v2992_v21 = vld [vmem:[#allocation9 + $0x320] sm:$0xff] }
 0x49e   :  { %9980 = vmatprep.subr.bf16.mxu1 %v12364_v23  ;;  %v3000_v22 = vld [vmem:[#allocation9 + $0x360] sm:$0xff]  ;;  %v2993_v23 = vld [vmem:[#allocation9 + $0x328] sm:$0xff] }
 0x49f   :  { %9626 = vmatmul.mubr.bf16.vlgmr.msra.gmra.mrb[16].mxu0 %v14608_v57  ;;  %v12458_v24 = vcombine.high %v2992_v21, %v3000_v22  ;;  %v12460_v25 = vcombine.high %v2993_v23, %v3001_v27  ;;  %v12459_v36 = vcombine.low %v2993_v23, %v3001_v27 }
 0x4a0   :  { %9798 = vmatmul.mubr.bf16.vlgmr.msra.gmra.mrb[16].mxu1 %v14608_v57  ;;  %9809 = vmatpush1.bf16.msra.mxu0 %v12361_v29  ;;  %v12443_v29 = vcombine.low %v2977_v16, %v2985_v9 }
 0x4a1   :  { %9840 = vmatprep.mubr.bf16.mxu0 %v14558_v17  ;;  %9981 = vmatpush1.bf16.msra.mxu1 %v12363_v26  ;;  %v3008_v26 = vld [vmem:[#allocation9 + $0x3a0] sm:$0xff] }
 0x4a2   :  { %10012 = vmatprep.mubr.bf16.mxu1 %v14558_v17  ;;  %9810 = vmatprep.subr.bf16.mxu0 %v12378_v11  ;;  %v3016_v11 = vld [vmem:[#allocation9 + $0x3e0] sm:$0xff] }
 0x4a3   :  { %9982 = vmatprep.subr.bf16.mxu1 %v12380_v35  ;;  %v12457_v35 = vcombine.low %v2992_v21, %v3000_v22  ;;  %v12474_v40 = vcombine.high %v3008_v26, %v3016_v11  ;;  %v12473_v43 = vcombine.low %v3008_v26, %v3016_v11  ;;  %v3081_v21 = vld [vmem:[#allocation9 + $0x5e8] sm:$0xff] }
 0x4a4   :  { %9811 = vmatpush1.bf16.msra.mxu0 %v12377_v52  ;;  %v12476_v52 = vcombine.high %v3009_v56, %v3017_v33  ;;  %v3097_v26 = vld [vmem:[#allocation9 + $0x668] sm:$0xff] }
 0x4a5   :  { %9983 = vmatpush1.bf16.msra.mxu1 %v12379_v38  ;;  %9812 = vmatprep.subr.bf16.mxu0 %v12394_v39  ;;  %v3024_v38 = vld [vmem:[#allocation9 + $0x420] sm:$0xff] }
 0x4a6   :  { %9984 = vmatprep.subr.bf16.mxu1 %v12396_v42  ;;  %v3032_v39 = vld [vmem:[#allocation9 + $0x460] sm:$0xff]  ;;  %v3025_v42 = vld [vmem:[#allocation9 + $0x428] sm:$0xff] }
 0x4a7   :  { %v12490_v49 = vcombine.high %v3024_v38, %v3032_v39  ;;  %v12489_v1 = vcombine.low %v3024_v38, %v3032_v39  ;;  %v12491_v63 = vcombine.low %v3025_v42, %v3033_v47  ;;  %v3113_v38 = vld [vmem:[#allocation9 + $0x6e8] sm:$0xff] }
 0x4a8   :  { %9813 = vmatpush1.bf16.msra.mxu0 %v12393_v50  ;;  %v12492_v50 = vcombine.high %v3025_v42, %v3033_v47 }
 0x4a9   :  { %9985 = vmatpush1.bf16.msra.mxu1 %v12395_v51  ;;  %9814 = vmatprep.subr.bf16.mxu0 %v12410_v53  ;;  %v3040_v51 = vld [vmem:[#allocation9 + $0x4a0] sm:$0xff] }
 0x4aa   :  { %9986 = vmatprep.subr.bf16.mxu1 %v12412_v54  ;;  %v3048_v53 = vld [vmem:[#allocation9 + $0x4e0] sm:$0xff]  ;;  %v3041_v54 = vld [vmem:[#allocation9 + $0x4a8] sm:$0xff] }
 0x4ab   :  { %v12506_v3 = vcombine.high %v3040_v51, %v3048_v53  ;;  %v12505_v10 = vcombine.low %v3040_v51, %v3048_v53  ;;  %v12507_v16 = vcombine.low %v3041_v54, %v3049_v0  ;;  %v3129_v51 = vld [vmem:[#allocation9 + $0x768] sm:$0xff] }
 0x4ac   :  { %9815 = vmatpush1.bf16.msra.mxu0 %v12409_v4  ;;  %v12508_v4 = vcombine.high %v3041_v54, %v3049_v0 }
 0x4ad   :  { %9987 = vmatpush1.bf16.msra.mxu1 %v12411_v5  ;;  %9816 = vmatprep.subr.bf16.mxu0 %v12426_v7  ;;  %v3056_v5 = vld [vmem:[#allocation9 + $0x520] sm:$0xff] }
 0x4ae   :  { %9988 = vmatprep.subr.bf16.mxu1 %v12428_v6  ;;  %v3064_v7 = vld [vmem:[#allocation9 + $0x560] sm:$0xff]  ;;  %v3057_v6 = vld [vmem:[#allocation9 + $0x528] sm:$0xff] }
 0x4af   :  { %v12522_v9 = vcombine.high %v3056_v5, %v3064_v7  ;;  %v12521_v22 = vcombine.low %v3056_v5, %v3064_v7  ;;  %v12523_v23 = vcombine.low %v3057_v6, %v3065_v8  ;;  %v3145_v5 = vld [vmem:[#allocation9 + $0x7e8] sm:$0xff] }
 0x4b0   :  { %9817 = vmatpush1.bf16.msra.mxu0 %v12425_v12  ;;  %v12524_v12 = vcombine.high %v3057_v6, %v3065_v8 }
 0x4b1   :  { %9989 = vmatpush1.bf16.msra.mxu1 %v12427_v15  ;;  %9818 = vmatprep.subr.bf16.mxu0 %v12442_v19  ;;  %v3072_v15 = vld [vmem:[#allocation9 + $0x5a0] sm:$0xff] }
 0x4b2   :  { %9990 = vmatprep.subr.bf16.mxu1 %v12444_v20  ;;  %v3080_v19 = vld [vmem:[#allocation9 + $0x5e0] sm:$0xff]  ;;  %v3073_v20 = vld [vmem:[#allocation9 + $0x5a8] sm:$0xff] }
 0x4b3   :  { %v12538_v27 = vcombine.high %v3072_v15, %v3080_v19  ;;  %v12537_v11 = vcombine.low %v3072_v15, %v3080_v19  ;;  %v12539_v56 = vcombine.low %v3073_v20, %v3081_v21  ;;  %v3161_v15 = vld [vmem:[#allocation9 + $0x868] sm:$0xff] }
 0x4b4   :  { %9819 = vmatpush1.bf16.msra.mxu0 %v12441_v28  ;;  %v12540_v28 = vcombine.high %v3073_v20, %v3081_v21 }
 0x4b5   :  { %9991 = vmatpush1.bf16.msra.mxu1 %v12443_v29  ;;  %9820 = vmatprep.subr.bf16.mxu0 %v12458_v24  ;;  %v3088_v29 = vld [vmem:[#allocation9 + $0x620] sm:$0xff] }
 0x4b6   :  { %9992 = vmatprep.subr.bf16.mxu1 %v12460_v25  ;;  %v3096_v24 = vld [vmem:[#allocation9 + $0x660] sm:$0xff]  ;;  %v3089_v25 = vld [vmem:[#allocation9 + $0x628] sm:$0xff] }
 0x4b7   :  { %v12554_v33 = vcombine.high %v3088_v29, %v3096_v24  ;;  %v12553_v39 = vcombine.low %v3088_v29, %v3096_v24  ;;  %v12555_v42 = vcombine.low %v3089_v25, %v3097_v26  ;;  %v3169_v29 = vld [vmem:[#allocation9 + $0x8a8] sm:$0xff] }
 0x4b8   :  { %9821 = vmatpush1.bf16.msra.mxu0 %v12457_v35  ;;  %v12556_v35 = vcombine.high %v3089_v25, %v3097_v26  ;;  %v3177_v24 = vld [vmem:[#allocation9 + $0x8e8] sm:$0xff] }
 0x4b9   :  { %9993 = vmatpush1.bf16.msra.mxu1 %v12459_v36  ;;  %9822 = vmatprep.subr.bf16.mxu0 %v12474_v40  ;;  %v3104_v36 = vld [vmem:[#allocation9 + $0x6a0] sm:$0xff] }
 0x4ba   :  { %9994 = vmatprep.subr.bf16.mxu1 %v12476_v52  ;;  %v3112_v40 = vld [vmem:[#allocation9 + $0x6e0] sm:$0xff]  ;;  %v3105_v52 = vld [vmem:[#allocation9 + $0x6a8] sm:$0xff] }
 0x4bb   :  { %v12570_v47 = vcombine.high %v3104_v36, %v3112_v40  ;;  %v12569_v53 = vcombine.low %v3104_v36, %v3112_v40  ;;  %v12571_v54 = vcombine.low %v3105_v52, %v3113_v38  ;;  %v3193_v36 = vld [vmem:[#allocation9 + $0x968] sm:$0xff] }
 0x4bc   :  { %9823 = vmatpush1.bf16.msra.mxu0 %v12473_v43  ;;  %v12572_v43 = vcombine.high %v3105_v52, %v3113_v38  ;;  %v12635_v52 = vcombine.low %v3169_v29, %v3177_v24 }
 0x4bd   :  { %9995 = vmatpush1.bf16.msra.mxu1 %v12475_v41  ;;  %9824 = vmatprep.subr.bf16.mxu0 %v12490_v49  ;;  %v3120_v41 = vld [vmem:[#allocation9 + $0x720] sm:$0xff] }
 0x4be   :  { %9996 = vmatprep.subr.bf16.mxu1 %v12492_v50  ;;  %v3128_v49 = vld [vmem:[#allocation9 + $0x760] sm:$0xff]  ;;  %v3121_v50 = vld [vmem:[#allocation9 + $0x728] sm:$0xff] }
 0x4bf   :  { %v12586_v0 = vcombine.high %v3120_v41, %v3128_v49  ;;  %v12585_v7 = vcombine.low %v3120_v41, %v3128_v49  ;;  %v12587_v6 = vcombine.low %v3121_v50, %v3129_v51  ;;  %v3209_v41 = vld [vmem:[#allocation9 + $0x9e8] sm:$0xff] }
 0x4c0   :  { %9825 = vmatpush1.bf16.msra.mxu0 %v12489_v1  ;;  %v12588_v1 = vcombine.high %v3121_v50, %v3129_v51 }
 0x4c1   :  { %9997 = vmatpush1.bf16.msra.mxu1 %v12491_v63  ;;  %9826 = vmatprep.subr.bf16.mxu0 %v12506_v3  ;;  %v3136_v63 = vld [vmem:[#allocation9 + $0x7a0] sm:$0xff] }
 0x4c2   :  { %9998 = vmatprep.subr.bf16.mxu1 %v12508_v4  ;;  %v3144_v3 = vld [vmem:[#allocation9 + $0x7e0] sm:$0xff]  ;;  %v3137_v4 = vld [vmem:[#allocation9 + $0x7a8] sm:$0xff] }
 0x4c3   :  { %v12602_v8 = vcombine.high %v3136_v63, %v3144_v3  ;;  %v12601_v19 = vcombine.low %v3136_v63, %v3144_v3  ;;  %v12603_v20 = vcombine.low %v3137_v4, %v3145_v5  ;;  %v3225_v63 = vld [vmem:[#allocation9 + $0xa68] sm:$0xff] }
 0x4c4   :  { %9827 = vmatpush1.bf16.msra.mxu0 %v12505_v10  ;;  %v12604_v10 = vcombine.high %v3137_v4, %v3145_v5 }
 0x4c5   :  { %9999 = vmatpush1.bf16.msra.mxu1 %v12507_v16  ;;  %9828 = vmatprep.subr.bf16.mxu0 %v12522_v9  ;;  %v3152_v16 = vld [vmem:[#allocation9 + $0x820] sm:$0xff] }
 0x4c6   :  { %10000 = vmatprep.subr.bf16.mxu1 %v12524_v12  ;;  %v3160_v9 = vld [vmem:[#allocation9 + $0x860] sm:$0xff]  ;;  %v3153_v12 = vld [vmem:[#allocation9 + $0x828] sm:$0xff] }
 0x4c7   :  { %v12618_v21 = vcombine.high %v3152_v16, %v3160_v9  ;;  %v12619_v25 = vcombine.low %v3153_v12, %v3161_v15 }
 0x4c8   :  { %9829 = vmatpush1.bf16.msra.mxu0 %v12521_v22  ;;  %v12620_v22 = vcombine.high %v3153_v12, %v3161_v15 }
 0x4c9   :  { %10001 = vmatpush1.bf16.msra.mxu1 %v12523_v23  ;;  %9830 = vmatprep.subr.bf16.mxu0 %v12538_v27  ;;  %v3168_v23 = vld [vmem:[#allocation9 + $0x8a0] sm:$0xff] }
 0x4ca   :  { %10002 = vmatprep.subr.bf16.mxu1 %v12540_v28  ;;  %v3176_v27 = vld [vmem:[#allocation9 + $0x8e0] sm:$0xff]  ;;  %v12617_v28 = vcombine.low %v3152_v16, %v3160_v9  ;;  %v3241_v16 = vld [vmem:[#allocation9 + $0xae8] sm:$0xff] }
 0x4cb   :  { %v12634_v26 = vcombine.high %v3168_v23, %v3176_v27  ;;  %v12633_v40 = vcombine.low %v3168_v23, %v3176_v27  ;;  %v3257_v23 = vld [vmem:[#allocation9 + $0xb68] sm:$0xff] }
 0x4cc   :  { %9831 = vmatpush1.bf16.msra.mxu0 %v12537_v11  ;;  %v3184_v11 = vld [vmem:[#allocation9 + $0x920] sm:$0xff] }
 0x4cd   :  { %10003 = vmatpush1.bf16.msra.mxu1 %v12539_v56  ;;  %9832 = vmatprep.subr.bf16.mxu0 %v12554_v33  ;;  %v3192_v56 = vld [vmem:[#allocation9 + $0x960] sm:$0xff]  ;;  %v12636_v33 = vcombine.high %v3169_v29, %v3177_v24 }
 0x4ce   :  { %10004 = vmatprep.subr.bf16.mxu1 %v12556_v35  ;;  %v3185_v35 = vld [vmem:[#allocation9 + $0x928] sm:$0xff]  ;;  %v12650_v38 = vcombine.high %v3184_v11, %v3192_v56  ;;  %v12649_v49 = vcombine.low %v3184_v11, %v3192_v56 }
 0x4cf   :  { %v12651_v50 = vcombine.low %v3185_v35, %v3193_v36  ;;  %v3265_v11 = vld [vmem:[#allocation9 + $0xba8] sm:$0xff] }
 0x4d0   :  { %9833 = vmatpush1.bf16.msra.mxu0 %v12553_v39  ;;  %v12652_v39 = vcombine.high %v3185_v35, %v3193_v36  ;;  %v3273_v56 = vld [vmem:[#allocation9 + $0xbe8] sm:$0xff] }
 0x4d1   :  { %10005 = vmatpush1.bf16.msra.mxu1 %v12555_v42  ;;  %9834 = vmatprep.subr.bf16.mxu0 %v12570_v47  ;;  %v3200_v42 = vld [vmem:[#allocation9 + $0x9a0] sm:$0xff] }
 0x4d2   :  { %10006 = vmatprep.subr.bf16.mxu1 %v12572_v43  ;;  %v3208_v47 = vld [vmem:[#allocation9 + $0x9e0] sm:$0xff]  ;;  %v3201_v43 = vld [vmem:[#allocation9 + $0x9a8] sm:$0xff] }
 0x4d3   :  { %v12666_v51 = vcombine.high %v3200_v42, %v3208_v47  ;;  %v12665_v3 = vcombine.low %v3200_v42, %v3208_v47  ;;  %v12667_v4 = vcombine.low %v3201_v43, %v3209_v41  ;;  %v3289_v42 = vld [vmem:[#allocation9 + $0xc68] sm:$0xff] }
 0x4d4   :  { %9835 = vmatpush1.bf16.msra.mxu0 %v12569_v53  ;;  %v12668_v53 = vcombine.high %v3201_v43, %v3209_v41  ;;  %v12731_v43 = vcombine.low %v3265_v11, %v3273_v56 }
 0x4d5   :  { %10007 = vmatpush1.bf16.msra.mxu1 %v12571_v54  ;;  %9836 = vmatprep.subr.bf16.mxu0 %v12586_v0  ;;  %v3216_v54 = vld [vmem:[#allocation9 + $0xa20] sm:$0xff] }
 0x4d6   :  { %10008 = vmatprep.subr.bf16.mxu1 %v12588_v1  ;;  %v3224_v0 = vld [vmem:[#allocation9 + $0xa60] sm:$0xff]  ;;  %v3217_v1 = vld [vmem:[#allocation9 + $0xa28] sm:$0xff] }
 0x4d7   :  { %v12682_v5 = vcombine.high %v3216_v54, %v3224_v0  ;;  %v12681_v9 = vcombine.low %v3216_v54, %v3224_v0  ;;  %v12683_v12 = vcombine.low %v3217_v1, %v3225_v63  ;;  %v3305_v54 = vld [vmem:[#allocation9 + $0xce8] sm:$0xff] }
 0x4d8   :  { %9837 = vmatpush1.bf16.msra.mxu0 %v12585_v7  ;;  %v12684_v7 = vcombine.high %v3217_v1, %v3225_v63 }
 0x4d9   :  { %10009 = vmatpush1.bf16.msra.mxu1 %v12587_v6  ;;  %9838 = vmatprep.subr.bf16.mxu0 %v12602_v8  ;;  %v3232_v6 = vld [vmem:[#allocation9 + $0xaa0] sm:$0xff] }
 0x4da   :  { %10010 = vmatprep.subr.bf16.mxu1 %v12604_v10  ;;  %v3240_v8 = vld [vmem:[#allocation9 + $0xae0] sm:$0xff]  ;;  %v3233_v10 = vld [vmem:[#allocation9 + $0xaa8] sm:$0xff] }
 0x4db   :  { %v12698_v15 = vcombine.high %v3232_v6, %v3240_v8  ;;  %v12697_v27 = vcombine.low %v3232_v6, %v3240_v8  ;;  %v3321_v6 = vld [vmem:[#allocation9 + $0xd68] sm:$0xff] }
 0x4dc   :  { %9839 = vmatpush1.bf16.msra.mxu0 %v12601_v19  ;;  %v12700_v19 = vcombine.high %v3233_v10, %v3241_v16 }
 0x4dd   :  { %10011 = vmatpush1.bf16.msra.mxu1 %v12603_v20  ;;  %9851 = vmatprep.subr.bf16.mxu0 %v12618_v21  ;;  %v3248_v20 = vld [vmem:[#allocation9 + $0xb20] sm:$0xff] }
 0x4de   :  { %10023 = vmatprep.subr.bf16.mxu1 %v12620_v22  ;;  %v3256_v21 = vld [vmem:[#allocation9 + $0xb60] sm:$0xff]  ;;  %v3249_v22 = vld [vmem:[#allocation9 + $0xb28] sm:$0xff] }
 0x4df   :  { %9841 = vmatmul.mubr.bf16.vlgmr.msra.gmra.mrb[20].mxu0 %v14554_v13  ;;  %v12714_v29 = vcombine.high %v3248_v20, %v3256_v21  ;;  %v12716_v24 = vcombine.high %v3249_v22, %v3257_v23  ;;  %v12715_v35 = vcombine.low %v3249_v22, %v3257_v23 }
 0x4e0   :  { %10013 = vmatmul.mubr.bf16.vlgmr.msra.gmra.mrb[20].mxu1 %v14554_v13  ;;  %9852 = vmatpush1.bf16.msra.mxu0 %v12617_v28  ;;  %v12699_v28 = vcombine.low %v3233_v10, %v3241_v16 }
 0x4e1   :  { %9883 = vmatprep.mubr.bf16.mxu0 %v14560_v18  ;;  %10024 = vmatpush1.bf16.msra.mxu1 %v12619_v25  ;;  %v3264_v25 = vld [vmem:[#allocation9 + $0xba0] sm:$0xff] }
 0x4e2   :  { %10055 = vmatprep.mubr.bf16.mxu1 %v14560_v18  ;;  %9853 = vmatprep.subr.bf16.mxu0 %v12634_v26  ;;  %v3272_v26 = vld [vmem:[#allocation9 + $0xbe0] sm:$0xff] }
 0x4e3   :  { %10025 = vmatprep.subr.bf16.mxu1 %v12636_v33  ;;  %v12713_v33 = vcombine.low %v3248_v20, %v3256_v21  ;;  %v12730_v36 = vcombine.high %v3264_v25, %v3272_v26  ;;  %v12729_v47 = vcombine.low %v3264_v25, %v3272_v26  ;;  %v3337_v20 = vld [vmem:[#allocation9 + $0xde8] sm:$0xff] }
 0x4e4   :  { %9854 = vmatpush1.bf16.msra.mxu0 %v12633_v40  ;;  %v12732_v40 = vcombine.high %v3265_v11, %v3273_v56  ;;  %v3353_v25 = vld [vmem:[#allocation9 + $0xe68] sm:$0xff] }
 0x4e5   :  { %10026 = vmatpush1.bf16.msra.mxu1 %v12635_v52  ;;  %9855 = vmatprep.subr.bf16.mxu0 %v12650_v38  ;;  %v3280_v52 = vld [vmem:[#allocation9 + $0xc20] sm:$0xff] }
 0x4e6   :  { %10027 = vmatprep.subr.bf16.mxu1 %v12652_v39  ;;  %v3288_v38 = vld [vmem:[#allocation9 + $0xc60] sm:$0xff]  ;;  %v3281_v39 = vld [vmem:[#allocation9 + $0xc28] sm:$0xff] }
 0x4e7   :  { %v12746_v41 = vcombine.high %v3280_v52, %v3288_v38  ;;  %v12745_v0 = vcombine.low %v3280_v52, %v3288_v38  ;;  %v12747_v1 = vcombine.low %v3281_v39, %v3289_v42  ;;  %v3369_v52 = vld [vmem:[#allocation9 + $0xee8] sm:$0xff] }
 0x4e8   :  { %9856 = vmatpush1.bf16.msra.mxu0 %v12649_v49  ;;  %v12748_v49 = vcombine.high %v3281_v39, %v3289_v42 }
 0x4e9   :  { %10028 = vmatpush1.bf16.msra.mxu1 %v12651_v50  ;;  %9857 = vmatprep.subr.bf16.mxu0 %v12666_v51  ;;  %v3296_v50 = vld [vmem:[#allocation9 + $0xca0] sm:$0xff] }
 0x4ea   :  { %10029 = vmatprep.subr.bf16.mxu1 %v12668_v53  ;;  %v3304_v51 = vld [vmem:[#allocation9 + $0xce0] sm:$0xff]  ;;  %v3297_v53 = vld [vmem:[#allocation9 + $0xca8] sm:$0xff] }
 0x4eb   :  { %v12762_v63 = vcombine.high %v3296_v50, %v3304_v51  ;;  %v12761_v8 = vcombine.low %v3296_v50, %v3304_v51  ;;  %v12763_v10 = vcombine.low %v3297_v53, %v3305_v54  ;;  %v3385_v50 = vld [vmem:[#allocation9 + $0xf68] sm:$0xff] }
 0x4ec   :  { %9858 = vmatpush1.bf16.msra.mxu0 %v12665_v3  ;;  %v12764_v3 = vcombine.high %v3297_v53, %v3305_v54 }
 0x4ed   :  { %10030 = vmatpush1.bf16.msra.mxu1 %v12667_v4  ;;  %9859 = vmatprep.subr.bf16.mxu0 %v12682_v5  ;;  %v3312_v4 = vld [vmem:[#allocation9 + $0xd20] sm:$0xff] }
 0x4ee   :  { %10031 = vmatprep.subr.bf16.mxu1 %v12684_v7  ;;  %v3320_v5 = vld [vmem:[#allocation9 + $0xd60] sm:$0xff]  ;;  %v3313_v7 = vld [vmem:[#allocation9 + $0xd28] sm:$0xff] }
 0x4ef   :  { %v12778_v16 = vcombine.high %v3312_v4, %v3320_v5  ;;  %v12777_v21 = vcombine.low %v3312_v4, %v3320_v5  ;;  %v12779_v22 = vcombine.low %v3313_v7, %v3321_v6  ;;  %v3401_v4 = vld [vmem:[#allocation9 + $0xfe8] sm:$0xff] }
 0x4f0   :  { %9860 = vmatpush1.bf16.msra.mxu0 %v12681_v9  ;;  %v12780_v9 = vcombine.high %v3313_v7, %v3321_v6 }
 0x4f1   :  { %10032 = vmatpush1.bf16.msra.mxu1 %v12683_v12  ;;  %9861 = vmatprep.subr.bf16.mxu0 %v12698_v15  ;;  %v3328_v12 = vld [vmem:[#allocation9 + $0xda0] sm:$0xff] }
 0x4f2   :  { %10033 = vmatprep.subr.bf16.mxu1 %v12700_v19  ;;  %v3336_v15 = vld [vmem:[#allocation9 + $0xde0] sm:$0xff]  ;;  %v3329_v19 = vld [vmem:[#allocation9 + $0xda8] sm:$0xff] }
 0x4f3   :  { %v12794_v23 = vcombine.high %v3328_v12, %v3336_v15  ;;  %v12793_v26 = vcombine.low %v3328_v12, %v3336_v15  ;;  %v12795_v11 = vcombine.low %v3329_v19, %v3337_v20  ;;  %v3417_v12 = vld [vmem:[#allocation9 + $0x1068] sm:$0xff] }
 0x4f4   :  { %9862 = vmatpush1.bf16.msra.mxu0 %v12697_v27  ;;  %v12796_v27 = vcombine.high %v3329_v19, %v3337_v20 }
 0x4f5   :  { %10034 = vmatpush1.bf16.msra.mxu1 %v12699_v28  ;;  %9863 = vmatprep.subr.bf16.mxu0 %v12714_v29  ;;  %v3344_v28 = vld [vmem:[#allocation9 + $0xe20] sm:$0xff] }
 0x4f6   :  { %10035 = vmatprep.subr.bf16.mxu1 %v12716_v24  ;;  %v3352_v29 = vld [vmem:[#allocation9 + $0xe60] sm:$0xff]  ;;  %v3345_v24 = vld [vmem:[#allocation9 + $0xe28] sm:$0xff] }
 0x4f7   :  { %v12810_v56 = vcombine.high %v3344_v28, %v3352_v29  ;;  %v12809_v38 = vcombine.low %v3344_v28, %v3352_v29  ;;  %v12811_v39 = vcombine.low %v3345_v24, %v3353_v25  ;;  %v3425_v28 = vld [vmem:[#allocation9 + $0x10a8] sm:$0xff] }
 0x4f8   :  { %9864 = vmatpush1.bf16.msra.mxu0 %v12713_v33  ;;  %v12812_v33 = vcombine.high %v3345_v24, %v3353_v25  ;;  %v3433_v29 = vld [vmem:[#allocation9 + $0x10e8] sm:$0xff] }
 0x4f9   :  { %10036 = vmatpush1.bf16.msra.mxu1 %v12715_v35  ;;  %9865 = vmatprep.subr.bf16.mxu0 %v12730_v36  ;;  %v3360_v35 = vld [vmem:[#allocation9 + $0xea0] sm:$0xff] }
 0x4fa   :  { %10037 = vmatprep.subr.bf16.mxu1 %v12732_v40  ;;  %v3368_v36 = vld [vmem:[#allocation9 + $0xee0] sm:$0xff]  ;;  %v3361_v40 = vld [vmem:[#allocation9 + $0xea8] sm:$0xff] }
 0x4fb   :  { %v12826_v42 = vcombine.high %v3360_v35, %v3368_v36  ;;  %v12825_v51 = vcombine.low %v3360_v35, %v3368_v36  ;;  %v12827_v53 = vcombine.low %v3361_v40, %v3369_v52  ;;  %v3449_v35 = vld [vmem:[#allocation9 + $0x1168] sm:$0xff] }
 0x4fc   :  { %9866 = vmatpush1.bf16.msra.mxu0 %v12729_v47  ;;  %v12828_v47 = vcombine.high %v3361_v40, %v3369_v52  ;;  %v12891_v40 = vcombine.low %v3425_v28, %v3433_v29 }
 0x4fd   :  { %10038 = vmatpush1.bf16.msra.mxu1 %v12731_v43  ;;  %9867 = vmatprep.subr.bf16.mxu0 %v12746_v41  ;;  %v3376_v43 = vld [vmem:[#allocation9 + $0xf20] sm:$0xff] }
 0x4fe   :  { %10039 = vmatprep.subr.bf16.mxu1 %v12748_v49  ;;  %v3384_v41 = vld [vmem:[#allocation9 + $0xf60] sm:$0xff]  ;;  %v3377_v49 = vld [vmem:[#allocation9 + $0xf28] sm:$0xff] }
 0x4ff   :  { %v12842_v54 = vcombine.high %v3376_v43, %v3384_v41  ;;  %v12841_v5 = vcombine.low %v3376_v43, %v3384_v41  ;;  %v12843_v7 = vcombine.low %v3377_v49, %v3385_v50  ;;  %v3465_v43 = vld [vmem:[#allocation9 + $0x11e8] sm:$0xff] }
 0x500   :  { %9868 = vmatpush1.bf16.msra.mxu0 %v12745_v0  ;;  %v12844_v0 = vcombine.high %v3377_v49, %v3385_v50 }
 0x501   :  { %10040 = vmatpush1.bf16.msra.mxu1 %v12747_v1  ;;  %9869 = vmatprep.subr.bf16.mxu0 %v12762_v63  ;;  %v3392_v1 = vld [vmem:[#allocation9 + $0xfa0] sm:$0xff] }
 0x502   :  { %10041 = vmatprep.subr.bf16.mxu1 %v12764_v3  ;;  %v3400_v63 = vld [vmem:[#allocation9 + $0xfe0] sm:$0xff]  ;;  %v3393_v3 = vld [vmem:[#allocation9 + $0xfa8] sm:$0xff] }
 0x503   :  { %v12858_v6 = vcombine.high %v3392_v1, %v3400_v63  ;;  %v12857_v15 = vcombine.low %v3392_v1, %v3400_v63  ;;  %v12859_v19 = vcombine.low %v3393_v3, %v3401_v4  ;;  %v3481_v1 = vld [vmem:[#allocation9 + $0x1268] sm:$0xff] }
 0x504   :  { %9870 = vmatpush1.bf16.msra.mxu0 %v12761_v8  ;;  %v12860_v8 = vcombine.high %v3393_v3, %v3401_v4 }
 0x505   :  { %10042 = vmatpush1.bf16.msra.mxu1 %v12763_v10  ;;  %9871 = vmatprep.subr.bf16.mxu0 %v12778_v16  ;;  %v3408_v10 = vld [vmem:[#allocation9 + $0x1020] sm:$0xff] }
 0x506   :  { %10043 = vmatprep.subr.bf16.mxu1 %v12780_v9  ;;  %v3416_v16 = vld [vmem:[#allocation9 + $0x1060] sm:$0xff]  ;;  %v3409_v9 = vld [vmem:[#allocation9 + $0x1028] sm:$0xff] }
 0x507   :  { %v12874_v20 = vcombine.high %v3408_v10, %v3416_v16  ;;  %v12875_v24 = vcombine.low %v3409_v9, %v3417_v12 }
 0x508   :  { %9872 = vmatpush1.bf16.msra.mxu0 %v12777_v21  ;;  %v12876_v21 = vcombine.high %v3409_v9, %v3417_v12 }
 0x509   :  { %10044 = vmatpush1.bf16.msra.mxu1 %v12779_v22  ;;  %9873 = vmatprep.subr.bf16.mxu0 %v12794_v23  ;;  %v3424_v22 = vld [vmem:[#allocation9 + $0x10a0] sm:$0xff] }
 0x50a   :  { %10045 = vmatprep.subr.bf16.mxu1 %v12796_v27  ;;  %v3432_v23 = vld [vmem:[#allocation9 + $0x10e0] sm:$0xff]  ;;  %v12873_v27 = vcombine.low %v3408_v10, %v3416_v16  ;;  %v3497_v10 = vld [vmem:[#allocation9 + $0x12e8] sm:$0xff] }
 0x50b   :  { %v12890_v25 = vcombine.high %v3424_v22, %v3432_v23  ;;  %v12889_v36 = vcombine.low %v3424_v22, %v3432_v23  ;;  %v3513_v22 = vld [vmem:[#allocation9 + $0x1368] sm:$0xff] }
 0x50c   :  { %9874 = vmatpush1.bf16.msra.mxu0 %v12793_v26  ;;  %v3440_v26 = vld [vmem:[#allocation9 + $0x1120] sm:$0xff] }
 0x50d   :  { %10046 = vmatpush1.bf16.msra.mxu1 %v12795_v11  ;;  %9875 = vmatprep.subr.bf16.mxu0 %v12810_v56  ;;  %v3448_v11 = vld [vmem:[#allocation9 + $0x1160] sm:$0xff]  ;;  %v12892_v56 = vcombine.high %v3425_v28, %v3433_v29 }
 0x50e   :  { %10047 = vmatprep.subr.bf16.mxu1 %v12812_v33  ;;  %v3441_v33 = vld [vmem:[#allocation9 + $0x1128] sm:$0xff]  ;;  %v12906_v52 = vcombine.high %v3440_v26, %v3448_v11  ;;  %v12905_v41 = vcombine.low %v3440_v26, %v3448_v11 }
 0x50f   :  { %v12907_v49 = vcombine.low %v3441_v33, %v3449_v35  ;;  %v3521_v26 = vld [vmem:[#allocation9 + $0x13a8] sm:$0xff] }
 0x510   :  { %9876 = vmatpush1.bf16.msra.mxu0 %v12809_v38  ;;  %v12908_v38 = vcombine.high %v3441_v33, %v3449_v35  ;;  %v3529_v11 = vld [vmem:[#allocation9 + $0x13e8] sm:$0xff] }
 0x511   :  { %10048 = vmatpush1.bf16.msra.mxu1 %v12811_v39  ;;  %9877 = vmatprep.subr.bf16.mxu0 %v12826_v42  ;;  %v3456_v39 = vld [vmem:[#allocation9 + $0x11a0] sm:$0xff] }
 0x512   :  { %10049 = vmatprep.subr.bf16.mxu1 %v12828_v47  ;;  %v3464_v42 = vld [vmem:[#allocation9 + $0x11e0] sm:$0xff]  ;;  %v3457_v47 = vld [vmem:[#allocation9 + $0x11a8] sm:$0xff] }
 0x513   :  { %v12922_v50 = vcombine.high %v3456_v39, %v3464_v42  ;;  %v12921_v63 = vcombine.low %v3456_v39, %v3464_v42  ;;  %v12923_v3 = vcombine.low %v3457_v47, %v3465_v43  ;;  %v3545_v39 = vld [vmem:[#allocation9 + $0x1468] sm:$0xff] }
 0x514   :  { %9878 = vmatpush1.bf16.msra.mxu0 %v12825_v51  ;;  %v12924_v51 = vcombine.high %v3457_v47, %v3465_v43  ;;  %v12987_v47 = vcombine.low %v3521_v26, %v3529_v11 }
 0x515   :  { %10050 = vmatpush1.bf16.msra.mxu1 %v12827_v53  ;;  %9879 = vmatprep.subr.bf16.mxu0 %v12842_v54  ;;  %v3472_v53 = vld [vmem:[#allocation9 + $0x1220] sm:$0xff] }
 0x516   :  { %10051 = vmatprep.subr.bf16.mxu1 %v12844_v0  ;;  %v3480_v54 = vld [vmem:[#allocation9 + $0x1260] sm:$0xff]  ;;  %v3473_v0 = vld [vmem:[#allocation9 + $0x1228] sm:$0xff] }
 0x517   :  { %v12938_v4 = vcombine.high %v3472_v53, %v3480_v54  ;;  %v12937_v16 = vcombine.low %v3472_v53, %v3480_v54  ;;  %v12939_v9 = vcombine.low %v3473_v0, %v3481_v1  ;;  %v3561_v53 = vld [vmem:[#allocation9 + $0x14e8] sm:$0xff] }
 0x518   :  { %9880 = vmatpush1.bf16.msra.mxu0 %v12841_v5  ;;  %v12940_v5 = vcombine.high %v3473_v0, %v3481_v1 }
 0x519   :  { %10052 = vmatpush1.bf16.msra.mxu1 %v12843_v7  ;;  %9881 = vmatprep.subr.bf16.mxu0 %v12858_v6  ;;  %v3488_v7 = vld [vmem:[#allocation9 + $0x12a0] sm:$0xff] }
 0x51a   :  { %10053 = vmatprep.subr.bf16.mxu1 %v12860_v8  ;;  %v3496_v6 = vld [vmem:[#allocation9 + $0x12e0] sm:$0xff]  ;;  %v3489_v8 = vld [vmem:[#allocation9 + $0x12a8] sm:$0xff] }
 0x51b   :  { %v12954_v12 = vcombine.high %v3488_v7, %v3496_v6  ;;  %v12953_v23 = vcombine.low %v3488_v7, %v3496_v6  ;;  %v3577_v7 = vld [vmem:[#allocation9 + $0x1568] sm:$0xff] }
 0x51c   :  { %9882 = vmatpush1.bf16.msra.mxu0 %v12857_v15  ;;  %v12956_v15 = vcombine.high %v3489_v8, %v3497_v10 }
 0x51d   :  { %10054 = vmatpush1.bf16.msra.mxu1 %v12859_v19  ;;  %9894 = vmatprep.subr.bf16.mxu0 %v12874_v20  ;;  %v3504_v19 = vld [vmem:[#allocation9 + $0x1320] sm:$0xff] }
 0x51e   :  { %10066 = vmatprep.subr.bf16.mxu1 %v12876_v21  ;;  %v3512_v20 = vld [vmem:[#allocation9 + $0x1360] sm:$0xff]  ;;  %v3505_v21 = vld [vmem:[#allocation9 + $0x1328] sm:$0xff] }
 0x51f   :  { %9884 = vmatmul.mubr.bf16.vlgmr.msra.gmra.mrb[20].mxu0 %v14556_v14  ;;  %v12970_v28 = vcombine.high %v3504_v19, %v3512_v20  ;;  %v12972_v29 = vcombine.high %v3505_v21, %v3513_v22  ;;  %v12971_v33 = vcombine.low %v3505_v21, %v3513_v22 }
 0x520   :  { %10056 = vmatmul.mubr.bf16.vlgmr.msra.gmra.mrb[20].mxu1 %v14556_v14  ;;  %9895 = vmatpush1.bf16.msra.mxu0 %v12873_v27  ;;  %v12955_v27 = vcombine.low %v3489_v8, %v3497_v10 }
 0x521   :  { %9926 = vmatprep.mubr.bf16.mxu0 %v14610_v58  ;;  %10067 = vmatpush1.bf16.msra.mxu1 %v12875_v24  ;;  %v3520_v24 = vld [vmem:[#allocation9 + $0x13a0] sm:$0xff] }
 0x522   :  { %10098 = vmatprep.mubr.bf16.mxu1 %v14610_v58  ;;  %9896 = vmatprep.subr.bf16.mxu0 %v12890_v25  ;;  %v3528_v25 = vld [vmem:[#allocation9 + $0x13e0] sm:$0xff] }
 0x523   :  { %10068 = vmatprep.subr.bf16.mxu1 %v12892_v56  ;;  %v12969_v56 = vcombine.low %v3504_v19, %v3512_v20  ;;  %v12986_v35 = vcombine.high %v3520_v24, %v3528_v25  ;;  %v12985_v42 = vcombine.low %v3520_v24, %v3528_v25  ;;  %v3593_v19 = vld [vmem:[#allocation9 + $0x15e8] sm:$0xff] }
 0x524   :  { %9897 = vmatpush1.bf16.msra.mxu0 %v12889_v36  ;;  %v12988_v36 = vcombine.high %v3521_v26, %v3529_v11  ;;  %v3609_v24 = vld [vmem:[#allocation9 + $0x1668] sm:$0xff] }
 0x525   :  { %10069 = vmatpush1.bf16.msra.mxu1 %v12891_v40  ;;  %9898 = vmatprep.subr.bf16.mxu0 %v12906_v52  ;;  %v3536_v40 = vld [vmem:[#allocation9 + $0x1420] sm:$0xff] }
 0x526   :  { %10070 = vmatprep.subr.bf16.mxu1 %v12908_v38  ;;  %v3544_v52 = vld [vmem:[#allocation9 + $0x1460] sm:$0xff]  ;;  %v3537_v38 = vld [vmem:[#allocation9 + $0x1428] sm:$0xff] }
 0x527   :  { %v13002_v43 = vcombine.high %v3536_v40, %v3544_v52  ;;  %v13001_v54 = vcombine.low %v3536_v40, %v3544_v52  ;;  %v13003_v0 = vcombine.low %v3537_v38, %v3545_v39  ;;  %v3625_v40 = vld [vmem:[#allocation9 + $0x16e8] sm:$0xff] }
 0x528   :  { %9899 = vmatpush1.bf16.msra.mxu0 %v12905_v41  ;;  %v13004_v41 = vcombine.high %v3537_v38, %v3545_v39 }
 0x529   :  { %10071 = vmatpush1.bf16.msra.mxu1 %v12907_v49  ;;  %9900 = vmatprep.subr.bf16.mxu0 %v12922_v50  ;;  %v3552_v49 = vld [vmem:[#allocation9 + $0x14a0] sm:$0xff] }
 0x52a   :  { %10072 = vmatprep.subr.bf16.mxu1 %v12924_v51  ;;  %v3560_v50 = vld [vmem:[#allocation9 + $0x14e0] sm:$0xff]  ;;  %v3553_v51 = vld [vmem:[#allocation9 + $0x14a8] sm:$0xff] }
 0x52b   :  { %v13018_v1 = vcombine.high %v3552_v49, %v3560_v50  ;;  %v13017_v6 = vcombine.low %v3552_v49, %v3560_v50  ;;  %v13019_v8 = vcombine.low %v3553_v51, %v3561_v53  ;;  %v3641_v49 = vld [vmem:[#allocation9 + $0x1768] sm:$0xff] }
 0x52c   :  { %9901 = vmatpush1.bf16.msra.mxu0 %v12921_v63  ;;  %v13020_v63 = vcombine.high %v3553_v51, %v3561_v53 }
 0x52d   :  { %10073 = vmatpush1.bf16.msra.mxu1 %v12923_v3  ;;  %9902 = vmatprep.subr.bf16.mxu0 %v12938_v4  ;;  %v3568_v3 = vld [vmem:[#allocation9 + $0x1520] sm:$0xff] }
 0x52e   :  { %10074 = vmatprep.subr.bf16.mxu1 %v12940_v5  ;;  %v3576_v4 = vld [vmem:[#allocation9 + $0x1560] sm:$0xff]  ;;  %v3569_v5 = vld [vmem:[#allocation9 + $0x1528] sm:$0xff] }
 0x52f   :  { %v13034_v10 = vcombine.high %v3568_v3, %v3576_v4  ;;  %v13033_v20 = vcombine.low %v3568_v3, %v3576_v4  ;;  %v13035_v21 = vcombine.low %v3569_v5, %v3577_v7  ;;  %v3657_v3 = vld [vmem:[#allocation9 + $0x17e8] sm:$0xff] }
 0x530   :  { %9903 = vmatpush1.bf16.msra.mxu0 %v12937_v16  ;;  %v13036_v16 = vcombine.high %v3569_v5, %v3577_v7 }
 0x531   :  { %10075 = vmatpush1.bf16.msra.mxu1 %v12939_v9  ;;  %9904 = vmatprep.subr.bf16.mxu0 %v12954_v12  ;;  %v3584_v9 = vld [vmem:[#allocation9 + $0x15a0] sm:$0xff] }
 0x532   :  { %10076 = vmatprep.subr.bf16.mxu1 %v12956_v15  ;;  %v3592_v12 = vld [vmem:[#allocation9 + $0x15e0] sm:$0xff]  ;;  %v3585_v15 = vld [vmem:[#allocation9 + $0x15a8] sm:$0xff] }
 0x533   :  { %v13050_v22 = vcombine.high %v3584_v9, %v3592_v12  ;;  %v13049_v25 = vcombine.low %v3584_v9, %v3592_v12  ;;  %v13051_v26 = vcombine.low %v3585_v15, %v3593_v19  ;;  %v3673_v9 = vld [vmem:[#allocation9 + $0x1868] sm:$0xff] }
 0x534   :  { %9905 = vmatpush1.bf16.msra.mxu0 %v12953_v23  ;;  %v13052_v23 = vcombine.high %v3585_v15, %v3593_v19 }
 0x535   :  { %10077 = vmatpush1.bf16.msra.mxu1 %v12955_v27  ;;  %9906 = vmatprep.subr.bf16.mxu0 %v12970_v28  ;;  %v3600_v27 = vld [vmem:[#allocation9 + $0x1620] sm:$0xff] }
 0x536   :  { %10078 = vmatprep.subr.bf16.mxu1 %v12972_v29  ;;  %v3608_v28 = vld [vmem:[#allocation9 + $0x1660] sm:$0xff]  ;;  %v3601_v29 = vld [vmem:[#allocation9 + $0x1628] sm:$0xff] }
 0x537   :  { %v13066_v11 = vcombine.high %v3600_v27, %v3608_v28  ;;  %v13065_v52 = vcombine.low %v3600_v27, %v3608_v28  ;;  %v13067_v38 = vcombine.low %v3601_v29, %v3609_v24  ;;  %v3681_v27 = vld [vmem:[#allocation9 + $0x18a8] sm:$0xff] }
 0x538   :  { %9907 = vmatpush1.bf16.msra.mxu0 %v12969_v56  ;;  %v13068_v56 = vcombine.high %v3601_v29, %v3609_v24  ;;  %v3689_v28 = vld [vmem:[#allocation9 + $0x18e8] sm:$0xff] }
 0x539   :  { %10079 = vmatpush1.bf16.msra.mxu1 %v12971_v33  ;;  %9908 = vmatprep.subr.bf16.mxu0 %v12986_v35  ;;  %v3616_v33 = vld [vmem:[#allocation9 + $0x16a0] sm:$0xff] }
 0x53a   :  { %10080 = vmatprep.subr.bf16.mxu1 %v12988_v36  ;;  %v3624_v35 = vld [vmem:[#allocation9 + $0x16e0] sm:$0xff]  ;;  %v3617_v36 = vld [vmem:[#allocation9 + $0x16a8] sm:$0xff] }
 0x53b   :  { %v13082_v39 = vcombine.high %v3616_v33, %v3624_v35  ;;  %v13081_v50 = vcombine.low %v3616_v33, %v3624_v35  ;;  %v13083_v51 = vcombine.low %v3617_v36, %v3625_v40  ;;  %v3705_v33 = vld [vmem:[#allocation9 + $0x1968] sm:$0xff] }
 0x53c   :  { %9909 = vmatpush1.bf16.msra.mxu0 %v12985_v42  ;;  %v13084_v42 = vcombine.high %v3617_v36, %v3625_v40  ;;  %v13147_v36 = vcombine.low %v3681_v27, %v3689_v28 }
 0x53d   :  { %10081 = vmatpush1.bf16.msra.mxu1 %v12987_v47  ;;  %9910 = vmatprep.subr.bf16.mxu0 %v13002_v43  ;;  %v3632_v47 = vld [vmem:[#allocation9 + $0x1720] sm:$0xff] }
 0x53e   :  { %10082 = vmatprep.subr.bf16.mxu1 %v13004_v41  ;;  %v3640_v43 = vld [vmem:[#allocation9 + $0x1760] sm:$0xff]  ;;  %v3633_v41 = vld [vmem:[#allocation9 + $0x1728] sm:$0xff] }
 0x53f   :  { %v13098_v53 = vcombine.high %v3632_v47, %v3640_v43  ;;  %v13097_v4 = vcombine.low %v3632_v47, %v3640_v43  ;;  %v13099_v5 = vcombine.low %v3633_v41, %v3641_v49  ;;  %v3721_v47 = vld [vmem:[#allocation9 + $0x19e8] sm:$0xff] }
 0x540   :  { %9911 = vmatpush1.bf16.msra.mxu0 %v13001_v54  ;;  %v13100_v54 = vcombine.high %v3633_v41, %v3641_v49 }
 0x541   :  { %10083 = vmatpush1.bf16.msra.mxu1 %v13003_v0  ;;  %9912 = vmatprep.subr.bf16.mxu0 %v13018_v1  ;;  %v3648_v0 = vld [vmem:[#allocation9 + $0x17a0] sm:$0xff] }
 0x542   :  { %10084 = vmatprep.subr.bf16.mxu1 %v13020_v63  ;;  %v3656_v1 = vld [vmem:[#allocation9 + $0x17e0] sm:$0xff]  ;;  %v3649_v63 = vld [vmem:[#allocation9 + $0x17a8] sm:$0xff] }
 0x543   :  { %v13114_v7 = vcombine.high %v3648_v0, %v3656_v1  ;;  %v13113_v12 = vcombine.low %v3648_v0, %v3656_v1  ;;  %v13115_v15 = vcombine.low %v3649_v63, %v3657_v3  ;;  %v3737_v0 = vld [vmem:[#allocation9 + $0x1a68] sm:$0xff] }
 0x544   :  { %9913 = vmatpush1.bf16.msra.mxu0 %v13017_v6  ;;  %v13116_v6 = vcombine.high %v3649_v63, %v3657_v3 }
 0x545   :  { %10085 = vmatpush1.bf16.msra.mxu1 %v13019_v8  ;;  %9914 = vmatprep.subr.bf16.mxu0 %v13034_v10  ;;  %v3664_v8 = vld [vmem:[#allocation9 + $0x1820] sm:$0xff] }
 0x546   :  { %10086 = vmatprep.subr.bf16.mxu1 %v13036_v16  ;;  %v3672_v10 = vld [vmem:[#allocation9 + $0x1860] sm:$0xff]  ;;  %v3665_v16 = vld [vmem:[#allocation9 + $0x1828] sm:$0xff] }
 0x547   :  { %v13130_v19 = vcombine.high %v3664_v8, %v3672_v10  ;;  %v13131_v29 = vcombine.low %v3665_v16, %v3673_v9 }
 0x548   :  { %9915 = vmatpush1.bf16.msra.mxu0 %v13033_v20  ;;  %v13132_v20 = vcombine.high %v3665_v16, %v3673_v9 }
 0x549   :  { %10087 = vmatpush1.bf16.msra.mxu1 %v13035_v21  ;;  %9916 = vmatprep.subr.bf16.mxu0 %v13050_v22  ;;  %v3680_v21 = vld [vmem:[#allocation9 + $0x18a0] sm:$0xff] }
 0x54a   :  { %10088 = vmatprep.subr.bf16.mxu1 %v13052_v23  ;;  %v3688_v22 = vld [vmem:[#allocation9 + $0x18e0] sm:$0xff]  ;;  %v13129_v23 = vcombine.low %v3664_v8, %v3672_v10  ;;  %v3753_v8 = vld [vmem:[#allocation9 + $0x1ae8] sm:$0xff] }
 0x54b   :  { %v13146_v24 = vcombine.high %v3680_v21, %v3688_v22  ;;  %v13145_v35 = vcombine.low %v3680_v21, %v3688_v22  ;;  %v3761_v22 = vld [vmem:[#allocation9 + $0x1b28] sm:$0xff] }
 0x54c   :  { %9917 = vmatpush1.bf16.msra.mxu0 %v13049_v25  ;;  %v3696_v25 = vld [vmem:[#allocation9 + $0x1920] sm:$0xff] }
 0x54d   :  { %10089 = vmatpush1.bf16.msra.mxu1 %v13051_v26  ;;  %9918 = vmatprep.subr.bf16.mxu0 %v13066_v11  ;;  %v3704_v26 = vld [vmem:[#allocation9 + $0x1960] sm:$0xff]  ;;  %v13148_v11 = vcombine.high %v3681_v27, %v3689_v28 }
 0x54e   :  { %10090 = vmatprep.subr.bf16.mxu1 %v13068_v56  ;;  %v3697_v56 = vld [vmem:[#allocation9 + $0x1928] sm:$0xff]  ;;  %v13162_v40 = vcombine.high %v3696_v25, %v3704_v26  ;;  %v13161_v43 = vcombine.low %v3696_v25, %v3704_v26 }
 0x54f   :  { %v13163_v41 = vcombine.low %v3697_v56, %v3705_v33 }
 0x550   :  { %9919 = vmatpush1.bf16.msra.mxu0 %v13065_v52  ;;  %v13164_v52 = vcombine.high %v3697_v56, %v3705_v33  ;;  %v3776_v33 = vld [vmem:[#allocation9 + $0x1ba0] sm:$0xff] }
 0x551   :  { %10091 = vmatpush1.bf16.msra.mxu1 %v13067_v38  ;;  %9920 = vmatprep.subr.bf16.mxu0 %v13082_v39  ;;  %v3712_v38 = vld [vmem:[#allocation9 + $0x19a0] sm:$0xff] }
 0x552   :  { %10092 = vmatprep.subr.bf16.mxu1 %v13084_v42  ;;  %v3720_v39 = vld [vmem:[#allocation9 + $0x19e0] sm:$0xff]  ;;  %v3713_v42 = vld [vmem:[#allocation9 + $0x19a8] sm:$0xff] }
 0x553   :  { %v13178_v49 = vcombine.high %v3712_v38, %v3720_v39  ;;  %v13177_v1 = vcombine.low %v3712_v38, %v3720_v39  ;;  %v13179_v63 = vcombine.low %v3713_v42, %v3721_v47  ;;  %v3777_v38 = vld [vmem:[#allocation9 + $0x1ba8] sm:$0xff] }
 0x554   :  { %9921 = vmatpush1.bf16.msra.mxu0 %v13081_v50  ;;  %v13180_v50 = vcombine.high %v3713_v42, %v3721_v47  ;;  %v3785_v39 = vld [vmem:[#allocation9 + $0x1be8] sm:$0xff] }
 0x555   :  { %10093 = vmatpush1.bf16.msra.mxu1 %v13083_v51  ;;  %9922 = vmatprep.subr.bf16.mxu0 %v13098_v53  ;;  %v3728_v51 = vld [vmem:[#allocation9 + $0x1a20] sm:$0xff] }
 0x556   :  { %10094 = vmatprep.subr.bf16.mxu1 %v13100_v54  ;;  %v3736_v53 = vld [vmem:[#allocation9 + $0x1a60] sm:$0xff]  ;;  %v3729_v54 = vld [vmem:[#allocation9 + $0x1a28] sm:$0xff] }
 0x557   :  { %v13194_v3 = vcombine.high %v3728_v51, %v3736_v53  ;;  %v13193_v10 = vcombine.low %v3728_v51, %v3736_v53  ;;  %v13195_v16 = vcombine.low %v3729_v54, %v3737_v0 }
 0x558   :  { %9923 = vmatpush1.bf16.msra.mxu0 %v13097_v4  ;;  %v13196_v4 = vcombine.high %v3729_v54, %v3737_v0 }
 0x559   :  { %10095 = vmatpush1.bf16.msra.mxu1 %v13099_v5  ;;  %9924 = vmatprep.subr.bf16.mxu0 %v13114_v7  ;;  %v3744_v5 = vld [vmem:[#allocation9 + $0x1aa0] sm:$0xff] }
 0x55a   :  { %10096 = vmatprep.subr.bf16.mxu1 %v13116_v6  ;;  %v3752_v7 = vld [vmem:[#allocation9 + $0x1ae0] sm:$0xff]  ;;  %v3745_v6 = vld [vmem:[#allocation9 + $0x1aa8] sm:$0xff] }
 0x55b   :  { %v13210_v9 = vcombine.high %v3744_v5, %v3752_v7  ;;  %v13211_v25 = vcombine.low %v3745_v6, %v3753_v8 }
 0x55c   :  { %9925 = vmatpush1.bf16.msra.mxu0 %v13113_v12  ;;  %v13212_v12 = vcombine.high %v3745_v6, %v3753_v8  ;;  %v13244_v8 = vcombine.high %v3777_v38, %v3785_v39 }
 0x55d   :  { %10097 = vmatpush1.bf16.msra.mxu1 %v13115_v15  ;;  %9937 = vmatprep.subr.bf16.mxu0 %v13130_v19  ;;  %v3760_v15 = vld [vmem:[#allocation9 + $0x1b20] sm:$0xff] }
 0x55e   :  { %10109 = vmatprep.subr.bf16.mxu1 %v13132_v20  ;;  %v3768_v19 = vld [vmem:[#allocation9 + $0x1b60] sm:$0xff] }
 0x55f   :  { %9927 = vmatmul.mubr.bf16.vlgmr.msra.gmra.mrb[20].mxu0 %v14605_v45  ;;  %v14161_v20 = vld [vmem:[#allocation10] sm:$0xff]  ;;  %v13226_v26 = vcombine.high %v3760_v15, %v3768_v19 }
 0x560   :  { %10099 = vmatmul.mubr.bf16.vlgmr.msra.gmra.mrb[20].mxu1 %v14605_v45  ;;  %9938 = vmatpush1.bf16.msra.mxu0 %v13129_v23  ;;  %v3939_v21 = vrot.slane %v14161_v20, %v14575_v30  ;;  %v3769_v23 = vld [vmem:[#allocation9 + $0x1b68] sm:$0xff]  ;;  %v3947_v27 = vrot.slane %v14161_v20, %v14578_v32  ;;  %v3943_v28 = vrot.slane %v14161_v20, %v14581_v34 }
 0x561   :  { %9969 = vmatprep.mubr.bf16.mxu0 %v14612_v61  ;;  %10110 = vmatpush1.bf16.msra.mxu1 %v13131_v29  ;;  %v13209_v29 = vcombine.low %v3744_v5, %v3752_v7  ;;  %v13228_v56 = vcombine.high %v3761_v22, %v3769_v23 }
 0x562   :  { %10141 = vmatprep.mubr.bf16.mxu1 %v14612_v61  ;;  %9939 = vmatprep.subr.bf16.mxu0 %v13146_v24  ;;  %v3951_v24 = vrot.slane %v14161_v20, %v14584_v37 }
 0x563   :  { %10111 = vmatprep.subr.bf16.mxu1 %v13148_v11 }
 0x564   :  { %9940 = vmatpush1.bf16.msra.mxu0 %v13145_v35  ;;  %v3784_v35 = vld [vmem:[#allocation9 + $0x1be0] sm:$0xff] }
 0x565   :  { %10112 = vmatpush1.bf16.msra.mxu1 %v13147_v36  ;;  %9941 = vmatprep.subr.bf16.mxu0 %v13162_v40 }
 0x566   :  { %10113 = vmatprep.subr.bf16.mxu1 %v13164_v52 }
 0x568   :  { %9942 = vmatpush1.bf16.msra.mxu0 %v13161_v43 }
 0x569   :  { %10114 = vmatpush1.bf16.msra.mxu1 %v13163_v41  ;;  %9943 = vmatprep.subr.bf16.mxu0 %v13178_v49  ;;  %v13225_v49 = vcombine.low %v3760_v15, %v3768_v19 }
 0x56a   :  { %10115 = vmatprep.subr.bf16.mxu1 %v13180_v50  ;;  %v13227_v50 = vcombine.low %v3761_v22, %v3769_v23  ;;  %v13241_v23 = vcombine.low %v3776_v33, %v3784_v35 }
 0x56c   :  { %9944 = vmatpush1.bf16.msra.mxu0 %v13177_v1 }
 0x56d   :  { %10116 = vmatpush1.bf16.msra.mxu1 %v13179_v63  ;;  %9945 = vmatprep.subr.bf16.mxu0 %v13194_v3  ;;  %v13242_v63 = vcombine.high %v3776_v33, %v3784_v35  ;;  %v3792_v3 = vld [vmem:[#allocation9 + $0x1c20] sm:$0xff]  ;;  %v3809_v33 = vld [vmem:[#allocation9 + $0x1ca8] sm:$0xff] }
 0x56e   :  { %10117 = vmatprep.subr.bf16.mxu1 %v13196_v4  ;;  %v3817_v35 = vld [vmem:[#allocation9 + $0x1ce8] sm:$0xff] }
 0x570   :  { %9946 = vmatpush1.bf16.msra.mxu0 %v13193_v10  ;;  %v3800_v10 = vld [vmem:[#allocation9 + $0x1c60] sm:$0xff] }
 0x571   :  { %10118 = vmatpush1.bf16.msra.mxu1 %v13195_v16  ;;  %9947 = vmatprep.subr.bf16.mxu0 %v13210_v9  ;;  %v3793_v16 = vld [vmem:[#allocation9 + $0x1c28] sm:$0xff] }
 0x572   :  { %v9627_v11 = vpop.f32.mrb[16].mxu0  ;;  %10119 = vmatprep.subr.bf16.mxu1 %v13212_v12  ;;  %v3801_v9 = vld [vmem:[#allocation9 + $0x1c68] sm:$0xff] }
 0x573   :  { %v13714_v36 = vadd.f32 %v9627_v11, %v3939_v21  ;;  %v9799_v40 = vpop.f32.mrb[16].mxu1  ;;  %v9629_v52 = vpop.f32.mrb[17].mxu0 }
 0x574   :  { %v13718_v42 = vadd.f32 %v9799_v40, %v3947_v27  ;;  %v13715_v47 = vadd.f32 %v9629_v52, %v3943_v28  ;;  %v9801_v43 = vpop.f32.mrb[17].mxu1  ;;  %v9631_v41 = vpop.f32.mrb[18].mxu0  ;;  %9948 = vmatpush1.bf16.msra.mxu0 %v13209_v29  ;;  %v13243_v29 = vcombine.low %v3777_v38, %v3785_v39  ;;  %v13260_v52 = vcombine.high %v3793_v16, %v3801_v9 }
 0x575   :  { %v10500_v51 = vmul.f32 0.2, %v13714_v36  ;;  %v13719_v53 = vadd.f32 %v9801_v43, %v3951_v24  ;;  %v13716_v54 = vadd.f32 %v9631_v41, %v3939_v21  ;;  %v9803_v0 = vpop.f32.mrb[18].mxu1  ;;  %10120 = vmatpush1.bf16.msra.mxu1 %v13211_v25  ;;  %v9633_v1 = vpop.f32.mrb[19].mxu0  ;;  %9949 = vmatprep.subr.bf16.mxu0 %v13226_v26  ;;  %v3808_v43 = vld [vmem:[#allocation9 + $0x1ca0] sm:$0xff]  ;;  %v13257_v38 = vcombine.low %v3792_v3, %v3800_v10 }
 0x576   :  { %v10502_v4 = vmul.f32 0.2, %v13718_v42  ;;  %v13720_v5 = vadd.f32 %v9803_v0, %v3947_v27  ;;  %v13717_v7 = vadd.f32 %v9633_v1, %v3943_v28  ;;  %v9805_v6 = vpop.f32.mrb[19].mxu1  ;;  %10121 = vmatprep.subr.bf16.mxu1 %v13228_v56  ;;  %v10501_v12 = vmul.f32 0.2, %v13715_v47  ;;  %v3816_v41 = vld [vmem:[#allocation9 + $0x1ce0] sm:$0xff] }
 0x577   :  { %v10503_v15 = vmul.f32 0.2, %v13719_v53  ;;  %v10516_v19 = vmul.f32 0.2, %v13716_v54  ;;  %v13721_v20 = vadd.f32 %v9805_v6, %v3951_v24  ;;  %v10532_v25 = vmax.f32 %v13714_v36, %v10500_v51 }
 0x578   :  { %v10518_v21 = vmul.f32 0.2, %v13720_v5  ;;  %v10517_v22 = vmul.f32 0.2, %v13717_v7  ;;  %9950 = vmatpush1.bf16.msra.mxu0 %v13225_v49  ;;  %v13258_v27 = vcombine.high %v3792_v3, %v3800_v10  ;;  %v10534_v28 = vmax.f32 %v13718_v42, %v10502_v4  ;;  %v3833_v4 = vld [vmem:[#allocation9 + $0x1d68] sm:$0xff]  ;;  %v3848_v10 = vld [vmem:[#allocation9 + $0x1de0] sm:$0xff] }
 0x579   :  { %v10548_v26 = vmax.f32 %v13716_v54, %v10516_v19  ;;  %v10519_v11 = vmul.f32 0.2, %v13721_v20  ;;  %10122 = vmatpush1.bf16.msra.mxu1 %v13227_v50  ;;  %9951 = vmatprep.subr.bf16.mxu0 %v13242_v63  ;;  %v10533_v0 = vmax.f32 %v13715_v47, %v10501_v12  ;;  %v10535_v24 = vmax.f32 %v13719_v53, %v10503_v15  ;;  %v3824_v53 = vld [vmem:[#allocation9 + $0x1d20] sm:$0xff]  ;;  %v3825_v63 = vld [vmem:[#allocation9 + $0x1d28] sm:$0xff] }
 0x57a   :  { %v10550_v56 = vmax.f32 %v13720_v5, %v10518_v21  ;;  %v10549_v40 = vmax.f32 %v13717_v7, %v10517_v22  ;;  %10123 = vmatprep.subr.bf16.mxu1 %v13244_v8  ;;  %v13259_v39 = vcombine.low %v3793_v16, %v3801_v9  ;;  %v13274_v42 = vcombine.high %v3808_v43, %v3816_v41  ;;  %v3832_v54 = vld [vmem:[#allocation9 + $0x1d60] sm:$0xff]  ;;  %v3841_v16 = vld [vmem:[#allocation9 + $0x1da8] sm:$0xff] }
 0x57b   :  { %v14676_v1 = vpack.c.bf16 %v10548_v26, %v10532_v25  ;;  %v10551_v49 = vmax.f32 %v13721_v20, %v10519_v11  ;;  %v13276_v47 = vcombine.high %v3809_v33, %v3817_v35  ;;  %v13273_v5 = vcombine.low %v3808_v43, %v3816_v41  ;;  %v3840_v8 = vld [vmem:[#allocation9 + $0x1da0] sm:$0xff]  ;;  %v3849_v9 = vld [vmem:[#allocation9 + $0x1de8] sm:$0xff] }
 0x57c   :  { %v14678_v36 = vpack.c.bf16 %v10550_v56, %v10534_v28  ;;  %9952 = vmatpush1.bf16.msra.mxu0 %v13241_v23  ;;  %v14680_v50 = vpack.c.bf16 %v10549_v40, %v10533_v0  ;;  %v13275_v7 = vcombine.low %v3809_v33, %v3817_v35  ;;  %v13290_v3 = vcombine.high %v3824_v53, %v3832_v54  ;;  %v3856_v21 = vld [vmem:[#allocation9 + $0x1e20] sm:$0xff]  ;;  %v3857_v23 = vld [vmem:[#allocation9 + $0x1e28] sm:$0xff] }
 0x57d   :  { %10124 = vmatpush1.bf16.msra.mxu1 %v13243_v29  ;;  %9953 = vmatprep.subr.bf16.mxu0 %v13258_v27  ;;  %v14682_v51 = vpack.c.bf16 %v10551_v49, %v10535_v24  ;;  %v13292_v6 = vcombine.high %v3825_v63, %v3833_v4  ;;  %v13289_v12 = vcombine.low %v3824_v53, %v3832_v54  ;;  %v3864_v22 = vld [vmem:[#allocation9 + $0x1e60] sm:$0xff]  ;;  %v3865_v29 = vld [vmem:[#allocation9 + $0x1e68] sm:$0xff] }
 0x57e   :  { %10125 = vmatprep.subr.bf16.mxu1 %v13260_v52  ;;  %v13291_v15 = vcombine.low %v3825_v63, %v3833_v4  ;;  %v13306_v19 = vcombine.high %v3840_v8, %v3848_v10  ;;  %v13308_v20 = vcombine.high %v3841_v16, %v3849_v9  ;;  %v13305_v25 = vcombine.low %v3840_v8, %v3848_v10  ;;  %v3872_v28 = vld [vmem:[#allocation9 + $0x1ea0] sm:$0xff]  ;;  %v3873_v40 = vld [vmem:[#allocation9 + $0x1ea8] sm:$0xff]  ;;  %v2898_v10 = vld [vmem:[#allocation9 + $0x30] sm:$0xff] }
 0x57f   :  { %v13307_v26 = vcombine.low %v3841_v16, %v3849_v9  ;;  %v13322_v11 = vcombine.high %v3856_v21, %v3864_v22  ;;  %v13324_v27 = vcombine.high %v3857_v23, %v3865_v29  ;;  %v3880_v56 = vld [vmem:[#allocation9 + $0x1ee0] sm:$0xff]  ;;  %v3881_v52 = vld [vmem:[#allocation9 + $0x1ee8] sm:$0xff]  ;;  %v13321_v43 = vcombine.low %v3856_v21, %v3864_v22  ;;  %v2906_v16 = vld [vmem:[#allocation9 + $0x70] sm:$0xff] }
 0x580   :  { %9954 = vmatpush1.bf16.msra.mxu0 %v13257_v38  ;;  %v13323_v41 = vcombine.low %v3857_v23, %v3865_v29  ;;  %v13338_v0 = vcombine.high %v3872_v28, %v3880_v56  ;;  %v13340_v24 = vcombine.high %v3873_v40, %v3881_v52  ;;  %v3888_v49 = vld [vmem:[#allocation9 + $0x1f20] sm:$0xff]  ;;  %v3889_v35 = vld [vmem:[#allocation9 + $0x1f28] sm:$0xff]  ;;  %v2899_v9 = vld [vmem:[#allocation9 + $0x38] sm:$0xff]  ;;  %v12365_v29 = vcombine.low %v2898_v10, %v2906_v16 }
 0x581   :  { %10126 = vmatpush1.bf16.msra.mxu1 %v13259_v39  ;;  %9955 = vmatprep.subr.bf16.mxu0 %v13274_v42  ;;  %v3896_v33 = vld [vmem:[#allocation9 + $0x1f60] sm:$0xff]  ;;  %v3897_v38 = vld [vmem:[#allocation9 + $0x1f68] sm:$0xff]  ;;  %v13337_v39 = vcombine.low %v3872_v28, %v3880_v56  ;;  %v13339_v42 = vcombine.low %v3873_v40, %v3881_v52  ;;  %v2914_v22 = vld [vmem:[#allocation9 + $0xb0] sm:$0xff] }
 0x582   :  { %10127 = vmatprep.subr.bf16.mxu1 %v13276_v47  ;;  %v13354_v47 = vcombine.high %v3888_v49, %v3896_v33  ;;  %v13356_v53 = vcombine.high %v3889_v35, %v3897_v38  ;;  %v3904_v54 = vld [vmem:[#allocation9 + $0x1fa0] sm:$0xff]  ;;  %v3905_v4 = vld [vmem:[#allocation9 + $0x1fa8] sm:$0xff]  ;;  %v2922_v23 = vld [vmem:[#allocation9 + $0xf0] sm:$0xff] }
 0x583   :  { %v3912_v63 = vld [vmem:[#allocation9 + $0x1fe0] sm:$0xff]  ;;  %v2930_v28 = vld [vmem:[#allocation9 + $0x130] sm:$0xff]  ;;  %v2931_v52 = vld [vmem:[#allocation9 + $0x138] sm:$0xff] }
 0x584   :  { %9956 = vmatpush1.bf16.msra.mxu0 %v13273_v5  ;;  %v3913_v5 = vld [vmem:[#allocation9 + $0x1fe8] sm:$0xff]  ;;  %v2938_v56 = vld [vmem:[#allocation9 + $0x170] sm:$0xff] }
 0x585   :  { %10128 = vmatpush1.bf16.msra.mxu1 %v13275_v7  ;;  %9957 = vmatprep.subr.bf16.mxu0 %v13290_v3  ;;  %v13353_v7 = vcombine.low %v3888_v49, %v3896_v33  ;;  %v13355_v3 = vcombine.low %v3889_v35, %v3897_v38  ;;  %v13372_v8 = vcombine.high %v3905_v4, %v3913_v5  ;;  %v2946_v33 = vld [vmem:[#allocation9 + $0x1b0] sm:$0xff]  ;;  %v2947_v38 = vld [vmem:[#allocation9 + $0x1b8] sm:$0xff] }
 0x586   :  { %10129 = vmatprep.subr.bf16.mxu1 %v13292_v6  ;;  %v13370_v6 = vcombine.high %v3904_v54, %v3912_v63  ;;  %v2954_v35 = vld [vmem:[#allocation9 + $0x1f0] sm:$0xff] }
 0x588   :  { %9958 = vmatpush1.bf16.msra.mxu0 %v13289_v12  ;;  %v2907_v12 = vld [vmem:[#allocation9 + $0x78] sm:$0xff] }
 0x589   :  { %10130 = vmatpush1.bf16.msra.mxu1 %v13291_v15  ;;  %9959 = vmatprep.subr.bf16.mxu0 %v13306_v19  ;;  %v13369_v15 = vcombine.low %v3904_v54, %v3912_v63  ;;  %v13371_v19 = vcombine.low %v3905_v4, %v3913_v5  ;;  %v12368_v21 = vcombine.high %v2899_v9, %v2907_v12  ;;  %v2962_v63 = vld [vmem:[#allocation9 + $0x230] sm:$0xff]  ;;  %v2963_v5 = vld [vmem:[#allocation9 + $0x238] sm:$0xff] }
 0x58a   :  { %10131 = vmatprep.subr.bf16.mxu1 %v13308_v20  ;;  %v12366_v20 = vcombine.high %v2898_v10, %v2906_v16  ;;  %v2970_v4 = vld [vmem:[#allocation9 + $0x270] sm:$0xff] }
 0x58b   :  { %v2978_v10 = vld [vmem:[#allocation9 + $0x2b0] sm:$0xff] }
 0x58c   :  { %9960 = vmatpush1.bf16.msra.mxu0 %v13305_v25  ;;  %v2915_v25 = vld [vmem:[#allocation9 + $0xb8] sm:$0xff]  ;;  %v2986_v16 = vld [vmem:[#allocation9 + $0x2f0] sm:$0xff] }
 0x58d   :  { %10132 = vmatpush1.bf16.msra.mxu1 %v13307_v26  ;;  %9961 = vmatprep.subr.bf16.mxu0 %v13322_v11  ;;  %v2923_v26 = vld [vmem:[#allocation9 + $0xf8] sm:$0xff]  ;;  %v12367_v11 = vcombine.low %v2899_v9, %v2907_v12 }
 0x58e   :  { %10133 = vmatprep.subr.bf16.mxu1 %v13324_v27  ;;  %v12382_v27 = vcombine.high %v2914_v22, %v2922_v23  ;;  %v12384_v40 = vcombine.high %v2915_v25, %v2923_v26  ;;  %v2979_v9 = vld [vmem:[#allocation9 + $0x2b8] sm:$0xff] }
 0x58f   :  { %v2987_v12 = vld [vmem:[#allocation9 + $0x2f8] sm:$0xff] }
 0x590   :  { %9962 = vmatpush1.bf16.msra.mxu0 %v13321_v43  ;;  %v2939_v43 = vld [vmem:[#allocation9 + $0x178] sm:$0xff] }
 0x591   :  { %10134 = vmatpush1.bf16.msra.mxu1 %v13323_v41  ;;  %9963 = vmatprep.subr.bf16.mxu0 %v13338_v0  ;;  %v12381_v41 = vcombine.low %v2914_v22, %v2922_v23  ;;  %v12383_v0 = vcombine.low %v2915_v25, %v2923_v26  ;;  %v12400_v49 = vcombine.high %v2931_v52, %v2939_v43  ;;  %v2994_v22 = vld [vmem:[#allocation9 + $0x330] sm:$0xff]  ;;  %v3003_v25 = vld [vmem:[#allocation9 + $0x378] sm:$0xff] }
 0x592   :  { %10135 = vmatprep.subr.bf16.mxu1 %v13340_v24  ;;  %v12398_v24 = vcombine.high %v2930_v28, %v2938_v56  ;;  %v3002_v23 = vld [vmem:[#allocation9 + $0x370] sm:$0xff]  ;;  %v12445_v26 = vcombine.low %v2978_v10, %v2986_v16 }
 0x594   :  { %9964 = vmatpush1.bf16.msra.mxu0 %v13337_v39  ;;  %v2955_v39 = vld [vmem:[#allocation9 + $0x1f8] sm:$0xff] }
 0x595   :  { %10136 = vmatpush1.bf16.msra.mxu1 %v13339_v42  ;;  %9965 = vmatprep.subr.bf16.mxu0 %v13354_v47  ;;  %v12397_v42 = vcombine.low %v2930_v28, %v2938_v56  ;;  %v12399_v47 = vcombine.low %v2931_v52, %v2939_v43  ;;  %v12416_v54 = vcombine.high %v2947_v38, %v2955_v39  ;;  %v3010_v56 = vld [vmem:[#allocation9 + $0x3b0] sm:$0xff]  ;;  %v3011_v52 = vld [vmem:[#allocation9 + $0x3b8] sm:$0xff] }
 0x596   :  { %10137 = vmatprep.subr.bf16.mxu1 %v13356_v53  ;;  %v12414_v53 = vcombine.high %v2946_v33, %v2954_v35  ;;  %v3019_v43 = vld [vmem:[#allocation9 + $0x3f8] sm:$0xff] }
 0x598   :  { %9966 = vmatpush1.bf16.msra.mxu0 %v13353_v7  ;;  %v2971_v7 = vld [vmem:[#allocation9 + $0x278] sm:$0xff] }
 0x599   :  { %10138 = vmatpush1.bf16.msra.mxu1 %v13355_v3  ;;  %9967 = vmatprep.subr.bf16.mxu0 %v13370_v6  ;;  %v12415_v3 = vcombine.low %v2947_v38, %v2955_v39  ;;  %v12430_v6 = vcombine.high %v2962_v63, %v2970_v4  ;;  %v3027_v38 = vld [vmem:[#allocation9 + $0x438] sm:$0xff] }
 0x59a   :  { %10139 = vmatprep.subr.bf16.mxu1 %v13372_v8  ;;  %v12432_v8 = vcombine.high %v2963_v5, %v2971_v7  ;;  %v3035_v39 = vld [vmem:[#allocation9 + $0x478] sm:$0xff] }
 0x59c   :  { %9968 = vmatpush1.bf16.msra.mxu0 %v13369_v15  ;;  %v12429_v15 = vcombine.low %v2962_v63, %v2970_v4  ;;  %v3042_v63 = vld [vmem:[#allocation9 + $0x4b0] sm:$0xff] }
 0x59d   :  { %10140 = vmatpush1.bf16.msra.mxu1 %v13371_v19  ;;  %10152 = vmatprep.subr.bf16.mxu0 %v12366_v20  ;;  %v12431_v19 = vcombine.low %v2963_v5, %v2971_v7  ;;  %v12446_v20 = vcombine.high %v2978_v10, %v2986_v16  ;;  %v3050_v4 = vld [vmem:[#allocation9 + $0x4f0] sm:$0xff]  ;;  %v3043_v5 = vld [vmem:[#allocation9 + $0x4b8] sm:$0xff] }
 0x59e   :  { %10324 = vmatprep.subr.bf16.mxu1 %v12368_v21  ;;  %v12448_v21 = vcombine.high %v2979_v9, %v2987_v12  ;;  %v3051_v7 = vld [vmem:[#allocation9 + $0x4f8] sm:$0xff]  ;;  %v3058_v10 = vld [vmem:[#allocation9 + $0x530] sm:$0xff] }
 0x59f   :  { %9970 = vmatmul.mubr.bf16.vlgmr.msra.gmra.mrb[20].mxu0 %v14608_v57  ;;  %v3066_v16 = vld [vmem:[#allocation9 + $0x570] sm:$0xff] }
 0x5a0   :  { %10142 = vmatmul.mubr.bf16.vlgmr.msra.gmra.mrb[20].mxu1 %v14608_v57  ;;  %10153 = vmatpush1.bf16.msra.mxu0 %v12365_v29  ;;  %v2995_v29 = vld [vmem:[#allocation9 + $0x338] sm:$0xff] }
 0x5a1   :  { %10184 = vmatprep.mubr.bf16.mxu0 %v14558_v17  ;;  %10325 = vmatpush1.bf16.msra.mxu1 %v12367_v11  ;;  %v12447_v11 = vcombine.low %v2979_v9, %v2987_v12  ;;  %v12464_v28 = vcombine.high %v2995_v29, %v3003_v25  ;;  %v3059_v9 = vld [vmem:[#allocation9 + $0x538] sm:$0xff] }
 0x5a2   :  { %10356 = vmatprep.mubr.bf16.mxu1 %v14558_v17  ;;  %10154 = vmatprep.subr.bf16.mxu0 %v12382_v27  ;;  %v12413_v17 = vcombine.low %v2946_v33, %v2954_v35  ;;  %v12462_v27 = vcombine.high %v2994_v22, %v3002_v23  ;;  %v3026_v33 = vld [vmem:[#allocation9 + $0x430] sm:$0xff]  ;;  %v3067_v12 = vld [vmem:[#allocation9 + $0x578] sm:$0xff] }
 0x5a3   :  { %10326 = vmatprep.subr.bf16.mxu1 %v12384_v40  ;;  %v3018_v40 = vld [vmem:[#allocation9 + $0x3f0] sm:$0xff] }
 0x5a4   :  { %10155 = vmatpush1.bf16.msra.mxu0 %v12381_v41  ;;  %v12461_v41 = vcombine.low %v2994_v22, %v3002_v23  ;;  %v3034_v35 = vld [vmem:[#allocation9 + $0x470] sm:$0xff] }
 0x5a5   :  { %10327 = vmatpush1.bf16.msra.mxu1 %v12383_v0  ;;  %10156 = vmatprep.subr.bf16.mxu0 %v12398_v24  ;;  %v12463_v0 = vcombine.low %v2995_v29, %v3003_v25  ;;  %v12478_v24 = vcombine.high %v3010_v56, %v3018_v40  ;;  %v3074_v22 = vld [vmem:[#allocation9 + $0x5b0] sm:$0xff]  ;;  %v3075_v29 = vld [vmem:[#allocation9 + $0x5b8] sm:$0xff] }
 0x5a6   :  { %10328 = vmatprep.subr.bf16.mxu1 %v12400_v49  ;;  %v12480_v49 = vcombine.high %v3011_v52, %v3019_v43  ;;  %v3082_v23 = vld [vmem:[#allocation9 + $0x5f0] sm:$0xff]  ;;  %v3083_v25 = vld [vmem:[#allocation9 + $0x5f8] sm:$0xff] }
 0x5a8   :  { %10157 = vmatpush1.bf16.msra.mxu0 %v12397_v42  ;;  %v12477_v42 = vcombine.low %v3010_v56, %v3018_v40  ;;  %v3090_v56 = vld [vmem:[#allocation9 + $0x630] sm:$0xff] }
 0x5a9   :  { %10329 = vmatpush1.bf16.msra.mxu1 %v12399_v47  ;;  %10158 = vmatprep.subr.bf16.mxu0 %v12414_v53  ;;  %v12479_v47 = vcombine.low %v3011_v52, %v3019_v43  ;;  %v12494_v53 = vcombine.high %v3026_v33, %v3034_v35  ;;  %v3098_v40 = vld [vmem:[#allocation9 + $0x670] sm:$0xff]  ;;  %v3091_v52 = vld [vmem:[#allocation9 + $0x638] sm:$0xff] }
 0x5aa   :  { %10330 = vmatprep.subr.bf16.mxu1 %v12416_v54  ;;  %v12496_v54 = vcombine.high %v3027_v38, %v3035_v39  ;;  %v3099_v43 = vld [vmem:[#allocation9 + $0x678] sm:$0xff] }
 0x5ac   :  { %10159 = vmatpush1.bf16.msra.mxu0 %v12413_v17  ;;  %v12493_v17 = vcombine.low %v3026_v33, %v3034_v35  ;;  %v3106_v33 = vld [vmem:[#allocation9 + $0x6b0] sm:$0xff] }
 0x5ad   :  { %10331 = vmatpush1.bf16.msra.mxu1 %v12415_v3  ;;  %10160 = vmatprep.subr.bf16.mxu0 %v12430_v6  ;;  %v12495_v3 = vcombine.low %v3027_v38, %v3035_v39  ;;  %v12510_v6 = vcombine.high %v3042_v63, %v3050_v4  ;;  %v3114_v35 = vld [vmem:[#allocation9 + $0x6f0] sm:$0xff]  ;;  %v3107_v38 = vld [vmem:[#allocation9 + $0x6b8] sm:$0xff] }
 0x5ae   :  { %10332 = vmatprep.subr.bf16.mxu1 %v12432_v8  ;;  %v12512_v8 = vcombine.high %v3043_v5, %v3051_v7  ;;  %v3115_v39 = vld [vmem:[#allocation9 + $0x6f8] sm:$0xff] }
 0x5b0   :  { %10161 = vmatpush1.bf16.msra.mxu0 %v12429_v15  ;;  %v12509_v15 = vcombine.low %v3042_v63, %v3050_v4  ;;  %v3122_v63 = vld [vmem:[#allocation9 + $0x730] sm:$0xff] }
 0x5b1   :  { %10333 = vmatpush1.bf16.msra.mxu1 %v12431_v19  ;;  %10162 = vmatprep.subr.bf16.mxu0 %v12446_v20  ;;  %v12511_v19 = vcombine.low %v3043_v5, %v3051_v7  ;;  %v12526_v20 = vcombine.high %v3058_v10, %v3066_v16  ;;  %v3130_v4 = vld [vmem:[#allocation9 + $0x770] sm:$0xff]  ;;  %v3123_v5 = vld [vmem:[#allocation9 + $0x738] sm:$0xff] }
 0x5b2   :  { %10334 = vmatprep.subr.bf16.mxu1 %v12448_v21  ;;  %v12528_v21 = vcombine.high %v3059_v9, %v3067_v12  ;;  %v3131_v7 = vld [vmem:[#allocation9 + $0x778] sm:$0xff] }
 0x5b4   :  { %10163 = vmatpush1.bf16.msra.mxu0 %v12445_v26  ;;  %v12525_v26 = vcombine.low %v3058_v10, %v3066_v16  ;;  %v3138_v10 = vld [vmem:[#allocation9 + $0x7b0] sm:$0xff] }
 0x5b5   :  { %10335 = vmatpush1.bf16.msra.mxu1 %v12447_v11  ;;  %10164 = vmatprep.subr.bf16.mxu0 %v12462_v27  ;;  %v12527_v11 = vcombine.low %v3059_v9, %v3067_v12  ;;  %v12542_v27 = vcombine.high %v3074_v22, %v3082_v23  ;;  %v3146_v16 = vld [vmem:[#allocation9 + $0x7f0] sm:$0xff]  ;;  %v3139_v9 = vld [vmem:[#allocation9 + $0x7b8] sm:$0xff] }
 0x5b6   :  { %10336 = vmatprep.subr.bf16.mxu1 %v12464_v28  ;;  %v12544_v28 = vcombine.high %v3075_v29, %v3083_v25  ;;  %v3147_v12 = vld [vmem:[#allocation9 + $0x7f8] sm:$0xff] }
 0x5b8   :  { %10165 = vmatpush1.bf16.msra.mxu0 %v12461_v41  ;;  %v12541_v41 = vcombine.low %v3074_v22, %v3082_v23  ;;  %v3154_v22 = vld [vmem:[#allocation9 + $0x830] sm:$0xff] }
 0x5b9   :  { %10337 = vmatpush1.bf16.msra.mxu1 %v12463_v0  ;;  %10166 = vmatprep.subr.bf16.mxu0 %v12478_v24  ;;  %v12543_v0 = vcombine.low %v3075_v29, %v3083_v25  ;;  %v12558_v24 = vcombine.high %v3090_v56, %v3098_v40  ;;  %v3162_v23 = vld [vmem:[#allocation9 + $0x870] sm:$0xff]  ;;  %v3155_v29 = vld [vmem:[#allocation9 + $0x838] sm:$0xff] }
 0x5ba   :  { %10338 = vmatprep.subr.bf16.mxu1 %v12480_v49  ;;  %v12560_v49 = vcombine.high %v3091_v52, %v3099_v43  ;;  %v3163_v25 = vld [vmem:[#allocation9 + $0x878] sm:$0xff] }
 0x5bc   :  { %10167 = vmatpush1.bf16.msra.mxu0 %v12477_v42  ;;  %v12557_v42 = vcombine.low %v3090_v56, %v3098_v40  ;;  %v3170_v56 = vld [vmem:[#allocation9 + $0x8b0] sm:$0xff] }
 0x5bd   :  { %10339 = vmatpush1.bf16.msra.mxu1 %v12479_v47  ;;  %10168 = vmatprep.subr.bf16.mxu0 %v12494_v53  ;;  %v12559_v47 = vcombine.low %v3091_v52, %v3099_v43  ;;  %v12574_v53 = vcombine.high %v3106_v33, %v3114_v35  ;;  %v3178_v40 = vld [vmem:[#allocation9 + $0x8f0] sm:$0xff]  ;;  %v12621_v52 = vcombine.low %v3154_v22, %v3162_v23  ;;  %v3171_v43 = vld [vmem:[#allocation9 + $0x8b8] sm:$0xff] }
 0x5be   :  { %10340 = vmatprep.subr.bf16.mxu1 %v12496_v54  ;;  %v12576_v54 = vcombine.high %v3107_v38, %v3115_v39 }
 0x5c0   :  { %10169 = vmatpush1.bf16.msra.mxu0 %v12493_v17  ;;  %v12573_v17 = vcombine.low %v3106_v33, %v3114_v35  ;;  %v3194_v33 = vld [vmem:[#allocation9 + $0x970] sm:$0xff] }
 0x5c1   :  { %10341 = vmatpush1.bf16.msra.mxu1 %v12495_v3  ;;  %10170 = vmatprep.subr.bf16.mxu0 %v12510_v6  ;;  %v12575_v3 = vcombine.low %v3107_v38, %v3115_v39  ;;  %v12590_v6 = vcombine.high %v3122_v63, %v3130_v4  ;;  %v3187_v38 = vld [vmem:[#allocation9 + $0x938] sm:$0xff] }
 0x5c2   :  { %10342 = vmatprep.subr.bf16.mxu1 %v12512_v8  ;;  %v12592_v8 = vcombine.high %v3123_v5, %v3131_v7  ;;  %v3195_v39 = vld [vmem:[#allocation9 + $0x978] sm:$0xff] }
 0x5c4   :  { %10171 = vmatpush1.bf16.msra.mxu0 %v12509_v15  ;;  %v12589_v15 = vcombine.low %v3122_v63, %v3130_v4  ;;  %v3202_v63 = vld [vmem:[#allocation9 + $0x9b0] sm:$0xff] }
 0x5c5   :  { %10343 = vmatpush1.bf16.msra.mxu1 %v12511_v19  ;;  %10172 = vmatprep.subr.bf16.mxu0 %v12526_v20  ;;  %v12591_v19 = vcombine.low %v3123_v5, %v3131_v7  ;;  %v12606_v20 = vcombine.high %v3138_v10, %v3146_v16  ;;  %v3210_v4 = vld [vmem:[#allocation9 + $0x9f0] sm:$0xff]  ;;  %v3203_v5 = vld [vmem:[#allocation9 + $0x9b8] sm:$0xff] }
 0x5c6   :  { %10344 = vmatprep.subr.bf16.mxu1 %v12528_v21  ;;  %v12608_v21 = vcombine.high %v3139_v9, %v3147_v12  ;;  %v3211_v7 = vld [vmem:[#allocation9 + $0x9f8] sm:$0xff] }
 0x5c8   :  { %10173 = vmatpush1.bf16.msra.mxu0 %v12525_v26  ;;  %v12605_v26 = vcombine.low %v3138_v10, %v3146_v16  ;;  %v3226_v10 = vld [vmem:[#allocation9 + $0xa70] sm:$0xff]  ;;  %v3219_v16 = vld [vmem:[#allocation9 + $0xa38] sm:$0xff] }
 0x5c9   :  { %10345 = vmatpush1.bf16.msra.mxu1 %v12527_v11  ;;  %10174 = vmatprep.subr.bf16.mxu0 %v12542_v27  ;;  %v12607_v11 = vcombine.low %v3139_v9, %v3147_v12  ;;  %v12622_v27 = vcombine.high %v3154_v22, %v3162_v23  ;;  %v3227_v9 = vld [vmem:[#allocation9 + $0xa78] sm:$0xff]  ;;  %v12671_v12 = vcombine.low %v3203_v5, %v3211_v7 }
 0x5ca   :  { %10346 = vmatprep.subr.bf16.mxu1 %v12544_v28  ;;  %v12624_v28 = vcombine.high %v3155_v29, %v3163_v25  ;;  %v3235_v22 = vld [vmem:[#allocation9 + $0xab8] sm:$0xff] }
 0x5cb   :  { %v3243_v23 = vld [vmem:[#allocation9 + $0xaf8] sm:$0xff] }
 0x5cc   :  { %10175 = vmatpush1.bf16.msra.mxu0 %v12541_v41  ;;  %v3179_v41 = vld [vmem:[#allocation9 + $0x8f8] sm:$0xff] }
 0x5cd   :  { %10347 = vmatpush1.bf16.msra.mxu1 %v12543_v0  ;;  %10176 = vmatprep.subr.bf16.mxu0 %v12558_v24  ;;  %v12623_v0 = vcombine.low %v3155_v29, %v3163_v25  ;;  %v12638_v24 = vcombine.high %v3170_v56, %v3178_v40  ;;  %v12640_v35 = vcombine.high %v3171_v43, %v3179_v41 }
 0x5ce   :  { %10348 = vmatprep.subr.bf16.mxu1 %v12560_v49  ;;  %v3186_v49 = vld [vmem:[#allocation9 + $0x930] sm:$0xff]  ;;  %v12687_v25 = vcombine.low %v3219_v16, %v3227_v9 }
 0x5d0   :  { %10177 = vmatpush1.bf16.msra.mxu0 %v12557_v42  ;;  %v12637_v42 = vcombine.low %v3170_v56, %v3178_v40  ;;  %v3251_v56 = vld [vmem:[#allocation9 + $0xb38] sm:$0xff] }
 0x5d1   :  { %10349 = vmatpush1.bf16.msra.mxu1 %v12559_v47  ;;  %10178 = vmatprep.subr.bf16.mxu0 %v12574_v53  ;;  %v12639_v47 = vcombine.low %v3171_v43, %v3179_v41  ;;  %v12654_v53 = vcombine.high %v3186_v49, %v3194_v33  ;;  %v3259_v40 = vld [vmem:[#allocation9 + $0xb78] sm:$0xff]  ;;  %v12703_v43 = vcombine.low %v3235_v22, %v3243_v23 }
 0x5d2   :  { %10350 = vmatprep.subr.bf16.mxu1 %v12576_v54  ;;  %v12656_v54 = vcombine.high %v3187_v38, %v3195_v39 }
 0x5d4   :  { %10179 = vmatpush1.bf16.msra.mxu0 %v12573_v17  ;;  %v12653_v17 = vcombine.low %v3186_v49, %v3194_v33  ;;  %v3274_v49 = vld [vmem:[#allocation9 + $0xbf0] sm:$0xff]  ;;  %v3267_v33 = vld [vmem:[#allocation9 + $0xbb8] sm:$0xff] }
 0x5d5   :  { %10351 = vmatpush1.bf16.msra.mxu1 %v12575_v3  ;;  %10180 = vmatprep.subr.bf16.mxu0 %v12590_v6  ;;  %v12670_v3 = vcombine.high %v3202_v63, %v3210_v4  ;;  %v12672_v6 = vcombine.high %v3203_v5, %v3211_v7 }
 0x5d6   :  { %10352 = vmatprep.subr.bf16.mxu1 %v12592_v8  ;;  %v3218_v8 = vld [vmem:[#allocation9 + $0xa30] sm:$0xff] }
 0x5d7   :  { %v12685_v29 = vcombine.low %v3218_v8, %v3226_v10 }
 0x5d8   :  { %10181 = vmatpush1.bf16.msra.mxu0 %v12589_v15  ;;  %v12686_v15 = vcombine.high %v3218_v8, %v3226_v10  ;;  %v3299_v8 = vld [vmem:[#allocation9 + $0xcb8] sm:$0xff] }
 0x5d9   :  { %10353 = vmatpush1.bf16.msra.mxu1 %v12591_v19  ;;  %10182 = vmatprep.subr.bf16.mxu0 %v12606_v20  ;;  %v12688_v19 = vcombine.high %v3219_v16, %v3227_v9  ;;  %v3234_v20 = vld [vmem:[#allocation9 + $0xab0] sm:$0xff]  ;;  %v3307_v10 = vld [vmem:[#allocation9 + $0xcf8] sm:$0xff] }
 0x5da   :  { %10354 = vmatprep.subr.bf16.mxu1 %v12608_v21  ;;  %v3242_v21 = vld [vmem:[#allocation9 + $0xaf0] sm:$0xff] }
 0x5dc   :  { %10183 = vmatpush1.bf16.msra.mxu0 %v12605_v26  ;;  %v12702_v26 = vcombine.high %v3234_v20, %v3242_v21 }
 0x5dd   :  { %10355 = vmatpush1.bf16.msra.mxu1 %v12607_v11  ;;  %10195 = vmatprep.subr.bf16.mxu0 %v12622_v27  ;;  %v12704_v11 = vcombine.high %v3235_v22, %v3243_v23  ;;  %v3250_v27 = vld [vmem:[#allocation9 + $0xb30] sm:$0xff]  ;;  %v12767_v23 = vcombine.low %v3299_v8, %v3307_v10 }
 0x5de   :  { %10367 = vmatprep.subr.bf16.mxu1 %v12624_v28  ;;  %v3258_v28 = vld [vmem:[#allocation9 + $0xb70] sm:$0xff] }
 0x5df   :  { %10185 = vmatmul.mubr.bf16.vlgmr.msra.gmra.mrb[24].mxu0 %v14554_v13  ;;  %v12718_v41 = vcombine.high %v3250_v27, %v3258_v28 }
 0x5e0   :  { %10357 = vmatmul.mubr.bf16.vlgmr.msra.gmra.mrb[24].mxu1 %v14554_v13  ;;  %10196 = vmatpush1.bf16.msra.mxu0 %v12621_v52  ;;  %v12655_v13 = vcombine.low %v3187_v38, %v3195_v39  ;;  %v12701_v52 = vcombine.low %v3234_v20, %v3242_v21  ;;  %v12717_v38 = vcombine.low %v3250_v27, %v3258_v28  ;;  %v3315_v20 = vld [vmem:[#allocation9 + $0xd38] sm:$0xff] }
 0x5e1   :  { %10227 = vmatprep.mubr.bf16.mxu0 %v14560_v18  ;;  %10368 = vmatpush1.bf16.msra.mxu1 %v12623_v0  ;;  %v12720_v0 = vcombine.high %v3251_v56, %v3259_v40  ;;  %v12719_v39 = vcombine.low %v3251_v56, %v3259_v40  ;;  %v3323_v21 = vld [vmem:[#allocation9 + $0xd78] sm:$0xff] }
 0x5e2   :  { %10399 = vmatprep.mubr.bf16.mxu1 %v14560_v18  ;;  %10197 = vmatprep.subr.bf16.mxu0 %v12638_v24  ;;  %v12669_v18 = vcombine.low %v3202_v63, %v3210_v4  ;;  %v3266_v24 = vld [vmem:[#allocation9 + $0xbb0] sm:$0xff]  ;;  %v3283_v63 = vld [vmem:[#allocation9 + $0xc38] sm:$0xff]  ;;  %v12783_v40 = vcombine.low %v3315_v20, %v3323_v21 }
 0x5e3   :  { %10369 = vmatprep.subr.bf16.mxu1 %v12640_v35  ;;  %v3275_v35 = vld [vmem:[#allocation9 + $0xbf8] sm:$0xff]  ;;  %v12733_v5 = vcombine.low %v3266_v24, %v3274_v49 }
 0x5e4   :  { %10198 = vmatpush1.bf16.msra.mxu0 %v12637_v42  ;;  %v12734_v42 = vcombine.high %v3266_v24, %v3274_v49  ;;  %v3291_v4 = vld [vmem:[#allocation9 + $0xc78] sm:$0xff]  ;;  %v12735_v7 = vcombine.low %v3267_v33, %v3275_v35 }
 0x5e5   :  { %10370 = vmatpush1.bf16.msra.mxu1 %v12639_v47  ;;  %10199 = vmatprep.subr.bf16.mxu0 %v12654_v53  ;;  %v12736_v47 = vcombine.high %v3267_v33, %v3275_v35  ;;  %v3282_v53 = vld [vmem:[#allocation9 + $0xc30] sm:$0xff]  ;;  %v12751_v9 = vcombine.low %v3283_v63, %v3291_v4  ;;  %v3331_v27 = vld [vmem:[#allocation9 + $0xdb8] sm:$0xff] }
 0x5e6   :  { %10371 = vmatprep.subr.bf16.mxu1 %v12656_v54  ;;  %v3290_v54 = vld [vmem:[#allocation9 + $0xc70] sm:$0xff]  ;;  %v3339_v28 = vld [vmem:[#allocation9 + $0xdf8] sm:$0xff] }
 0x5e7   :  { %v12749_v16 = vcombine.low %v3282_v53, %v3290_v54  ;;  %v3347_v24 = vld [vmem:[#allocation9 + $0xe38] sm:$0xff]  ;;  %v12799_v35 = vcombine.low %v3331_v27, %v3339_v28 }
 0x5e8   :  { %10200 = vmatpush1.bf16.msra.mxu0 %v12653_v17  ;;  %v12750_v17 = vcombine.high %v3282_v53, %v3290_v54  ;;  %v3355_v49 = vld [vmem:[#allocation9 + $0xe78] sm:$0xff] }
 0x5e9   :  { %10372 = vmatpush1.bf16.msra.mxu1 %v12655_v13  ;;  %10201 = vmatprep.subr.bf16.mxu0 %v12670_v3  ;;  %v12752_v13 = vcombine.high %v3283_v63, %v3291_v4  ;;  %v3298_v3 = vld [vmem:[#allocation9 + $0xcb0] sm:$0xff]  ;;  %v3363_v53 = vld [vmem:[#allocation9 + $0xeb8] sm:$0xff]  ;;  %v12815_v4 = vcombine.low %v3347_v24, %v3355_v49 }
 0x5ea   :  { %10373 = vmatprep.subr.bf16.mxu1 %v12672_v6  ;;  %v3306_v6 = vld [vmem:[#allocation9 + $0xcf0] sm:$0xff]  ;;  %v3371_v54 = vld [vmem:[#allocation9 + $0xef8] sm:$0xff] }
 0x5eb   :  { %v12765_v22 = vcombine.low %v3298_v3, %v3306_v6 }
 0x5ec   :  { %10202 = vmatpush1.bf16.msra.mxu0 %v12669_v18  ;;  %v12766_v18 = vcombine.high %v3298_v3, %v3306_v6  ;;  %v3379_v3 = vld [vmem:[#allocation9 + $0xf38] sm:$0xff] }
 0x5ed   :  { %10374 = vmatpush1.bf16.msra.mxu1 %v12671_v12  ;;  %10203 = vmatprep.subr.bf16.mxu0 %v12686_v15  ;;  %v12768_v12 = vcombine.high %v3299_v8, %v3307_v10  ;;  %v3314_v15 = vld [vmem:[#allocation9 + $0xd30] sm:$0xff]  ;;  %v3387_v6 = vld [vmem:[#allocation9 + $0xf78] sm:$0xff]  ;;  %v12831_v10 = vcombine.low %v3363_v53, %v3371_v54 }
 0x5ee   :  { %10375 = vmatprep.subr.bf16.mxu1 %v12688_v19  ;;  %v3322_v19 = vld [vmem:[#allocation9 + $0xd70] sm:$0xff] }
 0x5ef   :  { %v12781_v56 = vcombine.low %v3314_v15, %v3322_v19 }
 0x5f0   :  { %10204 = vmatpush1.bf16.msra.mxu0 %v12685_v29  ;;  %v12782_v29 = vcombine.high %v3314_v15, %v3322_v19  ;;  %v3395_v15 = vld [vmem:[#allocation9 + $0xfb8] sm:$0xff] }
 0x5f1   :  { %10376 = vmatpush1.bf16.msra.mxu1 %v12687_v25  ;;  %10205 = vmatprep.subr.bf16.mxu0 %v12702_v26  ;;  %v12784_v25 = vcombine.high %v3315_v20, %v3323_v21  ;;  %v3330_v26 = vld [vmem:[#allocation9 + $0xdb0] sm:$0xff]  ;;  %v3403_v19 = vld [vmem:[#allocation9 + $0xff8] sm:$0xff]  ;;  %v12847_v21 = vcombine.low %v3379_v3, %v3387_v6 }
 0x5f2   :  { %10377 = vmatprep.subr.bf16.mxu1 %v12704_v11  ;;  %v3338_v11 = vld [vmem:[#allocation9 + $0xdf0] sm:$0xff] }
 0x5f3   :  { %v12797_v33 = vcombine.low %v3330_v26, %v3338_v11 }
 0x5f4   :  { %10206 = vmatpush1.bf16.msra.mxu0 %v12701_v52  ;;  %v12798_v52 = vcombine.high %v3330_v26, %v3338_v11  ;;  %v3411_v26 = vld [vmem:[#allocation9 + $0x1038] sm:$0xff] }
 0x5f5   :  { %10378 = vmatpush1.bf16.msra.mxu1 %v12703_v43  ;;  %10207 = vmatprep.subr.bf16.mxu0 %v12718_v41  ;;  %v12800_v43 = vcombine.high %v3331_v27, %v3339_v28  ;;  %v3346_v41 = vld [vmem:[#allocation9 + $0xe30] sm:$0xff]  ;;  %v3419_v11 = vld [vmem:[#allocation9 + $0x1078] sm:$0xff]  ;;  %v12863_v28 = vcombine.low %v3395_v15, %v3403_v19 }
 0x5f6   :  { %10379 = vmatprep.subr.bf16.mxu1 %v12720_v0  ;;  %v3354_v0 = vld [vmem:[#allocation9 + $0xe70] sm:$0xff] }
 0x5f7   :  { %v12813_v63 = vcombine.low %v3346_v41, %v3354_v0 }
 0x5f8   :  { %10208 = vmatpush1.bf16.msra.mxu0 %v12717_v38  ;;  %v12814_v38 = vcombine.high %v3346_v41, %v3354_v0  ;;  %v3427_v0 = vld [vmem:[#allocation9 + $0x10b8] sm:$0xff] }
 0x5f9   :  { %10380 = vmatpush1.bf16.msra.mxu1 %v12719_v39  ;;  %10209 = vmatprep.subr.bf16.mxu0 %v12734_v42  ;;  %v12816_v39 = vcombine.high %v3347_v24, %v3355_v49  ;;  %v3362_v42 = vld [vmem:[#allocation9 + $0xeb0] sm:$0xff]  ;;  %v3435_v24 = vld [vmem:[#allocation9 + $0x10f8] sm:$0xff]  ;;  %v12879_v49 = vcombine.low %v3411_v26, %v3419_v11 }
 0x5fa   :  { %10381 = vmatprep.subr.bf16.mxu1 %v12736_v47  ;;  %v3370_v47 = vld [vmem:[#allocation9 + $0xef0] sm:$0xff] }
 0x5fb   :  { %v12829_v8 = vcombine.low %v3362_v42, %v3370_v47 }
 0x5fc   :  { %10210 = vmatpush1.bf16.msra.mxu0 %v12733_v5  ;;  %v12830_v5 = vcombine.high %v3362_v42, %v3370_v47  ;;  %v3443_v42 = vld [vmem:[#allocation9 + $0x1138] sm:$0xff] }
 0x5fd   :  { %10382 = vmatpush1.bf16.msra.mxu1 %v12735_v7  ;;  %10211 = vmatprep.subr.bf16.mxu0 %v12750_v17  ;;  %v12832_v7 = vcombine.high %v3363_v53, %v3371_v54  ;;  %v3378_v17 = vld [vmem:[#allocation9 + $0xf30] sm:$0xff]  ;;  %v3451_v47 = vld [vmem:[#allocation9 + $0x1178] sm:$0xff]  ;;  %v12895_v54 = vcombine.low %v3427_v0, %v3435_v24 }
 0x5fe   :  { %10383 = vmatprep.subr.bf16.mxu1 %v12752_v13  ;;  %v3386_v13 = vld [vmem:[#allocation9 + $0xf70] sm:$0xff] }
 0x5ff   :  { %v12845_v20 = vcombine.low %v3378_v17, %v3386_v13 }
 0x600   :  { %10212 = vmatpush1.bf16.msra.mxu0 %v12749_v16  ;;  %v12846_v16 = vcombine.high %v3378_v17, %v3386_v13  ;;  %v3459_v17 = vld [vmem:[#allocation9 + $0x11b8] sm:$0xff] }
 0x601   :  { %10384 = vmatpush1.bf16.msra.mxu1 %v12751_v9  ;;  %10213 = vmatprep.subr.bf16.mxu0 %v12766_v18  ;;  %v12848_v9 = vcombine.high %v3379_v3, %v3387_v6  ;;  %v3394_v18 = vld [vmem:[#allocation9 + $0xfb0] sm:$0xff]  ;;  %v3467_v13 = vld [vmem:[#allocation9 + $0x11f8] sm:$0xff] }
 0x602   :  { %10385 = vmatprep.subr.bf16.mxu1 %v12768_v12  ;;  %v3402_v12 = vld [vmem:[#allocation9 + $0xff0] sm:$0xff] }
 0x603   :  { %v12861_v27 = vcombine.low %v3394_v18, %v3402_v12 }
 0x604   :  { %10214 = vmatpush1.bf16.msra.mxu0 %v12765_v22  ;;  %v12862_v22 = vcombine.high %v3394_v18, %v3402_v12  ;;  %v3483_v18 = vld [vmem:[#allocation9 + $0x1278] sm:$0xff]  ;;  %v12927_v12 = vcombine.low %v3459_v17, %v3467_v13 }
 0x605   :  { %10386 = vmatpush1.bf16.msra.mxu1 %v12767_v23  ;;  %10215 = vmatprep.subr.bf16.mxu0 %v12782_v29  ;;  %v12864_v23 = vcombine.high %v3395_v15, %v3403_v19  ;;  %v3410_v29 = vld [vmem:[#allocation9 + $0x1030] sm:$0xff] }
 0x606   :  { %10387 = vmatprep.subr.bf16.mxu1 %v12784_v25  ;;  %v3418_v25 = vld [vmem:[#allocation9 + $0x1070] sm:$0xff] }
 0x607   :  { %v12877_v41 = vcombine.low %v3410_v29, %v3418_v25 }
 0x608   :  { %10216 = vmatpush1.bf16.msra.mxu0 %v12781_v56  ;;  %v12878_v56 = vcombine.high %v3410_v29, %v3418_v25 }
 0x609   :  { %10388 = vmatpush1.bf16.msra.mxu1 %v12783_v40  ;;  %10217 = vmatprep.subr.bf16.mxu0 %v12798_v52  ;;  %v12880_v40 = vcombine.high %v3411_v26, %v3419_v11  ;;  %v3426_v52 = vld [vmem:[#allocation9 + $0x10b0] sm:$0xff] }
 0x60a   :  { %10389 = vmatprep.subr.bf16.mxu1 %v12800_v43  ;;  %v3434_v43 = vld [vmem:[#allocation9 + $0x10f0] sm:$0xff] }
 0x60b   :  { %v12893_v53 = vcombine.low %v3426_v52, %v3434_v43 }
 0x60c   :  { %10218 = vmatpush1.bf16.msra.mxu0 %v12797_v33  ;;  %v12894_v33 = vcombine.high %v3426_v52, %v3434_v43 }
 0x60d   :  { %10390 = vmatpush1.bf16.msra.mxu1 %v12799_v35  ;;  %10219 = vmatprep.subr.bf16.mxu0 %v12814_v38  ;;  %v3442_v35 = vld [vmem:[#allocation9 + $0x1130] sm:$0xff] }
 0x60e   :  { %10391 = vmatprep.subr.bf16.mxu1 %v12816_v39  ;;  %v3450_v38 = vld [vmem:[#allocation9 + $0x1170] sm:$0xff]  ;;  %v12896_v39 = vcombine.high %v3427_v0, %v3435_v24 }
 0x60f   :  { %v12909_v3 = vcombine.low %v3442_v35, %v3450_v38  ;;  %v3522_v24 = vld [vmem:[#allocation9 + $0x13b0] sm:$0xff] }
 0x610   :  { %10220 = vmatpush1.bf16.msra.mxu0 %v12813_v63  ;;  %v12910_v63 = vcombine.high %v3442_v35, %v3450_v38  ;;  %v3531_v35 = vld [vmem:[#allocation9 + $0x13f8] sm:$0xff] }
 0x611   :  { %10392 = vmatpush1.bf16.msra.mxu1 %v12815_v4  ;;  %10221 = vmatprep.subr.bf16.mxu0 %v12830_v5  ;;  %v12912_v4 = vcombine.high %v3443_v42, %v3451_v47  ;;  %v3458_v5 = vld [vmem:[#allocation9 + $0x11b0] sm:$0xff] }
 0x612   :  { %10393 = vmatprep.subr.bf16.mxu1 %v12832_v7  ;;  %v3466_v7 = vld [vmem:[#allocation9 + $0x11f0] sm:$0xff] }
 0x613   :  { %v12926_v6 = vcombine.high %v3458_v5, %v3466_v7 }
 0x614   :  { %10222 = vmatpush1.bf16.msra.mxu0 %v12829_v8  ;;  %v12928_v8 = vcombine.high %v3459_v17, %v3467_v13 }
 0x615   :  { %10394 = vmatpush1.bf16.msra.mxu1 %v12831_v10  ;;  %10223 = vmatprep.subr.bf16.mxu0 %v12846_v16  ;;  %v3474_v10 = vld [vmem:[#allocation9 + $0x1230] sm:$0xff] }
 0x616   :  { %10395 = vmatprep.subr.bf16.mxu1 %v12848_v9  ;;  %v3482_v16 = vld [vmem:[#allocation9 + $0x1270] sm:$0xff]  ;;  %v3475_v9 = vld [vmem:[#allocation9 + $0x1238] sm:$0xff] }
 0x617   :  { %v12942_v15 = vcombine.high %v3474_v10, %v3482_v16  ;;  %v12944_v19 = vcombine.high %v3475_v9, %v3483_v18  ;;  %v12941_v29 = vcombine.low %v3474_v10, %v3482_v16  ;;  %v12943_v25 = vcombine.low %v3475_v9, %v3483_v18 }
 0x618   :  { %10224 = vmatpush1.bf16.msra.mxu0 %v12845_v20  ;;  %v3490_v20 = vld [vmem:[#allocation9 + $0x12b0] sm:$0xff] }
 0x619   :  { %10396 = vmatpush1.bf16.msra.mxu1 %v12847_v21  ;;  %10225 = vmatprep.subr.bf16.mxu0 %v12862_v22  ;;  %v3498_v21 = vld [vmem:[#allocation9 + $0x12f0] sm:$0xff]  ;;  %v3491_v22 = vld [vmem:[#allocation9 + $0x12b8] sm:$0xff] }
 0x61a   :  { %10397 = vmatprep.subr.bf16.mxu1 %v12864_v23  ;;  %v3499_v23 = vld [vmem:[#allocation9 + $0x12f8] sm:$0xff]  ;;  %v12958_v26 = vcombine.high %v3490_v20, %v3498_v21  ;;  %v12957_v52 = vcombine.low %v3490_v20, %v3498_v21 }
 0x61b   :  { %v12960_v11 = vcombine.high %v3491_v22, %v3499_v23  ;;  %v12959_v43 = vcombine.low %v3491_v22, %v3499_v23 }
 0x61c   :  { %10226 = vmatpush1.bf16.msra.mxu0 %v12861_v27  ;;  %v3506_v27 = vld [vmem:[#allocation9 + $0x1330] sm:$0xff] }
 0x61d   :  { %10398 = vmatpush1.bf16.msra.mxu1 %v12863_v28  ;;  %10238 = vmatprep.subr.bf16.mxu0 %v12878_v56  ;;  %v3514_v28 = vld [vmem:[#allocation9 + $0x1370] sm:$0xff]  ;;  %v3507_v56 = vld [vmem:[#allocation9 + $0x1338] sm:$0xff] }
 0x61e   :  { %10410 = vmatprep.subr.bf16.mxu1 %v12880_v40  ;;  %v3515_v40 = vld [vmem:[#allocation9 + $0x1378] sm:$0xff]  ;;  %v12973_v38 = vcombine.low %v3506_v27, %v3514_v28 }
 0x61f   :  { %10228 = vmatmul.mubr.bf16.vlgmr.msra.gmra.mrb[24].mxu0 %v14556_v14  ;;  %v12976_v0 = vcombine.high %v3507_v56, %v3515_v40 }
 0x620   :  { %10400 = vmatmul.mubr.bf16.vlgmr.msra.gmra.mrb[24].mxu1 %v14556_v14  ;;  %10239 = vmatpush1.bf16.msra.mxu0 %v12877_v41  ;;  %v12911_v14 = vcombine.low %v3443_v42, %v3451_v47  ;;  %v12974_v41 = vcombine.high %v3506_v27, %v3514_v28 }
 0x621   :  { %10270 = vmatprep.mubr.bf16.mxu0 %v14610_v58  ;;  %10411 = vmatpush1.bf16.msra.mxu1 %v12879_v49  ;;  %v3530_v49 = vld [vmem:[#allocation9 + $0x13f0] sm:$0xff] }
 0x622   :  { %10442 = vmatprep.mubr.bf16.mxu1 %v14610_v58  ;;  %10240 = vmatprep.subr.bf16.mxu0 %v12894_v33  ;;  %v12925_v58 = vcombine.low %v3458_v5, %v3466_v7  ;;  %v3523_v33 = vld [vmem:[#allocation9 + $0x13b8] sm:$0xff]  ;;  %v12990_v42 = vcombine.high %v3522_v24, %v3530_v49  ;;  %v12989_v5 = vcombine.low %v3522_v24, %v3530_v49 }
 0x623   :  { %10412 = vmatprep.subr.bf16.mxu1 %v12896_v39  ;;  %v12975_v39 = vcombine.low %v3507_v56, %v3515_v40  ;;  %v12992_v47 = vcombine.high %v3523_v33, %v3531_v35  ;;  %v12991_v7 = vcombine.low %v3523_v33, %v3531_v35 }
 0x624   :  { %10241 = vmatpush1.bf16.msra.mxu0 %v12893_v53  ;;  %v3538_v53 = vld [vmem:[#allocation9 + $0x1430] sm:$0xff] }
 0x625   :  { %10413 = vmatpush1.bf16.msra.mxu1 %v12895_v54  ;;  %10242 = vmatprep.subr.bf16.mxu0 %v12910_v63  ;;  %v3546_v54 = vld [vmem:[#allocation9 + $0x1470] sm:$0xff]  ;;  %v3539_v63 = vld [vmem:[#allocation9 + $0x1438] sm:$0xff] }
 0x626   :  { %10414 = vmatprep.subr.bf16.mxu1 %v12912_v4  ;;  %v3547_v4 = vld [vmem:[#allocation9 + $0x1478] sm:$0xff]  ;;  %v13006_v17 = vcombine.high %v3538_v53, %v3546_v54  ;;  %v13005_v10 = vcombine.low %v3538_v53, %v3546_v54 }
 0x627   :  { %v13008_v13 = vcombine.high %v3539_v63, %v3547_v4  ;;  %v13007_v16 = vcombine.low %v3539_v63, %v3547_v4 }
 0x628   :  { %10243 = vmatpush1.bf16.msra.mxu0 %v12909_v3  ;;  %v3554_v3 = vld [vmem:[#allocation9 + $0x14b0] sm:$0xff] }
 0x629   :  { %10415 = vmatpush1.bf16.msra.mxu1 %v12911_v14  ;;  %10244 = vmatprep.subr.bf16.mxu0 %v12926_v6  ;;  %v3562_v14 = vld [vmem:[#allocation9 + $0x14f0] sm:$0xff]  ;;  %v3555_v6 = vld [vmem:[#allocation9 + $0x14b8] sm:$0xff] }
 0x62a   :  { %10416 = vmatprep.subr.bf16.mxu1 %v12928_v8  ;;  %v3563_v8 = vld [vmem:[#allocation9 + $0x14f8] sm:$0xff]  ;;  %v13022_v9 = vcombine.high %v3554_v3, %v3562_v14  ;;  %v13021_v20 = vcombine.low %v3554_v3, %v3562_v14 }
 0x62b   :  { %v13024_v18 = vcombine.high %v3555_v6, %v3563_v8  ;;  %v13023_v21 = vcombine.low %v3555_v6, %v3563_v8 }
 0x62c   :  { %10245 = vmatpush1.bf16.msra.mxu0 %v12925_v58  ;;  %v3570_v58 = vld [vmem:[#allocation9 + $0x1530] sm:$0xff] }
 0x62d   :  { %10417 = vmatpush1.bf16.msra.mxu1 %v12927_v12  ;;  %10246 = vmatprep.subr.bf16.mxu0 %v12942_v15  ;;  %v3578_v12 = vld [vmem:[#allocation9 + $0x1570] sm:$0xff]  ;;  %v3571_v15 = vld [vmem:[#allocation9 + $0x1538] sm:$0xff] }
 0x62e   :  { %10418 = vmatprep.subr.bf16.mxu1 %v12944_v19  ;;  %v3579_v19 = vld [vmem:[#allocation9 + $0x1578] sm:$0xff]  ;;  %v13038_v22 = vcombine.high %v3570_v58, %v3578_v12  ;;  %v13037_v27 = vcombine.low %v3570_v58, %v3578_v12 }
 0x62f   :  { %v13040_v23 = vcombine.high %v3571_v15, %v3579_v19  ;;  %v13039_v28 = vcombine.low %v3571_v15, %v3579_v19 }
 0x630   :  { %10247 = vmatpush1.bf16.msra.mxu0 %v12941_v29  ;;  %v3586_v29 = vld [vmem:[#allocation9 + $0x15b0] sm:$0xff] }
 0x631   :  { %10419 = vmatpush1.bf16.msra.mxu1 %v12943_v25  ;;  %10248 = vmatprep.subr.bf16.mxu0 %v12958_v26  ;;  %v3594_v25 = vld [vmem:[#allocation9 + $0x15f0] sm:$0xff]  ;;  %v3587_v26 = vld [vmem:[#allocation9 + $0x15b8] sm:$0xff] }
 0x632   :  { %10420 = vmatprep.subr.bf16.mxu1 %v12960_v11  ;;  %v3595_v11 = vld [vmem:[#allocation9 + $0x15f8] sm:$0xff]  ;;  %v13054_v56 = vcombine.high %v3586_v29, %v3594_v25  ;;  %v13053_v24 = vcombine.low %v3586_v29, %v3594_v25 }
 0x633   :  { %v13056_v40 = vcombine.high %v3587_v26, %v3595_v11  ;;  %v13055_v49 = vcombine.low %v3587_v26, %v3595_v11 }
 0x634   :  { %10249 = vmatpush1.bf16.msra.mxu0 %v12957_v52  ;;  %v3602_v52 = vld [vmem:[#allocation9 + $0x1630] sm:$0xff] }
 0x635   :  { %10421 = vmatpush1.bf16.msra.mxu1 %v12959_v43  ;;  %10250 = vmatprep.subr.bf16.mxu0 %v12974_v41  ;;  %v3610_v43 = vld [vmem:[#allocation9 + $0x1670] sm:$0xff]  ;;  %v3603_v41 = vld [vmem:[#allocation9 + $0x1638] sm:$0xff] }
 0x636   :  { %10422 = vmatprep.subr.bf16.mxu1 %v12976_v0  ;;  %v3611_v0 = vld [vmem:[#allocation9 + $0x1678] sm:$0xff]  ;;  %v13070_v33 = vcombine.high %v3602_v52, %v3610_v43  ;;  %v13069_v53 = vcombine.low %v3602_v52, %v3610_v43 }
 0x637   :  { %v13072_v35 = vcombine.high %v3603_v41, %v3611_v0  ;;  %v13071_v54 = vcombine.low %v3603_v41, %v3611_v0  ;;  %v3691_v52 = vld [vmem:[#allocation9 + $0x18f8] sm:$0xff]  ;;  %v3698_v0 = vld [vmem:[#allocation9 + $0x1930] sm:$0xff] }
 0x638   :  { %10251 = vmatpush1.bf16.msra.mxu0 %v12973_v38  ;;  %v3618_v38 = vld [vmem:[#allocation9 + $0x16b0] sm:$0xff] }
 0x639   :  { %10423 = vmatpush1.bf16.msra.mxu1 %v12975_v39  ;;  %10252 = vmatprep.subr.bf16.mxu0 %v12990_v42  ;;  %v3626_v39 = vld [vmem:[#allocation9 + $0x16f0] sm:$0xff]  ;;  %v3619_v42 = vld [vmem:[#allocation9 + $0x16b8] sm:$0xff] }
 0x63a   :  { %10424 = vmatprep.subr.bf16.mxu1 %v12992_v47  ;;  %v3627_v47 = vld [vmem:[#allocation9 + $0x16f8] sm:$0xff]  ;;  %v13086_v63 = vcombine.high %v3618_v38, %v3626_v39  ;;  %v13085_v3 = vcombine.low %v3618_v38, %v3626_v39 }
 0x63b   :  { %v13088_v4 = vcombine.high %v3619_v42, %v3627_v47  ;;  %v13087_v14 = vcombine.low %v3619_v42, %v3627_v47 }
 0x63c   :  { %10253 = vmatpush1.bf16.msra.mxu0 %v12989_v5  ;;  %v3634_v5 = vld [vmem:[#allocation9 + $0x1730] sm:$0xff] }
 0x63d   :  { %10425 = vmatpush1.bf16.msra.mxu1 %v12991_v7  ;;  %10254 = vmatprep.subr.bf16.mxu0 %v13006_v17  ;;  %v3642_v7 = vld [vmem:[#allocation9 + $0x1770] sm:$0xff]  ;;  %v3635_v17 = vld [vmem:[#allocation9 + $0x1738] sm:$0xff] }
 0x63e   :  { %10426 = vmatprep.subr.bf16.mxu1 %v13008_v13  ;;  %v3643_v13 = vld [vmem:[#allocation9 + $0x1778] sm:$0xff]  ;;  %v13102_v6 = vcombine.high %v3634_v5, %v3642_v7  ;;  %v13101_v58 = vcombine.low %v3634_v5, %v3642_v7 }
 0x63f   :  { %v13104_v8 = vcombine.high %v3635_v17, %v3643_v13  ;;  %v13103_v12 = vcombine.low %v3635_v17, %v3643_v13  ;;  %v3730_v13 = vld [vmem:[#allocation9 + $0x1a30] sm:$0xff] }
 0x640   :  { %10255 = vmatpush1.bf16.msra.mxu0 %v13005_v10  ;;  %v3650_v10 = vld [vmem:[#allocation9 + $0x17b0] sm:$0xff] }
 0x641   :  { %10427 = vmatpush1.bf16.msra.mxu1 %v13007_v16  ;;  %10256 = vmatprep.subr.bf16.mxu0 %v13022_v9  ;;  %v3658_v16 = vld [vmem:[#allocation9 + $0x17f0] sm:$0xff]  ;;  %v3651_v9 = vld [vmem:[#allocation9 + $0x17b8] sm:$0xff] }
 0x642   :  { %10428 = vmatprep.subr.bf16.mxu1 %v13024_v18  ;;  %v3659_v18 = vld [vmem:[#allocation9 + $0x17f8] sm:$0xff]  ;;  %v13118_v15 = vcombine.high %v3650_v10, %v3658_v16  ;;  %v13117_v29 = vcombine.low %v3650_v10, %v3658_v16 }
 0x643   :  { %v13120_v19 = vcombine.high %v3651_v9, %v3659_v18  ;;  %v13119_v25 = vcombine.low %v3651_v9, %v3659_v18  ;;  %v3746_v9 = vld [vmem:[#allocation9 + $0x1ab0] sm:$0xff] }
 0x644   :  { %10257 = vmatpush1.bf16.msra.mxu0 %v13021_v20  ;;  %v3666_v20 = vld [vmem:[#allocation9 + $0x1830] sm:$0xff] }
 0x645   :  { %10429 = vmatpush1.bf16.msra.mxu1 %v13023_v21  ;;  %10258 = vmatprep.subr.bf16.mxu0 %v13038_v22  ;;  %v3674_v21 = vld [vmem:[#allocation9 + $0x1870] sm:$0xff]  ;;  %v3667_v22 = vld [vmem:[#allocation9 + $0x1838] sm:$0xff] }
 0x646   :  { %10430 = vmatprep.subr.bf16.mxu1 %v13040_v23  ;;  %v3675_v23 = vld [vmem:[#allocation9 + $0x1878] sm:$0xff]  ;;  %v13134_v26 = vcombine.high %v3666_v20, %v3674_v21  ;;  %v3754_v18 = vld [vmem:[#allocation9 + $0x1af0] sm:$0xff] }
 0x647   :  { %v13136_v11 = vcombine.high %v3667_v22, %v3675_v23  ;;  %v13135_v43 = vcombine.low %v3667_v22, %v3675_v23  ;;  %v3762_v23 = vld [vmem:[#allocation9 + $0x1b30] sm:$0xff] }
 0x648   :  { %10259 = vmatpush1.bf16.msra.mxu0 %v13037_v27  ;;  %v3682_v27 = vld [vmem:[#allocation9 + $0x18b0] sm:$0xff] }
 0x649   :  { %10431 = vmatpush1.bf16.msra.mxu1 %v13039_v28  ;;  %10260 = vmatprep.subr.bf16.mxu0 %v13054_v56  ;;  %v3690_v28 = vld [vmem:[#allocation9 + $0x18f0] sm:$0xff]  ;;  %v13133_v56 = vcombine.low %v3666_v20, %v3674_v21  ;;  %v13214_v21 = vcombine.high %v3746_v9, %v3754_v18 }
 0x64a   :  { %10432 = vmatprep.subr.bf16.mxu1 %v13056_v40  ;;  %v3683_v40 = vld [vmem:[#allocation9 + $0x18b8] sm:$0xff]  ;;  %v13150_v41 = vcombine.high %v3682_v27, %v3690_v28  ;;  %v13149_v38 = vcombine.low %v3682_v27, %v3690_v28 }
 0x64b   :  { %v13151_v39 = vcombine.low %v3683_v40, %v3691_v52 }
 0x64c   :  { %10261 = vmatpush1.bf16.msra.mxu0 %v13053_v24  ;;  %v3706_v24 = vld [vmem:[#allocation9 + $0x1970] sm:$0xff] }
 0x64d   :  { %10433 = vmatpush1.bf16.msra.mxu1 %v13055_v49  ;;  %10262 = vmatprep.subr.bf16.mxu0 %v13070_v33  ;;  %v13152_v49 = vcombine.high %v3683_v40, %v3691_v52  ;;  %v3699_v33 = vld [vmem:[#allocation9 + $0x1938] sm:$0xff]  ;;  %v13166_v42 = vcombine.high %v3698_v0, %v3706_v24  ;;  %v13165_v5 = vcombine.low %v3698_v0, %v3706_v24 }
 0x64e   :  { %10434 = vmatprep.subr.bf16.mxu1 %v13072_v35  ;;  %v3707_v35 = vld [vmem:[#allocation9 + $0x1978] sm:$0xff] }
 0x64f   :  { %v13168_v47 = vcombine.high %v3699_v33, %v3707_v35 }
 0x650   :  { %10263 = vmatpush1.bf16.msra.mxu0 %v13069_v53  ;;  %v3714_v53 = vld [vmem:[#allocation9 + $0x19b0] sm:$0xff] }
 0x651   :  { %10435 = vmatpush1.bf16.msra.mxu1 %v13071_v54  ;;  %10264 = vmatprep.subr.bf16.mxu0 %v13086_v63  ;;  %v3722_v54 = vld [vmem:[#allocation9 + $0x19f0] sm:$0xff]  ;;  %v3715_v63 = vld [vmem:[#allocation9 + $0x19b8] sm:$0xff] }
 0x652   :  { %10436 = vmatprep.subr.bf16.mxu1 %v13088_v4  ;;  %v3723_v4 = vld [vmem:[#allocation9 + $0x19f8] sm:$0xff]  ;;  %v13182_v7 = vcombine.high %v3714_v53, %v3722_v54 }
 0x653   :  { %v13184_v17 = vcombine.high %v3715_v63, %v3723_v4 }
 0x654   :  { %10265 = vmatpush1.bf16.msra.mxu0 %v13085_v3  ;;  %v3738_v3 = vld [vmem:[#allocation9 + $0x1a70] sm:$0xff] }
 0x655   :  { %10437 = vmatpush1.bf16.msra.mxu1 %v13087_v14  ;;  %10266 = vmatprep.subr.bf16.mxu0 %v13102_v6  ;;  %v3731_v14 = vld [vmem:[#allocation9 + $0x1a38] sm:$0xff]  ;;  %v13198_v10 = vcombine.high %v3730_v13, %v3738_v3 }
 0x656   :  { %10438 = vmatprep.subr.bf16.mxu1 %v13104_v8  ;;  %v3739_v6 = vld [vmem:[#allocation9 + $0x1a78] sm:$0xff]  ;;  %v13183_v8 = vcombine.low %v3715_v63, %v3723_v4  ;;  %v3794_v63 = vld [vmem:[#allocation9 + $0x1c30] sm:$0xff] }
 0x657   :  { %v13200_v16 = vcombine.high %v3731_v14, %v3739_v6  ;;  %v13199_v20 = vcombine.low %v3731_v14, %v3739_v6  ;;  %v3795_v14 = vld [vmem:[#allocation9 + $0x1c38] sm:$0xff] }
 0x658   :  { %10267 = vmatpush1.bf16.msra.mxu0 %v13101_v58  ;;  %v3747_v58 = vld [vmem:[#allocation9 + $0x1ab8] sm:$0xff] }
 0x659   :  { %10439 = vmatpush1.bf16.msra.mxu1 %v13103_v12  ;;  %10268 = vmatprep.subr.bf16.mxu0 %v13118_v15  ;;  %v3755_v12 = vld [vmem:[#allocation9 + $0x1af8] sm:$0xff]  ;;  %v13197_v15 = vcombine.low %v3730_v13, %v3738_v3  ;;  %v3802_v3 = vld [vmem:[#allocation9 + $0x1c70] sm:$0xff] }
 0x65a   :  { %10440 = vmatprep.subr.bf16.mxu1 %v13120_v19  ;;  %v14700_v19 = vld [vmem:[#allocation10 + $0x8] sm:$0xff]  ;;  %v13216_v22 = vcombine.high %v3747_v58, %v3755_v12  ;;  %v13215_v52 = vcombine.low %v3747_v58, %v3755_v12 }
 0x65b   :  { %v3963_v27 = vrot.slane %v14700_v19, %v14501_v59  ;;  %v3959_v28 = vrot.slane %v14700_v19, %v14496_v48  ;;  %v3967_v40 = vrot.slane %v14700_v19, %v14504_v62  ;;  %v3787_v59 = vld [vmem:[#allocation9 + $0x1bf8] sm:$0xff] }
 0x65c   :  { %10269 = vmatpush1.bf16.msra.mxu0 %v13117_v29  ;;  %v3770_v29 = vld [vmem:[#allocation9 + $0x1b70] sm:$0xff] }
 0x65d   :  { %10441 = vmatpush1.bf16.msra.mxu1 %v13119_v25  ;;  %10281 = vmatprep.subr.bf16.mxu0 %v13134_v26  ;;  %v3955_v25 = vrot.slane %v14700_v19, %v14493_v46  ;;  %v3763_v26 = vld [vmem:[#allocation9 + $0x1b38] sm:$0xff]  ;;  %v14712_v46 = vld [vmem:[#allocation9 + $0x1bf0] sm:$0xff] }
 0x65e   :  { %10453 = vmatprep.subr.bf16.mxu1 %v13136_v11  ;;  %v3771_v11 = vld [vmem:[#allocation9 + $0x1b78] sm:$0xff] }
 0x65f   :  { %10271 = vmatmul.mubr.bf16.vlgmr.msra.gmra.mrb[24].mxu0 %v14605_v45  ;;  %v13232_v24 = vcombine.high %v3763_v26, %v3771_v11 }
 0x660   :  { %10443 = vmatmul.mubr.bf16.vlgmr.msra.gmra.mrb[24].mxu1 %v14605_v45  ;;  %10282 = vmatpush1.bf16.msra.mxu0 %v13133_v56  ;;  %v13167_v45 = vcombine.low %v3699_v33, %v3707_v35  ;;  %v13213_v56 = vcombine.low %v3746_v9, %v3754_v18  ;;  %v3803_v9 = vld [vmem:[#allocation9 + $0x1c78] sm:$0xff] }
 0x661   :  { %10313 = vmatprep.mubr.bf16.mxu0 %v14612_v61  ;;  %10454 = vmatpush1.bf16.msra.mxu1 %v13135_v43  ;;  %v13230_v43 = vcombine.high %v3762_v23, %v3770_v29 }
 0x662   :  { %10485 = vmatprep.mubr.bf16.mxu1 %v14612_v61  ;;  %10283 = vmatprep.subr.bf16.mxu0 %v13150_v41  ;;  %v13181_v61 = vcombine.low %v3714_v53, %v3722_v54  ;;  %v14710_v41 = vld [vmem:[#allocation9 + $0x1bb0] sm:$0xff]  ;;  %v13231_v53 = vcombine.low %v3763_v26, %v3771_v11  ;;  %v13264_v11 = vcombine.high %v3795_v14, %v3803_v9 }
 0x663   :  { %10455 = vmatprep.subr.bf16.mxu1 %v13152_v49  ;;  %v3779_v49 = vld [vmem:[#allocation9 + $0x1bb8] sm:$0xff]  ;;  %v13246_v54 = vcombine.high %v14710_v41, %v14712_v46 }
 0x664   :  { %10284 = vmatpush1.bf16.msra.mxu0 %v13149_v38  ;;  %v13229_v38 = vcombine.low %v3762_v23, %v3770_v29  ;;  %v13248_v13 = vcombine.high %v3779_v49, %v3787_v59  ;;  %v13262_v23 = vcombine.high %v3794_v63, %v3802_v3 }
 0x665   :  { %10456 = vmatpush1.bf16.msra.mxu1 %v13151_v39  ;;  %10285 = vmatprep.subr.bf16.mxu0 %v13166_v42 }
 0x666   :  { %10457 = vmatprep.subr.bf16.mxu1 %v13168_v47 }
 0x668   :  { %10286 = vmatpush1.bf16.msra.mxu0 %v13165_v5 }
 0x669   :  { %10458 = vmatpush1.bf16.msra.mxu1 %v13167_v45  ;;  %10287 = vmatprep.subr.bf16.mxu0 %v13182_v7 }
 0x66a   :  { %10459 = vmatprep.subr.bf16.mxu1 %v13184_v17 }
 0x66c   :  { %10288 = vmatpush1.bf16.msra.mxu0 %v13181_v61 }
 0x66d   :  { %10460 = vmatpush1.bf16.msra.mxu1 %v13183_v8  ;;  %10289 = vmatprep.subr.bf16.mxu0 %v13198_v10 }
 0x66e   :  { %10461 = vmatprep.subr.bf16.mxu1 %v13200_v16 }
 0x670   :  { %10290 = vmatpush1.bf16.msra.mxu0 %v13197_v15  ;;  %v13245_v15 = vcombine.low %v14710_v41, %v14712_v46 }
 0x671   :  { %10462 = vmatpush1.bf16.msra.mxu1 %v13199_v20  ;;  %10291 = vmatprep.subr.bf16.mxu0 %v13214_v21 }
 0x672   :  { %v9971_v0 = vpop.f32.mrb[20].mxu0  ;;  %10463 = vmatprep.subr.bf16.mxu1 %v13216_v22  ;;  %v13247_v22 = vcombine.low %v3779_v49, %v3787_v59  ;;  %v3819_v49 = vld [vmem:[#allocation9 + $0x1cf8] sm:$0xff] }
 0x673   :  { %v13722_v33 = vadd.f32 %v9971_v0, %v3955_v25  ;;  %v10143_v35 = vpop.f32.mrb[20].mxu1  ;;  %v9973_v48 = vpop.f32.mrb[21].mxu0 }
 0x674   :  { %v13726_v39 = vadd.f32 %v10143_v35, %v3963_v27  ;;  %v13723_v42 = vadd.f32 %v9973_v48, %v3959_v28  ;;  %v10145_v47 = vpop.f32.mrb[21].mxu1  ;;  %v9975_v62 = vpop.f32.mrb[22].mxu0  ;;  %10292 = vmatpush1.bf16.msra.mxu0 %v13213_v56  ;;  %v13263_v48 = vcombine.low %v3795_v14, %v3803_v9  ;;  %v3859_v9 = vld [vmem:[#allocation9 + $0x1e38] sm:$0xff] }
 0x675   :  { %v10504_v4 = vmul.f32 0.2, %v13722_v33  ;;  %v13727_v5 = vadd.f32 %v10145_v47, %v3967_v40  ;;  %v13724_v45 = vadd.f32 %v9975_v62, %v3955_v25  ;;  %v10147_v7 = vpop.f32.mrb[22].mxu1  ;;  %10464 = vmatpush1.bf16.msra.mxu1 %v13215_v52  ;;  %v9977_v17 = vpop.f32.mrb[23].mxu0  ;;  %10293 = vmatprep.subr.bf16.mxu0 %v13230_v43  ;;  %v3818_v43 = vld [vmem:[#allocation9 + $0x1cf0] sm:$0xff] }
 0x676   :  { %v10506_v6 = vmul.f32 0.2, %v13726_v39  ;;  %v10505_v61 = vmul.f32 0.2, %v13723_v42  ;;  %v13728_v8 = vadd.f32 %v10147_v7, %v3963_v27  ;;  %v13725_v10 = vadd.f32 %v9977_v17, %v3959_v28  ;;  %v10149_v16 = vpop.f32.mrb[23].mxu1  ;;  %10465 = vmatprep.subr.bf16.mxu1 %v13232_v24  ;;  %v3811_v24 = vld [vmem:[#allocation9 + $0x1cb8] sm:$0xff] }
 0x677   :  { %v10507_v18 = vmul.f32 0.2, %v13727_v5  ;;  %v10520_v58 = vmul.f32 0.2, %v13724_v45  ;;  %v13729_v12 = vadd.f32 %v10149_v16, %v3967_v40  ;;  %v10536_v29 = vmax.f32 %v13722_v33, %v10504_v4  ;;  %v3810_v40 = vld [vmem:[#allocation9 + $0x1cb0] sm:$0xff] }
 0x678   :  { %v10522_v20 = vmul.f32 0.2, %v13728_v8  ;;  %v10521_v21 = vmul.f32 0.2, %v13725_v10  ;;  %10294 = vmatpush1.bf16.msra.mxu0 %v13229_v38  ;;  %v10538_v27 = vmax.f32 %v13726_v39, %v10506_v6  ;;  %v10537_v28 = vmax.f32 %v13723_v42, %v10505_v61  ;;  %v3826_v47 = vld [vmem:[#allocation9 + $0x1d30] sm:$0xff] }
 0x679   :  { %v10552_v25 = vmax.f32 %v13724_v45, %v10520_v58  ;;  %v10523_v26 = vmul.f32 0.2, %v13729_v12  ;;  %10466 = vmatpush1.bf16.msra.mxu1 %v13231_v53  ;;  %10295 = vmatprep.subr.bf16.mxu0 %v13246_v54  ;;  %v10539_v0 = vmax.f32 %v13727_v5, %v10507_v18  ;;  %v13261_v33 = vcombine.low %v3794_v63, %v3802_v3  ;;  %v3834_v62 = vld [vmem:[#allocation9 + $0x1d70] sm:$0xff]  ;;  %v3827_v53 = vld [vmem:[#allocation9 + $0x1d38] sm:$0xff] }
 0x67a   :  { %v10554_v56 = vmax.f32 %v13728_v8, %v10522_v20  ;;  %v10553_v52 = vmax.f32 %v13725_v10, %v10521_v21  ;;  %10467 = vmatprep.subr.bf16.mxu1 %v13248_v13  ;;  %v13278_v38 = vcombine.high %v3810_v40, %v3818_v43  ;;  %v13280_v42 = vcombine.high %v3811_v24, %v3819_v49  ;;  %v3835_v54 = vld [vmem:[#allocation9 + $0x1d78] sm:$0xff]  ;;  %v3842_v7 = vld [vmem:[#allocation9 + $0x1db0] sm:$0xff] }
 0x67b   :  { %v14718_v41 = vpack.c.bf16 %v10552_v25, %v10536_v29  ;;  %v10555_v46 = vmax.f32 %v13729_v12, %v10523_v26  ;;  %v13277_v4 = vcombine.low %v3810_v40, %v3818_v43  ;;  %v13279_v5 = vcombine.low %v3811_v24, %v3819_v49  ;;  %v3850_v17 = vld [vmem:[#allocation9 + $0x1df0] sm:$0xff]  ;;  %v3843_v13 = vld [vmem:[#allocation9 + $0x1db8] sm:$0xff] }
 0x67c   :  { %v14720_v59 = vpack.c.bf16 %v10554_v56, %v10538_v27  ;;  %10296 = vmatpush1.bf16.msra.mxu0 %v13245_v15  ;;  %v14722_v35 = vpack.c.bf16 %v10553_v52, %v10537_v28  ;;  %v13294_v63 = vcombine.high %v3826_v47, %v3834_v62  ;;  %v13296_v45 = vcombine.high %v3827_v53, %v3835_v54  ;;  %v3851_v3 = vld [vmem:[#allocation9 + $0x1df8] sm:$0xff]  ;;  %v3858_v10 = vld [vmem:[#allocation9 + $0x1e30] sm:$0xff] }
 0x67d   :  { %10468 = vmatpush1.bf16.msra.mxu1 %v13247_v22  ;;  %10297 = vmatprep.subr.bf16.mxu0 %v13262_v23  ;;  %v14724_v39 = vpack.c.bf16 %v10555_v46, %v10539_v0  ;;  %v13293_v14 = vcombine.low %v3826_v47, %v3834_v62  ;;  %v13295_v6 = vcombine.low %v3827_v53, %v3835_v54  ;;  %v3866_v16 = vld [vmem:[#allocation9 + $0x1e70] sm:$0xff]  ;;  %v3867_v18 = vld [vmem:[#allocation9 + $0x1e78] sm:$0xff] }
 0x67e   :  { %10469 = vmatprep.subr.bf16.mxu1 %v13264_v11  ;;  %v13310_v61 = vcombine.high %v3842_v7, %v3850_v17  ;;  %v13312_v8 = vcombine.high %v3843_v13, %v3851_v3  ;;  %v13309_v58 = vcombine.low %v3842_v7, %v3850_v17  ;;  %v13311_v12 = vcombine.low %v3843_v13, %v3851_v3  ;;  %v3874_v21 = vld [vmem:[#allocation9 + $0x1eb0] sm:$0xff]  ;;  %v3875_v23 = vld [vmem:[#allocation9 + $0x1eb8] sm:$0xff] }
 0x67f   :  { %v13326_v15 = vcombine.high %v3858_v10, %v3866_v16  ;;  %v13328_v20 = vcombine.high %v3859_v9, %v3867_v18  ;;  %v3882_v22 = vld [vmem:[#allocation9 + $0x1ef0] sm:$0xff]  ;;  %v3883_v29 = vld [vmem:[#allocation9 + $0x1ef8] sm:$0xff]  ;;  %v13325_v25 = vcombine.low %v3858_v10, %v3866_v16  ;;  %v13327_v26 = vcombine.low %v3859_v9, %v3867_v18 }
 0x680   :  { %10298 = vmatpush1.bf16.msra.mxu0 %v13261_v33  ;;  %v13342_v11 = vcombine.high %v3874_v21, %v3882_v22  ;;  %v13344_v27 = vcombine.high %v3875_v23, %v3883_v29  ;;  %v3890_v28 = vld [vmem:[#allocation9 + $0x1f30] sm:$0xff]  ;;  %v3891_v52 = vld [vmem:[#allocation9 + $0x1f38] sm:$0xff]  ;;  %v13341_v43 = vcombine.low %v3874_v21, %v3882_v22  ;;  %v13343_v0 = vcombine.low %v3875_v23, %v3883_v29  ;;  %v14045_v23 = vld [vmem:[%s15183_s7 + $0x70] sm:$0xff]  }
 0x681   :  { %10470 = vmatpush1.bf16.msra.mxu1 %v13263_v48  ;;  %10299 = vmatprep.subr.bf16.mxu0 %v13278_v38  ;;  %v3898_v56 = vld [vmem:[#allocation9 + $0x1f70] sm:$0xff]  ;;  %v3899_v40 = vld [vmem:[#allocation9 + $0x1f78] sm:$0xff]  ;;  %v14046_v29 = vld [vmem:[%s15183_s7 + $0xf0] sm:$0xff]  }
 0x682   :  { %10471 = vmatprep.subr.bf16.mxu1 %v13280_v42  ;;  %v13358_v46 = vcombine.high %v3890_v28, %v3898_v56  ;;  %v13360_v24 = vcombine.high %v3891_v52, %v3899_v40  ;;  %v3906_v49 = vld [vmem:[#allocation9 + $0x1fb0] sm:$0xff]  ;;  %v3907_v48 = vld [vmem:[#allocation9 + $0x1fb8] sm:$0xff]  ;;  %v13357_v42 = vcombine.low %v3890_v28, %v3898_v56  ;;  %v13359_v47 = vcombine.low %v3891_v52, %v3899_v40 }
 0x683   :  { %v3914_v33 = vld [vmem:[#allocation9 + $0x1ff0] sm:$0xff]  ;;  %v3915_v38 = vld [vmem:[#allocation9 + $0x1ff8] sm:$0xff] }
 0x684   :  { %10300 = vmatpush1.bf16.msra.mxu0 %v13277_v4  ;;  %v13374_v62 = vcombine.high %v3906_v49, %v3914_v33  ;;  %v13376_v53 = vcombine.high %v3907_v48, %v3915_v38  ;;  %v13373_v54 = vcombine.low %v3906_v49, %v3914_v33  ;;  %v13375_v4 = vcombine.low %v3907_v48, %v3915_v38  ;;  %v14024_v7 = vld [vmem:[%s15183_s7 + $0x80] sm:$0xff]   ;;  %v14025_v17 = vld [vmem:[%s15183_s7 + $0x48] sm:$0xff]   ;;  %v14035_v10 = vld [vmem:[%s15183_s7 + $0x18] sm:$0xff]  }
 0x685   :  { %10472 = vmatpush1.bf16.msra.mxu1 %v13279_v5  ;;  %10301 = vmatprep.subr.bf16.mxu0 %v13294_v63  ;;  %v14021_v5 = vld [vmem:[%s15183_s7 + $0x40] sm:$0xff]   ;;  %v14026_v13 = vld [vmem:[%s15183_s7 + $0xc8] sm:$0xff]   ;;  %v14036_v16 = vld [vmem:[%s15183_s7 + $0x98] sm:$0xff]  }
 0x686   :  { %10473 = vmatprep.subr.bf16.mxu1 %v13296_v45  ;;  %v14022_v63 = vld [vmem:[%s15183_s7 + $0xc0] sm:$0xff]   ;;  %v14027_v3 = vld [vmem:[%s15183_s7 + $0x8] sm:$0xff]   ;;  %v14051_v28 = vld [vmem:[%s15183_s7 + $0x38] sm:$0xff]  }
 0x687   :  { %v14023_v45 = vld [vmem:[%s15183_s7] sm:$0xff]   ;;  %v14043_v21 = vld [vmem:[%s15183_s7 + $0x28] sm:$0xff]   ;;  %v14052_v56 = vld [vmem:[%s15183_s7 + $0xb8] sm:$0xff]  }
 0x688   :  { %10302 = vmatpush1.bf16.msra.mxu0 %v13293_v14  ;;  %v14028_v14 = vld [vmem:[%s15183_s7 + $0x88] sm:$0xff]   ;;  %v14037_v9 = vld [vmem:[%s15183_s7 + $0x60] sm:$0xff]   ;;  %v14064_v48 = vld [vmem:[%s15183_s7 + $0x190] sm:$0xff]  }
 0x689   :  { %10474 = vmatpush1.bf16.msra.mxu1 %v13295_v6  ;;  %10303 = vmatprep.subr.bf16.mxu0 %v13310_v61  ;;  %v14029_v6 = vld [vmem:[%s15183_s7 + $0x50] sm:$0xff]   ;;  %v14038_v18 = vld [vmem:[%s15183_s7 + $0xe0] sm:$0xff]   ;;  %v14044_v22 = vld [vmem:[%s15183_s7 + $0xa8] sm:$0xff]  }
 0x68a   :  { %10475 = vmatprep.subr.bf16.mxu1 %v13312_v8  ;;  %v14032_v61 = vld [vmem:[%s15183_s7 + $0x90] sm:$0xff]   ;;  %v14034_v8 = vld [vmem:[%s15183_s7 + $0xd8] sm:$0xff]   ;;  %v14053_v52 = vld [vmem:[%s15183_s7 + $0x140] sm:$0xff]  }
 0x68b   :  { %v14054_v40 = vld [vmem:[%s15183_s7 + $0x1c0] sm:$0xff]   ;;  %v14059_v49 = vld [vmem:[%s15183_s7 + $0x108] sm:$0xff]   ;;  %v14066_v38 = vld [vmem:[%s15183_s7 + $0x1d8] sm:$0xff]  }
 0x68c   :  { %10304 = vmatpush1.bf16.msra.mxu0 %v13309_v58  ;;  %v14039_v58 = vld [vmem:[%s15183_s7 + $0x20] sm:$0xff]   ;;  %v14060_v33 = vld [vmem:[%s15183_s7 + $0x188] sm:$0xff]  }
 0x68d   :  { %10476 = vmatpush1.bf16.msra.mxu1 %v13311_v12  ;;  %10305 = vmatprep.subr.bf16.mxu0 %v13326_v15  ;;  %v14040_v12 = vld [vmem:[%s15183_s7 + $0xa0] sm:$0xff]   ;;  %v14041_v15 = vld [vmem:[%s15183_s7 + $0x68] sm:$0xff]  }
 0x68e   :  { %10477 = vmatprep.subr.bf16.mxu1 %v13328_v20  ;;  %v14042_v20 = vld [vmem:[%s15183_s7 + $0xe8] sm:$0xff]  }
 0x690   :  { %10306 = vmatpush1.bf16.msra.mxu0 %v13325_v25  ;;  %v14047_v25 = vld [vmem:[%s15183_s7 + $0x30] sm:$0xff]  }
 0x691   :  { %10478 = vmatpush1.bf16.msra.mxu1 %v13327_v26  ;;  %10307 = vmatprep.subr.bf16.mxu0 %v13342_v11  ;;  %v14048_v26 = vld [vmem:[%s15183_s7 + $0xb0] sm:$0xff]   ;;  %v14049_v11 = vld [vmem:[%s15183_s7 + $0x78] sm:$0xff]  }
 0x692   :  { %10479 = vmatprep.subr.bf16.mxu1 %v13344_v27  ;;  %v14050_v27 = vld [vmem:[%s15183_s7 + $0xf8] sm:$0xff]  }
 0x694   :  { %10308 = vmatpush1.bf16.msra.mxu0 %v13341_v43  ;;  %v14055_v43 = vld [vmem:[%s15183_s7 + $0x100] sm:$0xff]  }
 0x695   :  { %10480 = vmatpush1.bf16.msra.mxu1 %v13343_v0  ;;  %10309 = vmatprep.subr.bf16.mxu0 %v13358_v46  ;;  %v14056_v0 = vld [vmem:[%s15183_s7 + $0x180] sm:$0xff]   ;;  %v14057_v46 = vld [vmem:[%s15183_s7 + $0x148] sm:$0xff]  }
 0x696   :  { %10481 = vmatprep.subr.bf16.mxu1 %v13360_v24  ;;  %v14058_v24 = vld [vmem:[%s15183_s7 + $0x1c8] sm:$0xff]  }
 0x698   :  { %10310 = vmatpush1.bf16.msra.mxu0 %v13357_v42  ;;  %v14067_v42 = vld [vmem:[%s15183_s7 + $0x118] sm:$0xff]  }
 0x699   :  { %10482 = vmatpush1.bf16.msra.mxu1 %v13359_v47  ;;  %10311 = vmatprep.subr.bf16.mxu0 %v13374_v62  ;;  %v14068_v47 = vld [vmem:[%s15183_s7 + $0x198] sm:$0xff]   ;;  %v14069_v62 = vld [vmem:[%s15183_s7 + $0x160] sm:$0xff]  }
 0x69a   :  { %10483 = vmatprep.subr.bf16.mxu1 %v13376_v53  ;;  %v14070_v53 = vld [vmem:[%s15183_s7 + $0x1e0] sm:$0xff]  }
 0x69c   :  { %10312 = vmatpush1.bf16.msra.mxu0 %v13373_v54  ;;  %v14071_v54 = vld [vmem:[%s15183_s7 + $0x120] sm:$0xff]  }
 0x69d   :  { %10484 = vmatpush1.bf16.msra.mxu1 %v13375_v4  ;;  %13506 = vmatprep.subr.bf16.mxu0 %v14021_v5  ;;  %v14072_v4 = vld [vmem:[%s15183_s7 + $0x1a0] sm:$0xff]   ;;  %v14073_v5 = vld [vmem:[%s15183_s7 + $0x168] sm:$0xff]  }
 0x69e   :  { %13528 = vmatprep.subr.bf16.mxu1 %v14022_v63  ;;  %v14074_v63 = vld [vmem:[%s15183_s7 + $0x1e8] sm:$0xff]  }
 0x69f   :  { %10314 = vmatmul.mubr.bf16.vlgmr.msra.gmra.mrb[24].mxu0 %v14608_v57 }
 0x6a0   :  { %10486 = vmatmul.mubr.bf16.vlgmr.msra.gmra.mrb[24].mxu1 %v14608_v57  ;;  %13507 = vmatpush3.bf16.msra.mxu0 %v14023_v45  ;;  %v14030_v57 = vld [vmem:[%s15183_s7 + $0xd0] sm:$0xff]   ;;  %v14075_v45 = vld [vmem:[%s15183_s7 + $0x128] sm:$0xff]  }
 0x6a1   :  { %11639 = vmatprep.mubr.bf16.mxu0 %v14652_v2  ;;  %13529 = vmatpush3.bf16.msra.mxu1 %v14024_v7  ;;  %v14031_v2 = vld [vmem:[%s15183_s7 + $0x10] sm:$0xff]   ;;  %v14076_v7 = vld [vmem:[%s15183_s7 + $0x1a8] sm:$0xff]  }
 0x6a2   :  { %11680 = vmatprep.mubr.bf16.mxu1 %v14654_v31  ;;  %13508 = vmatprep.subr.bf16.mxu0 %v14025_v17  ;;  %v14033_v31 = vld [vmem:[%s15183_s7 + $0x58] sm:$0xff]   ;;  %v14077_v17 = vld [vmem:[%s15183_s7 + $0x170] sm:$0xff]  }
 0x6a3   :  { %13530 = vmatprep.subr.bf16.mxu1 %v14026_v13  ;;  %v14078_v13 = vld [vmem:[%s15183_s7 + $0x1f0] sm:$0xff]  }
 0x6a4   :  { %13509 = vmatpush3.bf16.msra.mxu0 %v14027_v3  ;;  %v14079_v3 = vld [vmem:[%s15183_s7 + $0x130] sm:$0xff]  }
 0x6a5   :  { %13531 = vmatpush3.bf16.msra.mxu1 %v14028_v14  ;;  %13510 = vmatprep.subr.bf16.mxu0 %v14029_v6  ;;  %v14080_v14 = vld [vmem:[%s15183_s7 + $0x1b0] sm:$0xff]   ;;  %v14081_v6 = vld [vmem:[%s15183_s7 + $0x178] sm:$0xff]  }
 0x6a6   :  { %13532 = vmatprep.subr.bf16.mxu1 %v14030_v57  ;;  %v14082_v57 = vld [vmem:[%s15183_s7 + $0x1f8] sm:$0xff]  }
 0x6a8   :  { %13511 = vmatpush3.bf16.msra.mxu0 %v14031_v2  ;;  %v14083_v2 = vld [vmem:[%s15183_s7 + $0x138] sm:$0xff]  }
 0x6a9   :  { %13533 = vmatpush3.bf16.msra.mxu1 %v14032_v61  ;;  %13512 = vmatprep.subr.bf16.mxu0 %v14033_v31  ;;  %v14084_v61 = vld [vmem:[%s15183_s7 + $0x1b8] sm:$0xff]   ;;  %v14085_v31 = vld [vmem:[%s15183_s7 + $0x240] sm:$0xff]  }
 0x6aa   :  { %13534 = vmatprep.subr.bf16.mxu1 %v14034_v8  ;;  %v14086_v8 = vld [vmem:[%s15183_s7 + $0x2c0] sm:$0xff]  }
 0x6ac   :  { %13513 = vmatpush3.bf16.msra.mxu0 %v14035_v10  ;;  %v14087_v10 = vld [vmem:[%s15183_s7 + $0x200] sm:$0xff]  }
 0x6ad   :  { %13535 = vmatpush3.bf16.msra.mxu1 %v14036_v16  ;;  %13514 = vmatprep.subr.bf16.mxu0 %v14037_v9  ;;  %v14088_v16 = vld [vmem:[%s15183_s7 + $0x280] sm:$0xff]   ;;  %v14089_v9 = vld [vmem:[%s15183_s7 + $0x248] sm:$0xff]  }
 0x6ae   :  { %13536 = vmatprep.subr.bf16.mxu1 %v14038_v18  ;;  %v14090_v18 = vld [vmem:[%s15183_s7 + $0x2c8] sm:$0xff]  }
 0x6b0   :  { %13515 = vmatpush3.bf16.msra.mxu0 %v14039_v58  ;;  %v14091_v58 = vld [vmem:[%s15183_s7 + $0x208] sm:$0xff]  }
 0x6b1   :  { %13537 = vmatpush3.bf16.msra.mxu1 %v14040_v12  ;;  %13516 = vmatprep.subr.bf16.mxu0 %v14041_v15  ;;  %v14092_v12 = vld [vmem:[%s15183_s7 + $0x288] sm:$0xff]   ;;  %v14096_v15 = vld [vmem:[%s15183_s7 + $0x290] sm:$0xff]  }
 0x6b2   :  { %13538 = vmatprep.subr.bf16.mxu1 %v14042_v20  ;;  %v14098_v20 = vld [vmem:[%s15183_s7 + $0x2d8] sm:$0xff]  }
 0x6b4   :  { %13517 = vmatpush3.bf16.msra.mxu0 %v14043_v21  ;;  %v14099_v21 = vld [vmem:[%s15183_s7 + $0x218] sm:$0xff]  }
 0x6b5   :  { %13539 = vmatpush3.bf16.msra.mxu1 %v14044_v22  ;;  %13518 = vmatprep.subr.bf16.mxu0 %v14045_v23  ;;  %v14100_v22 = vld [vmem:[%s15183_s7 + $0x298] sm:$0xff]   ;;  %v14101_v23 = vld [vmem:[%s15183_s7 + $0x260] sm:$0xff]  }
 0x6b6   :  { %13540 = vmatprep.subr.bf16.mxu1 %v14046_v29  ;;  %v14102_v29 = vld [vmem:[%s15183_s7 + $0x2e0] sm:$0xff]  }
 0x6b8   :  { %13519 = vmatpush3.bf16.msra.mxu0 %v14047_v25  ;;  %v14103_v25 = vld [vmem:[%s15183_s7 + $0x220] sm:$0xff]  }
 0x6b9   :  { %13541 = vmatpush3.bf16.msra.mxu1 %v14048_v26  ;;  %13520 = vmatprep.subr.bf16.mxu0 %v14049_v11  ;;  %v14104_v26 = vld [vmem:[%s15183_s7 + $0x2a0] sm:$0xff]   ;;  %v14105_v11 = vld [vmem:[%s15183_s7 + $0x268] sm:$0xff]  }
 0x6ba   :  { %13542 = vmatprep.subr.bf16.mxu1 %v14050_v27  ;;  %v14106_v27 = vld [vmem:[%s15183_s7 + $0x2e8] sm:$0xff]  }
 0x6bc   :  { %13521 = vmatpush3.bf16.msra.mxu0 %v14051_v28  ;;  %v14107_v28 = vld [vmem:[%s15183_s7 + $0x228] sm:$0xff]  }
 0x6bd   :  { %13543 = vmatpush3.bf16.msra.mxu1 %v14052_v56  ;;  %13550 = vmatprep.subr.bf16.mxu0 %v14053_v52  ;;  %v14108_v56 = vld [vmem:[%s15183_s7 + $0x2a8] sm:$0xff]   ;;  %v14109_v52 = vld [vmem:[%s15183_s7 + $0x270] sm:$0xff]  }
 0x6be   :  { %13572 = vmatprep.subr.bf16.mxu1 %v14054_v40  ;;  %v14110_v40 = vld [vmem:[%s15183_s7 + $0x2f0] sm:$0xff]  }
 0x6bf   :  { %11640 = vmatmul.mubr.bf16.vlgmr.msra.gmra.mrb[28].mxu0 %v14648_v55  ;;  %v14061_v55 = vld [vmem:[%s15183_s7 + $0x150] sm:$0xff]  }
 0x6c0   :  { %11681 = vmatmul.mubr.bf16.vlgmr.msra.gmra.mrb[28].mxu1 %v14650_v60  ;;  %13551 = vmatpush3.bf16.msra.mxu0 %v14055_v43  ;;  %v14062_v60 = vld [vmem:[%s15183_s7 + $0x1d0] sm:$0xff]  }
 0x6c1   :  { %11721 = vmatprep.mubr.bf16.mxu0 %v14680_v50  ;;  %13573 = vmatpush3.bf16.msra.mxu1 %v14056_v0  ;;  %v14063_v50 = vld [vmem:[%s15183_s7 + $0x110] sm:$0xff]  }
 0x6c2   :  { %11762 = vmatprep.mubr.bf16.mxu1 %v14682_v51  ;;  %13552 = vmatprep.subr.bf16.mxu0 %v14057_v46  ;;  %v14065_v51 = vld [vmem:[%s15183_s7 + $0x158] sm:$0xff]   ;;  %v14111_v43 = vld [vmem:[%s15183_s7 + $0x230] sm:$0xff]  }
 0x6c3   :  { %13574 = vmatprep.subr.bf16.mxu1 %v14058_v24  ;;  %v14112_v0 = vld [vmem:[%s15183_s7 + $0x2b0] sm:$0xff]   ;;  %v14113_v46 = vld [vmem:[%s15183_s7 + $0x278] sm:$0xff]  }
 0x6c4   :  { %13553 = vmatpush3.bf16.msra.mxu0 %v14059_v49  ;;  %v14114_v24 = vld [vmem:[%s15183_s7 + $0x2f8] sm:$0xff]  }
 0x6c5   :  { %13575 = vmatpush3.bf16.msra.mxu1 %v14060_v33  ;;  %13554 = vmatprep.subr.bf16.mxu0 %v14061_v55  ;;  %v14115_v49 = vld [vmem:[%s15183_s7 + $0x238] sm:$0xff]   ;;  %v14117_v55 = vld [vmem:[%s15183_s7 + $0x340] sm:$0xff]  }
 0x6c6   :  { %13576 = vmatprep.subr.bf16.mxu1 %v14062_v60  ;;  %v14116_v33 = vld [vmem:[%s15183_s7 + $0x2b8] sm:$0xff]   ;;  %v14118_v60 = vld [vmem:[%s15183_s7 + $0x3c0] sm:$0xff]  }
 0x6c8   :  { %13555 = vmatpush3.bf16.msra.mxu0 %v14063_v50  ;;  %v14119_v50 = vld [vmem:[%s15183_s7 + $0x300] sm:$0xff]  }
 0x6c9   :  { %13577 = vmatpush3.bf16.msra.mxu1 %v14064_v48  ;;  %13556 = vmatprep.subr.bf16.mxu0 %v14065_v51  ;;  %v14120_v48 = vld [vmem:[%s15183_s7 + $0x380] sm:$0xff]   ;;  %v14121_v51 = vld [vmem:[%s15183_s7 + $0x348] sm:$0xff]  }
 0x6ca   :  { %13578 = vmatprep.subr.bf16.mxu1 %v14066_v38  ;;  %v14122_v38 = vld [vmem:[%s15183_s7 + $0x3c8] sm:$0xff]  }
 0x6cc   :  { %13557 = vmatpush3.bf16.msra.mxu0 %v14067_v42  ;;  %v14123_v42 = vld [vmem:[%s15183_s7 + $0x308] sm:$0xff]  }
 0x6cd   :  { %13579 = vmatpush3.bf16.msra.mxu1 %v14068_v47  ;;  %13558 = vmatprep.subr.bf16.mxu0 %v14069_v62  ;;  %v14124_v47 = vld [vmem:[%s15183_s7 + $0x388] sm:$0xff]   ;;  %v14125_v62 = vld [vmem:[%s15183_s7 + $0x350] sm:$0xff]  }
 0x6ce   :  { %13580 = vmatprep.subr.bf16.mxu1 %v14070_v53  ;;  %v14128_v53 = vld [vmem:[%s15183_s7 + $0x390] sm:$0xff]  }
 0x6d0   :  { %13559 = vmatpush3.bf16.msra.mxu0 %v14071_v54  ;;  %v14129_v54 = vld [vmem:[%s15183_s7 + $0x358] sm:$0xff]  }
 0x6d1   :  { %13581 = vmatpush3.bf16.msra.mxu1 %v14072_v4  ;;  %13560 = vmatprep.subr.bf16.mxu0 %v14073_v5  ;;  %v14130_v4 = vld [vmem:[%s15183_s7 + $0x3d8] sm:$0xff]  }
 0x6d2   :  { %13582 = vmatprep.subr.bf16.mxu1 %v14074_v63  ;;  %v14131_v5 = vld [vmem:[%s15183_s7 + $0x318] sm:$0xff]  }
 0x6d3   :  { %v14132_v63 = vld [vmem:[%s15183_s7 + $0x398] sm:$0xff]  }
 0x6d4   :  { %13561 = vmatpush3.bf16.msra.mxu0 %v14075_v45  ;;  %v14133_v45 = vld [vmem:[%s15183_s7 + $0x360] sm:$0xff]  }
 0x6d5   :  { %13583 = vmatpush3.bf16.msra.mxu1 %v14076_v7  ;;  %13562 = vmatprep.subr.bf16.mxu0 %v14077_v17  ;;  %v14134_v7 = vld [vmem:[%s15183_s7 + $0x3e0] sm:$0xff]  }
 0x6d6   :  { %13584 = vmatprep.subr.bf16.mxu1 %v14078_v13  ;;  %v14135_v17 = vld [vmem:[%s15183_s7 + $0x320] sm:$0xff]  }
 0x6d7   :  { %v14136_v13 = vld [vmem:[%s15183_s7 + $0x3a0] sm:$0xff]  }
 0x6d8   :  { %13563 = vmatpush3.bf16.msra.mxu0 %v14079_v3  ;;  %v14137_v3 = vld [vmem:[%s15183_s7 + $0x368] sm:$0xff]  }
 0x6d9   :  { %13585 = vmatpush3.bf16.msra.mxu1 %v14080_v14  ;;  %13564 = vmatprep.subr.bf16.mxu0 %v14081_v6  ;;  %v14138_v14 = vld [vmem:[%s15183_s7 + $0x3e8] sm:$0xff]  }
 0x6da   :  { %13586 = vmatprep.subr.bf16.mxu1 %v14082_v57  ;;  %v14139_v6 = vld [vmem:[%s15183_s7 + $0x328] sm:$0xff]  }
 0x6db   :  { %v14140_v57 = vld [vmem:[%s15183_s7 + $0x3a8] sm:$0xff]  }
 0x6dc   :  { %13565 = vmatpush3.bf16.msra.mxu0 %v14083_v2  ;;  %v14141_v2 = vld [vmem:[%s15183_s7 + $0x370] sm:$0xff]  }
 0x6dd   :  { %13587 = vmatpush3.bf16.msra.mxu1 %v14084_v61  ;;  %13594 = vmatprep.subr.bf16.mxu0 %v14085_v31  ;;  %v14142_v61 = vld [vmem:[%s15183_s7 + $0x3f0] sm:$0xff]  }
 0x6de   :  { %13616 = vmatprep.subr.bf16.mxu1 %v14086_v8  ;;  %v14143_v31 = vld [vmem:[%s15183_s7 + $0x330] sm:$0xff]  }
 0x6df   :  { %11722 = vmatmul.mubr.bf16.vlgmr.msra.gmra.mrb[32].mxu0 %v14676_v1  ;;  %v14093_v1 = vld [vmem:[%s15183_s7 + $0x250] sm:$0xff]  }
 0x6e0   :  { %11763 = vmatmul.mubr.bf16.vlgmr.msra.gmra.mrb[32].mxu1 %v14678_v36  ;;  %13595 = vmatpush3.bf16.msra.mxu0 %v14087_v10  ;;  %v14094_v36 = vld [vmem:[%s15183_s7 + $0x2d0] sm:$0xff]   ;;  %v14145_v10 = vld [vmem:[%s15183_s7 + $0x378] sm:$0xff]  }
 0x6e1   :  { %11803 = vmatprep.mubr.bf16.mxu0 %v14722_v35  ;;  %13617 = vmatpush3.bf16.msra.mxu1 %v14088_v16  ;;  %v14095_v35 = vld [vmem:[%s15183_s7 + $0x210] sm:$0xff]   ;;  %v14146_v16 = vld [vmem:[%s15183_s7 + $0x3f8] sm:$0xff]  }
 0x6e2   :  { %11844 = vmatprep.mubr.bf16.mxu1 %v14724_v39  ;;  %13596 = vmatprep.subr.bf16.mxu0 %v14089_v9  ;;  %v14097_v39 = vld [vmem:[%s15183_s7 + $0x258] sm:$0xff]   ;;  %v14144_v8 = vld [vmem:[%s15183_s7 + $0x3b0] sm:$0xff]  }
 0x6e3   :  { %13618 = vmatprep.subr.bf16.mxu1 %v14090_v18  ;;  %v14147_v9 = vld [vmem:[%s15183_s7 + $0x338] sm:$0xff]  }
 0x6e4   :  { %13597 = vmatpush3.bf16.msra.mxu0 %v14091_v58  ;;  %v14148_v18 = vld [vmem:[%s15183_s7 + $0x3b8] sm:$0xff]   ;;  %v3971_v58 = vrot.slane %v14700_v19, %v14575_v30 }
 0x6e5   :  { %13619 = vmatpush3.bf16.msra.mxu1 %v14092_v12  ;;  %13598 = vmatprep.subr.bf16.mxu0 %v14093_v1  ;;  %v3979_v12 = vrot.slane %v14700_v19, %v14578_v32  ;;  %v3975_v1 = vrot.slane %v14700_v19, %v14581_v34 }
 0x6e6   :  { %13620 = vmatprep.subr.bf16.mxu1 %v14094_v36  ;;  %v3983_v36 = vrot.slane %v14700_v19, %v14584_v37 }
 0x6e8   :  { %13599 = vmatpush3.bf16.msra.mxu0 %v14095_v35 }
 0x6e9   :  { %13621 = vmatpush3.bf16.msra.mxu1 %v14096_v15  ;;  %13600 = vmatprep.subr.bf16.mxu0 %v14097_v39 }
 0x6ea   :  { %13622 = vmatprep.subr.bf16.mxu1 %v14098_v20 }
 0x6ec   :  { %13601 = vmatpush3.bf16.msra.mxu0 %v14099_v21 }
 0x6ed   :  { %13623 = vmatpush3.bf16.msra.mxu1 %v14100_v22  ;;  %13602 = vmatprep.subr.bf16.mxu0 %v14101_v23 }
 0x6ee   :  { %13624 = vmatprep.subr.bf16.mxu1 %v14102_v29 }
 0x6f0   :  { %13603 = vmatpush3.bf16.msra.mxu0 %v14103_v25 }
 0x6f1   :  { %13625 = vmatpush3.bf16.msra.mxu1 %v14104_v26  ;;  %13604 = vmatprep.subr.bf16.mxu0 %v14105_v11 }
 0x6f2   :  { %13626 = vmatprep.subr.bf16.mxu1 %v14106_v27 }
 0x6f4   :  { %13605 = vmatpush3.bf16.msra.mxu0 %v14107_v28 }
 0x6f5   :  { %13627 = vmatpush3.bf16.msra.mxu1 %v14108_v56  ;;  %13606 = vmatprep.subr.bf16.mxu0 %v14109_v52 }
 0x6f6   :  { %13628 = vmatprep.subr.bf16.mxu1 %v14110_v40 }
 0x6f8   :  { %13607 = vmatpush3.bf16.msra.mxu0 %v14111_v43 }
 0x6f9   :  { %13629 = vmatpush3.bf16.msra.mxu1 %v14112_v0  ;;  %13608 = vmatprep.subr.bf16.mxu0 %v14113_v46 }
 0x6fa   :  { %13630 = vmatprep.subr.bf16.mxu1 %v14114_v24 }
 0x6fc   :  { %13609 = vmatpush3.bf16.msra.mxu0 %v14115_v49 }
 0x6fd   :  { %13631 = vmatpush3.bf16.msra.mxu1 %v14116_v33  ;;  %13638 = vmatprep.subr.bf16.mxu0 %v14117_v55 }
 0x6fe   :  { %13660 = vmatprep.subr.bf16.mxu1 %v14118_v60 }
 0x6ff   :  { %11804 = vmatmul.mubr.bf16.vlgmr.msra.gmra.mrb[36].mxu0 %v14718_v41  ;;  %v14126_v41 = vld [vmem:[%s15183_s7 + $0x3d0] sm:$0xff]  }
 0x700   :  { %11845 = vmatmul.mubr.bf16.vlgmr.msra.gmra.mrb[36].mxu1 %v14720_v59  ;;  %13639 = vmatpush3.bf16.msra.mxu0 %v14119_v50  ;;  %v14127_v59 = vld [vmem:[%s15183_s7 + $0x310] sm:$0xff]  }
 0x701   :  { %13661 = vmatpush3.bf16.msra.mxu1 %v14120_v48  ;;  %13640 = vmatprep.subr.bf16.mxu0 %v14121_v51 }
 0x702   :  { %13662 = vmatprep.subr.bf16.mxu1 %v14122_v38 }
 0x704   :  { %13641 = vmatpush3.bf16.msra.mxu0 %v14123_v42 }
 0x705   :  { %13663 = vmatpush3.bf16.msra.mxu1 %v14124_v47  ;;  %13642 = vmatprep.subr.bf16.mxu0 %v14125_v62 }
 0x706   :  { %13664 = vmatprep.subr.bf16.mxu1 %v14126_v41 }
 0x708   :  { %13643 = vmatpush3.bf16.msra.mxu0 %v14127_v59 }
 0x709   :  { %13665 = vmatpush3.bf16.msra.mxu1 %v14128_v53  ;;  %13644 = vmatprep.subr.bf16.mxu0 %v14129_v54  ;;  %v13377_v53 = vld [vmem:[#allocation12] ss:$0 sm:$0xff] }
 0x70a   :  { %13666 = vmatprep.subr.bf16.mxu1 %v14130_v4 }
 0x70c   :  { %13645 = vmatpush3.bf16.msra.mxu0 %v14131_v5 }
 0x70d   :  { %13667 = vmatpush3.bf16.msra.mxu1 %v14132_v63  ;;  %13646 = vmatprep.subr.bf16.mxu0 %v14133_v45 }
 0x70e   :  { %13668 = vmatprep.subr.bf16.mxu1 %v14134_v7 }
 0x710   :  { %13647 = vmatpush3.bf16.msra.mxu0 %v14135_v17 }
 0x711   :  { %13669 = vmatpush3.bf16.msra.mxu1 %v14136_v13  ;;  %13648 = vmatprep.subr.bf16.mxu0 %v14137_v3 }
 0x712   :  { %13670 = vmatprep.subr.bf16.mxu1 %v14138_v14 }
 0x714   :  { %13649 = vmatpush3.bf16.msra.mxu0 %v14139_v6 }
 0x715   :  { %13671 = vmatpush3.bf16.msra.mxu1 %v14140_v57  ;;  %13650 = vmatprep.subr.bf16.mxu0 %v14141_v2 }
 0x716   :  { %13672 = vmatprep.subr.bf16.mxu1 %v14142_v61 }
 0x718   :  { %13651 = vmatpush3.bf16.msra.mxu0 %v14143_v31 }
 0x719   :  { %13673 = vmatpush3.bf16.msra.mxu1 %v14144_v8  ;;  %13652 = vmatprep.subr.bf16.mxu0 %v14145_v10 }
 0x71a   :  { %13674 = vmatprep.subr.bf16.mxu1 %v14146_v16 }
 0x71c   :  { %13653 = vmatpush3.bf16.msra.mxu0 %v14147_v9 }
 0x71d   :  { %13675 = vmatpush3.bf16.msra.mxu1 %v14148_v18 }
 0x772   :  { %v10315_v35 = vpop.f32.mrb[24].mxu0 }
 0x773   :  { %v13730_v15 = vadd.f32 %v10315_v35, %v3971_v58  ;;  %v10487_v39 = vpop.f32.mrb[24].mxu1  ;;  %v10317_v20 = vpop.f32.mrb[25].mxu0 }
 0x774   :  { %v13734_v21 = vadd.f32 %v10487_v39, %v3979_v12  ;;  %v13731_v22 = vadd.f32 %v10317_v20, %v3975_v1  ;;  %v10489_v23 = vpop.f32.mrb[25].mxu1  ;;  %v10319_v29 = vpop.f32.mrb[26].mxu0 }
 0x775   :  { %v10508_v25 = vmul.f32 0.2, %v13730_v15  ;;  %v13735_v26 = vadd.f32 %v10489_v23, %v3983_v36  ;;  %v13732_v30 = vadd.f32 %v10319_v29, %v3971_v58  ;;  %v10491_v11 = vpop.f32.mrb[26].mxu1  ;;  %v10321_v27 = vpop.f32.mrb[27].mxu0 }
 0x776   :  { %v10510_v32 = vmul.f32 0.2, %v13734_v21  ;;  %v10509_v28 = vmul.f32 0.2, %v13731_v22  ;;  %v13736_v56 = vadd.f32 %v10491_v11, %v3979_v12  ;;  %v13733_v34 = vadd.f32 %v10321_v27, %v3975_v1  ;;  %v10493_v52 = vpop.f32.mrb[27].mxu1 }
 0x777   :  { %v10511_v40 = vmul.f32 0.2, %v13735_v26  ;;  %v10524_v37 = vmul.f32 0.2, %v13732_v30  ;;  %v13737_v19 = vadd.f32 %v10493_v52, %v3983_v36  ;;  %v10540_v46 = vmax.f32 %v13730_v15, %v10508_v25 }
 0x778   :  { %v10526_v43 = vmul.f32 0.2, %v13736_v56  ;;  %v10525_v0 = vmul.f32 0.2, %v13733_v34  ;;  %v10542_v33 = vmax.f32 %v13734_v21, %v10510_v32  ;;  %v10541_v55 = vmax.f32 %v13731_v22, %v10509_v28 }
 0x779   :  { %v10556_v24 = vmax.f32 %v13732_v30, %v10524_v37  ;;  %v10527_v49 = vmul.f32 0.2, %v13737_v19  ;;  %v10543_v48 = vmax.f32 %v13735_v26, %v10511_v40 }
 0x77a   :  { %v10558_v60 = vmax.f32 %v13736_v56, %v10526_v43  ;;  %v10557_v50 = vmax.f32 %v13733_v34, %v10525_v0  ;;  %v15133_v0 = vand.u32 127, %v222_v44 }
 0x77b   :  { %v10572_v51 = vpack.c.bf16 %v10556_v24, %v10540_v46  ;;  %v10559_v38 = vmax.f32 %v13737_v19, %v10527_v49 }
 0x77c   :  { %v10574_v42 = vpack.c.bf16 %v10558_v60, %v10542_v33  ;;  %v10573_v47 = vpack.c.bf16 %v10557_v50, %v10541_v55  ;;  %vm11938_vm0 = vcmp.ge.s32.totalorder %v15133_v0, 1  ;;  %vm11939_vm1 = vcmp.le.s32.totalorder %v15133_v0, 6 }
 0x77d   :  { %v10575_v62 = vpack.c.bf16 %v10559_v38, %v10543_v48  ;;  %vm15137_vm2 = vmand %vm11938_vm0, %vm11939_vm1  ;;  %vm11937_vm4 = vcmp.eq.s32.totalorder %v15133_v0, 0 }
 0x77e   :  { %11885 = vmatprep.mubr.bf16.mxu0 %v10573_v47 }
 0x77f   :  { %11926 = vmatprep.mubr.bf16.mxu1 %v10575_v62  ;;  %11886 = vmatmul.mubr.bf16.vlgmr.msra.gmra.mrb[40].mxu0 %v10572_v51 }
 0x780   :  { %11927 = vmatmul.mubr.bf16.vlgmr.msra.gmra.mrb[40].mxu1 %v10574_v42 }
 0x792   :  { %v13522_v41 = vpop.f32.mrb[28].mxu0 }
 0x793   :  { %v13544_v59 = vpop.f32.mrb[28].mxu1  ;;  %v13523_v54 = vpop.f32.mrb[29].mxu0 }
 0x794   :  { %v13524_v4 = vadd.f32 %v13523_v54, %v13522_v41  ;;  %v13545_v5 = vpop.f32.mrb[29].mxu1  ;;  %v13525_v63 = vpop.f32.mrb[30].mxu0 }
 0x795   :  { %v13546_v45 = vadd.f32 %v13545_v5, %v13544_v59  ;;  %v13547_v7 = vpop.f32.mrb[30].mxu1  ;;  %v13526_v17 = vpop.f32.mrb[31].mxu0 }
 0x796   :  { %v11642_v13 = vadd.f32 %v13524_v4, %v13377_v53  ;;  %v13527_v3 = vadd.f32 %v13526_v17, %v13525_v63  ;;  %v13548_v14 = vpop.f32.mrb[31].mxu1 }
 0x797   :  { %v13549_v6 = vadd.f32 %v13548_v14, %v13547_v7 }
 0x798   :  { %v11683_v57 = vadd.f32 %v13546_v45, %v11642_v13  ;;  %v11645_v2 = vadd.f32 %v13527_v3, %v13377_v53  ;;  %v14338_v45 = vmov 0.0  }
 0x799   :  { %11984 = vst [vmem:[%s15185_s9] sm:$0xff] %v14338_v45  ;;  %11985 = vst [vmem:[%s15185_s9 + $0x8] sm:$0xff] %v14338_v45 }
 0x79a   :  { %v11686_v61 = vadd.f32 %v13549_v6, %v11645_v2 }
 0x7b2   :  { %v13566_v31 = vpop.f32.mrb[32].mxu0 }
 0x7b3   :  { %v13588_v8 = vpop.f32.mrb[32].mxu1  ;;  %v13567_v10 = vpop.f32.mrb[33].mxu0 }
 0x7b4   :  { %v13568_v16 = vadd.f32 %v13567_v10, %v13566_v31  ;;  %v13589_v9 = vpop.f32.mrb[33].mxu1  ;;  %v13569_v18 = vpop.f32.mrb[34].mxu0 }
 0x7b5   :  { %v13590_v58 = vadd.f32 %v13589_v9, %v13588_v8  ;;  %v13591_v12 = vpop.f32.mrb[34].mxu1  ;;  %v13570_v1 = vpop.f32.mrb[35].mxu0 }
 0x7b6   :  { %v11724_v36 = vadd.f32 %v13568_v16, %v11683_v57  ;;  %v13571_v35 = vadd.f32 %v13570_v1, %v13569_v18  ;;  %v13592_v15 = vpop.f32.mrb[35].mxu1 }
 0x7b7   :  { %v13593_v39 = vadd.f32 %v13592_v15, %v13591_v12 }
 0x7b8   :  { %v11765_v20 = vadd.f32 %v13590_v58, %v11724_v36  ;;  %v11727_v21 = vadd.f32 %v13571_v35, %v11686_v61 }
 0x7ba   :  { %v11768_v22 = vadd.f32 %v13593_v39, %v11727_v21 }
 0x7d2   :  { %v13610_v23 = vpop.f32.mrb[36].mxu0 }
 0x7d3   :  { %v13632_v29 = vpop.f32.mrb[36].mxu1  ;;  %v13611_v25 = vpop.f32.mrb[37].mxu0 }
 0x7d4   :  { %v13612_v26 = vadd.f32 %v13611_v25, %v13610_v23  ;;  %v13633_v30 = vpop.f32.mrb[37].mxu1  ;;  %v13613_v11 = vpop.f32.mrb[38].mxu0 }
 0x7d5   :  { %v13634_v27 = vadd.f32 %v13633_v30, %v13632_v29  ;;  %v13635_v32 = vpop.f32.mrb[38].mxu1  ;;  %v13614_v28 = vpop.f32.mrb[39].mxu0 }
 0x7d6   :  { %v11806_v56 = vadd.f32 %v13612_v26, %v11765_v20  ;;  %v13615_v34 = vadd.f32 %v13614_v28, %v13613_v11  ;;  %v13636_v52 = vpop.f32.mrb[39].mxu1 }
 0x7d7   :  { %v13637_v40 = vadd.f32 %v13636_v52, %v13635_v32 }
 0x7d8   :  { %v11847_v37 = vadd.f32 %v13634_v27, %v11806_v56  ;;  %v11809_v19 = vadd.f32 %v13615_v34, %v11768_v22 }
 0x7da   :  { %v11850_v43 = vadd.f32 %v13637_v40, %v11809_v19 }
 0x852   :  { %v13654_v46 = vpop.f32.mrb[40].mxu0 }
 0x853   :  { %v13676_v24 = vpop.f32.mrb[40].mxu1  ;;  %v13655_v49 = vpop.f32.mrb[41].mxu0 }
 0x854   :  { %v13656_v33 = vadd.f32 %v13655_v49, %v13654_v46  ;;  %v13677_v55 = vpop.f32.mrb[41].mxu1  ;;  %v13657_v60 = vpop.f32.mrb[42].mxu0 }
 0x855   :  { %v13678_v50 = vadd.f32 %v13677_v55, %v13676_v24  ;;  %v13679_v48 = vpop.f32.mrb[42].mxu1  ;;  %v13658_v51 = vpop.f32.mrb[43].mxu0 }
 0x856   :  { %v11888_v38 = vadd.f32 %v13656_v33, %v11847_v37  ;;  %v13659_v42 = vadd.f32 %v13658_v51, %v13657_v60  ;;  %v13680_v47 = vpop.f32.mrb[43].mxu1 }
 0x857   :  { %v13681_v62 = vadd.f32 %v13680_v47, %v13679_v48 }
 0x858   :  { %v11929_v41 = vadd.f32 %v13678_v50, %v11888_v38  ;;  %v11891_v59 = vadd.f32 %v13659_v42, %v11850_v43 }
 0x85a   :  { %v11932_v53 = vadd.f32 %v13681_v62, %v11891_v59  ;;  %v11941_v54 = vsel %vm15137_vm2, %v11929_v41, -1e+30  ;;  %v11950_v7 = vand.u32 2147483647, %v11929_v41  ;;  %vm11966_vm5 = vcmp.ge.f32.partialorder %v11929_v41, 0.0 }
 0x85b   :  { %v11944_v4 = vsel %vm11943_vm3, %v11941_v54, -inf }
 0x85c   :  { %11945 = vmax.xlane.f32.xlu0 %v11944_v4  ;;  %v11942_v5 = vsel %vm15137_vm2, %v11932_v53, -1e+30  ;;  %v11952_v13 = vsub.f32 0.0, %v11950_v7  ;;  %v11951_v3 = vand.u32 2147483647, %v11932_v53  ;;  %vm11967_vm6 = vcmp.ge.f32.partialorder %v11932_v53, 0.0 }
 0x85d   :  { %v11947_v63 = vsel %vm11943_vm3, %v11942_v5, -inf }
 0x85e   :  { %v11953_v61 = vsub.f32 0.0, %v11951_v3 }
 0x860   :  { %11948 = vmax.xlane.f32.xlu0 %v11947_v63 }
 0x8e9   :  { %v11946_v17 = vpop.xlane.xlu0 %11945 }
 0x8ea   :  { %v11954_v14 = vsub.f32 %v11941_v54, %v11946_v17 }
 0x8ec   :  { %v11956_v6 = vsel %vm11937_vm4, %v11952_v13, %v11954_v14 }
 0x8ed   :  { %v11958_v57 = vmul.f32 1.442695, %v11956_v6  ;;  %v11949_v2 = vpop.xlane.xlu0 %11948 }
 0x8ee   :  { %v11955_v31 = vsub.f32 %v11942_v5, %v11949_v2 }
 0x8ef   :  { %14149 = vpow2.f32 %v11958_v57 }
 0x8f0   :  { %v11957_v8 = vsel %vm11937_vm4, %v11953_v61, %v11955_v31 }
 0x8f1   :  { %v11960_v10 = vmul.f32 1.442695, %v11957_v8 }
 0x8f3   :  { %14151 = vpow2.f32 %v11960_v10 }
 0x8f9   :  { %v14150_v16 = vpop.eup %14149 }
 0x8fa   :  { %v11962_v9 = vadd.f32 1.0, %v14150_v16  ;;  %v11972_v18 = vsel %vm15137_vm2, %v14150_v16, 0.0 }
 0x8fb   :  { %v11974_v58 = vsel %vm11943_vm3, %v11972_v18, 0.0 }
 0x8fc   :  { %14153 = vrcp.f32 %v11962_v9  ;;  %11975 = vadd.xlane.f32.xlu1 %v11974_v58 }
 0x8fd   :  { %v14152_v12 = vpop.eup %14151 }
 0x8fe   :  { %v11963_v1 = vadd.f32 1.0, %v14152_v12  ;;  %v11973_v36 = vsel %vm15137_vm2, %v14152_v12, 0.0 }
 0x8ff   :  { %v11977_v35 = vsel %vm11943_vm3, %v11973_v36, 0.0 }
 0x900   :  { %14155 = vrcp.f32 %v11963_v1  ;;  %11978 = vadd.xlane.f32.xlu1 %v11977_v35 }
 0x906   :  { %v14154_v15 = vpop.eup %14153 }
 0x907   :  { %v11968_v39 = vmul.f32 %v14154_v15, %v14150_v16 }
 0x909   :  { %v11970_v20 = vsel %vm11966_vm5, %v14154_v15, %v11968_v39 }
 0x90a   :  { %v14156_v21 = vpop.eup %14155 }
 0x90b   :  { %v11969_v22 = vmul.f32 %v14156_v21, %v14152_v12 }
 0x90d   :  { %v11971_v23 = vsel %vm11967_vm6, %v14156_v21, %v11969_v22 }
 0x989   :  { %v11976_v29 = vpop.xlane.xlu1 %11975 }
 0x98a   :  { %14157 = vrcp.f32 %v11976_v29 }
 0x98d   :  { %v11979_v25 = vpop.xlane.xlu1 %11978 }
 0x98e   :  { %14159 = vrcp.f32 %v11979_v25 }
 0x994   :  { %v14158_v26 = vpop.eup %14157 }
 0x995   :  { %v11982_v30 = vmul.f32 %v14158_v26, %v11972_v18 }
 0x997   :  { %v11986_v11 = vsel %vm11937_vm4, %v11970_v20, %v11982_v30 }
 0x998   :  { %v14160_v27 = vpop.eup %14159  ;;  %11988 = vst.msk [vmem:[%s15185_s9] sm:$0xff] %vm11943_vm3, %v11986_v11 }
 0x999   :  { %v11983_v32 = vmul.f32 %v14160_v27, %v11973_v36 }
 0x99b   :  { %v11987_v28 = vsel %vm11937_vm4, %v11971_v23, %v11983_v32 }
 0x99c   :  { %11989 = vst.msk [vmem:[%s15185_s9 + $0x8] sm:$0xff] %vm11943_vm3, %v11987_v28 }
 0x99d   :  { %11994 = vsyncpa [#allocation3], 1 }
 0x99e   :  { %11995 = vsyncpa [#allocation5], 1 }
 0x99f   :  { %11996 = vsyncpa [#allocation8], 1 }
 0x9a0   :  { %11997 = vsyncpa [#allocation11], 1 }

</bundles_post_ra>
